<compile_context>
chip_gen: v7x
topology: tpu7x:2x2x1
jax: 0.10.0
libtpu: 0.0.40
codegen_flags: <defaults>
</compile_context>

<pallas_src>
import jax
import jax.numpy as jnp
import numpy as np
from jax.experimental import pallas as pl
from jax.experimental.pallas import tpu as pltpu


# ----------------------------- Pallas kernel --------------------------------
def betarnn_kernel(
    x_ref,      # (T, tm, input_dim) f32 : this M-tile's input sequence
    h0_ref,     # (L, tm, dim)       f32 : this M-tile's initial hidden states
    wih0_ref,   # (input_dim, dim)   bf16: layer-0 input weights (transposed)
    wih_ref,    # (max(L-1,1), dim, dim) bf16: layer>=1 input weights (transposed)
    whh_ref,    # (L, dim, dim)      bf16: hidden weights (transposed)
    b_ref,      # (L, 1, dim)        f32 : bih + bhh folded once in the wrapper
    vw_ref,     # (1, dim)           f32 : v.weight as a lane-dense row
    out_ref,    # (T, tm)            f32 : sigmoid(logits), lane-dense over tm
    hbuf_ref,   # scratch (T*tm, dim) bf16: previous layer's output sequence
    xproj_ref,  # scratch (T*tm, dim) f32 : hoisted input projection + bias
):
    T, tm, input_dim = x_ref.shape
    L, _, dim = h0_ref.shape

    vw_row = vw_ref[...]                          # (1, dim), hoisted once

    def row_start(t):
        r = t * tm
        # tm % 8 == 0 by construction -> aligned sublane slices.
        return r if isinstance(r, int) else pl.multiple_of(r, tm)

    def run_layer(l, wih_l, layer_in_bf16, is_last):
        # Hoisted batched input projection + folded bias: one big MXU matmul per
        # layer, reading the whole previous-layer sequence *before* the step
        # loop overwrites hbuf.  bf16 operands, f32 accumulation.
        xproj_ref[...] = (
            jnp.dot(layer_in_bf16, wih_l, preferred_element_type=jnp.float32)
            + b_ref[l]
        )

        # Loop-invariant RHS loaded once per layer: the (dim, dim) weight stays
        # staged in the MXU across the unrolled T steps instead of being
        # re-pushed every step.
        whh_l = whh_ref[l]                        # (dim, dim) bf16

        def step(t, h):
            r = row_start(t)
            pre = xproj_ref[pl.ds(r, tm), :] + jnp.dot(
                h.astype(jnp.bfloat16), whh_l, preferred_element_type=jnp.float32
            )
            hn = jnp.tanh(pre)                    # f32 (EUP)
            if is_last:
                # Fused readout: VPU multiply + XLU lane-reduce + EUP sigmoid,
                # lane-dense (1, tm) row store per step.  Skips the (T*tm, dim)
                # hbuf store + re-read of the unfused version; the reduce sits
                # in XLU/EUP slots the serial MXU chain leaves idle.
                logit = jnp.sum(hn * vw_row, axis=-1)              # (tm,)
                out_ref[pl.ds(t, 1), :] = jax.nn.sigmoid(logit).reshape(1, tm)
            else:
                hbuf_ref[pl.ds(r, tm), :] = hn.astype(jnp.bfloat16)
            return hn                             # hidden state stays in vregs

        # Capped unroll keeps EUP/MXU/VPU co-issue across steps without
        # exploding instruction footprint / vreg live ranges for large T.
        jax.lax.fori_loop(0, T, step, h0_ref[l], unroll=min(T, 8))

    # ----- layer 0: input comes from x (tm % 8 == 0 keeps the reshape a view) --
    run_layer(
        0,
        wih0_ref[...],
        x_ref[...].reshape(T * tm, input_dim).astype(jnp.bfloat16),
        is_last=(L == 1),
    )

    # ----- layers 1..L-1: input is the previous layer's output sequence --------
    # TODO(synk): for large L or large dim, make this an "arbitrary" grid axis
    # blocking wih/whh/b along L so only one layer's weights are VMEM-resident
    # and the next layer's weight DMA overlaps the current layer's T loop.
    for l in range(1, L):
        run_layer(l, wih_ref[l - 1], hbuf_ref[...], is_last=(l == L - 1))


def _round_up(a, b):
    return -(-a // b) * b


@jax.jit
def betarnn_forward(x, h0, wih0, wih_rest, whh, bih, bhh, vw):
    T, M, input_dim = x.shape
    L, _, dim = h0.shape

    # ---- M-tile selection (lane-dense output, MXU-friendly row counts) -------
    if M >= 256 and M % 256 == 0:
        tm = 256                      # v6e/v7x 2x256^2 MXU
    elif M >= 128:
        tm = 128                      # safe everywhere (v5e 4x128^2 MXU)
    else:
        tm = _round_up(M, 8)          # single tile; respects (8,128) sublane rule
    m_pad = _round_up(M, tm)
    grid_m = m_pad // tm

    if m_pad != M:                    # pad batch; padded rows sliced off at the end
        x = jnp.pad(x, ((0, 0), (0, m_pad - M), (0, 0)))
        h0 = jnp.pad(h0, ((0, 0), (0, m_pad - M), (0, 0)))

    # ---- parameter prep (done once, outside the kernel) ----------------------
    b = (bih + bhh).astype(jnp.float32)            # fold the two bias vectors
    v_row = vw.reshape(1, dim).astype(jnp.float32)
    wih0_bf = wih0.astype(jnp.bfloat16)
    whh_bf = whh.astype(jnp.bfloat16)
    if L > 1:
        wih_rest_bf = wih_rest.astype(jnp.bfloat16)
    else:
        wih_rest_bf = jnp.zeros((1, dim, dim), jnp.bfloat16)   # never read

    # ---- explicit VMEM budget (v7x: 64 MiB/TC physical, 32 MiB scoped default)
    def nbytes(shape, dt):
        shape = tuple(int(s) for s in shape)
        padded = shape[:-1] + (max(shape[-1], 128),)   # lane padding headroom
        return int(np.prod(padded)) * jnp.dtype(dt).itemsize

    working_set = (
        2 * nbytes((T, tm, input_dim), jnp.float32)        # x block (dbl-buffered)
        + 2 * nbytes((L, tm, dim), jnp.float32)            # h0 block
        + nbytes(wih0_bf.shape, jnp.bfloat16)              # resident weights
        + nbytes(wih_rest_bf.shape, jnp.bfloat16)
        + nbytes(whh_bf.shape, jnp.bfloat16)
        + nbytes(b.shape, jnp.float32)
        + nbytes(v_row.shape, jnp.float32)
        + 2 * nbytes((T, tm), jnp.float32)                 # out block
        + nbytes((T * tm, dim), jnp.bfloat16)              # hbuf scratch
        + nbytes((T * tm, dim), jnp.float32)               # xproj scratch
    )
    vmem_limit = int(min(max(2 * working_set, 32 * 2**20), 64 * 2**20))

    grid_spec = pltpu.PrefetchScalarGridSpec(
        num_scalar_prefetch=0,
        grid=(grid_m,),
        in_specs=[
            pl.BlockSpec((T, tm, input_dim), lambda m: (0, m, 0)),   # x: M-tiled
            pl.BlockSpec((L, tm, dim), lambda m: (0, m, 0)),         # h0: M-tiled
            pl.BlockSpec(wih0_bf.shape, lambda m: (0, 0)),           # resident
            pl.BlockSpec(wih_rest_bf.shape, lambda m: (0, 0, 0)),    # resident
            pl.BlockSpec(whh_bf.shape, lambda m: (0, 0, 0)),         # resident
            pl.BlockSpec(b.shape, lambda m: (0, 0, 0)),              # resident
            pl.BlockSpec(v_row.shape, lambda m: (0, 0)),             # resident
        ],
        out_specs=pl.BlockSpec((T, tm), lambda m: (0, m)),           # lane-dense
        scratch_shapes=[
            pltpu.VMEM((T * tm, dim), jnp.bfloat16),   # hbuf  (layer output seq)
            pltpu.VMEM((T * tm, dim), jnp.float32),    # xproj (hoisted projection)
        ],
    )

    out = pl.pallas_call(
        betarnn_kernel,
        out_shape=jax.ShapeDtypeStruct((T, m_pad), jnp.float32),
        grid_spec=grid_spec,
        compiler_params=pltpu.CompilerParams(
            dimension_semantics=("parallel",),      # M-tiles -> both v7x cores
            vmem_limit_bytes=vmem_limit,
        ),
    )(x, h0, wih0_bf, wih_rest_bf, whh_bf, b, v_row)

    return out[:, :M, None]            # (T, M, 1) to match the PyTorch module


# ------------------------- pure-JAX reference --------------------------------
def betarnn_ref(x, h0, wih0, wih_rest, whh, bih, bhh, vw):
    T = x.shape[0]
    L = h0.shape[0]
    layer_in = x
    for l in range(L):
        wih = wih0 if l == 0 else wih_rest[l - 1]
        h = h0[l]
        outs = []
        for t in range(T):
            h = jnp.tanh(layer_in[t] @ wih + h @ whh[l] + bih[l] + bhh[l])
            outs.append(h)
        layer_in = jnp.stack(outs, axis=0)
    return jax.nn.sigmoid(jnp.einsum("tmd,do->tmo", layer_in, vw))


# ------------------------------ parameters -----------------------------------
def xavier_normal(key, shape):
    # shape = (fan_in, fan_out) in our transposed layout
    fan_in, fan_out = shape[-2], shape[-1]
    std = float(np.sqrt(2.0 / (fan_in + fan_out)))
    return jax.random.normal(key, shape, dtype=jnp.float32) * std


if __name__ == "__main__":
    # Shapes consistent with BetaRNN(M, layers, dim, input_dim); T = seq length.
    # M > 128 exercises the multi-tile "parallel" grid + batch padding path.
    M, layers, dim, input_dim = 200, 2, 32, 4
    T = 8

    key = jax.random.PRNGKey(0)
    keys = jax.random.split(key, 8)

    # Parameters (deterministic, synthetic -- shapes match nn.RNN / nn.Linear).
    # h0 is a learnable parameter in the module; use small nonzero values here
    # so the initial-state path is actually exercised.
    h0 = 0.1 * jax.random.normal(keys[7], (layers, M, dim), dtype=jnp.float32)
    wih0 = xavier_normal(keys[0], (input_dim, dim))                  # weight_ih_l0^T
    wih_rest = xavier_normal(keys[1], (layers - 1, dim, dim))        # weight_ih_l{>=1}^T
    whh = xavier_normal(keys[2], (layers, dim, dim))                 # weight_hh_l*^T
    bih = 0.05 * jax.random.normal(keys[3], (layers, 1, dim), dtype=jnp.float32)
    bhh = 0.05 * jax.random.normal(keys[4], (layers, 1, dim), dtype=jnp.float32)
    vw = xavier_normal(keys[5], (dim, 1))                            # v.weight^T

    # Input x: (seq, batch=M, input_dim)
    x = jax.random.normal(keys[6], (T, M, input_dim), dtype=jnp.float32)

    beta = betarnn_forward(x, h0, wih0, wih_rest, whh, bih, bhh, vw)
    beta = jax.block_until_ready(beta)

    ref = betarnn_ref(x, h0, wih0, wih_rest, whh, bih, bhh, vw)
    assert beta.shape == (T, M, 1), beta.shape
    # bf16 MXU operands (f32 accumulation, f32 tanh/sigmoid) vs. an f32 reference
    # -> relaxed tolerance per the review's correctness note.
    np.testing.assert_allclose(np.asarray(beta), np.asarray(ref), rtol=5e-2, atol=5e-2)

    print("KERNEL_OK")
</pallas_src>

<mosaic_0001>
module attributes {stable_mosaic.version = 11 : i64} {
  func.func @betarnn_kernel(%arg0: i32, %arg1: memref<8x128x4xf32, #tpu.memory_space<vmem>>, %arg2: memref<2x128x32xf32, #tpu.memory_space<vmem>>, %arg3: memref<4x32xbf16, #tpu.memory_space<vmem>>, %arg4: memref<1x32x32xbf16, #tpu.memory_space<vmem>>, %arg5: memref<2x32x32xbf16, #tpu.memory_space<vmem>>, %arg6: memref<2x1x32xf32, #tpu.memory_space<vmem>>, %arg7: memref<1x32xf32, #tpu.memory_space<vmem>>, %arg8: memref<8x128xf32, #tpu.memory_space<vmem>>, %arg9: memref<1024x32xbf16, #tpu.memory_space<vmem>>, %arg10: memref<1024x32xf32, #tpu.memory_space<vmem>>) attributes {dimension_semantics = [#tpu.dimension_semantics<parallel>], iteration_bounds = array<i64: 2>, scalar_prefetch = 0 : i64, scratch_operands = 2 : i64, tpu.core_type = #tpu.core_type<tc>, window_params = [{transform_indices = @transform_0, window_bounds = array<i64: 8, 128, 4>}, {transform_indices = @transform_1, window_bounds = array<i64: 2, 128, 32>}, {pipeline_mode = #tpu.pipeline_mode<synchronous>, transform_indices = @transform_2, window_bounds = array<i64: 4, 32>}, {pipeline_mode = #tpu.pipeline_mode<synchronous>, transform_indices = @transform_3, window_bounds = array<i64: 1, 32, 32>}, {pipeline_mode = #tpu.pipeline_mode<synchronous>, transform_indices = @transform_4, window_bounds = array<i64: 2, 32, 32>}, {pipeline_mode = #tpu.pipeline_mode<synchronous>, transform_indices = @transform_5, window_bounds = array<i64: 2, 1, 32>}, {pipeline_mode = #tpu.pipeline_mode<synchronous>, transform_indices = @transform_6, window_bounds = array<i64: 1, 32>}, {transform_indices = @transform_7, window_bounds = array<i64: 8, 128>}]} {
    %c0 = arith.constant 0 : index
    %c0_0 = arith.constant 0 : index
    %0 = vector.load %arg7[%c0, %c0_0] : memref<1x32xf32, #tpu.memory_space<vmem>>, vector<1x32xf32>
    %c0_1 = arith.constant 0 : index
    %c0_2 = arith.constant 0 : index
    %1 = vector.load %arg3[%c0_1, %c0_2] : memref<4x32xbf16, #tpu.memory_space<vmem>>, vector<4x32xbf16>
    %c0_3 = arith.constant 0 : index
    %c0_4 = arith.constant 0 : index
    %c0_5 = arith.constant 0 : index
    %2 = vector.load %arg1[%c0_3, %c0_4, %c0_5] : memref<8x128x4xf32, #tpu.memory_space<vmem>>, vector<8x128x4xf32>
    %3 = vector.shape_cast %2 : vector<8x128x4xf32> to vector<1024x4xf32>
    %4 = arith.truncf %3 : vector<1024x4xf32> to vector<1024x4xbf16>
    %cst = arith.constant dense<0.000000e+00> : vector<1024x32xf32>
    %5 = tpu.matmul %4, %1, %cst {dimension_numbers = #tpu.dot_dimension_numbers<[1], [0], [0], [1], [0, 0, 1, 1], [], []>} : vector<1024x4xbf16>, vector<4x32xbf16>, vector<1024x32xf32> -> vector<1024x32xf32>
    %c0_6 = arith.constant 0 : index
    %c0_7 = arith.constant 0 : index
    %c0_8 = arith.constant 0 : index
    %6 = vector.load %arg6[%c0_6, %c0_7, %c0_8] : memref<2x1x32xf32, #tpu.memory_space<vmem>>, vector<1x1x32xf32>
    %7 = vector.shape_cast %6 : vector<1x1x32xf32> to vector<1x32xf32>
    %8 = vector.broadcast %7 : vector<1x32xf32> to vector<1024x32xf32>
    %9 = arith.addf %5, %8 : vector<1024x32xf32>
    %c0_9 = arith.constant 0 : index
    %c0_10 = arith.constant 0 : index
    %10 = vector.load %arg10[%c0_9, %c0_10] : memref<1024x32xf32, #tpu.memory_space<vmem>>, vector<1024x32xf32>
    tpu.vector_store %arg10[%c0_9, %c0_10], %9 {strides = array<i32>} : memref<1024x32xf32, #tpu.memory_space<vmem>>, vector<1024x32xf32>,
    %c0_11 = arith.constant 0 : index
    %c0_12 = arith.constant 0 : index
    %c0_13 = arith.constant 0 : index
    %11 = vector.load %arg5[%c0_11, %c0_12, %c0_13] : memref<2x32x32xbf16, #tpu.memory_space<vmem>>, vector<1x32x32xbf16>
    %12 = vector.shape_cast %11 : vector<1x32x32xbf16> to vector<32x32xbf16>
    %c0_14 = arith.constant 0 : index
    %c0_15 = arith.constant 0 : index
    %c0_16 = arith.constant 0 : index
    %13 = vector.load %arg2[%c0_14, %c0_15, %c0_16] : memref<2x128x32xf32, #tpu.memory_space<vmem>>, vector<1x128x32xf32>
    %14 = vector.shape_cast %13 : vector<1x128x32xf32> to vector<128x32xf32>
    %c0_i32 = arith.constant 0 : i32
    %c128_i32 = arith.constant 128 : i32
    %15 = arith.muli %c0_i32, %c128_i32 : i32
    %16 = tpu.assume_multiple %15, 128 : i32
    %17 = arith.index_cast %16 : i32 to index
    %c0_17 = arith.constant 0 : index
    %18 = vector.load %arg10[%17, %c0_17] : memref<1024x32xf32, #tpu.memory_space<vmem>>, vector<128x32xf32>
    %19 = arith.truncf %14 : vector<128x32xf32> to vector<128x32xbf16>
    %cst_18 = arith.constant dense<0.000000e+00> : vector<128x32xf32>
    %20 = tpu.matmul %19, %12, %cst_18 {dimension_numbers = #tpu.dot_dimension_numbers<[1], [0], [0], [1], [0, 0, 1, 1], [], []>} : vector<128x32xbf16>, vector<32x32xbf16>, vector<128x32xf32> -> vector<128x32xf32>
    %21 = arith.addf %18, %20 : vector<128x32xf32>
    %22 = math.tanh %21 : vector<128x32xf32>
    %23 = arith.truncf %22 : vector<128x32xf32> to vector<128x32xbf16>
    %24 = arith.index_cast %16 : i32 to index
    %c0_19 = arith.constant 0 : index
    %25 = vector.load %arg9[%24, %c0_19] : memref<1024x32xbf16, #tpu.memory_space<vmem>>, vector<128x32xbf16>
    tpu.vector_store %arg9[%24, %c0_19], %23 {strides = array<i32>} : memref<1024x32xbf16, #tpu.memory_space<vmem>>, vector<128x32xbf16>,
    %c1_i32 = arith.constant 1 : i32
    %c128_i32_20 = arith.constant 128 : i32
    %26 = arith.muli %c1_i32, %c128_i32_20 : i32
    %27 = tpu.assume_multiple %26, 128 : i32
    %28 = arith.index_cast %27 : i32 to index
    %c0_21 = arith.constant 0 : index
    %29 = vector.load %arg10[%28, %c0_21] : memref<1024x32xf32, #tpu.memory_space<vmem>>, vector<128x32xf32>
    %30 = arith.truncf %22 : vector<128x32xf32> to vector<128x32xbf16>
    %cst_22 = arith.constant dense<0.000000e+00> : vector<128x32xf32>
    %31 = tpu.matmul %30, %12, %cst_22 {dimension_numbers = #tpu.dot_dimension_numbers<[1], [0], [0], [1], [0, 0, 1, 1], [], []>} : vector<128x32xbf16>, vector<32x32xbf16>, vector<128x32xf32> -> vector<128x32xf32>
    %32 = arith.addf %29, %31 : vector<128x32xf32>
    %33 = math.tanh %32 : vector<128x32xf32>
    %34 = arith.truncf %33 : vector<128x32xf32> to vector<128x32xbf16>
    %35 = arith.index_cast %27 : i32 to index
    %c0_23 = arith.constant 0 : index
    %36 = vector.load %arg9[%35, %c0_23] : memref<1024x32xbf16, #tpu.memory_space<vmem>>, vector<128x32xbf16>
    tpu.vector_store %arg9[%35, %c0_23], %34 {strides = array<i32>} : memref<1024x32xbf16, #tpu.memory_space<vmem>>, vector<128x32xbf16>,
    %c2_i32 = arith.constant 2 : i32
    %c128_i32_24 = arith.constant 128 : i32
    %37 = arith.muli %c2_i32, %c128_i32_24 : i32
    %38 = tpu.assume_multiple %37, 128 : i32
    %39 = arith.index_cast %38 : i32 to index
    %c0_25 = arith.constant 0 : index
    %40 = vector.load %arg10[%39, %c0_25] : memref<1024x32xf32, #tpu.memory_space<vmem>>, vector<128x32xf32>
    %41 = arith.truncf %33 : vector<128x32xf32> to vector<128x32xbf16>
    %cst_26 = arith.constant dense<0.000000e+00> : vector<128x32xf32>
    %42 = tpu.matmul %41, %12, %cst_26 {dimension_numbers = #tpu.dot_dimension_numbers<[1], [0], [0], [1], [0, 0, 1, 1], [], []>} : vector<128x32xbf16>, vector<32x32xbf16>, vector<128x32xf32> -> vector<128x32xf32>
    %43 = arith.addf %40, %42 : vector<128x32xf32>
    %44 = math.tanh %43 : vector<128x32xf32>
    %45 = arith.truncf %44 : vector<128x32xf32> to vector<128x32xbf16>
    %46 = arith.index_cast %38 : i32 to index
    %c0_27 = arith.constant 0 : index
    %47 = vector.load %arg9[%46, %c0_27] : memref<1024x32xbf16, #tpu.memory_space<vmem>>, vector<128x32xbf16>
    tpu.vector_store %arg9[%46, %c0_27], %45 {strides = array<i32>} : memref<1024x32xbf16, #tpu.memory_space<vmem>>, vector<128x32xbf16>,
    %c3_i32 = arith.constant 3 : i32
    %c128_i32_28 = arith.constant 128 : i32
    %48 = arith.muli %c3_i32, %c128_i32_28 : i32
    %49 = tpu.assume_multiple %48, 128 : i32
    %50 = arith.index_cast %49 : i32 to index
    %c0_29 = arith.constant 0 : index
    %51 = vector.load %arg10[%50, %c0_29] : memref<1024x32xf32, #tpu.memory_space<vmem>>, vector<128x32xf32>
    %52 = arith.truncf %44 : vector<128x32xf32> to vector<128x32xbf16>
    %cst_30 = arith.constant dense<0.000000e+00> : vector<128x32xf32>
    %53 = tpu.matmul %52, %12, %cst_30 {dimension_numbers = #tpu.dot_dimension_numbers<[1], [0], [0], [1], [0, 0, 1, 1], [], []>} : vector<128x32xbf16>, vector<32x32xbf16>, vector<128x32xf32> -> vector<128x32xf32>
    %54 = arith.addf %51, %53 : vector<128x32xf32>
    %55 = math.tanh %54 : vector<128x32xf32>
    %56 = arith.truncf %55 : vector<128x32xf32> to vector<128x32xbf16>
    %57 = arith.index_cast %49 : i32 to index
    %c0_31 = arith.constant 0 : index
    %58 = vector.load %arg9[%57, %c0_31] : memref<1024x32xbf16, #tpu.memory_space<vmem>>, vector<128x32xbf16>
    tpu.vector_store %arg9[%57, %c0_31], %56 {strides = array<i32>} : memref<1024x32xbf16, #tpu.memory_space<vmem>>, vector<128x32xbf16>,
    %c4_i32 = arith.constant 4 : i32
    %c128_i32_32 = arith.constant 128 : i32
    %59 = arith.muli %c4_i32, %c128_i32_32 : i32
    %60 = tpu.assume_multiple %59, 128 : i32
    %61 = arith.index_cast %60 : i32 to index
    %c0_33 = arith.constant 0 : index
    %62 = vector.load %arg10[%61, %c0_33] : memref<1024x32xf32, #tpu.memory_space<vmem>>, vector<128x32xf32>
    %63 = arith.truncf %55 : vector<128x32xf32> to vector<128x32xbf16>
    %cst_34 = arith.constant dense<0.000000e+00> : vector<128x32xf32>
    %64 = tpu.matmul %63, %12, %cst_34 {dimension_numbers = #tpu.dot_dimension_numbers<[1], [0], [0], [1], [0, 0, 1, 1], [], []>} : vector<128x32xbf16>, vector<32x32xbf16>, vector<128x32xf32> -> vector<128x32xf32>
    %65 = arith.addf %62, %64 : vector<128x32xf32>
    %66 = math.tanh %65 : vector<128x32xf32>
    %67 = arith.truncf %66 : vector<128x32xf32> to vector<128x32xbf16>
    %68 = arith.index_cast %60 : i32 to index
    %c0_35 = arith.constant 0 : index
    %69 = vector.load %arg9[%68, %c0_35] : memref<1024x32xbf16, #tpu.memory_space<vmem>>, vector<128x32xbf16>
    tpu.vector_store %arg9[%68, %c0_35], %67 {strides = array<i32>} : memref<1024x32xbf16, #tpu.memory_space<vmem>>, vector<128x32xbf16>,
    %c5_i32 = arith.constant 5 : i32
    %c128_i32_36 = arith.constant 128 : i32
    %70 = arith.muli %c5_i32, %c128_i32_36 : i32
    %71 = tpu.assume_multiple %70, 128 : i32
    %72 = arith.index_cast %71 : i32 to index
    %c0_37 = arith.constant 0 : index
    %73 = vector.load %arg10[%72, %c0_37] : memref<1024x32xf32, #tpu.memory_space<vmem>>, vector<128x32xf32>
    %74 = arith.truncf %66 : vector<128x32xf32> to vector<128x32xbf16>
    %cst_38 = arith.constant dense<0.000000e+00> : vector<128x32xf32>
    %75 = tpu.matmul %74, %12, %cst_38 {dimension_numbers = #tpu.dot_dimension_numbers<[1], [0], [0], [1], [0, 0, 1, 1], [], []>} : vector<128x32xbf16>, vector<32x32xbf16>, vector<128x32xf32> -> vector<128x32xf32>
    %76 = arith.addf %73, %75 : vector<128x32xf32>
    %77 = math.tanh %76 : vector<128x32xf32>
    %78 = arith.truncf %77 : vector<128x32xf32> to vector<128x32xbf16>
    %79 = arith.index_cast %71 : i32 to index
    %c0_39 = arith.constant 0 : index
    %80 = vector.load %arg9[%79, %c0_39] : memref<1024x32xbf16, #tpu.memory_space<vmem>>, vector<128x32xbf16>
    tpu.vector_store %arg9[%79, %c0_39], %78 {strides = array<i32>} : memref<1024x32xbf16, #tpu.memory_space<vmem>>, vector<128x32xbf16>,
    %c6_i32 = arith.constant 6 : i32
    %c128_i32_40 = arith.constant 128 : i32
    %81 = arith.muli %c6_i32, %c128_i32_40 : i32
    %82 = tpu.assume_multiple %81, 128 : i32
    %83 = arith.index_cast %82 : i32 to index
    %c0_41 = arith.constant 0 : index
    %84 = vector.load %arg10[%83, %c0_41] : memref<1024x32xf32, #tpu.memory_space<vmem>>, vector<128x32xf32>
    %85 = arith.truncf %77 : vector<128x32xf32> to vector<128x32xbf16>
    %cst_42 = arith.constant dense<0.000000e+00> : vector<128x32xf32>
    %86 = tpu.matmul %85, %12, %cst_42 {dimension_numbers = #tpu.dot_dimension_numbers<[1], [0], [0], [1], [0, 0, 1, 1], [], []>} : vector<128x32xbf16>, vector<32x32xbf16>, vector<128x32xf32> -> vector<128x32xf32>
    %87 = arith.addf %84, %86 : vector<128x32xf32>
    %88 = math.tanh %87 : vector<128x32xf32>
    %89 = arith.truncf %88 : vector<128x32xf32> to vector<128x32xbf16>
    %90 = arith.index_cast %82 : i32 to index
    %c0_43 = arith.constant 0 : index
    %91 = vector.load %arg9[%90, %c0_43] : memref<1024x32xbf16, #tpu.memory_space<vmem>>, vector<128x32xbf16>
    tpu.vector_store %arg9[%90, %c0_43], %89 {strides = array<i32>} : memref<1024x32xbf16, #tpu.memory_space<vmem>>, vector<128x32xbf16>,
    %c7_i32 = arith.constant 7 : i32
    %c128_i32_44 = arith.constant 128 : i32
    %92 = arith.muli %c7_i32, %c128_i32_44 : i32
    %93 = tpu.assume_multiple %92, 128 : i32
    %94 = arith.index_cast %93 : i32 to index
    %c0_45 = arith.constant 0 : index
    %95 = vector.load %arg10[%94, %c0_45] : memref<1024x32xf32, #tpu.memory_space<vmem>>, vector<128x32xf32>
    %96 = arith.truncf %88 : vector<128x32xf32> to vector<128x32xbf16>
    %cst_46 = arith.constant dense<0.000000e+00> : vector<128x32xf32>
    %97 = tpu.matmul %96, %12, %cst_46 {dimension_numbers = #tpu.dot_dimension_numbers<[1], [0], [0], [1], [0, 0, 1, 1], [], []>} : vector<128x32xbf16>, vector<32x32xbf16>, vector<128x32xf32> -> vector<128x32xf32>
    %98 = arith.addf %95, %97 : vector<128x32xf32>
    %99 = math.tanh %98 : vector<128x32xf32>
    %100 = arith.truncf %99 : vector<128x32xf32> to vector<128x32xbf16>
    %101 = arith.index_cast %93 : i32 to index
    %c0_47 = arith.constant 0 : index
    %102 = vector.load %arg9[%101, %c0_47] : memref<1024x32xbf16, #tpu.memory_space<vmem>>, vector<128x32xbf16>
    tpu.vector_store %arg9[%101, %c0_47], %100 {strides = array<i32>} : memref<1024x32xbf16, #tpu.memory_space<vmem>>, vector<128x32xbf16>,
    %c8_i32 = arith.constant 8 : i32
    %c0_48 = arith.constant 0 : index
    %c0_49 = arith.constant 0 : index
    %c0_50 = arith.constant 0 : index
    %103 = vector.load %arg4[%c0_48, %c0_49, %c0_50] : memref<1x32x32xbf16, #tpu.memory_space<vmem>>, vector<1x32x32xbf16>
    %104 = vector.shape_cast %103 : vector<1x32x32xbf16> to vector<32x32xbf16>
    %c0_51 = arith.constant 0 : index
    %c0_52 = arith.constant 0 : index
    %105 = vector.load %arg9[%c0_51, %c0_52] : memref<1024x32xbf16, #tpu.memory_space<vmem>>, vector<1024x32xbf16>
    %cst_53 = arith.constant dense<0.000000e+00> : vector<1024x32xf32>
    %106 = tpu.matmul %105, %104, %cst_53 {dimension_numbers = #tpu.dot_dimension_numbers<[1], [0], [0], [1], [0, 0, 1, 1], [], []>} : vector<1024x32xbf16>, vector<32x32xbf16>, vector<1024x32xf32> -> vector<1024x32xf32>
    %c1 = arith.constant 1 : index
    %c0_54 = arith.constant 0 : index
    %c0_55 = arith.constant 0 : index
    %107 = vector.load %arg6[%c1, %c0_54, %c0_55] : memref<2x1x32xf32, #tpu.memory_space<vmem>>, vector<1x1x32xf32>
    %108 = vector.shape_cast %107 : vector<1x1x32xf32> to vector<1x32xf32>
    %109 = vector.broadcast %108 : vector<1x32xf32> to vector<1024x32xf32>
    %110 = arith.addf %106, %109 : vector<1024x32xf32>
    %c0_56 = arith.constant 0 : index
    %c0_57 = arith.constant 0 : index
    %111 = vector.load %arg10[%c0_56, %c0_57] : memref<1024x32xf32, #tpu.memory_space<vmem>>, vector<1024x32xf32>
    tpu.vector_store %arg10[%c0_56, %c0_57], %110 {strides = array<i32>} : memref<1024x32xf32, #tpu.memory_space<vmem>>, vector<1024x32xf32>,
    %c1_58 = arith.constant 1 : index
    %c0_59 = arith.constant 0 : index
    %c0_60 = arith.constant 0 : index
    %112 = vector.load %arg5[%c1_58, %c0_59, %c0_60] : memref<2x32x32xbf16, #tpu.memory_space<vmem>>, vector<1x32x32xbf16>
    %113 = vector.shape_cast %112 : vector<1x32x32xbf16> to vector<32x32xbf16>
    %c1_61 = arith.constant 1 : index
    %c0_62 = arith.constant 0 : index
    %c0_63 = arith.constant 0 : index
    %114 = vector.load %arg2[%c1_61, %c0_62, %c0_63] : memref<2x128x32xf32, #tpu.memory_space<vmem>>, vector<1x128x32xf32>
    %115 = vector.shape_cast %114 : vector<1x128x32xf32> to vector<128x32xf32>
    %c0_i32_64 = arith.constant 0 : i32
    %c128_i32_65 = arith.constant 128 : i32
    %116 = arith.muli %c0_i32_64, %c128_i32_65 : i32
    %117 = tpu.assume_multiple %116, 128 : i32
    %118 = arith.index_cast %117 : i32 to index
    %c0_66 = arith.constant 0 : index
    %119 = vector.load %arg10[%118, %c0_66] : memref<1024x32xf32, #tpu.memory_space<vmem>>, vector<128x32xf32>
    %120 = arith.truncf %115 : vector<128x32xf32> to vector<128x32xbf16>
    %cst_67 = arith.constant dense<0.000000e+00> : vector<128x32xf32>
    %121 = tpu.matmul %120, %113, %cst_67 {dimension_numbers = #tpu.dot_dimension_numbers<[1], [0], [0], [1], [0, 0, 1, 1], [], []>} : vector<128x32xbf16>, vector<32x32xbf16>, vector<128x32xf32> -> vector<128x32xf32>
    %122 = arith.addf %119, %121 : vector<128x32xf32>
    %123 = math.tanh %122 : vector<128x32xf32>
    %124 = vector.broadcast %0 : vector<1x32xf32> to vector<128x32xf32>
    %125 = arith.mulf %123, %124 : vector<128x32xf32>
    %cst_68 = arith.constant dense<0.000000e+00> : vector<128xf32>
    %126 = vector.multi_reduction <add>, %125, %cst_68 [1] : vector<128x32xf32> to vector<128xf32>
    %127 = arith.negf %126 : vector<128xf32>
    %128 = math.exp %127 : vector<128xf32>
    %cst_69 = arith.constant 1.000000e+00 : f32
    %129 = vector.broadcast %cst_69 : f32 to vector<128xf32>
    %130 = arith.addf %129, %128 : vector<128xf32>
    %131 = arith.divf %129, %130 : vector<128xf32>
    %132 = vector.shape_cast %131 : vector<128xf32> to vector<1x128xf32>
    %133 = arith.index_cast %c0_i32_64 : i32 to index
    %c0_70 = arith.constant 0 : index
    %134 = vector.load %arg8[%133, %c0_70] : memref<8x128xf32, #tpu.memory_space<vmem>>, vector<1x128xf32>
    tpu.vector_store %arg8[%133, %c0_70], %132 {strides = array<i32>} : memref<8x128xf32, #tpu.memory_space<vmem>>, vector<1x128xf32>,
    %c1_i32_71 = arith.constant 1 : i32
    %c128_i32_72 = arith.constant 128 : i32
    %135 = arith.muli %c1_i32_71, %c128_i32_72 : i32
    %136 = tpu.assume_multiple %135, 128 : i32
    %137 = arith.index_cast %136 : i32 to index
    %c0_73 = arith.constant 0 : index
    %138 = vector.load %arg10[%137, %c0_73] : memref<1024x32xf32, #tpu.memory_space<vmem>>, vector<128x32xf32>
    %139 = arith.truncf %123 : vector<128x32xf32> to vector<128x32xbf16>
    %cst_74 = arith.constant dense<0.000000e+00> : vector<128x32xf32>
    %140 = tpu.matmul %139, %113, %cst_74 {dimension_numbers = #tpu.dot_dimension_numbers<[1], [0], [0], [1], [0, 0, 1, 1], [], []>} : vector<128x32xbf16>, vector<32x32xbf16>, vector<128x32xf32> -> vector<128x32xf32>
    %141 = arith.addf %138, %140 : vector<128x32xf32>
    %142 = math.tanh %141 : vector<128x32xf32>
    %143 = vector.broadcast %0 : vector<1x32xf32> to vector<128x32xf32>
    %144 = arith.mulf %142, %143 : vector<128x32xf32>
    %cst_75 = arith.constant dense<0.000000e+00> : vector<128xf32>
    %145 = vector.multi_reduction <add>, %144, %cst_75 [1] : vector<128x32xf32> to vector<128xf32>
    %146 = arith.negf %145 : vector<128xf32>
    %147 = math.exp %146 : vector<128xf32>
    %cst_76 = arith.constant 1.000000e+00 : f32
    %148 = vector.broadcast %cst_76 : f32 to vector<128xf32>
    %149 = arith.addf %148, %147 : vector<128xf32>
    %150 = arith.divf %148, %149 : vector<128xf32>
    %151 = vector.shape_cast %150 : vector<128xf32> to vector<1x128xf32>
    %152 = arith.index_cast %c1_i32_71 : i32 to index
    %c0_77 = arith.constant 0 : index
    %153 = vector.load %arg8[%152, %c0_77] : memref<8x128xf32, #tpu.memory_space<vmem>>, vector<1x128xf32>
    tpu.vector_store %arg8[%152, %c0_77], %151 {strides = array<i32>} : memref<8x128xf32, #tpu.memory_space<vmem>>, vector<1x128xf32>,
    %c2_i32_78 = arith.constant 2 : i32
    %c128_i32_79 = arith.constant 128 : i32
    %154 = arith.muli %c2_i32_78, %c128_i32_79 : i32
    %155 = tpu.assume_multiple %154, 128 : i32
    %156 = arith.index_cast %155 : i32 to index
    %c0_80 = arith.constant 0 : index
    %157 = vector.load %arg10[%156, %c0_80] : memref<1024x32xf32, #tpu.memory_space<vmem>>, vector<128x32xf32>
    %158 = arith.truncf %142 : vector<128x32xf32> to vector<128x32xbf16>
    %cst_81 = arith.constant dense<0.000000e+00> : vector<128x32xf32>
    %159 = tpu.matmul %158, %113, %cst_81 {dimension_numbers = #tpu.dot_dimension_numbers<[1], [0], [0], [1], [0, 0, 1, 1], [], []>} : vector<128x32xbf16>, vector<32x32xbf16>, vector<128x32xf32> -> vector<128x32xf32>
    %160 = arith.addf %157, %159 : vector<128x32xf32>
    %161 = math.tanh %160 : vector<128x32xf32>
    %162 = vector.broadcast %0 : vector<1x32xf32> to vector<128x32xf32>
    %163 = arith.mulf %161, %162 : vector<128x32xf32>
    %cst_82 = arith.constant dense<0.000000e+00> : vector<128xf32>
    %164 = vector.multi_reduction <add>, %163, %cst_82 [1] : vector<128x32xf32> to vector<128xf32>
    %165 = arith.negf %164 : vector<128xf32>
    %166 = math.exp %165 : vector<128xf32>
    %cst_83 = arith.constant 1.000000e+00 : f32
    %167 = vector.broadcast %cst_83 : f32 to vector<128xf32>
    %168 = arith.addf %167, %166 : vector<128xf32>
    %169 = arith.divf %167, %168 : vector<128xf32>
    %170 = vector.shape_cast %169 : vector<128xf32> to vector<1x128xf32>
    %171 = arith.index_cast %c2_i32_78 : i32 to index
    %c0_84 = arith.constant 0 : index
    %172 = vector.load %arg8[%171, %c0_84] : memref<8x128xf32, #tpu.memory_space<vmem>>, vector<1x128xf32>
    tpu.vector_store %arg8[%171, %c0_84], %170 {strides = array<i32>} : memref<8x128xf32, #tpu.memory_space<vmem>>, vector<1x128xf32>,
    %c3_i32_85 = arith.constant 3 : i32
    %c128_i32_86 = arith.constant 128 : i32
    %173 = arith.muli %c3_i32_85, %c128_i32_86 : i32
    %174 = tpu.assume_multiple %173, 128 : i32
    %175 = arith.index_cast %174 : i32 to index
    %c0_87 = arith.constant 0 : index
    %176 = vector.load %arg10[%175, %c0_87] : memref<1024x32xf32, #tpu.memory_space<vmem>>, vector<128x32xf32>
    %177 = arith.truncf %161 : vector<128x32xf32> to vector<128x32xbf16>
    %cst_88 = arith.constant dense<0.000000e+00> : vector<128x32xf32>
    %178 = tpu.matmul %177, %113, %cst_88 {dimension_numbers = #tpu.dot_dimension_numbers<[1], [0], [0], [1], [0, 0, 1, 1], [], []>} : vector<128x32xbf16>, vector<32x32xbf16>, vector<128x32xf32> -> vector<128x32xf32>
    %179 = arith.addf %176, %178 : vector<128x32xf32>
    %180 = math.tanh %179 : vector<128x32xf32>
    %181 = vector.broadcast %0 : vector<1x32xf32> to vector<128x32xf32>
    %182 = arith.mulf %180, %181 : vector<128x32xf32>
    %cst_89 = arith.constant dense<0.000000e+00> : vector<128xf32>
    %183 = vector.multi_reduction <add>, %182, %cst_89 [1] : vector<128x32xf32> to vector<128xf32>
    %184 = arith.negf %183 : vector<128xf32>
    %185 = math.exp %184 : vector<128xf32>
    %cst_90 = arith.constant 1.000000e+00 : f32
    %186 = vector.broadcast %cst_90 : f32 to vector<128xf32>
    %187 = arith.addf %186, %185 : vector<128xf32>
    %188 = arith.divf %186, %187 : vector<128xf32>
    %189 = vector.shape_cast %188 : vector<128xf32> to vector<1x128xf32>
    %190 = arith.index_cast %c3_i32_85 : i32 to index
    %c0_91 = arith.constant 0 : index
    %191 = vector.load %arg8[%190, %c0_91] : memref<8x128xf32, #tpu.memory_space<vmem>>, vector<1x128xf32>
    tpu.vector_store %arg8[%190, %c0_91], %189 {strides = array<i32>} : memref<8x128xf32, #tpu.memory_space<vmem>>, vector<1x128xf32>,
    %c4_i32_92 = arith.constant 4 : i32
    %c128_i32_93 = arith.constant 128 : i32
    %192 = arith.muli %c4_i32_92, %c128_i32_93 : i32
    %193 = tpu.assume_multiple %192, 128 : i32
    %194 = arith.index_cast %193 : i32 to index
    %c0_94 = arith.constant 0 : index
    %195 = vector.load %arg10[%194, %c0_94] : memref<1024x32xf32, #tpu.memory_space<vmem>>, vector<128x32xf32>
    %196 = arith.truncf %180 : vector<128x32xf32> to vector<128x32xbf16>
    %cst_95 = arith.constant dense<0.000000e+00> : vector<128x32xf32>
    %197 = tpu.matmul %196, %113, %cst_95 {dimension_numbers = #tpu.dot_dimension_numbers<[1], [0], [0], [1], [0, 0, 1, 1], [], []>} : vector<128x32xbf16>, vector<32x32xbf16>, vector<128x32xf32> -> vector<128x32xf32>
    %198 = arith.addf %195, %197 : vector<128x32xf32>
    %199 = math.tanh %198 : vector<128x32xf32>
    %200 = vector.broadcast %0 : vector<1x32xf32> to vector<128x32xf32>
    %201 = arith.mulf %199, %200 : vector<128x32xf32>
    %cst_96 = arith.constant dense<0.000000e+00> : vector<128xf32>
    %202 = vector.multi_reduction <add>, %201, %cst_96 [1] : vector<128x32xf32> to vector<128xf32>
    %203 = arith.negf %202 : vector<128xf32>
    %204 = math.exp %203 : vector<128xf32>
    %cst_97 = arith.constant 1.000000e+00 : f32
    %205 = vector.broadcast %cst_97 : f32 to vector<128xf32>
    %206 = arith.addf %205, %204 : vector<128xf32>
    %207 = arith.divf %205, %206 : vector<128xf32>
    %208 = vector.shape_cast %207 : vector<128xf32> to vector<1x128xf32>
    %209 = arith.index_cast %c4_i32_92 : i32 to index
    %c0_98 = arith.constant 0 : index
    %210 = vector.load %arg8[%209, %c0_98] : memref<8x128xf32, #tpu.memory_space<vmem>>, vector<1x128xf32>
    tpu.vector_store %arg8[%209, %c0_98], %208 {strides = array<i32>} : memref<8x128xf32, #tpu.memory_space<vmem>>, vector<1x128xf32>,
    %c5_i32_99 = arith.constant 5 : i32
    %c128_i32_100 = arith.constant 128 : i32
    %211 = arith.muli %c5_i32_99, %c128_i32_100 : i32
    %212 = tpu.assume_multiple %211, 128 : i32
    %213 = arith.index_cast %212 : i32 to index
    %c0_101 = arith.constant 0 : index
    %214 = vector.load %arg10[%213, %c0_101] : memref<1024x32xf32, #tpu.memory_space<vmem>>, vector<128x32xf32>
    %215 = arith.truncf %199 : vector<128x32xf32> to vector<128x32xbf16>
    %cst_102 = arith.constant dense<0.000000e+00> : vector<128x32xf32>
    %216 = tpu.matmul %215, %113, %cst_102 {dimension_numbers = #tpu.dot_dimension_numbers<[1], [0], [0], [1], [0, 0, 1, 1], [], []>} : vector<128x32xbf16>, vector<32x32xbf16>, vector<128x32xf32> -> vector<128x32xf32>
    %217 = arith.addf %214, %216 : vector<128x32xf32>
    %218 = math.tanh %217 : vector<128x32xf32>
    %219 = vector.broadcast %0 : vector<1x32xf32> to vector<128x32xf32>
    %220 = arith.mulf %218, %219 : vector<128x32xf32>
    %cst_103 = arith.constant dense<0.000000e+00> : vector<128xf32>
    %221 = vector.multi_reduction <add>, %220, %cst_103 [1] : vector<128x32xf32> to vector<128xf32>
    %222 = arith.negf %221 : vector<128xf32>
    %223 = math.exp %222 : vector<128xf32>
    %cst_104 = arith.constant 1.000000e+00 : f32
    %224 = vector.broadcast %cst_104 : f32 to vector<128xf32>
    %225 = arith.addf %224, %223 : vector<128xf32>
    %226 = arith.divf %224, %225 : vector<128xf32>
    %227 = vector.shape_cast %226 : vector<128xf32> to vector<1x128xf32>
    %228 = arith.index_cast %c5_i32_99 : i32 to index
    %c0_105 = arith.constant 0 : index
    %229 = vector.load %arg8[%228, %c0_105] : memref<8x128xf32, #tpu.memory_space<vmem>>, vector<1x128xf32>
    tpu.vector_store %arg8[%228, %c0_105], %227 {strides = array<i32>} : memref<8x128xf32, #tpu.memory_space<vmem>>, vector<1x128xf32>,
    %c6_i32_106 = arith.constant 6 : i32
    %c128_i32_107 = arith.constant 128 : i32
    %230 = arith.muli %c6_i32_106, %c128_i32_107 : i32
    %231 = tpu.assume_multiple %230, 128 : i32
    %232 = arith.index_cast %231 : i32 to index
    %c0_108 = arith.constant 0 : index
    %233 = vector.load %arg10[%232, %c0_108] : memref<1024x32xf32, #tpu.memory_space<vmem>>, vector<128x32xf32>
    %234 = arith.truncf %218 : vector<128x32xf32> to vector<128x32xbf16>
    %cst_109 = arith.constant dense<0.000000e+00> : vector<128x32xf32>
    %235 = tpu.matmul %234, %113, %cst_109 {dimension_numbers = #tpu.dot_dimension_numbers<[1], [0], [0], [1], [0, 0, 1, 1], [], []>} : vector<128x32xbf16>, vector<32x32xbf16>, vector<128x32xf32> -> vector<128x32xf32>
    %236 = arith.addf %233, %235 : vector<128x32xf32>
    %237 = math.tanh %236 : vector<128x32xf32>
    %238 = vector.broadcast %0 : vector<1x32xf32> to vector<128x32xf32>
    %239 = arith.mulf %237, %238 : vector<128x32xf32>
    %cst_110 = arith.constant dense<0.000000e+00> : vector<128xf32>
    %240 = vector.multi_reduction <add>, %239, %cst_110 [1] : vector<128x32xf32> to vector<128xf32>
    %241 = arith.negf %240 : vector<128xf32>
    %242 = math.exp %241 : vector<128xf32>
    %cst_111 = arith.constant 1.000000e+00 : f32
    %243 = vector.broadcast %cst_111 : f32 to vector<128xf32>
    %244 = arith.addf %243, %242 : vector<128xf32>
    %245 = arith.divf %243, %244 : vector<128xf32>
    %246 = vector.shape_cast %245 : vector<128xf32> to vector<1x128xf32>
    %247 = arith.index_cast %c6_i32_106 : i32 to index
    %c0_112 = arith.constant 0 : index
    %248 = vector.load %arg8[%247, %c0_112] : memref<8x128xf32, #tpu.memory_space<vmem>>, vector<1x128xf32>
    tpu.vector_store %arg8[%247, %c0_112], %246 {strides = array<i32>} : memref<8x128xf32, #tpu.memory_space<vmem>>, vector<1x128xf32>,
    %c7_i32_113 = arith.constant 7 : i32
    %c128_i32_114 = arith.constant 128 : i32
    %249 = arith.muli %c7_i32_113, %c128_i32_114 : i32
    %250 = tpu.assume_multiple %249, 128 : i32
    %251 = arith.index_cast %250 : i32 to index
    %c0_115 = arith.constant 0 : index
    %252 = vector.load %arg10[%251, %c0_115] : memref<1024x32xf32, #tpu.memory_space<vmem>>, vector<128x32xf32>
    %253 = arith.truncf %237 : vector<128x32xf32> to vector<128x32xbf16>
    %cst_116 = arith.constant dense<0.000000e+00> : vector<128x32xf32>
    %254 = tpu.matmul %253, %113, %cst_116 {dimension_numbers = #tpu.dot_dimension_numbers<[1], [0], [0], [1], [0, 0, 1, 1], [], []>} : vector<128x32xbf16>, vector<32x32xbf16>, vector<128x32xf32> -> vector<128x32xf32>
    %255 = arith.addf %252, %254 : vector<128x32xf32>
    %256 = math.tanh %255 : vector<128x32xf32>
    %257 = vector.broadcast %0 : vector<1x32xf32> to vector<128x32xf32>
    %258 = arith.mulf %256, %257 : vector<128x32xf32>
    %cst_117 = arith.constant dense<0.000000e+00> : vector<128xf32>
    %259 = vector.multi_reduction <add>, %258, %cst_117 [1] : vector<128x32xf32> to vector<128xf32>
    %260 = arith.negf %259 : vector<128xf32>
    %261 = math.exp %260 : vector<128xf32>
    %cst_118 = arith.constant 1.000000e+00 : f32
    %262 = vector.broadcast %cst_118 : f32 to vector<128xf32>
    %263 = arith.addf %262, %261 : vector<128xf32>
    %264 = arith.divf %262, %263 : vector<128xf32>
    %265 = vector.shape_cast %264 : vector<128xf32> to vector<1x128xf32>
    %266 = arith.index_cast %c7_i32_113 : i32 to index
    %c0_119 = arith.constant 0 : index
    %267 = vector.load %arg8[%266, %c0_119] : memref<8x128xf32, #tpu.memory_space<vmem>>, vector<1x128xf32>
    tpu.vector_store %arg8[%266, %c0_119], %265 {strides = array<i32>} : memref<8x128xf32, #tpu.memory_space<vmem>>, vector<1x128xf32>,
    %c8_i32_120 = arith.constant 8 : i32
    return
  }
  func.func @transform_0(%arg0: i32) -> (i32, i32, i32) {
    %c0_i32 = arith.constant 0 : i32
    %c0_i32_0 = arith.constant 0 : i32
    %c0_i32_1 = arith.constant 0 : i32
    return %c0_i32, %arg0, %c0_i32_0 : i32, i32, i32
  }
  func.func @transform_1(%arg0: i32) -> (i32, i32, i32) {
    %c0_i32 = arith.constant 0 : i32
    %c0_i32_0 = arith.constant 0 : i32
    %c0_i32_1 = arith.constant 0 : i32
    return %c0_i32, %arg0, %c0_i32_0 : i32, i32, i32
  }
  func.func @transform_2(%arg0: i32) -> (i32, i32) {
    %c0_i32 = arith.constant 0 : i32
    %c0_i32_0 = arith.constant 0 : i32
    %c0_i32_1 = arith.constant 0 : i32
    return %c0_i32, %c0_i32_0 : i32, i32
  }
  func.func @transform_3(%arg0: i32) -> (i32, i32, i32) {
    %c0_i32 = arith.constant 0 : i32
    %c0_i32_0 = arith.constant 0 : i32
    %c0_i32_1 = arith.constant 0 : i32
    %c0_i32_2 = arith.constant 0 : i32
    return %c0_i32, %c0_i32_0, %c0_i32_1 : i32, i32, i32
  }
  func.func @transform_4(%arg0: i32) -> (i32, i32, i32) {
    %c0_i32 = arith.constant 0 : i32
    %c0_i32_0 = arith.constant 0 : i32
    %c0_i32_1 = arith.constant 0 : i32
    %c0_i32_2 = arith.constant 0 : i32
    return %c0_i32, %c0_i32_0, %c0_i32_1 : i32, i32, i32
  }
  func.func @transform_5(%arg0: i32) -> (i32, i32, i32) {
    %c0_i32 = arith.constant 0 : i32
    %c0_i32_0 = arith.constant 0 : i32
    %c0_i32_1 = arith.constant 0 : i32
    %c0_i32_2 = arith.constant 0 : i32
    return %c0_i32, %c0_i32_0, %c0_i32_1 : i32, i32, i32
  }
  func.func @transform_6(%arg0: i32) -> (i32, i32) {
    %c0_i32 = arith.constant 0 : i32
    %c0_i32_0 = arith.constant 0 : i32
    %c0_i32_1 = arith.constant 0 : i32
    return %c0_i32, %c0_i32_0 : i32, i32
  }
  func.func @transform_7(%arg0: i32) -> (i32, i32) {
    %c0_i32 = arith.constant 0 : i32
    %c0_i32_0 = arith.constant 0 : i32
    return %c0_i32, %arg0 : i32, i32
  }
}

</mosaic_0001>

<bundles_post_ra>
// kernel: betarnn_forward.1
= control target key start
LH: loop header
LB: loop body
LE: loop exit
PB: predicated region body
PF: predicated region fallthrough
CT: control target
= control target key end

     0   :  { %s10623_s24 = smov 0   ;;  %s10625_s25 = smov 0   ;;  %s12839_s0 = inlined_call_operand.vmem [shape: f32[8,256,4], index: 0, kind: input, shape index: {}]   ;;  %s12840_s1 = inlined_call_operand.vmem [shape: f32[2,256,32], index: 1, kind: input, shape index: {}]   ;;  %s12841_s2 = inlined_call_operand.vmem [shape: bf16[4,32], index: 2, kind: input, shape index: {}]   ;;  %s12842_s3 = inlined_call_operand.vmem [shape: bf16[1,32,32], index: 3, kind: input, shape index: {}]   ;;  %s12843_s4 = inlined_call_operand.vmem [shape: bf16[2,32,32], index: 4, kind: input, shape index: {}]   ;;  %s12844_s5 = inlined_call_operand.vmem [shape: f32[2,1,32], index: 5, kind: input, shape index: {}]   ;;  %s12845_s6 = inlined_call_operand.vmem [shape: f32[1,32], index: 6, kind: input, shape index: {}]   ;;  %s12846_s7 = inlined_call_operand.vmem [shape: f32[8,256], index: 7, kind: output, shape index: {}]  }
   0x1   :  { %s10627_s26 = smov 0  }
   0x2 LB: > { %s8182_s27 = sadd.s32 4294967295, %s10581_s26   ;;  %s10640_s28 = sadd.s32 1, %s10581_s26   ;;  %s10581_s26 = sphi %s10627_s26, %s12851_s26   ;;  %s10577_s25 = sphi %s10625_s25, %s12850_s25   ;;  %s10573_s24 = sphi %s10623_s24, %s12849_s24  }
   0x3   : > { %s21_s29 = ssub.s32 %s10581_s26, %s10640_s28  ;;  %s24_s30 = sadd.s32 1, %s10577_s25 }
   0x4   : > { %p22_p0 = scmp.eq.s32.totalorder %s21_s29, 0  ;;  %p31_p1 = scmp.ne.s32.totalorder %s10577_s25, %s10573_s24 }
   0x5   : > { %p32_p2 = scmp.eq.s32.totalorder %s10581_s26, 0  ;;  %p8185_p4 = scmp.ge.s32.totalorder %s10581_s26, 2 }
   0x6   : > { %s10649_s8 = scalar_select %p22_p0, %s10577_s25, %s24_s30  }
   0x7   : > { %p10651_p3 = por %p32_p2, %p31_p1  ;;  %229 = sbr.rel (%p8185_p4) target bundleno = 102 (0x66), region = 36 }
   0xe   : > { %232 = sbr.rel (!%p10651_p3) target bundleno = 82 (0x52), region = 40  ;;  %s234_s10 = sand.u32 (%p10651_p3), 1, %s10577_s25  }
   0xf   : > { %s8612_s11 = sshll.u32 (%p10651_p3), %s10581_s26, 7  ;;  %s8186_s12 = sshll.u32 (%p10651_p3), %s234_s10, 10 }
  0x10   : > { %s10663_s15 = scalar_lea.vmem (%p10651_p3), %s12839_s0, %s8612_s11  ;;  %s10668_s16 = scalar_lea.vmem (%p10651_p3), [#allocation4], %s8186_s12 }
  0x11   : > { %v521_v0 = vld [vmem:[%s10663_s15] sm:$0xff] (%p10651_p3)  ;;  %v523_v1 = vld [vmem:[%s10663_s15 + $0x8] sm:$0xff] (%p10651_p3)  ;;  %v525_v2 = vld [vmem:[%s10663_s15 + $0x10] sm:$0xff] (%p10651_p3) }
  0x12   : > { %522 = vst [vmem:[%s10668_s16] sm:$0xff] (%p10651_p3), %v521_v0  ;;  %524 = vst [vmem:[%s10668_s16 + $0x8] sm:$0xff] (%p10651_p3), %v523_v1  ;;  %v527_v3 = vld [vmem:[%s10663_s15 + $0x18] sm:$0xff] (%p10651_p3)  ;;  %v529_v4 = vld [vmem:[%s10663_s15 + $0x20] sm:$0xff] (%p10651_p3) }
  0x13   : > { %526 = vst [vmem:[%s10668_s16 + $0x10] sm:$0xff] (%p10651_p3), %v525_v2  ;;  %v531_v5 = vld [vmem:[%s10663_s15 + $0x28] sm:$0xff] (%p10651_p3)  ;;  %528 = vst [vmem:[%s10668_s16 + $0x18] sm:$0xff] (%p10651_p3), %v527_v3  ;;  %v533_v6 = vld [vmem:[%s10663_s15 + $0x30] sm:$0xff] (%p10651_p3) }
  0x14   : > { %530 = vst [vmem:[%s10668_s16 + $0x20] sm:$0xff] (%p10651_p3), %v529_v4  ;;  %532 = vst [vmem:[%s10668_s16 + $0x28] sm:$0xff] (%p10651_p3), %v531_v5  ;;  %v535_v7 = vld [vmem:[%s10663_s15 + $0x38] sm:$0xff] (%p10651_p3)  ;;  %v537_v8 = vld [vmem:[%s10663_s15 + $0x40] sm:$0xff] (%p10651_p3) }
  0x15   : > { %534 = vst [vmem:[%s10668_s16 + $0x30] sm:$0xff] %v533_v6  ;;  %536 = vst [vmem:[%s10668_s16 + $0x38] sm:$0xff] %v535_v7  ;;  %v539_v9 = vld [vmem:[%s10663_s15 + $0x48] sm:$0xff]  ;;  %v541_v10 = vld [vmem:[%s10663_s15 + $0x50] sm:$0xff] }
  0x16   : > { %538 = vst [vmem:[%s10668_s16 + $0x40] sm:$0xff] %v537_v8  ;;  %v543_v11 = vld [vmem:[%s10663_s15 + $0x58] sm:$0xff]  ;;  %540 = vst [vmem:[%s10668_s16 + $0x48] sm:$0xff] %v539_v9  ;;  %v545_v12 = vld [vmem:[%s10663_s15 + $0x60] sm:$0xff] }
  0x17   : > { %542 = vst [vmem:[%s10668_s16 + $0x50] sm:$0xff] %v541_v10  ;;  %544 = vst [vmem:[%s10668_s16 + $0x58] sm:$0xff] %v543_v11  ;;  %v547_v13 = vld [vmem:[%s10663_s15 + $0x68] sm:$0xff]  ;;  %v549_v14 = vld [vmem:[%s10663_s15 + $0x70] sm:$0xff] }
  0x18   : > { %546 = vst [vmem:[%s10668_s16 + $0x60] sm:$0xff] %v545_v12  ;;  %548 = vst [vmem:[%s10668_s16 + $0x68] sm:$0xff] %v547_v13  ;;  %v551_v15 = vld [vmem:[%s10663_s15 + $0x78] sm:$0xff]  ;;  %v553_v16 = vld [vmem:[%s10663_s15 + $0x100] sm:$0xff] }
  0x19   : > { %550 = vst [vmem:[%s10668_s16 + $0x70] sm:$0xff] %v549_v14  ;;  %v555_v17 = vld [vmem:[%s10663_s15 + $0x108] sm:$0xff]  ;;  %552 = vst [vmem:[%s10668_s16 + $0x78] sm:$0xff] %v551_v15  ;;  %v557_v18 = vld [vmem:[%s10663_s15 + $0x110] sm:$0xff] }
  0x1a   : > { %554 = vst [vmem:[%s10668_s16 + $0x80] sm:$0xff] %v553_v16  ;;  %556 = vst [vmem:[%s10668_s16 + $0x88] sm:$0xff] %v555_v17  ;;  %v559_v19 = vld [vmem:[%s10663_s15 + $0x118] sm:$0xff]  ;;  %v561_v20 = vld [vmem:[%s10663_s15 + $0x120] sm:$0xff] }
  0x1b   : > { %558 = vst [vmem:[%s10668_s16 + $0x90] sm:$0xff] %v557_v18  ;;  %560 = vst [vmem:[%s10668_s16 + $0x98] sm:$0xff] %v559_v19  ;;  %v563_v21 = vld [vmem:[%s10663_s15 + $0x128] sm:$0xff]  ;;  %v565_v22 = vld [vmem:[%s10663_s15 + $0x130] sm:$0xff] }
  0x1c   : > { %562 = vst [vmem:[%s10668_s16 + $0xa0] sm:$0xff] %v561_v20  ;;  %v567_v23 = vld [vmem:[%s10663_s15 + $0x138] sm:$0xff]  ;;  %564 = vst [vmem:[%s10668_s16 + $0xa8] sm:$0xff] %v563_v21  ;;  %v569_v24 = vld [vmem:[%s10663_s15 + $0x140] sm:$0xff] }
  0x1d   : > { %566 = vst [vmem:[%s10668_s16 + $0xb0] sm:$0xff] %v565_v22  ;;  %568 = vst [vmem:[%s10668_s16 + $0xb8] sm:$0xff] %v567_v23  ;;  %v571_v25 = vld [vmem:[%s10663_s15 + $0x148] sm:$0xff]  ;;  %v573_v26 = vld [vmem:[%s10663_s15 + $0x150] sm:$0xff] }
  0x1e   : > { %570 = vst [vmem:[%s10668_s16 + $0xc0] sm:$0xff] %v569_v24  ;;  %572 = vst [vmem:[%s10668_s16 + $0xc8] sm:$0xff] %v571_v25  ;;  %v575_v27 = vld [vmem:[%s10663_s15 + $0x158] sm:$0xff]  ;;  %v577_v28 = vld [vmem:[%s10663_s15 + $0x160] sm:$0xff] }
  0x1f   : > { %574 = vst [vmem:[%s10668_s16 + $0xd0] sm:$0xff] %v573_v26  ;;  %v579_v29 = vld [vmem:[%s10663_s15 + $0x168] sm:$0xff]  ;;  %576 = vst [vmem:[%s10668_s16 + $0xd8] sm:$0xff] %v575_v27  ;;  %v581_v30 = vld [vmem:[%s10663_s15 + $0x170] sm:$0xff] }
  0x20   : > { %578 = vst [vmem:[%s10668_s16 + $0xe0] sm:$0xff] %v577_v28  ;;  %580 = vst [vmem:[%s10668_s16 + $0xe8] sm:$0xff] %v579_v29  ;;  %v583_v31 = vld [vmem:[%s10663_s15 + $0x178] sm:$0xff]  ;;  %v585_v32 = vld [vmem:[%s10663_s15 + $0x200] sm:$0xff] }
  0x21   : > { %582 = vst [vmem:[%s10668_s16 + $0xf0] sm:$0xff] %v581_v30  ;;  %584 = vst [vmem:[%s10668_s16 + $0xf8] sm:$0xff] %v583_v31  ;;  %v587_v33 = vld [vmem:[%s10663_s15 + $0x208] sm:$0xff]  ;;  %v589_v34 = vld [vmem:[%s10663_s15 + $0x210] sm:$0xff] }
  0x22   : > { %586 = vst [vmem:[%s10668_s16 + $0x100] sm:$0xff] %v585_v32  ;;  %v591_v35 = vld [vmem:[%s10663_s15 + $0x218] sm:$0xff]  ;;  %588 = vst [vmem:[%s10668_s16 + $0x108] sm:$0xff] %v587_v33  ;;  %v593_v36 = vld [vmem:[%s10663_s15 + $0x220] sm:$0xff] }
  0x23   : > { %590 = vst [vmem:[%s10668_s16 + $0x110] sm:$0xff] %v589_v34  ;;  %592 = vst [vmem:[%s10668_s16 + $0x118] sm:$0xff] %v591_v35  ;;  %v595_v37 = vld [vmem:[%s10663_s15 + $0x228] sm:$0xff]  ;;  %v597_v38 = vld [vmem:[%s10663_s15 + $0x230] sm:$0xff] }
  0x24   : > { %594 = vst [vmem:[%s10668_s16 + $0x120] sm:$0xff] %v593_v36  ;;  %596 = vst [vmem:[%s10668_s16 + $0x128] sm:$0xff] %v595_v37  ;;  %v599_v39 = vld [vmem:[%s10663_s15 + $0x238] sm:$0xff]  ;;  %v601_v40 = vld [vmem:[%s10663_s15 + $0x240] sm:$0xff] }
  0x25   : > { %598 = vst [vmem:[%s10668_s16 + $0x130] sm:$0xff] %v597_v38  ;;  %v603_v41 = vld [vmem:[%s10663_s15 + $0x248] sm:$0xff]  ;;  %600 = vst [vmem:[%s10668_s16 + $0x138] sm:$0xff] %v599_v39  ;;  %v605_v42 = vld [vmem:[%s10663_s15 + $0x250] sm:$0xff] }
  0x26   : > { %602 = vst [vmem:[%s10668_s16 + $0x140] sm:$0xff] %v601_v40  ;;  %604 = vst [vmem:[%s10668_s16 + $0x148] sm:$0xff] %v603_v41  ;;  %v607_v43 = vld [vmem:[%s10663_s15 + $0x258] sm:$0xff]  ;;  %v609_v44 = vld [vmem:[%s10663_s15 + $0x260] sm:$0xff] }
  0x27   : > { %606 = vst [vmem:[%s10668_s16 + $0x150] sm:$0xff] %v605_v42  ;;  %608 = vst [vmem:[%s10668_s16 + $0x158] sm:$0xff] %v607_v43  ;;  %v611_v45 = vld [vmem:[%s10663_s15 + $0x268] sm:$0xff]  ;;  %v613_v46 = vld [vmem:[%s10663_s15 + $0x270] sm:$0xff] }
  0x28   : > { %610 = vst [vmem:[%s10668_s16 + $0x160] sm:$0xff] %v609_v44  ;;  %v615_v47 = vld [vmem:[%s10663_s15 + $0x278] sm:$0xff]  ;;  %612 = vst [vmem:[%s10668_s16 + $0x168] sm:$0xff] %v611_v45  ;;  %v617_v48 = vld [vmem:[%s10663_s15 + $0x300] sm:$0xff] }
  0x29   : > { %614 = vst [vmem:[%s10668_s16 + $0x170] sm:$0xff] %v613_v46  ;;  %616 = vst [vmem:[%s10668_s16 + $0x178] sm:$0xff] %v615_v47  ;;  %v619_v49 = vld [vmem:[%s10663_s15 + $0x308] sm:$0xff]  ;;  %v621_v50 = vld [vmem:[%s10663_s15 + $0x310] sm:$0xff] }
  0x2a   : > { %618 = vst [vmem:[%s10668_s16 + $0x180] sm:$0xff] %v617_v48  ;;  %620 = vst [vmem:[%s10668_s16 + $0x188] sm:$0xff] %v619_v49  ;;  %v623_v51 = vld [vmem:[%s10663_s15 + $0x318] sm:$0xff]  ;;  %v625_v52 = vld [vmem:[%s10663_s15 + $0x320] sm:$0xff] }
  0x2b   : > { %622 = vst [vmem:[%s10668_s16 + $0x190] sm:$0xff] %v621_v50  ;;  %v627_v53 = vld [vmem:[%s10663_s15 + $0x328] sm:$0xff]  ;;  %624 = vst [vmem:[%s10668_s16 + $0x198] sm:$0xff] %v623_v51  ;;  %v629_v54 = vld [vmem:[%s10663_s15 + $0x330] sm:$0xff] }
  0x2c   : > { %626 = vst [vmem:[%s10668_s16 + $0x1a0] sm:$0xff] %v625_v52  ;;  %628 = vst [vmem:[%s10668_s16 + $0x1a8] sm:$0xff] %v627_v53  ;;  %v631_v55 = vld [vmem:[%s10663_s15 + $0x338] sm:$0xff]  ;;  %v633_v56 = vld [vmem:[%s10663_s15 + $0x340] sm:$0xff] }
  0x2d   : > { %630 = vst [vmem:[%s10668_s16 + $0x1b0] sm:$0xff] %v629_v54  ;;  %632 = vst [vmem:[%s10668_s16 + $0x1b8] sm:$0xff] %v631_v55  ;;  %v635_v57 = vld [vmem:[%s10663_s15 + $0x348] sm:$0xff]  ;;  %v637_v58 = vld [vmem:[%s10663_s15 + $0x350] sm:$0xff] }
  0x2e   : > { %634 = vst [vmem:[%s10668_s16 + $0x1c0] sm:$0xff] %v633_v56  ;;  %v639_v59 = vld [vmem:[%s10663_s15 + $0x358] sm:$0xff]  ;;  %636 = vst [vmem:[%s10668_s16 + $0x1c8] sm:$0xff] %v635_v57  ;;  %v641_v60 = vld [vmem:[%s10663_s15 + $0x360] sm:$0xff] }
  0x2f   : > { %638 = vst [vmem:[%s10668_s16 + $0x1d0] sm:$0xff] %v637_v58  ;;  %640 = vst [vmem:[%s10668_s16 + $0x1d8] sm:$0xff] %v639_v59  ;;  %v643_v61 = vld [vmem:[%s10663_s15 + $0x368] sm:$0xff]  ;;  %v645_v62 = vld [vmem:[%s10663_s15 + $0x370] sm:$0xff] }
  0x30   : > { %642 = vst [vmem:[%s10668_s16 + $0x1e0] sm:$0xff] %v641_v60  ;;  %644 = vst [vmem:[%s10668_s16 + $0x1e8] sm:$0xff] %v643_v61  ;;  %v647_v63 = vld [vmem:[%s10663_s15 + $0x378] sm:$0xff]  ;;  %v649_v0 = vld [vmem:[%s10663_s15 + $0x400] sm:$0xff] }
  0x31   : > { %646 = vst [vmem:[%s10668_s16 + $0x1f0] sm:$0xff] %v645_v62  ;;  %v651_v1 = vld [vmem:[%s10663_s15 + $0x408] sm:$0xff]  ;;  %648 = vst [vmem:[%s10668_s16 + $0x1f8] sm:$0xff] %v647_v63  ;;  %v653_v2 = vld [vmem:[%s10663_s15 + $0x410] sm:$0xff] }
  0x32   : > { %650 = vst [vmem:[%s10668_s16 + $0x200] sm:$0xff] %v649_v0  ;;  %652 = vst [vmem:[%s10668_s16 + $0x208] sm:$0xff] %v651_v1  ;;  %v655_v3 = vld [vmem:[%s10663_s15 + $0x418] sm:$0xff]  ;;  %v657_v4 = vld [vmem:[%s10663_s15 + $0x420] sm:$0xff] }
  0x33   : > { %654 = vst [vmem:[%s10668_s16 + $0x210] sm:$0xff] %v653_v2  ;;  %656 = vst [vmem:[%s10668_s16 + $0x218] sm:$0xff] %v655_v3  ;;  %v659_v5 = vld [vmem:[%s10663_s15 + $0x428] sm:$0xff]  ;;  %v661_v6 = vld [vmem:[%s10663_s15 + $0x430] sm:$0xff] }
  0x34   : > { %658 = vst [vmem:[%s10668_s16 + $0x220] sm:$0xff] %v657_v4  ;;  %v663_v7 = vld [vmem:[%s10663_s15 + $0x438] sm:$0xff]  ;;  %660 = vst [vmem:[%s10668_s16 + $0x228] sm:$0xff] %v659_v5  ;;  %v665_v8 = vld [vmem:[%s10663_s15 + $0x440] sm:$0xff] }
  0x35   : > { %662 = vst [vmem:[%s10668_s16 + $0x230] sm:$0xff] %v661_v6  ;;  %664 = vst [vmem:[%s10668_s16 + $0x238] sm:$0xff] %v663_v7  ;;  %v667_v9 = vld [vmem:[%s10663_s15 + $0x448] sm:$0xff]  ;;  %v669_v10 = vld [vmem:[%s10663_s15 + $0x450] sm:$0xff] }
  0x36   : > { %666 = vst [vmem:[%s10668_s16 + $0x240] sm:$0xff] %v665_v8  ;;  %668 = vst [vmem:[%s10668_s16 + $0x248] sm:$0xff] %v667_v9  ;;  %v671_v11 = vld [vmem:[%s10663_s15 + $0x458] sm:$0xff]  ;;  %v673_v12 = vld [vmem:[%s10663_s15 + $0x460] sm:$0xff] }
  0x37   : > { %670 = vst [vmem:[%s10668_s16 + $0x250] sm:$0xff] %v669_v10  ;;  %v675_v13 = vld [vmem:[%s10663_s15 + $0x468] sm:$0xff]  ;;  %672 = vst [vmem:[%s10668_s16 + $0x258] sm:$0xff] %v671_v11  ;;  %v677_v14 = vld [vmem:[%s10663_s15 + $0x470] sm:$0xff] }
  0x38   : > { %674 = vst [vmem:[%s10668_s16 + $0x260] sm:$0xff] %v673_v12  ;;  %676 = vst [vmem:[%s10668_s16 + $0x268] sm:$0xff] %v675_v13  ;;  %v679_v15 = vld [vmem:[%s10663_s15 + $0x478] sm:$0xff]  ;;  %v681_v16 = vld [vmem:[%s10663_s15 + $0x500] sm:$0xff] }
  0x39   : > { %678 = vst [vmem:[%s10668_s16 + $0x270] sm:$0xff] %v677_v14  ;;  %680 = vst [vmem:[%s10668_s16 + $0x278] sm:$0xff] %v679_v15  ;;  %v683_v17 = vld [vmem:[%s10663_s15 + $0x508] sm:$0xff]  ;;  %v685_v18 = vld [vmem:[%s10663_s15 + $0x510] sm:$0xff] }
  0x3a   : > { %682 = vst [vmem:[%s10668_s16 + $0x280] sm:$0xff] %v681_v16  ;;  %v687_v19 = vld [vmem:[%s10663_s15 + $0x518] sm:$0xff]  ;;  %684 = vst [vmem:[%s10668_s16 + $0x288] sm:$0xff] %v683_v17  ;;  %v689_v20 = vld [vmem:[%s10663_s15 + $0x520] sm:$0xff] }
  0x3b   : > { %686 = vst [vmem:[%s10668_s16 + $0x290] sm:$0xff] %v685_v18  ;;  %688 = vst [vmem:[%s10668_s16 + $0x298] sm:$0xff] %v687_v19  ;;  %v691_v21 = vld [vmem:[%s10663_s15 + $0x528] sm:$0xff]  ;;  %v693_v22 = vld [vmem:[%s10663_s15 + $0x530] sm:$0xff] }
  0x3c   : > { %690 = vst [vmem:[%s10668_s16 + $0x2a0] sm:$0xff] %v689_v20  ;;  %692 = vst [vmem:[%s10668_s16 + $0x2a8] sm:$0xff] %v691_v21  ;;  %v695_v23 = vld [vmem:[%s10663_s15 + $0x538] sm:$0xff]  ;;  %v697_v24 = vld [vmem:[%s10663_s15 + $0x540] sm:$0xff] }
  0x3d   : > { %694 = vst [vmem:[%s10668_s16 + $0x2b0] sm:$0xff] %v693_v22  ;;  %v699_v25 = vld [vmem:[%s10663_s15 + $0x548] sm:$0xff]  ;;  %696 = vst [vmem:[%s10668_s16 + $0x2b8] sm:$0xff] %v695_v23  ;;  %v701_v26 = vld [vmem:[%s10663_s15 + $0x550] sm:$0xff] }
  0x3e   : > { %698 = vst [vmem:[%s10668_s16 + $0x2c0] sm:$0xff] %v697_v24  ;;  %700 = vst [vmem:[%s10668_s16 + $0x2c8] sm:$0xff] %v699_v25  ;;  %v703_v27 = vld [vmem:[%s10663_s15 + $0x558] sm:$0xff]  ;;  %v705_v28 = vld [vmem:[%s10663_s15 + $0x560] sm:$0xff] }
  0x3f   : > { %702 = vst [vmem:[%s10668_s16 + $0x2d0] sm:$0xff] %v701_v26  ;;  %704 = vst [vmem:[%s10668_s16 + $0x2d8] sm:$0xff] %v703_v27  ;;  %v707_v29 = vld [vmem:[%s10663_s15 + $0x568] sm:$0xff]  ;;  %v709_v30 = vld [vmem:[%s10663_s15 + $0x570] sm:$0xff] }
  0x40   : > { %706 = vst [vmem:[%s10668_s16 + $0x2e0] sm:$0xff] %v705_v28  ;;  %v711_v31 = vld [vmem:[%s10663_s15 + $0x578] sm:$0xff]  ;;  %708 = vst [vmem:[%s10668_s16 + $0x2e8] sm:$0xff] %v707_v29  ;;  %v713_v32 = vld [vmem:[%s10663_s15 + $0x600] sm:$0xff] }
  0x41   : > { %710 = vst [vmem:[%s10668_s16 + $0x2f0] sm:$0xff] %v709_v30  ;;  %712 = vst [vmem:[%s10668_s16 + $0x2f8] sm:$0xff] %v711_v31  ;;  %v715_v33 = vld [vmem:[%s10663_s15 + $0x608] sm:$0xff]  ;;  %v717_v34 = vld [vmem:[%s10663_s15 + $0x610] sm:$0xff] }
  0x42   : > { %714 = vst [vmem:[%s10668_s16 + $0x300] sm:$0xff] %v713_v32  ;;  %716 = vst [vmem:[%s10668_s16 + $0x308] sm:$0xff] %v715_v33  ;;  %v719_v35 = vld [vmem:[%s10663_s15 + $0x618] sm:$0xff]  ;;  %v721_v36 = vld [vmem:[%s10663_s15 + $0x620] sm:$0xff] }
  0x43   : > { %718 = vst [vmem:[%s10668_s16 + $0x310] sm:$0xff] %v717_v34  ;;  %v723_v37 = vld [vmem:[%s10663_s15 + $0x628] sm:$0xff]  ;;  %720 = vst [vmem:[%s10668_s16 + $0x318] sm:$0xff] %v719_v35  ;;  %v725_v38 = vld [vmem:[%s10663_s15 + $0x630] sm:$0xff] }
  0x44   : > { %722 = vst [vmem:[%s10668_s16 + $0x320] sm:$0xff] %v721_v36  ;;  %724 = vst [vmem:[%s10668_s16 + $0x328] sm:$0xff] %v723_v37  ;;  %v727_v39 = vld [vmem:[%s10663_s15 + $0x638] sm:$0xff]  ;;  %v729_v40 = vld [vmem:[%s10663_s15 + $0x640] sm:$0xff] }
  0x45   : > { %726 = vst [vmem:[%s10668_s16 + $0x330] sm:$0xff] %v725_v38  ;;  %728 = vst [vmem:[%s10668_s16 + $0x338] sm:$0xff] %v727_v39  ;;  %v731_v41 = vld [vmem:[%s10663_s15 + $0x648] sm:$0xff]  ;;  %v733_v42 = vld [vmem:[%s10663_s15 + $0x650] sm:$0xff] }
  0x46   : > { %730 = vst [vmem:[%s10668_s16 + $0x340] sm:$0xff] %v729_v40  ;;  %v735_v43 = vld [vmem:[%s10663_s15 + $0x658] sm:$0xff]  ;;  %732 = vst [vmem:[%s10668_s16 + $0x348] sm:$0xff] %v731_v41  ;;  %v737_v44 = vld [vmem:[%s10663_s15 + $0x660] sm:$0xff] }
  0x47   : > { %734 = vst [vmem:[%s10668_s16 + $0x350] sm:$0xff] %v733_v42  ;;  %736 = vst [vmem:[%s10668_s16 + $0x358] sm:$0xff] %v735_v43  ;;  %v739_v45 = vld [vmem:[%s10663_s15 + $0x668] sm:$0xff]  ;;  %v741_v46 = vld [vmem:[%s10663_s15 + $0x670] sm:$0xff] }
  0x48   : > { %738 = vst [vmem:[%s10668_s16 + $0x360] sm:$0xff] %v737_v44  ;;  %740 = vst [vmem:[%s10668_s16 + $0x368] sm:$0xff] %v739_v45  ;;  %v743_v47 = vld [vmem:[%s10663_s15 + $0x678] sm:$0xff]  ;;  %v745_v48 = vld [vmem:[%s10663_s15 + $0x700] sm:$0xff] }
  0x49   : > { %742 = vst [vmem:[%s10668_s16 + $0x370] sm:$0xff] %v741_v46  ;;  %v747_v49 = vld [vmem:[%s10663_s15 + $0x708] sm:$0xff]  ;;  %744 = vst [vmem:[%s10668_s16 + $0x378] sm:$0xff] %v743_v47  ;;  %v749_v50 = vld [vmem:[%s10663_s15 + $0x710] sm:$0xff] }
  0x4a   : > { %746 = vst [vmem:[%s10668_s16 + $0x380] sm:$0xff] %v745_v48  ;;  %748 = vst [vmem:[%s10668_s16 + $0x388] sm:$0xff] %v747_v49  ;;  %v751_v51 = vld [vmem:[%s10663_s15 + $0x718] sm:$0xff]  ;;  %v753_v52 = vld [vmem:[%s10663_s15 + $0x720] sm:$0xff] }
  0x4b   : > { %750 = vst [vmem:[%s10668_s16 + $0x390] sm:$0xff] %v749_v50  ;;  %752 = vst [vmem:[%s10668_s16 + $0x398] sm:$0xff] %v751_v51  ;;  %v755_v53 = vld [vmem:[%s10663_s15 + $0x728] sm:$0xff]  ;;  %v757_v54 = vld [vmem:[%s10663_s15 + $0x730] sm:$0xff] }
  0x4c   : > { %754 = vst [vmem:[%s10668_s16 + $0x3a0] sm:$0xff] %v753_v52  ;;  %v759_v55 = vld [vmem:[%s10663_s15 + $0x738] sm:$0xff]  ;;  %756 = vst [vmem:[%s10668_s16 + $0x3a8] sm:$0xff] %v755_v53  ;;  %v761_v56 = vld [vmem:[%s10663_s15 + $0x740] sm:$0xff] }
  0x4d   : > { %758 = vst [vmem:[%s10668_s16 + $0x3b0] sm:$0xff] %v757_v54  ;;  %760 = vst [vmem:[%s10668_s16 + $0x3b8] sm:$0xff] %v759_v55  ;;  %v763_v57 = vld [vmem:[%s10663_s15 + $0x748] sm:$0xff]  ;;  %v765_v58 = vld [vmem:[%s10663_s15 + $0x750] sm:$0xff] }
  0x4e   : > { %762 = vst [vmem:[%s10668_s16 + $0x3c0] sm:$0xff] %v761_v56  ;;  %764 = vst [vmem:[%s10668_s16 + $0x3c8] sm:$0xff] %v763_v57  ;;  %v767_v59 = vld [vmem:[%s10663_s15 + $0x758] sm:$0xff]  ;;  %v769_v60 = vld [vmem:[%s10663_s15 + $0x760] sm:$0xff] }
  0x4f   : > { %766 = vst [vmem:[%s10668_s16 + $0x3d0] sm:$0xff] %v765_v58  ;;  %v771_v61 = vld [vmem:[%s10663_s15 + $0x768] sm:$0xff]  ;;  %768 = vst [vmem:[%s10668_s16 + $0x3d8] sm:$0xff] %v767_v59  ;;  %v773_v62 = vld [vmem:[%s10663_s15 + $0x770] sm:$0xff] }
  0x50   : > { %770 = vst [vmem:[%s10668_s16 + $0x3e0] sm:$0xff] %v769_v60  ;;  %772 = vst [vmem:[%s10668_s16 + $0x3e8] sm:$0xff] %v771_v61  ;;  %v775_v63 = vld [vmem:[%s10663_s15 + $0x778] sm:$0xff] }
  0x51   : > { %774 = vst [vmem:[%s10668_s16 + $0x3f0] sm:$0xff] %v773_v62  ;;  %776 = vst [vmem:[%s10668_s16 + $0x3f8] sm:$0xff] %v775_v63 }
  0x52 PF: > { %782 = sbr.rel (!%p10651_p3) target bundleno = 102 (0x66), region = 78  ;;  %s784_s17 = sand.u32 (%p10651_p3), 1, %s10577_s25  }
  0x53   : > { %s8613_s18 = sshll.u32 (%p10651_p3), %s10581_s26, 7  ;;  %s8189_s19 = sshll.u32 (%p10651_p3), %s784_s17, 8 }
  0x54   : > { %s10930_s22 = scalar_lea.vmem (%p10651_p3), %s12840_s1, %s8613_s18  ;;  %s10935_s23 = scalar_lea.vmem (%p10651_p3), [#allocation5], %s8189_s19 }
  0x55   : > { %v879_v0 = vld [vmem:[%s10930_s22] sm:$0xff] (%p10651_p3)  ;;  %v881_v1 = vld [vmem:[%s10930_s22 + $0x8] sm:$0xff] (%p10651_p3)  ;;  %v883_v2 = vld [vmem:[%s10930_s22 + $0x10] sm:$0xff] (%p10651_p3) }
  0x56   : > { %880 = vst [vmem:[%s10935_s23] sm:$0xff] (%p10651_p3), %v879_v0  ;;  %882 = vst [vmem:[%s10935_s23 + $0x8] sm:$0xff] (%p10651_p3), %v881_v1  ;;  %v885_v3 = vld [vmem:[%s10930_s22 + $0x18] sm:$0xff] (%p10651_p3)  ;;  %v887_v4 = vld [vmem:[%s10930_s22 + $0x20] sm:$0xff] (%p10651_p3) }
  0x57   : > { %884 = vst [vmem:[%s10935_s23 + $0x10] sm:$0xff] (%p10651_p3), %v883_v2  ;;  %v889_v5 = vld [vmem:[%s10930_s22 + $0x28] sm:$0xff] (%p10651_p3)  ;;  %886 = vst [vmem:[%s10935_s23 + $0x18] sm:$0xff] (%p10651_p3), %v885_v3  ;;  %v891_v6 = vld [vmem:[%s10930_s22 + $0x30] sm:$0xff] (%p10651_p3) }
  0x58   : > { %888 = vst [vmem:[%s10935_s23 + $0x20] sm:$0xff] (%p10651_p3), %v887_v4  ;;  %890 = vst [vmem:[%s10935_s23 + $0x28] sm:$0xff] (%p10651_p3), %v889_v5  ;;  %v893_v7 = vld [vmem:[%s10930_s22 + $0x38] sm:$0xff] (%p10651_p3)  ;;  %v895_v8 = vld [vmem:[%s10930_s22 + $0x40] sm:$0xff] (%p10651_p3) }
  0x59   : > { %892 = vst [vmem:[%s10935_s23 + $0x30] sm:$0xff] %v891_v6  ;;  %894 = vst [vmem:[%s10935_s23 + $0x38] sm:$0xff] %v893_v7  ;;  %v897_v9 = vld [vmem:[%s10930_s22 + $0x48] sm:$0xff]  ;;  %v899_v10 = vld [vmem:[%s10930_s22 + $0x50] sm:$0xff] }
  0x5a   : > { %896 = vst [vmem:[%s10935_s23 + $0x40] sm:$0xff] %v895_v8  ;;  %v901_v11 = vld [vmem:[%s10930_s22 + $0x58] sm:$0xff]  ;;  %898 = vst [vmem:[%s10935_s23 + $0x48] sm:$0xff] %v897_v9  ;;  %v903_v12 = vld [vmem:[%s10930_s22 + $0x60] sm:$0xff] }
  0x5b   : > { %900 = vst [vmem:[%s10935_s23 + $0x50] sm:$0xff] %v899_v10  ;;  %902 = vst [vmem:[%s10935_s23 + $0x58] sm:$0xff] %v901_v11  ;;  %v905_v13 = vld [vmem:[%s10930_s22 + $0x68] sm:$0xff]  ;;  %v907_v14 = vld [vmem:[%s10930_s22 + $0x70] sm:$0xff] }
  0x5c   : > { %904 = vst [vmem:[%s10935_s23 + $0x60] sm:$0xff] %v903_v12  ;;  %906 = vst [vmem:[%s10935_s23 + $0x68] sm:$0xff] %v905_v13  ;;  %v909_v15 = vld [vmem:[%s10930_s22 + $0x78] sm:$0xff]  ;;  %v911_v16 = vld [vmem:[%s10930_s22 + $0x100] sm:$0xff] }
  0x5d   : > { %908 = vst [vmem:[%s10935_s23 + $0x70] sm:$0xff] %v907_v14  ;;  %v913_v17 = vld [vmem:[%s10930_s22 + $0x108] sm:$0xff]  ;;  %910 = vst [vmem:[%s10935_s23 + $0x78] sm:$0xff] %v909_v15  ;;  %v915_v18 = vld [vmem:[%s10930_s22 + $0x110] sm:$0xff] }
  0x5e   : > { %912 = vst [vmem:[%s10935_s23 + $0x80] sm:$0xff] %v911_v16  ;;  %914 = vst [vmem:[%s10935_s23 + $0x88] sm:$0xff] %v913_v17  ;;  %v917_v19 = vld [vmem:[%s10930_s22 + $0x118] sm:$0xff]  ;;  %v919_v20 = vld [vmem:[%s10930_s22 + $0x120] sm:$0xff] }
  0x5f   : > { %916 = vst [vmem:[%s10935_s23 + $0x90] sm:$0xff] %v915_v18  ;;  %918 = vst [vmem:[%s10935_s23 + $0x98] sm:$0xff] %v917_v19  ;;  %v921_v21 = vld [vmem:[%s10930_s22 + $0x128] sm:$0xff]  ;;  %v923_v22 = vld [vmem:[%s10930_s22 + $0x130] sm:$0xff] }
  0x60   : > { %920 = vst [vmem:[%s10935_s23 + $0xa0] sm:$0xff] %v919_v20  ;;  %v925_v23 = vld [vmem:[%s10930_s22 + $0x138] sm:$0xff]  ;;  %922 = vst [vmem:[%s10935_s23 + $0xa8] sm:$0xff] %v921_v21  ;;  %v927_v24 = vld [vmem:[%s10930_s22 + $0x140] sm:$0xff] }
  0x61   : > { %924 = vst [vmem:[%s10935_s23 + $0xb0] sm:$0xff] %v923_v22  ;;  %926 = vst [vmem:[%s10935_s23 + $0xb8] sm:$0xff] %v925_v23  ;;  %v929_v25 = vld [vmem:[%s10930_s22 + $0x148] sm:$0xff]  ;;  %v931_v26 = vld [vmem:[%s10930_s22 + $0x150] sm:$0xff] }
  0x62   : > { %928 = vst [vmem:[%s10935_s23 + $0xc0] sm:$0xff] %v927_v24  ;;  %930 = vst [vmem:[%s10935_s23 + $0xc8] sm:$0xff] %v929_v25  ;;  %v933_v27 = vld [vmem:[%s10930_s22 + $0x158] sm:$0xff]  ;;  %v935_v28 = vld [vmem:[%s10930_s22 + $0x160] sm:$0xff] }
  0x63   : > { %932 = vst [vmem:[%s10935_s23 + $0xd0] sm:$0xff] %v931_v26  ;;  %v937_v29 = vld [vmem:[%s10930_s22 + $0x168] sm:$0xff]  ;;  %934 = vst [vmem:[%s10935_s23 + $0xd8] sm:$0xff] %v933_v27  ;;  %v939_v30 = vld [vmem:[%s10930_s22 + $0x170] sm:$0xff] }
  0x64   : > { %936 = vst [vmem:[%s10935_s23 + $0xe0] sm:$0xff] %v935_v28  ;;  %938 = vst [vmem:[%s10935_s23 + $0xe8] sm:$0xff] %v937_v29  ;;  %v941_v31 = vld [vmem:[%s10930_s22 + $0x178] sm:$0xff] }
  0x65   : > { %940 = vst [vmem:[%s10935_s23 + $0xf0] sm:$0xff] %v939_v30  ;;  %942 = vst [vmem:[%s10935_s23 + $0xf8] sm:$0xff] %v941_v31 }
  0x66 PF: > { %p8192_p5 = scmp.ge.s32.totalorder %s10581_s26, 1  ;;  %p947_p6 = scmp.lt.s32.totalorder %s10581_s26, 3 }
  0x68   : > { %p948_p7 = pnand %p8192_p5, %p947_p6 }
  0x69   : > { %v1003_v32 = vld [vmem:[%s12841_s2] sm:$0x3] (!%p948_p7)  ;;  %vm1396_vm0 = vcmask (!%p948_p7), 1041408   ;;  %s954_s9 = sand.u32 (!%p948_p7), 1, %s10573_s24   ;;  %v11013_v35 = vld [vmem:[%s12843_s4 + $0x8] sm:$0xff] (!%p948_p7)   ;;  %vm1203_vm1 = vcmask (!%p948_p7), 31744  }
  0x6a   : > { %951 = sbr.rel (%p948_p7) target bundleno = 3841 (0xf01), region = 116  ;;  %v11007_v33 = vld [vmem:[%s12843_s4] sm:$0xff] (!%p948_p7)   ;;  %9487 = vmatprep.subr.msk.bf16.mxu0 (!%p948_p7), %vm1396_vm0, %v1003_v32  ;;  %v1398_v34 = vsel (!%p948_p7), %vm1396_vm0, %v1003_v32, 0  ;;  %s8193_s12 = sshll.u32 (!%p948_p7), %s954_s9, 10  ;;  %vm1945_vm2 = vcmask (!%p948_p7), 261120   ;;  %vm4965_vm3 = vcmask (!%p948_p7), 130112  }
  0x6b   : > { %8906 = vmatpush3.bf16.msra.mxu0 (!%p948_p7), %v1398_v34  ;;  %9035 = vmatprep.subr.bf16.mxu1 (!%p948_p7), %v11007_v33  ;;  %s11015_s15 = scalar_lea.vmem (!%p948_p7), [#allocation4], %s8193_s12  ;;  %s8194_s24 = sshll.u32 (!%p948_p7), %s954_s9, 8  ;;  %vm4972_vm4 = vcmask (!%p948_p7), 195712   ;;  %vm4979_vm5 = vcmask (!%p948_p7), 261312   ;;  %vm4986_vm6 = vcmask (!%p948_p7), 326912   ;;  %vm4993_vm7 = vcmask (!%p948_p7), 392512  }
  0x6c   : > { %v1004_v36 = vld [vmem:[%s11015_s15] sm:$0xff] (!%p948_p7)  ;;  %v1005_v37 = vld [vmem:[%s11015_s15 + $0x8] sm:$0xff] (!%p948_p7)  ;;  %v1006_v38 = vld [vmem:[%s11015_s15 + $0x10] sm:$0xff] (!%p948_p7)  ;;  %9036 = vmatpush3.bf16.msra.mxu1 (!%p948_p7), %v11007_v33  ;;  %s11025_s16 = scalar_lea.vmem (!%p948_p7), [#allocation5], %s8194_s24  ;;  %vm5000_vm8 = vcmask (!%p948_p7), 458112   ;;  %vm5007_vm9 = vcmask (!%p948_p7), 523712  }
  0x6d   : > { %v1132_v39 = vpack.c.bf16 (!%p948_p7), %v1005_v37, %v1004_v36  ;;  %v1007_v40 = vld [vmem:[%s11015_s15 + $0x18] sm:$0xff] (!%p948_p7)  ;;  %9037 = vmatprep.subr.bf16.mxu1 (!%p948_p7), %v11013_v35  ;;  %v1008_v41 = vld [vmem:[%s11015_s15 + $0x20] sm:$0xff] (!%p948_p7)  ;;  %v1009_v42 = vld [vmem:[%s11015_s15 + $0x28] sm:$0xff] (!%p948_p7)  ;;  %vm5014_vm10 = vcmask (!%p948_p7), 589312   ;;  %p12128_p8 = scmp.lt.s32.totalorder (!%p948_p7), %s8182_s27, 1  ;;  %vm5021_vm11 = vcmask (!%p948_p7), 654912  }
  0x6e   : > { %v1133_v43 = vpack.c.bf16 (!%p948_p7), %v1007_v40, %v1006_v38  ;;  %v2078_v44 = vld [vmem:[%s11025_s16] sm:$0xff] (!%p948_p7)  ;;  %v2079_v45 = vld [vmem:[%s11025_s16 + $0x8] sm:$0xff] (!%p948_p7)  ;;  %v1134_v46 = vpack.c.bf16 (!%p948_p7), %v1009_v42, %v1008_v41  ;;  %v2080_v47 = vld [vmem:[%s11025_s16 + $0x10] sm:$0xff] (!%p948_p7)  ;;  %vm5028_vm12 = vcmask (!%p948_p7), 720512   ;;  %vm5035_vm13 = vcmask (!%p948_p7), 786112  }
  0x6f   : > { %8907 = vmatprep.mubr.msk.bf16.mxu0 (!%p948_p7), %vm1203_vm1, %v1132_v39  ;;  %v2110_v48 = vpack.c.bf16 (!%p948_p7), %v2079_v45, %v2078_v44  ;;  %v2081_v49 = vld [vmem:[%s11025_s16 + $0x18] sm:$0xff] (!%p948_p7)  ;;  %v2082_v51 = vld [vmem:[%s11025_s16 + $0x20] sm:$0xff] (!%p948_p7)  ;;  %v2083_v52 = vld [vmem:[%s11025_s16 + $0x28] sm:$0xff] (!%p948_p7)  ;;  %vm5042_vm14 = vcmask (!%p948_p7), 851712   ;;  %vm5049_vm15 = vcmask (!%p948_p7), 917312   ;;  %vm5056_vm0 = vcmask (!%p948_p7), 982912  }
  0x70   : > { %8908 = vmatmul.mubr.msk.bf16.vlgmr.msra.gmra.mrb[0].mxu0 (!%p948_p7), %vm1203_vm1, %v1133_v43  ;;  %9038 = vmatpush3.bf16.msra.mxu1 (!%p948_p7), %v11013_v35  ;;  %v2111_v50 = vpack.c.bf16 (!%p948_p7), %v2081_v49, %v2080_v47  ;;  %v1010_v53 = vld [vmem:[%s11015_s15 + $0x30] sm:$0xff] (!%p948_p7)  ;;  %v1011_v54 = vld [vmem:[%s11015_s15 + $0x38] sm:$0xff] (!%p948_p7)  ;;  %v2112_v55 = vpack.c.bf16 (!%p948_p7), %v2083_v52, %v2082_v51  ;;  %v1012_v56 = vld [vmem:[%s11015_s15 + $0x40] sm:$0xff] (!%p948_p7) }
  0x71   : > { %9039 = vmatprep.mubr.msk.bf16.mxu1 %vm1945_vm2, %v2110_v48  ;;  %8911 = vmatprep.mubr.msk.bf16.mxu0 %vm1203_vm1, %v1134_v46  ;;  %v1013_v57 = vld [vmem:[%s11015_s15 + $0x48] sm:$0xff]  ;;  %v1135_v58 = vpack.c.bf16 %v1011_v54, %v1010_v53  ;;  %v2084_v59 = vld [vmem:[%s11025_s16 + $0x30] sm:$0xff]  ;;  %v2085_v60 = vld [vmem:[%s11025_s16 + $0x38] sm:$0xff]  ;;  %s12853_s27 = smov (!%p12128_p8, %s8182_s27), 1 }
  0x72   : > { %9055 = vmatprep.subr.bf16.mxu1 %v11007_v33  ;;  %v1136_v61 = vpack.c.bf16 %v1013_v57, %v1012_v56  ;;  %v2086_v62 = vld [vmem:[%s11025_s16 + $0x40] sm:$0xff]  ;;  %v2087_v63 = vld [vmem:[%s11025_s16 + $0x48] sm:$0xff]  ;;  %v2113_v0 = vpack.c.bf16 %v2085_v60, %v2084_v59  ;;  %v1014_v2 = vld [vmem:[%s11015_s15 + $0x50] sm:$0xff]  ;;  %s8195_s26 = sshll.u32 %s12853_s27, 3 }
  0x73   : > { %9040 = vmatmul.mubr.msk.bf16.vlgmr.msra.gmra.mrb[0].mxu1 %vm1945_vm2, %v2111_v50  ;;  %v2114_v1 = vpack.c.bf16 %v2087_v63, %v2086_v62  ;;  %v1015_v3 = vld [vmem:[%s11015_s15 + $0x58] sm:$0xff]  ;;  %v1016_v4 = vld [vmem:[%s11015_s15 + $0x60] sm:$0xff]  ;;  %v1017_v5 = vld [vmem:[%s11015_s15 + $0x68] sm:$0xff]  ;;  %s12182_s12 = scalar_lea.vmem %s12846_s7, %s8195_s26 }
  0x74   : > { %9043 = vmatprep.mubr.msk.bf16.mxu1 %vm1945_vm2, %v2112_v55  ;;  %9056 = vmatpush3.bf16.msra.mxu1 %v11007_v33  ;;  %v1137_v6 = vpack.c.bf16 %v1015_v3, %v1014_v2  ;;  %v2088_v7 = vld [vmem:[%s11025_s16 + $0x50] sm:$0xff]  ;;  %v2089_v8 = vld [vmem:[%s11025_s16 + $0x58] sm:$0xff]  ;;  %v1138_v9 = vpack.c.bf16 %v1017_v5, %v1016_v4  ;;  %v2090_v10 = vld [vmem:[%s11025_s16 + $0x60] sm:$0xff] }
  0x75   : > { %9057 = vmatprep.subr.bf16.mxu1 %v11013_v35  ;;  %v2091_v11 = vld [vmem:[%s11025_s16 + $0x68] sm:$0xff]  ;;  %v2115_v12 = vpack.c.bf16 %v2089_v8, %v2088_v7  ;;  %v1018_v14 = vld [vmem:[%s11015_s15 + $0x70] sm:$0xff]  ;;  %v1019_v15 = vld [vmem:[%s11015_s15 + $0x78] sm:$0xff] }
  0x76   : > { %v2116_v13 = vpack.c.bf16 %v2091_v11, %v2090_v10  ;;  %v1020_v16 = vld [vmem:[%s11015_s15 + $0x80] sm:$0xff]  ;;  %v1021_v17 = vld [vmem:[%s11015_s15 + $0x88] sm:$0xff]  ;;  %v1139_v18 = vpack.c.bf16 %v1019_v15, %v1018_v14  ;;  %v2092_v19 = vld [vmem:[%s11025_s16 + $0x70] sm:$0xff] }
  0x77   : > { %v2093_v20 = vld [vmem:[%s11025_s16 + $0x78] sm:$0xff]  ;;  %v1140_v21 = vpack.c.bf16 %v1021_v17, %v1020_v16  ;;  %v1022_v23 = vld [vmem:[%s11015_s15 + $0x90] sm:$0xff]  ;;  %v1024_v25 = vld [vmem:[%s11015_s15 + $0xa0] sm:$0xff] }
  0x78   : > { %8912 = vmatmul.mubr.msk.bf16.gmra.mrb[4].mxu0 %vm1203_vm1, %v1135_v58  ;;  %9058 = vmatpush3.bf16.msra.mxu1 %v11013_v35  ;;  %v2117_v22 = vpack.c.bf16 %v2093_v20, %v2092_v19  ;;  %v1023_v24 = vld [vmem:[%s11015_s15 + $0x98] sm:$0xff]  ;;  %v1025_v26 = vld [vmem:[%s11015_s15 + $0xa8] sm:$0xff]  ;;  %v1026_v29 = vld [vmem:[%s11015_s15 + $0xb0] sm:$0xff] }
  0x79   : > { %8915 = vmatprep.mubr.msk.bf16.mxu0 %vm1203_vm1, %v1136_v61  ;;  %9075 = vmatprep.subr.bf16.mxu1 %v11007_v33  ;;  %v1141_v27 = vpack.c.bf16 %v1023_v24, %v1022_v23  ;;  %v1142_v28 = vpack.c.bf16 %v1025_v26, %v1024_v25  ;;  %v1027_v30 = vld [vmem:[%s11015_s15 + $0xb8] sm:$0xff]  ;;  %v1028_v31 = vld [vmem:[%s11015_s15 + $0xc0] sm:$0xff]  ;;  %v1029_v32 = vld [vmem:[%s11015_s15 + $0xc8] sm:$0xff] }
  0x7a   : > { %v1143_v34 = vpack.c.bf16 %v1027_v30, %v1026_v29  ;;  %v1144_v36 = vpack.c.bf16 %v1029_v32, %v1028_v31  ;;  %v1030_v37 = vld [vmem:[%s11015_s15 + $0xd0] sm:$0xff]  ;;  %v1031_v38 = vld [vmem:[%s11015_s15 + $0xd8] sm:$0xff]  ;;  %v1032_v39 = vld [vmem:[%s11015_s15 + $0xe0] sm:$0xff] }
  0x7b   : > { %9044 = vmatmul.mubr.msk.bf16.gmra.mrb[4].mxu1 %vm1945_vm2, %v2113_v0  ;;  %v1033_v40 = vld [vmem:[%s11015_s15 + $0xe8] sm:$0xff]  ;;  %v1145_v41 = vpack.c.bf16 %v1031_v38, %v1030_v37  ;;  %v1034_v43 = vld [vmem:[%s11015_s15 + $0xf0] sm:$0xff]  ;;  %v1035_v44 = vld [vmem:[%s11015_s15 + $0xf8] sm:$0xff] }
  0x7c   : > { %9047 = vmatprep.mubr.msk.bf16.mxu1 %vm1945_vm2, %v2114_v1  ;;  %v1146_v42 = vpack.c.bf16 %v1033_v40, %v1032_v39  ;;  %v1036_v45 = vld [vmem:[%s11015_s15 + $0x100] sm:$0xff]  ;;  %v1037_v46 = vld [vmem:[%s11015_s15 + $0x108] sm:$0xff]  ;;  %v1147_v47 = vpack.c.bf16 %v1035_v44, %v1034_v43  ;;  %v1038_v49 = vld [vmem:[%s11015_s15 + $0x110] sm:$0xff] }
  0x7d   : > { %v1148_v48 = vpack.c.bf16 %v1037_v46, %v1036_v45  ;;  %v1039_v50 = vld [vmem:[%s11015_s15 + $0x118] sm:$0xff]  ;;  %v1040_v51 = vld [vmem:[%s11015_s15 + $0x120] sm:$0xff]  ;;  %v1041_v52 = vld [vmem:[%s11015_s15 + $0x128] sm:$0xff] }
  0x7e   : > { %v1149_v53 = vpack.c.bf16 %v1039_v50, %v1038_v49  ;;  %v1150_v54 = vpack.c.bf16 %v1041_v52, %v1040_v51  ;;  %v1042_v55 = vld [vmem:[%s11015_s15 + $0x130] sm:$0xff]  ;;  %v1043_v56 = vld [vmem:[%s11015_s15 + $0x138] sm:$0xff]  ;;  %v1044_v57 = vld [vmem:[%s11015_s15 + $0x140] sm:$0xff] }
  0x7f   : > { %v1045_v58 = vld [vmem:[%s11015_s15 + $0x148] sm:$0xff]  ;;  %v1151_v59 = vpack.c.bf16 %v1043_v56, %v1042_v55  ;;  %v1046_v61 = vld [vmem:[%s11015_s15 + $0x150] sm:$0xff]  ;;  %v1047_v62 = vld [vmem:[%s11015_s15 + $0x158] sm:$0xff] }
  0x80   : > { %8916 = vmatmul.mubr.msk.bf16.gmra.mrb[8].mxu0 %vm1203_vm1, %v1137_v6  ;;  %v1152_v60 = vpack.c.bf16 %v1045_v58, %v1044_v57  ;;  %v1048_v63 = vld [vmem:[%s11015_s15 + $0x160] sm:$0xff]  ;;  %v1049_v0 = vld [vmem:[%s11015_s15 + $0x168] sm:$0xff]  ;;  %v1153_v1 = vpack.c.bf16 %v1047_v62, %v1046_v61  ;;  %v1050_v3 = vld [vmem:[%s11015_s15 + $0x170] sm:$0xff] }
  0x81   : > { %8919 = vmatprep.mubr.msk.bf16.mxu0 %vm1203_vm1, %v1138_v9  ;;  %v1154_v2 = vpack.c.bf16 %v1049_v0, %v1048_v63  ;;  %v1051_v4 = vld [vmem:[%s11015_s15 + $0x178] sm:$0xff]  ;;  %v1052_v5 = vld [vmem:[%s11015_s15 + $0x180] sm:$0xff]  ;;  %v1053_v6 = vld [vmem:[%s11015_s15 + $0x188] sm:$0xff] }
  0x82   : > { %v1155_v7 = vpack.c.bf16 %v1051_v4, %v1050_v3  ;;  %v1156_v8 = vpack.c.bf16 %v1053_v6, %v1052_v5  ;;  %v1054_v9 = vld [vmem:[%s11015_s15 + $0x190] sm:$0xff]  ;;  %v1055_v10 = vld [vmem:[%s11015_s15 + $0x198] sm:$0xff]  ;;  %v1056_v11 = vld [vmem:[%s11015_s15 + $0x1a0] sm:$0xff] }
  0x83   : > { %9048 = vmatmul.mubr.msk.bf16.gmra.mrb[8].mxu1 %vm1945_vm2, %v2115_v12  ;;  %v1057_v12 = vld [vmem:[%s11015_s15 + $0x1a8] sm:$0xff]  ;;  %v1058_v15 = vld [vmem:[%s11015_s15 + $0x1b0] sm:$0xff]  ;;  %v1059_v16 = vld [vmem:[%s11015_s15 + $0x1b8] sm:$0xff] }
  0x84   : > { %9051 = vmatprep.mubr.msk.bf16.mxu1 %vm1945_vm2, %v2116_v13  ;;  %v1157_v13 = vpack.c.bf16 %v1055_v10, %v1054_v9  ;;  %v1158_v14 = vpack.c.bf16 %v1057_v12, %v1056_v11  ;;  %v1060_v17 = vld [vmem:[%s11015_s15 + $0x1c0] sm:$0xff]  ;;  %v1159_v19 = vpack.c.bf16 %v1059_v16, %v1058_v15  ;;  %v1065_v24 = vld [vmem:[%s11015_s15 + $0x1e8] sm:$0xff]  ;;  %v1071_v37 = vld [vmem:[%s11015_s15 + $0x218] sm:$0xff] }
  0x85   : > { %v1064_v23 = vld [vmem:[%s11015_s15 + $0x1e0] sm:$0xff]  ;;  %v1069_v30 = vld [vmem:[%s11015_s15 + $0x208] sm:$0xff]  ;;  %v1074_v43 = vld [vmem:[%s11015_s15 + $0x230] sm:$0xff] }
  0x86   : > { %v1162_v26 = vpack.c.bf16 %v1065_v24, %v1064_v23  ;;  %v1068_v29 = vld [vmem:[%s11015_s15 + $0x200] sm:$0xff]  ;;  %v1073_v39 = vld [vmem:[%s11015_s15 + $0x228] sm:$0xff]  ;;  %v1075_v44 = vld [vmem:[%s11015_s15 + $0x238] sm:$0xff] }
  0x87   : > { %v1164_v32 = vpack.c.bf16 %v1069_v30, %v1068_v29  ;;  %v1072_v38 = vld [vmem:[%s11015_s15 + $0x220] sm:$0xff]  ;;  %v9515_v40 = vld [vmem:[%s12842_s3 + $0x8] sm:$0xff]   ;;  %v1078_v49 = vld [vmem:[%s11015_s15 + $0x250] sm:$0xff] }
  0x88   : > { %8920 = vmatmul.mubr.msk.bf16.gmra.mrb[12].mxu0 %vm1203_vm1, %v1139_v18  ;;  %v1061_v18 = vld [vmem:[%s11015_s15 + $0x1c8] sm:$0xff]  ;;  %v1076_v45 = vld [vmem:[%s11015_s15 + $0x240] sm:$0xff]  ;;  %v1079_v50 = vld [vmem:[%s11015_s15 + $0x258] sm:$0xff] }
  0x89   : > { %8923 = vmatprep.mubr.msk.bf16.mxu0 %vm1203_vm1, %v1140_v21  ;;  %v1160_v20 = vpack.c.bf16 %v1061_v18, %v1060_v17  ;;  %v1062_v21 = vld [vmem:[%s11015_s15 + $0x1d0] sm:$0xff]  ;;  %v1077_v46 = vld [vmem:[%s11015_s15 + $0x248] sm:$0xff]  ;;  %v1080_v51 = vld [vmem:[%s11015_s15 + $0x260] sm:$0xff] }
  0x8a   : > { %v1081_v52 = vld [vmem:[%s11015_s15 + $0x268] sm:$0xff]  ;;  %v1082_v55 = vld [vmem:[%s11015_s15 + $0x270] sm:$0xff]  ;;  %v1083_v56 = vld [vmem:[%s11015_s15 + $0x278] sm:$0xff] }
  0x8b   : > { %9052 = vmatmul.mubr.msk.bf16.gmra.mrb[12].mxu1 %vm1945_vm2, %v2117_v22  ;;  %v1063_v22 = vld [vmem:[%s11015_s15 + $0x1d8] sm:$0xff]  ;;  %v1084_v57 = vld [vmem:[%s11015_s15 + $0x280] sm:$0xff]  ;;  %v1085_v58 = vld [vmem:[%s11015_s15 + $0x288] sm:$0xff] }
  0x8c   : > { %v1161_v25 = vpack.c.bf16 %v1063_v22, %v1062_v21  ;;  %v1086_v61 = vld [vmem:[%s11015_s15 + $0x290] sm:$0xff]  ;;  %v1087_v62 = vld [vmem:[%s11015_s15 + $0x298] sm:$0xff]  ;;  %v1088_v63 = vld [vmem:[%s11015_s15 + $0x2a0] sm:$0xff] }
  0x8d   : > { %v1089_v0 = vld [vmem:[%s11015_s15 + $0x2a8] sm:$0xff]  ;;  %v1090_v3 = vld [vmem:[%s11015_s15 + $0x2b0] sm:$0xff]  ;;  %v1091_v4 = vld [vmem:[%s11015_s15 + $0x2b8] sm:$0xff] }
  0x8e   : > { %v1092_v5 = vld [vmem:[%s11015_s15 + $0x2c0] sm:$0xff]  ;;  %v1093_v6 = vld [vmem:[%s11015_s15 + $0x2c8] sm:$0xff]  ;;  %v1094_v9 = vld [vmem:[%s11015_s15 + $0x2d0] sm:$0xff] }
  0x8f   : > { %v1095_v10 = vld [vmem:[%s11015_s15 + $0x2d8] sm:$0xff]  ;;  %v1096_v11 = vld [vmem:[%s11015_s15 + $0x2e0] sm:$0xff]  ;;  %v1097_v12 = vld [vmem:[%s11015_s15 + $0x2e8] sm:$0xff] }
  0x90   : > { %8924 = vmatmul.mubr.msk.bf16.gmra.mrb[16].mxu0 %vm1203_vm1, %v1141_v27  ;;  %v1066_v27 = vld [vmem:[%s11015_s15 + $0x1f0] sm:$0xff]  ;;  %v1099_v16 = vld [vmem:[%s11015_s15 + $0x2f8] sm:$0xff]  ;;  %v1100_v17 = vld [vmem:[%s11015_s15 + $0x300] sm:$0xff] }
  0x91   : > { %8927 = vmatprep.mubr.msk.bf16.mxu0 %vm1203_vm1, %v1142_v28  ;;  %v1067_v28 = vld [vmem:[%s11015_s15 + $0x1f8] sm:$0xff]  ;;  %v1098_v15 = vld [vmem:[%s11015_s15 + $0x2f0] sm:$0xff]  ;;  %v1101_v18 = vld [vmem:[%s11015_s15 + $0x308] sm:$0xff] }
  0x92   : > { %v1163_v31 = vpack.c.bf16 %v1067_v28, %v1066_v27  ;;  %v1102_v21 = vld [vmem:[%s11015_s15 + $0x310] sm:$0xff]  ;;  %v1103_v22 = vld [vmem:[%s11015_s15 + $0x318] sm:$0xff]  ;;  %v1104_v23 = vld [vmem:[%s11015_s15 + $0x320] sm:$0xff] }
  0x93   : > { %v1105_v24 = vld [vmem:[%s11015_s15 + $0x328] sm:$0xff]  ;;  %v1106_v27 = vld [vmem:[%s11015_s15 + $0x330] sm:$0xff]  ;;  %v1107_v28 = vld [vmem:[%s11015_s15 + $0x338] sm:$0xff] }
  0x94   : > { %v1108_v29 = vld [vmem:[%s11015_s15 + $0x340] sm:$0xff]  ;;  %v1109_v30 = vld [vmem:[%s11015_s15 + $0x348] sm:$0xff] }
  0x98   : > { %8928 = vmatmul.mubr.msk.bf16.gmra.mrb[20].mxu0 %vm1203_vm1, %v1143_v34  ;;  %v9514_v34 = vld [vmem:[%s12842_s3] sm:$0xff]  }
  0x99   : > { %8931 = vmatprep.mubr.msk.bf16.mxu0 %vm1203_vm1, %v1144_v36  ;;  %9195 = vmatprep.subr.bf16.mxu0 %v9514_v34  ;;  %v1070_v36 = vld [vmem:[%s11015_s15 + $0x210] sm:$0xff] }
  0x9a   : > { %9196 = vmatpush3.bf16.msra.mxu0 %v9514_v34  ;;  %v1110_v34 = vld [vmem:[%s11015_s15 + $0x350] sm:$0xff] }
  0x9b   : > { %9197 = vmatprep.subr.bf16.mxu0 %v9515_v40 }
  0x9e   : > { %9198 = vmatpush3.bf16.msra.mxu0 %v9515_v40 }
  0xa0   : > { %8932 = vmatmul.mubr.msk.bf16.gmra.mrb[24].mxu0 %vm1203_vm1, %v1145_v41  ;;  %v1165_v41 = vpack.c.bf16 %v1071_v37, %v1070_v36  ;;  %v1111_v36 = vld [vmem:[%s11015_s15 + $0x358] sm:$0xff]  ;;  %v1112_v37 = vld [vmem:[%s11015_s15 + $0x360] sm:$0xff] }
  0xa1   : > { %8935 = vmatprep.mubr.msk.bf16.mxu0 %vm1203_vm1, %v1146_v42  ;;  %v1166_v42 = vpack.c.bf16 %v1073_v39, %v1072_v38  ;;  %v1113_v38 = vld [vmem:[%s11015_s15 + $0x368] sm:$0xff]  ;;  %v1185_v39 = vpack.c.bf16 %v1111_v36, %v1110_v34 }
  0xa2   : > { %v1186_v40 = vpack.c.bf16 %v1113_v38, %v1112_v37 }
  0xa8   : > { %8936 = vmatmul.mubr.msk.bf16.gmra.mrb[28].mxu0 %vm1203_vm1, %v1147_v47  ;;  %v1167_v47 = vpack.c.bf16 %v1075_v44, %v1074_v43  ;;  %v1115_v43 = vld [vmem:[%s11015_s15 + $0x378] sm:$0xff]  ;;  %v1116_v44 = vld [vmem:[%s11015_s15 + $0x380] sm:$0xff] }
  0xa9   : > { %8939 = vmatprep.mubr.msk.bf16.mxu0 %vm1203_vm1, %v1148_v48  ;;  %v1168_v48 = vpack.c.bf16 %v1077_v46, %v1076_v45  ;;  %v1117_v45 = vld [vmem:[%s11015_s15 + $0x388] sm:$0xff] }
  0xb0   : > { %8940 = vmatmul.mubr.msk.bf16.gmra.mrb[32].mxu0 %vm1203_vm1, %v1149_v53  ;;  %v1169_v53 = vpack.c.bf16 %v1079_v50, %v1078_v49 }
  0xb1   : > { %8943 = vmatprep.mubr.msk.bf16.mxu0 %vm1203_vm1, %v1150_v54  ;;  %v1170_v54 = vpack.c.bf16 %v1081_v52, %v1080_v51  ;;  %v1188_v52 = vpack.c.bf16 %v1117_v45, %v1116_v44 }
  0xb8   : > { %8944 = vmatmul.mubr.msk.bf16.gmra.mrb[36].mxu0 %vm1203_vm1, %v1151_v59  ;;  %v1171_v59 = vpack.c.bf16 %v1083_v56, %v1082_v55 }
  0xb9   : > { %8947 = vmatprep.mubr.msk.bf16.mxu0 %vm1203_vm1, %v1152_v60  ;;  %v1172_v60 = vpack.c.bf16 %v1085_v58, %v1084_v57 }
  0xc0   : > { %8948 = vmatmul.mubr.msk.bf16.gmra.mrb[40].mxu0 %vm1203_vm1, %v1153_v1  ;;  %v1173_v1 = vpack.c.bf16 %v1087_v62, %v1086_v61  ;;  %v1119_v61 = vld [vmem:[%s11015_s15 + $0x398] sm:$0xff]  ;;  %v1120_v62 = vld [vmem:[%s11015_s15 + $0x3a0] sm:$0xff] }
  0xc1   : > { %8951 = vmatprep.mubr.msk.bf16.mxu0 %vm1203_vm1, %v1154_v2  ;;  %v1174_v2 = vpack.c.bf16 %v1089_v0, %v1088_v63  ;;  %v1121_v63 = vld [vmem:[%s11015_s15 + $0x3a8] sm:$0xff] }
  0xc8   : > { %8952 = vmatmul.mubr.msk.bf16.gmra.mrb[44].mxu0 %vm1203_vm1, %v1155_v7  ;;  %v1175_v7 = vpack.c.bf16 %v1091_v4, %v1090_v3 }
  0xc9   : > { %8955 = vmatprep.mubr.msk.bf16.mxu0 %vm1203_vm1, %v1156_v8  ;;  %v1176_v8 = vpack.c.bf16 %v1093_v6, %v1092_v5 }
  0xd0   : > { %8956 = vmatmul.mubr.msk.bf16.gmra.mrb[48].mxu0 %vm1203_vm1, %v1157_v13  ;;  %v1177_v13 = vpack.c.bf16 %v1095_v10, %v1094_v9 }
  0xd1   : > { %8959 = vmatprep.mubr.msk.bf16.mxu0 %vm1203_vm1, %v1158_v14  ;;  %v1178_v14 = vpack.c.bf16 %v1097_v12, %v1096_v11 }
  0xd8   : > { %8960 = vmatmul.mubr.msk.bf16.gmra.mrb[52].mxu0 %vm1203_vm1, %v1159_v19  ;;  %v1179_v19 = vpack.c.bf16 %v1099_v16, %v1098_v15 }
  0xd9   : > { %8963 = vmatprep.mubr.msk.bf16.mxu0 %vm1203_vm1, %v1160_v20  ;;  %v1180_v20 = vpack.c.bf16 %v1101_v18, %v1100_v17 }
  0xe0   : > { %8964 = vmatmul.mubr.msk.bf16.gmra.mrb[56].mxu0 %vm1203_vm1, %v1161_v25  ;;  %v1181_v25 = vpack.c.bf16 %v1103_v22, %v1102_v21  ;;  %v1122_v22 = vld [vmem:[%s11015_s15 + $0x3b0] sm:$0xff] }
  0xe1   : > { %8967 = vmatprep.mubr.msk.bf16.mxu0 %vm1203_vm1, %v1162_v26  ;;  %v1182_v26 = vpack.c.bf16 %v1105_v24, %v1104_v23  ;;  %v1123_v23 = vld [vmem:[%s11015_s15 + $0x3b8] sm:$0xff]  ;;  %v1124_v24 = vld [vmem:[%s11015_s15 + $0x3c0] sm:$0xff] }
  0xe8   : > { %8968 = vmatmul.mubr.msk.bf16.gmra.mrb[60].mxu0 %vm1203_vm1, %v1163_v31  ;;  %v1183_v31 = vpack.c.bf16 %v1107_v28, %v1106_v27 }
  0xe9   : > { %8971 = vmatprep.mubr.msk.bf16.mxu0 %vm1203_vm1, %v1164_v32  ;;  %v1184_v32 = vpack.c.bf16 %v1109_v30, %v1108_v29  ;;  %v1191_v29 = vpack.c.bf16 %v1123_v23, %v1122_v22 }
  0xf0   : > { %8972 = vmatmul.mubr.msk.bf16.gmra.mrb[64].mxu0 %vm1203_vm1, %v1165_v41  ;;  %v11224_v41 = vld [vmem:[%s12844_s5] ss:$0 sm:$0xff] }
  0xf1   : > { %8975 = vmatprep.mubr.msk.bf16.mxu0 %vm1203_vm1, %v1166_v42  ;;  %v1114_v42 = vld [vmem:[%s11015_s15 + $0x370] sm:$0xff] }
  0xf2   : > { %v1187_v49 = vpack.c.bf16 %v1115_v43, %v1114_v42 }
  0xf8   : > { %8976 = vmatmul.mubr.msk.bf16.gmra.mrb[68].mxu0 %vm1203_vm1, %v1167_v47 }
  0xf9   : > { %8979 = vmatprep.mubr.msk.bf16.mxu0 %vm1203_vm1, %v1168_v48 }
 0x100   : > { %8980 = vmatmul.mubr.msk.bf16.gmra.mrb[72].mxu0 %vm1203_vm1, %v1169_v53 }
 0x101   : > { %8983 = vmatprep.mubr.msk.bf16.mxu0 %vm1203_vm1, %v1170_v54 }
 0x108   : > { %8984 = vmatmul.mubr.msk.bf16.gmra.mrb[76].mxu0 %vm1203_vm1, %v1171_v59 }
 0x109   : > { %8987 = vmatprep.mubr.msk.bf16.mxu0 %vm1203_vm1, %v1172_v60  ;;  %v1118_v60 = vld [vmem:[%s11015_s15 + $0x390] sm:$0xff] }
 0x10a   : > { %v1189_v3 = vpack.c.bf16 %v1119_v61, %v1118_v60 }
 0x110   : > { %8988 = vmatmul.mubr.msk.bf16.gmra.mrb[80].mxu0 %vm1203_vm1, %v1173_v1 }
 0x111   : > { %8991 = vmatprep.mubr.msk.bf16.mxu0 %vm1203_vm1, %v1174_v2 }
 0x118   : > { %8992 = vmatmul.mubr.msk.bf16.gmra.mrb[84].mxu0 %vm1203_vm1, %v1175_v7  ;;  %v1190_v7 = vpack.c.bf16 %v1121_v63, %v1120_v62 }
 0x119   : > { %8995 = vmatprep.mubr.msk.bf16.mxu0 %vm1203_vm1, %v1176_v8 }
 0x120   : > { %8996 = vmatmul.mubr.msk.bf16.gmra.mrb[88].mxu0 %vm1203_vm1, %v1177_v13 }
 0x121   : > { %8999 = vmatprep.mubr.msk.bf16.mxu0 %vm1203_vm1, %v1178_v14 }
 0x128   : > { %9000 = vmatmul.mubr.msk.bf16.gmra.mrb[92].mxu0 %vm1203_vm1, %v1179_v19 }
 0x129   : > { %9003 = vmatprep.mubr.msk.bf16.mxu0 %vm1203_vm1, %v1180_v20 }
 0x130   : > { %9004 = vmatmul.mubr.msk.bf16.gmra.mrb[96].mxu0 %vm1203_vm1, %v1181_v25  ;;  %v1125_v25 = vld [vmem:[%s11015_s15 + $0x3c8] sm:$0xff] }
 0x131   : > { %9007 = vmatprep.mubr.msk.bf16.mxu0 %vm1203_vm1, %v1182_v26  ;;  %v1192_v34 = vpack.c.bf16 %v1125_v25, %v1124_v24 }
 0x138   : > { %9008 = vmatmul.mubr.msk.bf16.gmra.mrb[100].mxu0 %vm1203_vm1, %v1183_v31 }
 0x139   : > { %9011 = vmatprep.mubr.msk.bf16.mxu0 %vm1203_vm1, %v1184_v32 }
 0x140   : > { %9012 = vmatmul.mubr.msk.bf16.gmra.mrb[104].mxu0 %vm1203_vm1, %v1185_v39 }
 0x141   : > { %9015 = vmatprep.mubr.msk.bf16.mxu0 %vm1203_vm1, %v1186_v40 }
 0x143   : > { %v8909_v46 = vpop.f32.mrb[0].mxu0 }
 0x144   : > { %v1443_v47 = vadd.f32 %v8909_v46, %v11224_v41  ;;  %v1434_v48 = vpop.f32.mrb[1].mxu0 }
 0x145   : > { %v1435_v50 = vadd.f32 %v11224_v41, %v1434_v48  ;;  %v8910_v51 = vpop.f32.mrb[2].mxu0 }
 0x146   : > { %1948 = vst.msk [vmem:[#allocation3 + $0x10] sm:$0xff] %vm1945_vm2, %v1443_v47  ;;  %v1446_v53 = vadd.f32 %v8910_v51, %v11224_v41  ;;  %v1437_v54 = vpop.f32.mrb[3].mxu0  ;;  %v9041_v55 = vpop.f32.mrb[0].mxu1  ;;  %v1126_v51 = vld [vmem:[%s11015_s15 + $0x3d0] sm:$0xff] }
 0x147   : > { %1946 = vst.msk [vmem:[#allocation3] sm:$0xff] %vm1945_vm2, %v1435_v50  ;;  %v1438_v56 = vadd.f32 %v11224_v41, %v1437_v54  ;;  %v2188_v57 = vpop.f32.mrb[1].mxu1  ;;  %v1128_v54 = vld [vmem:[%s11015_s15 + $0x3e0] sm:$0xff] }
 0x148   : > { %1949 = vst.msk [vmem:[#allocation3 + $0x18] sm:$0xff] %vm1945_vm2, %v1446_v53  ;;  %9016 = vmatmul.mubr.msk.bf16.gmra.mrb[108].mxu0 %vm1203_vm1, %v1187_v49  ;;  %v9042_v58 = vpop.f32.mrb[2].mxu1 }
 0x149   : > { %1947 = vst.msk [vmem:[#allocation3 + $0x8] sm:$0xff] %vm1945_vm2, %v1438_v56  ;;  %v2191_v59 = vpop.f32.mrb[3].mxu1  ;;  %9019 = vmatprep.mubr.msk.bf16.mxu0 %vm1203_vm1, %v1188_v52  ;;  %v1127_v52 = vld [vmem:[%s11015_s15 + $0x3d8] sm:$0xff] }
 0x14a   : > { %v1193_v61 = vpack.c.bf16 %v1127_v52, %v1126_v51 }
 0x14b   : > { %v8913_v0 = vpop.f32.mrb[4].mxu0 }
 0x14c   : > { %v1459_v1 = vadd.f32 %v8913_v0, %v11224_v41  ;;  %v1450_v2 = vpop.f32.mrb[5].mxu0 }
 0x14d   : > { %v2096_v4 = vld [vmem:[#allocation3 + $0x10] sm:$0xff]  ;;  %v1451_v5 = vadd.f32 %v11224_v41, %v1450_v2  ;;  %v8914_v6 = vpop.f32.mrb[6].mxu0 }
 0x14e   : > { %v2253_v8 = vadd.f32 %v9041_v55, %v2096_v4  ;;  %1952 = vst.msk [vmem:[#allocation3 + $0x30] sm:$0xff] %vm1945_vm2, %v1459_v1  ;;  %v2094_v9 = vld [vmem:[#allocation3] sm:$0xff]  ;;  %v1462_v10 = vadd.f32 %v8914_v6, %v11224_v41  ;;  %v1453_v11 = vpop.f32.mrb[7].mxu0  ;;  %v9045_v12 = vpop.f32.mrb[4].mxu1  ;;  %v1129_v55 = vld [vmem:[%s11015_s15 + $0x3e8] sm:$0xff] }
 0x14f   : > { %v2251_v13 = vadd.f32 %v2188_v57, %v2094_v9  ;;  %1950 = vst.msk [vmem:[#allocation3 + $0x20] sm:$0xff] %vm1945_vm2, %v1451_v5  ;;  %v2097_v14 = vld [vmem:[#allocation3 + $0x18] sm:$0xff]  ;;  %v1454_v15 = vadd.f32 %v11224_v41, %v1453_v11  ;;  %v2204_v16 = vpop.f32.mrb[5].mxu1 }
 0x150   : > { %9518 = vtanh.f32 %v2253_v8  ;;  %v2254_v17 = vadd.f32 %v9042_v58, %v2097_v14  ;;  %1953 = vst.msk [vmem:[#allocation3 + $0x38] sm:$0xff] %vm1945_vm2, %v1462_v10  ;;  %v2095_v18 = vld [vmem:[#allocation3 + $0x8] sm:$0xff]  ;;  %9020 = vmatmul.mubr.msk.bf16.gmra.mrb[112].mxu0 %vm1203_vm1, %v1189_v3  ;;  %v9046_v19 = vpop.f32.mrb[6].mxu1  ;;  %v1194_v3 = vpack.c.bf16 %v1129_v55, %v1128_v54 }
 0x151   : > { %9520 = vtanh.f32 %v2251_v13  ;;  %v2252_v20 = vadd.f32 %v2191_v59, %v2095_v18  ;;  %1951 = vst.msk [vmem:[#allocation3 + $0x28] sm:$0xff] %vm1945_vm2, %v1454_v15  ;;  %v2207_v21 = vpop.f32.mrb[7].mxu1  ;;  %9023 = vmatprep.mubr.msk.bf16.mxu0 %vm1203_vm1, %v1190_v7 }
 0x152   : > { %9522 = vtanh.f32 %v2254_v17 }
 0x153   : > { %9524 = vtanh.f32 %v2252_v20  ;;  %v8917_v26 = vpop.f32.mrb[8].mxu0  ;;  %v1131_v20 = vld [vmem:[%s11015_s15 + $0x3f8] sm:$0xff] }
 0x154   : > { %v1475_v27 = vadd.f32 %v8917_v26, %v11224_v41  ;;  %v1466_v28 = vpop.f32.mrb[9].mxu0 }
 0x155   : > { %v2100_v30 = vld [vmem:[#allocation3 + $0x30] sm:$0xff]  ;;  %v1467_v31 = vadd.f32 %v11224_v41, %v1466_v28  ;;  %v8918_v32 = vpop.f32.mrb[10].mxu0 }
 0x156   : > { %v2257_v36 = vadd.f32 %v9045_v12, %v2100_v30  ;;  %1956 = vst.msk [vmem:[#allocation3 + $0x50] sm:$0xff] %vm1945_vm2, %v1475_v27  ;;  %v2098_v37 = vld [vmem:[#allocation3 + $0x20] sm:$0xff]  ;;  %v1478_v38 = vadd.f32 %v8918_v32, %v11224_v41  ;;  %v1469_v39 = vpop.f32.mrb[11].mxu0  ;;  %v9049_v40 = vpop.f32.mrb[8].mxu1 }
 0x157   : > { %v2255_v42 = vadd.f32 %v2204_v16, %v2098_v37  ;;  %1954 = vst.msk [vmem:[#allocation3 + $0x40] sm:$0xff] %vm1945_vm2, %v1467_v31  ;;  %v2101_v43 = vld [vmem:[#allocation3 + $0x38] sm:$0xff]  ;;  %v1470_v44 = vadd.f32 %v11224_v41, %v1469_v39  ;;  %v2220_v45 = vpop.f32.mrb[9].mxu1 }
 0x158   : > { %9526 = vtanh.f32 %v2257_v36  ;;  %v2258_v46 = vadd.f32 %v9046_v19, %v2101_v43  ;;  %1957 = vst.msk [vmem:[#allocation3 + $0x58] sm:$0xff] %vm1945_vm2, %v1478_v38  ;;  %v2099_v47 = vld [vmem:[#allocation3 + $0x28] sm:$0xff]  ;;  %9024 = vmatmul.mubr.msk.bf16.gmra.mrb[116].mxu0 %vm1203_vm1, %v1191_v29  ;;  %v9050_v48 = vpop.f32.mrb[10].mxu1  ;;  %v1130_v19 = vld [vmem:[%s11015_s15 + $0x3f0] sm:$0xff] }
 0x159   : > { %9528 = vtanh.f32 %v2255_v42  ;;  %v2256_v49 = vadd.f32 %v2207_v21, %v2099_v47  ;;  %1955 = vst.msk [vmem:[#allocation3 + $0x48] sm:$0xff] %vm1945_vm2, %v1470_v44  ;;  %v2223_v50 = vpop.f32.mrb[11].mxu1  ;;  %9027 = vmatprep.mubr.msk.bf16.mxu0 %vm1203_vm1, %v1192_v34  ;;  %v1195_v25 = vpack.c.bf16 %v1131_v20, %v1130_v19 }
 0x15a   : > { %v9519_v53 = vpop.eup %9518  ;;  %9530 = vtanh.f32 %v2258_v46 }
 0x15b   : > { %v9521_v56 = vpop.eup %9520  ;;  %9532 = vtanh.f32 %v2256_v49  ;;  %v8921_v57 = vpop.f32.mrb[12].mxu0 }
 0x15c   : > { %v9523_v58 = vpop.eup %9522  ;;  %v1491_v59 = vadd.f32 %v8921_v57, %v11224_v41  ;;  %v1482_v60 = vpop.f32.mrb[13].mxu0 }
 0x15d   : > { %v9525_v62 = vpop.eup %9524  ;;  %v2284_v63 = vpack.c.bf16 %v9523_v58, %v9519_v53  ;;  %v2104_v0 = vld [vmem:[#allocation3 + $0x50] sm:$0xff]  ;;  %v1483_v1 = vadd.f32 %v11224_v41, %v1482_v60  ;;  %v8922_v2 = vpop.f32.mrb[14].mxu0 }
 0x15e   : > { %v2261_v4 = vadd.f32 %v9049_v40, %v2104_v0  ;;  %1960 = vst.msk [vmem:[#allocation3 + $0x70] sm:$0xff] %vm1945_vm2, %v1491_v59  ;;  %v2102_v5 = vld [vmem:[#allocation3 + $0x40] sm:$0xff]  ;;  %v1494_v6 = vadd.f32 %v8922_v2, %v11224_v41  ;;  %v1485_v7 = vpop.f32.mrb[15].mxu0  ;;  %v2283_v8 = vpack.c.bf16 %v9525_v62, %v9521_v56  ;;  %v9053_v9 = vpop.f32.mrb[12].mxu1 }
 0x15f   : > { %2292 = vst.msk [vmem:[#allocation2 + $0x8] sm:$0xff] %vm1945_vm2, %v2284_v63  ;;  %v2259_v10 = vadd.f32 %v2220_v45, %v2102_v5  ;;  %1958 = vst.msk [vmem:[#allocation3 + $0x60] sm:$0xff] %vm1945_vm2, %v1483_v1  ;;  %v2105_v11 = vld [vmem:[#allocation3 + $0x58] sm:$0xff]  ;;  %v1486_v12 = vadd.f32 %v11224_v41, %v1485_v7  ;;  %v2236_v13 = vpop.f32.mrb[13].mxu1 }
 0x160   : > { %9534 = vtanh.f32 %v2261_v4  ;;  %v2262_v14 = vadd.f32 %v9050_v48, %v2105_v11  ;;  %1961 = vst.msk [vmem:[#allocation3 + $0x78] sm:$0xff] %vm1945_vm2, %v1494_v6  ;;  %v2103_v15 = vld [vmem:[#allocation3 + $0x48] sm:$0xff]  ;;  %9028 = vmatmul.mubr.msk.bf16.gmra.mrb[120].mxu0 %vm1203_vm1, %v1193_v61  ;;  %2291 = vst.msk [vmem:[#allocation2] sm:$0xff] %vm1945_vm2, %v2283_v8  ;;  %9059 = vmatprep.mubr.msk.bf16.mxu1 %vm1945_vm2, %v2283_v8  ;;  %v9054_v16 = vpop.f32.mrb[14].mxu1 }
 0x161   : > { %9536 = vtanh.f32 %v2259_v10  ;;  %v2260_v17 = vadd.f32 %v2223_v50, %v2103_v15  ;;  %1959 = vst.msk [vmem:[#allocation3 + $0x68] sm:$0xff] %vm1945_vm2, %v1486_v12  ;;  %9060 = vmatmul.mubr.msk.bf16.vlgmr.msra.gmra.mrb[16].mxu1 %vm1945_vm2, %v2284_v63  ;;  %v2239_v18 = vpop.f32.mrb[15].mxu1  ;;  %9031 = vmatprep.mubr.msk.bf16.mxu0 %vm1203_vm1, %v1194_v3 }
 0x162   : > { %v9527_v21 = vpop.eup %9526  ;;  %9538 = vtanh.f32 %v2262_v14  ;;  %9076 = vmatpush3.bf16.msra.mxu1 %v11007_v33 }
 0x163   : > { %v9529_v22 = vpop.eup %9528  ;;  %9540 = vtanh.f32 %v2260_v17  ;;  %v8925_v23 = vpop.f32.mrb[16].mxu0  ;;  %9077 = vmatprep.subr.bf16.mxu1 %v11013_v35 }
 0x164   : > { %v9531_v24 = vpop.eup %9530  ;;  %v1507_v26 = vadd.f32 %v8925_v23, %v11224_v41  ;;  %v1498_v27 = vpop.f32.mrb[17].mxu0 }
 0x165   : > { %v9533_v28 = vpop.eup %9532  ;;  %v2108_v29 = vld [vmem:[#allocation3 + $0x70] sm:$0xff]  ;;  %v2286_v30 = vpack.c.bf16 %v9531_v24, %v9527_v21  ;;  %v1499_v31 = vadd.f32 %v11224_v41, %v1498_v27  ;;  %v8926_v32 = vpop.f32.mrb[18].mxu0 }
 0x166   : > { %v2265_v34 = vadd.f32 %v9053_v9, %v2108_v29  ;;  %v2106_v36 = vld [vmem:[#allocation3 + $0x60] sm:$0xff]  ;;  %v2285_v37 = vpack.c.bf16 %v9533_v28, %v9529_v22  ;;  %1964 = vst.msk [vmem:[#allocation3 + $0x90] sm:$0xff] %vm1945_vm2, %v1507_v26  ;;  %v1510_v38 = vadd.f32 %v8926_v32, %v11224_v41  ;;  %v1501_v39 = vpop.f32.mrb[19].mxu0  ;;  %9078 = vmatpush3.bf16.msra.mxu1 %v11013_v35  ;;  %v3613_v59 = vld [vmem:[#allocation2 + $0x8] sm:$0xff] }
 0x167   : > { %v2263_v40 = vadd.f32 %v2236_v13, %v2106_v36  ;;  %v2109_v42 = vld [vmem:[#allocation3 + $0x78] sm:$0xff]  ;;  %2294 = vst.msk [vmem:[#allocation2 + $0x18] sm:$0xff] %vm1945_vm2, %v2286_v30  ;;  %v3612_v43 = vld [vmem:[#allocation2] sm:$0xff]  ;;  %1962 = vst.msk [vmem:[#allocation3 + $0x80] sm:$0xff] %vm1945_vm2, %v1499_v31  ;;  %v1502_v44 = vadd.f32 %v11224_v41, %v1501_v39  ;;  %9095 = vmatprep.subr.bf16.mxu1 %v11007_v33 }
 0x168   : > { %9542 = vtanh.f32 %v2265_v34  ;;  %v2266_v45 = vadd.f32 %v9054_v16, %v2109_v42  ;;  %v2107_v46 = vld [vmem:[#allocation3 + $0x68] sm:$0xff]  ;;  %9032 = vmatmul.mubr.msk.bf16.gmra.mrb[124].mxu0 %vm1203_vm1, %v1195_v25  ;;  %2293 = vst.msk [vmem:[#allocation2 + $0x10] sm:$0xff] %vm1945_vm2, %v2285_v37  ;;  %9063 = vmatprep.mubr.msk.bf16.mxu1 %vm1945_vm2, %v2285_v37  ;;  %1965 = vst.msk [vmem:[#allocation3 + $0x98] sm:$0xff] %vm1945_vm2, %v1510_v38  ;;  %vm5063_vm1 = vcmask 1048512  }
 0x169   : > { %9544 = vtanh.f32 %v2263_v40  ;;  %v2264_v35 = vadd.f32 %v2239_v18, %v2107_v46  ;;  %9064 = vmatmul.mubr.msk.bf16.gmra.mrb[20].mxu1 %vm1945_vm2, %v2286_v30  ;;  %9199 = vmatprep.mubr.msk.bf16.mxu0 %vm1945_vm2, %v3612_v43  ;;  %1963 = vst.msk [vmem:[#allocation3 + $0x88] sm:$0xff] %vm1945_vm2, %v1502_v44 }
 0x16a   : > { %v9535_v33 = vpop.eup %9534  ;;  %9546 = vtanh.f32 %v2266_v45 }
 0x16b   : > { %v9537_v47 = vpop.eup %9536  ;;  %9548 = vtanh.f32 %v2264_v35  ;;  %v8929_v48 = vpop.f32.mrb[20].mxu0 }
 0x16c   : > { %v9539_v49 = vpop.eup %9538  ;;  %v1523_v50 = vadd.f32 %v8929_v48, %v11224_v41  ;;  %v1514_v51 = vpop.f32.mrb[21].mxu0 }
 0x16d   : > { %v9541_v52 = vpop.eup %9540  ;;  %v2288_v53 = vpack.c.bf16 %v9539_v49, %v9535_v33  ;;  %v1515_v54 = vadd.f32 %v11224_v41, %v1514_v51  ;;  %v8930_v55 = vpop.f32.mrb[22].mxu0 }
 0x16e   : > { %v2287_v56 = vpack.c.bf16 %v9541_v52, %v9537_v47  ;;  %1968 = vst.msk [vmem:[#allocation3 + $0xb0] sm:$0xff] %vm1945_vm2, %v1523_v50  ;;  %v1526_v57 = vadd.f32 %v8930_v55, %v11224_v41  ;;  %v1517_v58 = vpop.f32.mrb[23].mxu0  ;;  %v3615_v11 = vld [vmem:[#allocation2 + $0x18] sm:$0xff] }
 0x16f   : > { %2296 = vst.msk [vmem:[#allocation2 + $0x28] sm:$0xff] %vm1945_vm2, %v2288_v53  ;;  %v3614_v60 = vld [vmem:[#allocation2 + $0x10] sm:$0xff]  ;;  %1966 = vst.msk [vmem:[#allocation3 + $0xa0] sm:$0xff] %vm1945_vm2, %v1515_v54  ;;  %v1518_v61 = vadd.f32 %v11224_v41, %v1517_v58 }
 0x170   : > { %2295 = vst.msk [vmem:[#allocation2 + $0x20] sm:$0xff] %vm1945_vm2, %v2287_v56  ;;  %9067 = vmatprep.mubr.msk.bf16.mxu1 %vm1945_vm2, %v2287_v56  ;;  %9200 = vmatmul.mubr.msk.bf16.vlgmr.msra.gmra.mrb[128].mxu0 %vm1945_vm2, %v3613_v59  ;;  %1969 = vst.msk [vmem:[#allocation3 + $0xb8] sm:$0xff] %vm1945_vm2, %v1526_v57 }
 0x171   : > { %9068 = vmatmul.mubr.msk.bf16.gmra.mrb[24].mxu1 %vm1945_vm2, %v2288_v53  ;;  %9203 = vmatprep.mubr.msk.bf16.mxu0 %vm1945_vm2, %v3614_v60  ;;  %1967 = vst.msk [vmem:[#allocation3 + $0xa8] sm:$0xff] %vm1945_vm2, %v1518_v61 }
 0x172   : > { %v9543_v62 = vpop.eup %9542 }
 0x173   : > { %v9545_v63 = vpop.eup %9544  ;;  %v8933_v0 = vpop.f32.mrb[24].mxu0 }
 0x174   : > { %v9547_v1 = vpop.eup %9546  ;;  %v1539_v2 = vadd.f32 %v8933_v0, %v11224_v41  ;;  %v1530_v3 = vpop.f32.mrb[25].mxu0 }
 0x175   : > { %v9549_v4 = vpop.eup %9548  ;;  %v2290_v5 = vpack.c.bf16 %v9547_v1, %v9543_v62  ;;  %v1531_v6 = vadd.f32 %v11224_v41, %v1530_v3  ;;  %v8934_v7 = vpop.f32.mrb[26].mxu0 }
 0x176   : > { %v2289_v8 = vpack.c.bf16 %v9549_v4, %v9545_v63  ;;  %1972 = vst.msk [vmem:[#allocation3 + $0xd0] sm:$0xff] %vm1945_vm2, %v1539_v2  ;;  %v1542_v9 = vadd.f32 %v8934_v7, %v11224_v41  ;;  %v1533_v10 = vpop.f32.mrb[27].mxu0  ;;  %v3617_v21 = vld [vmem:[#allocation2 + $0x28] sm:$0xff] }
 0x177   : > { %2298 = vst.msk [vmem:[#allocation2 + $0x38] sm:$0xff] %vm1945_vm2, %v2290_v5  ;;  %v3616_v12 = vld [vmem:[#allocation2 + $0x20] sm:$0xff]  ;;  %1970 = vst.msk [vmem:[#allocation3 + $0xc0] sm:$0xff] %vm1945_vm2, %v1531_v6  ;;  %v1534_v13 = vadd.f32 %v11224_v41, %v1533_v10 }
 0x178   : > { %2297 = vst.msk [vmem:[#allocation2 + $0x30] sm:$0xff] %vm1945_vm2, %v2289_v8  ;;  %9071 = vmatprep.mubr.msk.bf16.mxu1 %vm1945_vm2, %v2289_v8  ;;  %9204 = vmatmul.mubr.msk.bf16.gmra.mrb[132].mxu0 %vm1945_vm2, %v3615_v11  ;;  %1973 = vst.msk [vmem:[#allocation3 + $0xd8] sm:$0xff] %vm1945_vm2, %v1542_v9 }
 0x179   : > { %9072 = vmatmul.mubr.msk.bf16.gmra.mrb[28].mxu1 %vm1945_vm2, %v2290_v5  ;;  %9207 = vmatprep.mubr.msk.bf16.mxu0 %vm1945_vm2, %v3616_v12  ;;  %1971 = vst.msk [vmem:[#allocation3 + $0xc8] sm:$0xff] %vm1945_vm2, %v1534_v13 }
 0x17b   : > { %v8937_v14 = vpop.f32.mrb[28].mxu0 }
 0x17c   : > { %v1555_v15 = vadd.f32 %v8937_v14, %v11224_v41  ;;  %v1546_v16 = vpop.f32.mrb[29].mxu0 }
 0x17d   : > { %v1547_v17 = vadd.f32 %v11224_v41, %v1546_v16  ;;  %v8938_v18 = vpop.f32.mrb[30].mxu0 }
 0x17e   : > { %1976 = vst.msk [vmem:[#allocation3 + $0xf0] sm:$0xff] %vm1945_vm2, %v1555_v15  ;;  %v1558_v19 = vadd.f32 %v8938_v18, %v11224_v41  ;;  %v1549_v20 = vpop.f32.mrb[31].mxu0  ;;  %v3619_v31 = vld [vmem:[#allocation2 + $0x38] sm:$0xff] }
 0x17f   : > { %v3618_v22 = vld [vmem:[#allocation2 + $0x30] sm:$0xff]  ;;  %1974 = vst.msk [vmem:[#allocation3 + $0xe0] sm:$0xff] %vm1945_vm2, %v1547_v17  ;;  %v1550_v23 = vadd.f32 %v11224_v41, %v1549_v20 }
 0x180   : > { %9208 = vmatmul.mubr.msk.bf16.gmra.mrb[136].mxu0 %vm1945_vm2, %v3617_v21  ;;  %1977 = vst.msk [vmem:[#allocation3 + $0xf8] sm:$0xff] %vm1945_vm2, %v1558_v19 }
 0x181   : > { %9211 = vmatprep.mubr.msk.bf16.mxu0 %vm1945_vm2, %v3618_v22  ;;  %1975 = vst.msk [vmem:[#allocation3 + $0xe8] sm:$0xff] %vm1945_vm2, %v1550_v23 }
 0x183   : > { %v8941_v24 = vpop.f32.mrb[32].mxu0 }
 0x184   : > { %v1571_v25 = vadd.f32 %v8941_v24, %v11224_v41  ;;  %v1562_v26 = vpop.f32.mrb[33].mxu0 }
 0x185   : > { %v1563_v27 = vadd.f32 %v11224_v41, %v1562_v26  ;;  %v8942_v28 = vpop.f32.mrb[34].mxu0 }
 0x186   : > { %1980 = vst.msk [vmem:[#allocation3 + $0x110] sm:$0xff] %vm1945_vm2, %v1571_v25  ;;  %v1574_v29 = vadd.f32 %v8942_v28, %v11224_v41  ;;  %v1565_v30 = vpop.f32.mrb[35].mxu0 }
 0x187   : > { %1978 = vst.msk [vmem:[#allocation3 + $0x100] sm:$0xff] %vm1945_vm2, %v1563_v27  ;;  %v1566_v32 = vadd.f32 %v11224_v41, %v1565_v30 }
 0x188   : > { %9212 = vmatmul.mubr.msk.bf16.gmra.mrb[140].mxu0 %vm1945_vm2, %v3619_v31  ;;  %1981 = vst.msk [vmem:[#allocation3 + $0x118] sm:$0xff] %vm1945_vm2, %v1574_v29 }
 0x189   : > { %1979 = vst.msk [vmem:[#allocation3 + $0x108] sm:$0xff] %vm1945_vm2, %v1566_v32 }
 0x18b   : > { %v8945_v34 = vpop.f32.mrb[36].mxu0 }
 0x18c   : > { %v1587_v36 = vadd.f32 %v8945_v34, %v11224_v41  ;;  %v1578_v37 = vpop.f32.mrb[37].mxu0 }
 0x18d   : > { %v1579_v38 = vadd.f32 %v11224_v41, %v1578_v37  ;;  %v8946_v39 = vpop.f32.mrb[38].mxu0 }
 0x18e   : > { %1984 = vst.msk [vmem:[#allocation3 + $0x130] sm:$0xff] %vm1945_vm2, %v1587_v36  ;;  %v1590_v40 = vadd.f32 %v8946_v39, %v11224_v41  ;;  %v1581_v42 = vpop.f32.mrb[39].mxu0 }
 0x18f   : > { %1982 = vst.msk [vmem:[#allocation3 + $0x120] sm:$0xff] %vm1945_vm2, %v1579_v38  ;;  %v1582_v43 = vadd.f32 %v11224_v41, %v1581_v42 }
 0x190   : > { %1985 = vst.msk [vmem:[#allocation3 + $0x138] sm:$0xff] %vm1945_vm2, %v1590_v40 }
 0x191   : > { %1983 = vst.msk [vmem:[#allocation3 + $0x128] sm:$0xff] %vm1945_vm2, %v1582_v43 }
 0x193   : > { %v8949_v44 = vpop.f32.mrb[40].mxu0 }
 0x194   : > { %v1603_v45 = vadd.f32 %v8949_v44, %v11224_v41  ;;  %v1594_v46 = vpop.f32.mrb[41].mxu0 }
 0x195   : > { %v1595_v35 = vadd.f32 %v11224_v41, %v1594_v46  ;;  %v8950_v33 = vpop.f32.mrb[42].mxu0 }
 0x196   : > { %1988 = vst.msk [vmem:[#allocation3 + $0x150] sm:$0xff] %vm1945_vm2, %v1603_v45  ;;  %v1606_v47 = vadd.f32 %v8950_v33, %v11224_v41  ;;  %v1597_v48 = vpop.f32.mrb[43].mxu0 }
 0x197   : > { %1986 = vst.msk [vmem:[#allocation3 + $0x140] sm:$0xff] %vm1945_vm2, %v1595_v35  ;;  %v1598_v49 = vadd.f32 %v11224_v41, %v1597_v48 }
 0x198   : > { %1989 = vst.msk [vmem:[#allocation3 + $0x158] sm:$0xff] %vm1945_vm2, %v1606_v47 }
 0x199   : > { %1987 = vst.msk [vmem:[#allocation3 + $0x148] sm:$0xff] %vm1945_vm2, %v1598_v49 }
 0x19b   : > { %v8953_v50 = vpop.f32.mrb[44].mxu0 }
 0x19c   : > { %v1619_v51 = vadd.f32 %v8953_v50, %v11224_v41  ;;  %v1610_v52 = vpop.f32.mrb[45].mxu0 }
 0x19d   : > { %v1611_v53 = vadd.f32 %v11224_v41, %v1610_v52  ;;  %v8954_v54 = vpop.f32.mrb[46].mxu0 }
 0x19e   : > { %1992 = vst.msk [vmem:[#allocation3 + $0x170] sm:$0xff] %vm1945_vm2, %v1619_v51  ;;  %v1622_v55 = vadd.f32 %v8954_v54, %v11224_v41  ;;  %v1613_v56 = vpop.f32.mrb[47].mxu0 }
 0x19f   : > { %1990 = vst.msk [vmem:[#allocation3 + $0x160] sm:$0xff] %vm1945_vm2, %v1611_v53  ;;  %v1614_v57 = vadd.f32 %v11224_v41, %v1613_v56 }
 0x1a0   : > { %1993 = vst.msk [vmem:[#allocation3 + $0x178] sm:$0xff] %vm1945_vm2, %v1622_v55 }
 0x1a1   : > { %1991 = vst.msk [vmem:[#allocation3 + $0x168] sm:$0xff] %vm1945_vm2, %v1614_v57 }
 0x1a3   : > { %v8957_v58 = vpop.f32.mrb[48].mxu0 }
 0x1a4   : > { %v1635_v59 = vadd.f32 %v8957_v58, %v11224_v41  ;;  %v1626_v60 = vpop.f32.mrb[49].mxu0 }
 0x1a5   : > { %v1627_v61 = vadd.f32 %v11224_v41, %v1626_v60  ;;  %v8958_v62 = vpop.f32.mrb[50].mxu0 }
 0x1a6   : > { %1996 = vst.msk [vmem:[#allocation3 + $0x190] sm:$0xff] %vm1945_vm2, %v1635_v59  ;;  %v1638_v63 = vadd.f32 %v8958_v62, %v11224_v41  ;;  %v1629_v0 = vpop.f32.mrb[51].mxu0 }
 0x1a7   : > { %1994 = vst.msk [vmem:[#allocation3 + $0x180] sm:$0xff] %vm1945_vm2, %v1627_v61  ;;  %v1630_v1 = vadd.f32 %v11224_v41, %v1629_v0 }
 0x1a8   : > { %1997 = vst.msk [vmem:[#allocation3 + $0x198] sm:$0xff] %vm1945_vm2, %v1638_v63 }
 0x1a9   : > { %1995 = vst.msk [vmem:[#allocation3 + $0x188] sm:$0xff] %vm1945_vm2, %v1630_v1 }
 0x1ab   : > { %v8961_v2 = vpop.f32.mrb[52].mxu0 }
 0x1ac   : > { %v1651_v3 = vadd.f32 %v8961_v2, %v11224_v41  ;;  %v1642_v4 = vpop.f32.mrb[53].mxu0 }
 0x1ad   : > { %v1643_v5 = vadd.f32 %v11224_v41, %v1642_v4  ;;  %v8962_v6 = vpop.f32.mrb[54].mxu0 }
 0x1ae   : > { %2000 = vst.msk [vmem:[#allocation3 + $0x1b0] sm:$0xff] %vm1945_vm2, %v1651_v3  ;;  %v1654_v7 = vadd.f32 %v8962_v6, %v11224_v41  ;;  %v1645_v8 = vpop.f32.mrb[55].mxu0 }
 0x1af   : > { %1998 = vst.msk [vmem:[#allocation3 + $0x1a0] sm:$0xff] %vm1945_vm2, %v1643_v5  ;;  %v1646_v9 = vadd.f32 %v11224_v41, %v1645_v8 }
 0x1b0   : > { %2001 = vst.msk [vmem:[#allocation3 + $0x1b8] sm:$0xff] %vm1945_vm2, %v1654_v7 }
 0x1b1   : > { %1999 = vst.msk [vmem:[#allocation3 + $0x1a8] sm:$0xff] %vm1945_vm2, %v1646_v9 }
 0x1b3   : > { %v8965_v10 = vpop.f32.mrb[56].mxu0 }
 0x1b4   : > { %v1667_v11 = vadd.f32 %v8965_v10, %v11224_v41  ;;  %v1658_v12 = vpop.f32.mrb[57].mxu0 }
 0x1b5   : > { %v1659_v13 = vadd.f32 %v11224_v41, %v1658_v12  ;;  %v8966_v14 = vpop.f32.mrb[58].mxu0 }
 0x1b6   : > { %2004 = vst.msk [vmem:[#allocation3 + $0x1d0] sm:$0xff] %vm1945_vm2, %v1667_v11  ;;  %v1670_v15 = vadd.f32 %v8966_v14, %v11224_v41  ;;  %v1661_v16 = vpop.f32.mrb[59].mxu0 }
 0x1b7   : > { %2002 = vst.msk [vmem:[#allocation3 + $0x1c0] sm:$0xff] %vm1945_vm2, %v1659_v13  ;;  %v1662_v17 = vadd.f32 %v11224_v41, %v1661_v16 }
 0x1b8   : > { %2005 = vst.msk [vmem:[#allocation3 + $0x1d8] sm:$0xff] %vm1945_vm2, %v1670_v15 }
 0x1b9   : > { %2003 = vst.msk [vmem:[#allocation3 + $0x1c8] sm:$0xff] %vm1945_vm2, %v1662_v17 }
 0x1bb   : > { %v8969_v18 = vpop.f32.mrb[60].mxu0 }
 0x1bc   : > { %v1683_v19 = vadd.f32 %v8969_v18, %v11224_v41  ;;  %v1674_v20 = vpop.f32.mrb[61].mxu0 }
 0x1bd   : > { %v1675_v21 = vadd.f32 %v11224_v41, %v1674_v20  ;;  %v8970_v22 = vpop.f32.mrb[62].mxu0 }
 0x1be   : > { %2008 = vst.msk [vmem:[#allocation3 + $0x1f0] sm:$0xff] %vm1945_vm2, %v1683_v19  ;;  %v1686_v23 = vadd.f32 %v8970_v22, %v11224_v41  ;;  %v1677_v24 = vpop.f32.mrb[63].mxu0 }
 0x1bf   : > { %2006 = vst.msk [vmem:[#allocation3 + $0x1e0] sm:$0xff] %vm1945_vm2, %v1675_v21  ;;  %v1678_v25 = vadd.f32 %v11224_v41, %v1677_v24 }
 0x1c0   : > { %2009 = vst.msk [vmem:[#allocation3 + $0x1f8] sm:$0xff] %vm1945_vm2, %v1686_v23 }
 0x1c1   : > { %2007 = vst.msk [vmem:[#allocation3 + $0x1e8] sm:$0xff] %vm1945_vm2, %v1678_v25 }
 0x1c3   : > { %v8973_v26 = vpop.f32.mrb[64].mxu0 }
 0x1c4   : > { %v1699_v27 = vadd.f32 %v8973_v26, %v11224_v41  ;;  %v1690_v28 = vpop.f32.mrb[65].mxu0 }
 0x1c5   : > { %v1691_v29 = vadd.f32 %v11224_v41, %v1690_v28  ;;  %v8974_v30 = vpop.f32.mrb[66].mxu0 }
 0x1c6   : > { %2012 = vst.msk [vmem:[#allocation3 + $0x210] sm:$0xff] %vm1945_vm2, %v1699_v27  ;;  %v1702_v31 = vadd.f32 %v8974_v30, %v11224_v41  ;;  %v1693_v32 = vpop.f32.mrb[67].mxu0 }
 0x1c7   : > { %2010 = vst.msk [vmem:[#allocation3 + $0x200] sm:$0xff] %vm1945_vm2, %v1691_v29  ;;  %v1694_v34 = vadd.f32 %v11224_v41, %v1693_v32 }
 0x1c8   : > { %2013 = vst.msk [vmem:[#allocation3 + $0x218] sm:$0xff] %vm1945_vm2, %v1702_v31 }
 0x1c9   : > { %2011 = vst.msk [vmem:[#allocation3 + $0x208] sm:$0xff] %vm1945_vm2, %v1694_v34 }
 0x1cb   : > { %v8977_v36 = vpop.f32.mrb[68].mxu0 }
 0x1cc   : > { %v1715_v37 = vadd.f32 %v8977_v36, %v11224_v41  ;;  %v1706_v38 = vpop.f32.mrb[69].mxu0 }
 0x1cd   : > { %v1707_v39 = vadd.f32 %v11224_v41, %v1706_v38  ;;  %v8978_v40 = vpop.f32.mrb[70].mxu0 }
 0x1ce   : > { %2016 = vst.msk [vmem:[#allocation3 + $0x230] sm:$0xff] %vm1945_vm2, %v1715_v37  ;;  %v1718_v42 = vadd.f32 %v8978_v40, %v11224_v41  ;;  %v1709_v43 = vpop.f32.mrb[71].mxu0 }
 0x1cf   : > { %2014 = vst.msk [vmem:[#allocation3 + $0x220] sm:$0xff] %vm1945_vm2, %v1707_v39  ;;  %v1710_v44 = vadd.f32 %v11224_v41, %v1709_v43 }
 0x1d0   : > { %2017 = vst.msk [vmem:[#allocation3 + $0x238] sm:$0xff] %vm1945_vm2, %v1718_v42 }
 0x1d1   : > { %2015 = vst.msk [vmem:[#allocation3 + $0x228] sm:$0xff] %vm1945_vm2, %v1710_v44 }
 0x1d3   : > { %v8981_v45 = vpop.f32.mrb[72].mxu0 }
 0x1d4   : > { %v1731_v46 = vadd.f32 %v8981_v45, %v11224_v41  ;;  %v1722_v35 = vpop.f32.mrb[73].mxu0 }
 0x1d5   : > { %v1723_v33 = vadd.f32 %v11224_v41, %v1722_v35  ;;  %v8982_v47 = vpop.f32.mrb[74].mxu0 }
 0x1d6   : > { %2020 = vst.msk [vmem:[#allocation3 + $0x250] sm:$0xff] %vm1945_vm2, %v1731_v46  ;;  %v1734_v48 = vadd.f32 %v8982_v47, %v11224_v41  ;;  %v1725_v49 = vpop.f32.mrb[75].mxu0 }
 0x1d7   : > { %2018 = vst.msk [vmem:[#allocation3 + $0x240] sm:$0xff] %vm1945_vm2, %v1723_v33  ;;  %v1726_v50 = vadd.f32 %v11224_v41, %v1725_v49 }
 0x1d8   : > { %2021 = vst.msk [vmem:[#allocation3 + $0x258] sm:$0xff] %vm1945_vm2, %v1734_v48 }
 0x1d9   : > { %2019 = vst.msk [vmem:[#allocation3 + $0x248] sm:$0xff] %vm1945_vm2, %v1726_v50 }
 0x1db   : > { %v8985_v51 = vpop.f32.mrb[76].mxu0 }
 0x1dc   : > { %v1747_v52 = vadd.f32 %v8985_v51, %v11224_v41  ;;  %v1738_v53 = vpop.f32.mrb[77].mxu0 }
 0x1dd   : > { %v1739_v54 = vadd.f32 %v11224_v41, %v1738_v53  ;;  %v8986_v55 = vpop.f32.mrb[78].mxu0 }
 0x1de   : > { %2024 = vst.msk [vmem:[#allocation3 + $0x270] sm:$0xff] %vm1945_vm2, %v1747_v52  ;;  %v1750_v56 = vadd.f32 %v8986_v55, %v11224_v41  ;;  %v1741_v57 = vpop.f32.mrb[79].mxu0 }
 0x1df   : > { %2022 = vst.msk [vmem:[#allocation3 + $0x260] sm:$0xff] %vm1945_vm2, %v1739_v54  ;;  %v1742_v58 = vadd.f32 %v11224_v41, %v1741_v57 }
 0x1e0   : > { %2025 = vst.msk [vmem:[#allocation3 + $0x278] sm:$0xff] %vm1945_vm2, %v1750_v56 }
 0x1e1   : > { %2023 = vst.msk [vmem:[#allocation3 + $0x268] sm:$0xff] %vm1945_vm2, %v1742_v58 }
 0x1e3   : > { %v8989_v59 = vpop.f32.mrb[80].mxu0 }
 0x1e4   : > { %v1763_v60 = vadd.f32 %v8989_v59, %v11224_v41  ;;  %v1754_v61 = vpop.f32.mrb[81].mxu0 }
 0x1e5   : > { %v1755_v62 = vadd.f32 %v11224_v41, %v1754_v61  ;;  %v8990_v63 = vpop.f32.mrb[82].mxu0 }
 0x1e6   : > { %2028 = vst.msk [vmem:[#allocation3 + $0x290] sm:$0xff] %vm1945_vm2, %v1763_v60  ;;  %v1766_v0 = vadd.f32 %v8990_v63, %v11224_v41  ;;  %v1757_v1 = vpop.f32.mrb[83].mxu0 }
 0x1e7   : > { %2026 = vst.msk [vmem:[#allocation3 + $0x280] sm:$0xff] %vm1945_vm2, %v1755_v62  ;;  %v1758_v2 = vadd.f32 %v11224_v41, %v1757_v1 }
 0x1e8   : > { %2029 = vst.msk [vmem:[#allocation3 + $0x298] sm:$0xff] %vm1945_vm2, %v1766_v0 }
 0x1e9   : > { %2027 = vst.msk [vmem:[#allocation3 + $0x288] sm:$0xff] %vm1945_vm2, %v1758_v2 }
 0x1eb   : > { %v8993_v3 = vpop.f32.mrb[84].mxu0 }
 0x1ec   : > { %v1779_v4 = vadd.f32 %v8993_v3, %v11224_v41  ;;  %v1770_v5 = vpop.f32.mrb[85].mxu0 }
 0x1ed   : > { %v1771_v6 = vadd.f32 %v11224_v41, %v1770_v5  ;;  %v8994_v7 = vpop.f32.mrb[86].mxu0 }
 0x1ee   : > { %2032 = vst.msk [vmem:[#allocation3 + $0x2b0] sm:$0xff] %vm1945_vm2, %v1779_v4  ;;  %v1782_v8 = vadd.f32 %v8994_v7, %v11224_v41  ;;  %v1773_v9 = vpop.f32.mrb[87].mxu0  ;;  %v10542_v7 = vld [vmem:[%s12844_s5] ss:$0 sm:$0xff] }
 0x1ef   : > { %2030 = vst.msk [vmem:[#allocation3 + $0x2a0] sm:$0xff] %vm1945_vm2, %v1771_v6  ;;  %v1774_v10 = vadd.f32 %v11224_v41, %v1773_v9 }
 0x1f0   : > { %2033 = vst.msk [vmem:[#allocation3 + $0x2b8] sm:$0xff] %vm1945_vm2, %v1782_v8 }
 0x1f1   : > { %2031 = vst.msk [vmem:[#allocation3 + $0x2a8] sm:$0xff] %vm1945_vm2, %v1774_v10 }
 0x1f3   : > { %v8997_v11 = vpop.f32.mrb[88].mxu0 }
 0x1f4   : > { %v1795_v12 = vadd.f32 %v8997_v11, %v11224_v41  ;;  %v1786_v13 = vpop.f32.mrb[89].mxu0 }
 0x1f5   : > { %v1787_v14 = vadd.f32 %v11224_v41, %v1786_v13  ;;  %v8998_v15 = vpop.f32.mrb[90].mxu0  ;;  %v2302_v13 = vld [vmem:[#allocation3 + $0x90] sm:$0xff] }
 0x1f6   : > { %2036 = vst.msk [vmem:[#allocation3 + $0x2d0] sm:$0xff] %vm1945_vm2, %v1795_v12  ;;  %v1798_v16 = vadd.f32 %v8998_v15, %v11224_v41  ;;  %v1789_v17 = vpop.f32.mrb[91].mxu0 }
 0x1f7   : > { %2034 = vst.msk [vmem:[#allocation3 + $0x2c0] sm:$0xff] %vm1945_vm2, %v1787_v14  ;;  %v1790_v18 = vadd.f32 %v11224_v41, %v1789_v17 }
 0x1f8   : > { %2037 = vst.msk [vmem:[#allocation3 + $0x2d8] sm:$0xff] %vm1945_vm2, %v1798_v16 }
 0x1f9   : > { %2035 = vst.msk [vmem:[#allocation3 + $0x2c8] sm:$0xff] %vm1945_vm2, %v1790_v18 }
 0x1fb   : > { %v9001_v19 = vpop.f32.mrb[92].mxu0 }
 0x1fc   : > { %v1811_v20 = vadd.f32 %v9001_v19, %v11224_v41  ;;  %v1802_v21 = vpop.f32.mrb[93].mxu0 }
 0x1fd   : > { %v1803_v22 = vadd.f32 %v11224_v41, %v1802_v21  ;;  %v9002_v23 = vpop.f32.mrb[94].mxu0 }
 0x1fe   : > { %2040 = vst.msk [vmem:[#allocation3 + $0x2f0] sm:$0xff] %vm1945_vm2, %v1811_v20  ;;  %v1814_v24 = vadd.f32 %v9002_v23, %v11224_v41  ;;  %v1805_v25 = vpop.f32.mrb[95].mxu0  ;;  %v2303_v23 = vld [vmem:[#allocation3 + $0x98] sm:$0xff] }
 0x1ff   : > { %2038 = vst.msk [vmem:[#allocation3 + $0x2e0] sm:$0xff] %vm1945_vm2, %v1803_v22  ;;  %v1806_v26 = vadd.f32 %v11224_v41, %v1805_v25 }
 0x200   : > { %2041 = vst.msk [vmem:[#allocation3 + $0x2f8] sm:$0xff] %vm1945_vm2, %v1814_v24 }
 0x201   : > { %2039 = vst.msk [vmem:[#allocation3 + $0x2e8] sm:$0xff] %vm1945_vm2, %v1806_v26 }
 0x203   : > { %v9005_v27 = vpop.f32.mrb[96].mxu0 }
 0x204   : > { %v1827_v28 = vadd.f32 %v9005_v27, %v11224_v41  ;;  %v1818_v29 = vpop.f32.mrb[97].mxu0 }
 0x205   : > { %v1819_v30 = vadd.f32 %v11224_v41, %v1818_v29  ;;  %v9006_v31 = vpop.f32.mrb[98].mxu0 }
 0x206   : > { %2044 = vst.msk [vmem:[#allocation3 + $0x310] sm:$0xff] %vm1945_vm2, %v1827_v28  ;;  %v1830_v32 = vadd.f32 %v9006_v31, %v11224_v41  ;;  %v1821_v34 = vpop.f32.mrb[99].mxu0  ;;  %v2301_v28 = vld [vmem:[#allocation3 + $0x88] sm:$0xff] }
 0x207   : > { %2042 = vst.msk [vmem:[#allocation3 + $0x300] sm:$0xff] %vm1945_vm2, %v1819_v30  ;;  %v1822_v36 = vadd.f32 %v11224_v41, %v1821_v34  ;;  %v2304_v34 = vld [vmem:[#allocation3 + $0xa0] sm:$0xff] }
 0x208   : > { %2045 = vst.msk [vmem:[#allocation3 + $0x318] sm:$0xff] %vm1945_vm2, %v1830_v32  ;;  %v2306_v32 = vld [vmem:[#allocation3 + $0xb0] sm:$0xff] }
 0x209   : > { %2043 = vst.msk [vmem:[#allocation3 + $0x308] sm:$0xff] %vm1945_vm2, %v1822_v36 }
 0x20b   : > { %v9009_v37 = vpop.f32.mrb[100].mxu0 }
 0x20c   : > { %v1843_v38 = vadd.f32 %v9009_v37, %v11224_v41  ;;  %v1834_v39 = vpop.f32.mrb[101].mxu0 }
 0x20d   : > { %v1835_v40 = vadd.f32 %v11224_v41, %v1834_v39  ;;  %v9010_v42 = vpop.f32.mrb[102].mxu0 }
 0x20e   : > { %2048 = vst.msk [vmem:[#allocation3 + $0x330] sm:$0xff] %vm1945_vm2, %v1843_v38  ;;  %v1846_v43 = vadd.f32 %v9010_v42, %v11224_v41  ;;  %v1837_v44 = vpop.f32.mrb[103].mxu0 }
 0x20f   : > { %2046 = vst.msk [vmem:[#allocation3 + $0x320] sm:$0xff] %vm1945_vm2, %v1835_v40  ;;  %v1838_v45 = vadd.f32 %v11224_v41, %v1837_v44 }
 0x210   : > { %2049 = vst.msk [vmem:[#allocation3 + $0x338] sm:$0xff] %vm1945_vm2, %v1846_v43 }
 0x211   : > { %2047 = vst.msk [vmem:[#allocation3 + $0x328] sm:$0xff] %vm1945_vm2, %v1838_v45 }
 0x213   : > { %v9013_v46 = vpop.f32.mrb[104].mxu0 }
 0x214   : > { %v1859_v35 = vadd.f32 %v9013_v46, %v11224_v41  ;;  %v1850_v33 = vpop.f32.mrb[105].mxu0  ;;  %v2307_v46 = vld [vmem:[#allocation3 + $0xb8] sm:$0xff] }
 0x215   : > { %v1851_v47 = vadd.f32 %v11224_v41, %v1850_v33  ;;  %v9014_v48 = vpop.f32.mrb[106].mxu0 }
 0x216   : > { %2052 = vst.msk [vmem:[#allocation3 + $0x350] sm:$0xff] %vm1945_vm2, %v1859_v35  ;;  %v1862_v49 = vadd.f32 %v9014_v48, %v11224_v41  ;;  %v1853_v50 = vpop.f32.mrb[107].mxu0 }
 0x217   : > { %2050 = vst.msk [vmem:[#allocation3 + $0x340] sm:$0xff] %vm1945_vm2, %v1851_v47  ;;  %v1854_v51 = vadd.f32 %v11224_v41, %v1853_v50 }
 0x218   : > { %2053 = vst.msk [vmem:[#allocation3 + $0x358] sm:$0xff] %vm1945_vm2, %v1862_v49  ;;  %v2305_v49 = vld [vmem:[#allocation3 + $0xa8] sm:$0xff] }
 0x219   : > { %2051 = vst.msk [vmem:[#allocation3 + $0x348] sm:$0xff] %vm1945_vm2, %v1854_v51 }
 0x21b   : > { %v9017_v52 = vpop.f32.mrb[108].mxu0 }
 0x21c   : > { %v1875_v53 = vadd.f32 %v9017_v52, %v11224_v41  ;;  %v1866_v54 = vpop.f32.mrb[109].mxu0 }
 0x21d   : > { %v1867_v55 = vadd.f32 %v11224_v41, %v1866_v54  ;;  %v9018_v56 = vpop.f32.mrb[110].mxu0  ;;  %v11533_v54 = vld [vmem:[%s12844_s5 + $0x1] ss:$0 sm:$0xff] }
 0x21e   : > { %2056 = vst.msk [vmem:[#allocation3 + $0x370] sm:$0xff] %vm1945_vm2, %v1875_v53  ;;  %v1878_v57 = vadd.f32 %v9018_v56, %v11224_v41  ;;  %v1869_v58 = vpop.f32.mrb[111].mxu0  ;;  %v2310_v56 = vld [vmem:[#allocation3 + $0xd0] sm:$0xff] }
 0x21f   : > { %2054 = vst.msk [vmem:[#allocation3 + $0x360] sm:$0xff] %vm1945_vm2, %v1867_v55  ;;  %v1870_v59 = vadd.f32 %v11224_v41, %v1869_v58 }
 0x220   : > { %2057 = vst.msk [vmem:[#allocation3 + $0x378] sm:$0xff] %vm1945_vm2, %v1878_v57 }
 0x221   : > { %2055 = vst.msk [vmem:[#allocation3 + $0x368] sm:$0xff] %vm1945_vm2, %v1870_v59  ;;  %v2308_v59 = vld [vmem:[#allocation3 + $0xc0] sm:$0xff] }
 0x223   : > { %v9021_v60 = vpop.f32.mrb[112].mxu0 }
 0x224   : > { %v1891_v61 = vadd.f32 %v9021_v60, %v11224_v41  ;;  %v1882_v62 = vpop.f32.mrb[113].mxu0 }
 0x225   : > { %v1883_v63 = vadd.f32 %v11224_v41, %v1882_v62  ;;  %v9022_v0 = vpop.f32.mrb[114].mxu0 }
 0x226   : > { %2060 = vst.msk [vmem:[#allocation3 + $0x390] sm:$0xff] %vm1945_vm2, %v1891_v61  ;;  %v1894_v1 = vadd.f32 %v9022_v0, %v11224_v41  ;;  %v1885_v2 = vpop.f32.mrb[115].mxu0 }
 0x227   : > { %2058 = vst.msk [vmem:[#allocation3 + $0x380] sm:$0xff] %vm1945_vm2, %v1883_v63  ;;  %v1886_v3 = vadd.f32 %v11224_v41, %v1885_v2 }
 0x228   : > { %2061 = vst.msk [vmem:[#allocation3 + $0x398] sm:$0xff] %vm1945_vm2, %v1894_v1 }
 0x229   : > { %2059 = vst.msk [vmem:[#allocation3 + $0x388] sm:$0xff] %vm1945_vm2, %v1886_v3 }
 0x22b   : > { %v9025_v4 = vpop.f32.mrb[116].mxu0 }
 0x22c   : > { %v1907_v5 = vadd.f32 %v9025_v4, %v11224_v41  ;;  %v1898_v6 = vpop.f32.mrb[117].mxu0  ;;  %v2300_v41 = vld [vmem:[#allocation3 + $0x80] sm:$0xff] }
 0x22d   : > { %v1899_v8 = vadd.f32 %v10542_v7, %v1898_v6  ;;  %v9026_v9 = vpop.f32.mrb[118].mxu0 }
 0x22e   : > { %2064 = vst.msk [vmem:[#allocation3 + $0x3b0] sm:$0xff] %vm1945_vm2, %v1907_v5  ;;  %v1910_v10 = vadd.f32 %v10542_v7, %v9026_v9  ;;  %v1901_v11 = vpop.f32.mrb[119].mxu0 }
 0x22f   : > { %2062 = vst.msk [vmem:[#allocation3 + $0x3a0] sm:$0xff] %vm1945_vm2, %v1899_v8  ;;  %v1902_v12 = vadd.f32 %v10542_v7, %v1901_v11  ;;  %v2311_v8 = vld [vmem:[#allocation3 + $0xd8] sm:$0xff] }
 0x230   : > { %2065 = vst.msk [vmem:[#allocation3 + $0x3b8] sm:$0xff] %vm1945_vm2, %v1910_v10 }
 0x231   : > { %2063 = vst.msk [vmem:[#allocation3 + $0x3a8] sm:$0xff] %vm1945_vm2, %v1902_v12 }
 0x233   : > { %v9029_v14 = vpop.f32.mrb[120].mxu0 }
 0x234   : > { %v9061_v15 = vpop.f32.mrb[16].mxu1  ;;  %v1923_v16 = vadd.f32 %v10542_v7, %v9029_v14  ;;  %v1914_v17 = vpop.f32.mrb[121].mxu0 }
 0x235   : > { %v2439_v18 = vadd.f32 %v9061_v15, %v2302_v13  ;;  %v2374_v19 = vpop.f32.mrb[17].mxu1  ;;  %v1915_v20 = vadd.f32 %v10542_v7, %v1914_v17  ;;  %v9030_v21 = vpop.f32.mrb[122].mxu0  ;;  %v2309_v13 = vld [vmem:[#allocation3 + $0xc8] sm:$0xff] }
 0x236   : > { %v2437_v22 = vadd.f32 %v2374_v19, %v2300_v41  ;;  %v9062_v24 = vpop.f32.mrb[18].mxu1  ;;  %2068 = vst.msk [vmem:[#allocation3 + $0x3d0] sm:$0xff] %vm1945_vm2, %v1923_v16  ;;  %v1926_v25 = vadd.f32 %v10542_v7, %v9030_v21  ;;  %v1917_v26 = vpop.f32.mrb[123].mxu0  ;;  %v11550_v16 = vld [vmem:[%s12843_s4] sm:$0xff]   ;;  %v11556_v19 = vld [vmem:[%s12843_s4 + $0x8] sm:$0xff]  }
 0x237   : > { %9550 = vtanh.f32 %v2439_v18  ;;  %v2440_v27 = vadd.f32 %v9062_v24, %v2303_v23  ;;  %v2377_v29 = vpop.f32.mrb[19].mxu1  ;;  %2066 = vst.msk [vmem:[#allocation3 + $0x3c0] sm:$0xff] %vm1945_vm2, %v1915_v20  ;;  %v1918_v30 = vadd.f32 %v10542_v7, %v1917_v26  ;;  %v2314_v18 = vld [vmem:[#allocation3 + $0xf0] sm:$0xff] }
 0x238   : > { %9552 = vtanh.f32 %v2437_v22  ;;  %v2438_v31 = vadd.f32 %v2377_v29, %v2301_v28  ;;  %2069 = vst.msk [vmem:[#allocation3 + $0x3d8] sm:$0xff] %vm1945_vm2, %v1926_v25  ;;  %v2312_v22 = vld [vmem:[#allocation3 + $0xe0] sm:$0xff] }
 0x239   : > { %9554 = vtanh.f32 %v2440_v27  ;;  %2067 = vst.msk [vmem:[#allocation3 + $0x3c8] sm:$0xff] %vm1945_vm2, %v1918_v30 }
 0x23a   : > { %9556 = vtanh.f32 %v2438_v31 }
 0x23b   : > { %v9033_v36 = vpop.f32.mrb[124].mxu0 }
 0x23c   : > { %v9065_v37 = vpop.f32.mrb[20].mxu1  ;;  %v1939_v38 = vadd.f32 %v10542_v7, %v9033_v36  ;;  %v1930_v39 = vpop.f32.mrb[125].mxu0 }
 0x23d   : > { %v2443_v40 = vadd.f32 %v9065_v37, %v2306_v32  ;;  %v2390_v42 = vpop.f32.mrb[21].mxu1  ;;  %v1931_v43 = vadd.f32 %v10542_v7, %v1930_v39  ;;  %v9034_v44 = vpop.f32.mrb[126].mxu0  ;;  %v2315_v37 = vld [vmem:[#allocation3 + $0xf8] sm:$0xff] }
 0x23e   : > { %v2441_v45 = vadd.f32 %v2390_v42, %v2304_v34  ;;  %v9066_v35 = vpop.f32.mrb[22].mxu1  ;;  %2072 = vst.msk [vmem:[#allocation3 + $0x3f0] sm:$0xff] %vm1945_vm2, %v1939_v38  ;;  %v1942_v33 = vadd.f32 %v10542_v7, %v9034_v44  ;;  %v1933_v47 = vpop.f32.mrb[127].mxu0  ;;  %v2313_v44 = vld [vmem:[#allocation3 + $0xe8] sm:$0xff] }
 0x23f   : > { %9558 = vtanh.f32 %v2443_v40  ;;  %v2444_v48 = vadd.f32 %v9066_v35, %v2307_v46  ;;  %v2393_v50 = vpop.f32.mrb[23].mxu1  ;;  %2070 = vst.msk [vmem:[#allocation3 + $0x3e0] sm:$0xff] %vm1945_vm2, %v1931_v43  ;;  %v1934_v51 = vadd.f32 %v10542_v7, %v1933_v47 }
 0x240   : > { %9560 = vtanh.f32 %v2441_v45  ;;  %v2442_v52 = vadd.f32 %v2393_v50, %v2305_v49  ;;  %2073 = vst.msk [vmem:[#allocation3 + $0x3f8] sm:$0xff] %vm1945_vm2, %v1942_v33 }
 0x241   : > { %v9551_v53 = vpop.eup %9550  ;;  %9562 = vtanh.f32 %v2444_v48  ;;  %2071 = vst.msk [vmem:[#allocation3 + $0x3e8] sm:$0xff] %vm1945_vm2, %v1934_v51 }
 0x242   : > { %v9553_v55 = vpop.eup %9552  ;;  %9564 = vtanh.f32 %v2442_v52 }
 0x243   : > { %v9555_v57 = vpop.eup %9554  ;;  %v9201_v58 = vpop.f32.mrb[128].mxu0 }
 0x244   : > { %v9557_v60 = vpop.eup %9556  ;;  %v2470_v61 = vpack.c.bf16 %v9555_v57, %v9551_v53  ;;  %v3931_v62 = vadd.f32 %v9201_v58, %v11533_v54  ;;  %v9069_v63 = vpop.f32.mrb[24].mxu1 }
 0x245   : > { %v3922_v0 = vpop.f32.mrb[129].mxu0  ;;  %v2447_v1 = vadd.f32 %v9069_v63, %v2310_v56  ;;  %v2406_v3 = vpop.f32.mrb[25].mxu1  ;;  %v2469_v5 = vpack.c.bf16 %v9557_v60, %v9553_v55 }
 0x246   : > { %v3923_v2 = vadd.f32 %v11533_v54, %v3922_v0  ;;  %v9202_v4 = vpop.f32.mrb[130].mxu0  ;;  %2479 = vst.msk [vmem:[#allocation2 + $0x48] sm:$0xff] %vm1945_vm2, %v2470_v61  ;;  %4435 = vst.msk [vmem:[#allocation3 + $0x10] sm:$0xff] %vm1945_vm2, %v3931_v62  ;;  %v2445_v6 = vadd.f32 %v2406_v3, %v2308_v59  ;;  %v9070_v9 = vpop.f32.mrb[26].mxu1 }
 0x247   : > { %v3934_v7 = vadd.f32 %v9202_v4, %v11533_v54  ;;  %v3925_v10 = vpop.f32.mrb[131].mxu0  ;;  %9566 = vtanh.f32 %v2447_v1  ;;  %v2448_v11 = vadd.f32 %v9070_v9, %v2311_v8  ;;  %v2409_v41 = vpop.f32.mrb[27].mxu1  ;;  %2478 = vst.msk [vmem:[#allocation2 + $0x40] sm:$0xff] %vm1945_vm2, %v2469_v5  ;;  %9079 = vmatprep.mubr.msk.bf16.mxu1 %vm1945_vm2, %v2469_v5 }
 0x248   : > { %4433 = vst.msk [vmem:[#allocation3] sm:$0xff] %vm1945_vm2, %v3923_v2  ;;  %v3926_v12 = vadd.f32 %v11533_v54, %v3925_v10  ;;  %9568 = vtanh.f32 %v2445_v6  ;;  %v2446_v14 = vadd.f32 %v2409_v41, %v2309_v13  ;;  %9080 = vmatmul.mubr.msk.bf16.vlgmr.msra.gmra.mrb[32].mxu1 %vm1945_vm2, %v2470_v61 }
 0x249   : > { %4436 = vst.msk [vmem:[#allocation3 + $0x18] sm:$0xff] %vm1945_vm2, %v3934_v7  ;;  %v9559_v15 = vpop.eup %9558  ;;  %9570 = vtanh.f32 %v2448_v11  ;;  %9096 = vmatpush3.bf16.msra.mxu1 %v11550_v16 }
 0x24a   : > { %4434 = vst.msk [vmem:[#allocation3 + $0x8] sm:$0xff] %vm1945_vm2, %v3926_v12  ;;  %v9561_v17 = vpop.eup %9560  ;;  %9572 = vtanh.f32 %v2446_v14  ;;  %9097 = vmatprep.subr.bf16.mxu1 %v11556_v19 }
 0x24b   : > { %v9563_v20 = vpop.eup %9562  ;;  %v9205_v21 = vpop.f32.mrb[132].mxu0 }
 0x24c   : > { %v9565_v23 = vpop.eup %9564  ;;  %v3947_v24 = vadd.f32 %v9205_v21, %v11533_v54  ;;  %v9073_v25 = vpop.f32.mrb[28].mxu1  ;;  %v2472_v27 = vpack.c.bf16 %v9563_v20, %v9559_v15 }
 0x24d   : > { %v3938_v26 = vpop.f32.mrb[133].mxu0  ;;  %v2451_v28 = vadd.f32 %v9073_v25, %v2314_v18  ;;  %v2422_v30 = vpop.f32.mrb[29].mxu1  ;;  %v2471_v32 = vpack.c.bf16 %v9565_v23, %v9561_v17  ;;  %9098 = vmatpush3.bf16.msra.mxu1 %v11556_v19  ;;  %v3621_v46 = vld [vmem:[#allocation2 + $0x48] sm:$0xff]  ;;  %v2489_v17 = vld [vmem:[#allocation3 + $0x110] sm:$0xff]  ;;  %v2487_v18 = vld [vmem:[#allocation3 + $0x100] sm:$0xff] }
 0x24e   : > { %v3939_v29 = vadd.f32 %v11533_v54, %v3938_v26  ;;  %v9206_v31 = vpop.f32.mrb[134].mxu0  ;;  %4439 = vst.msk [vmem:[#allocation3 + $0x30] sm:$0xff] %vm1945_vm2, %v3947_v24  ;;  %v2449_v34 = vadd.f32 %v2422_v30, %v2312_v22  ;;  %v9074_v38 = vpop.f32.mrb[30].mxu1  ;;  %v3620_v40 = vld [vmem:[#allocation2 + $0x40] sm:$0xff]  ;;  %2481 = vst.msk [vmem:[#allocation2 + $0x58] sm:$0xff] %vm1945_vm2, %v2472_v27  ;;  %9115 = vmatprep.subr.bf16.mxu1 %v11550_v16  ;;  %v2490_v24 = vld [vmem:[#allocation3 + $0x118] sm:$0xff] }
 0x24f   : > { %v3950_v36 = vadd.f32 %v9206_v31, %v11533_v54  ;;  %v3941_v39 = vpop.f32.mrb[135].mxu0  ;;  %9574 = vtanh.f32 %v2451_v28  ;;  %v2452_v42 = vadd.f32 %v9074_v38, %v2315_v37  ;;  %v2425_v45 = vpop.f32.mrb[31].mxu1  ;;  %2480 = vst.msk [vmem:[#allocation2 + $0x50] sm:$0xff] %vm1945_vm2, %v2471_v32  ;;  %9083 = vmatprep.mubr.msk.bf16.mxu1 %vm1945_vm2, %v2471_v32  ;;  %9215 = vmatprep.mubr.msk.bf16.mxu0 %vm1945_vm2, %v3620_v40  ;;  %v2493_v30 = vld [vmem:[#allocation3 + $0x130] sm:$0xff]  ;;  %v2491_v31 = vld [vmem:[#allocation3 + $0x120] sm:$0xff] }
 0x250   : > { %4437 = vst.msk [vmem:[#allocation3 + $0x20] sm:$0xff] %vm1945_vm2, %v3939_v29  ;;  %v3942_v43 = vadd.f32 %v11533_v54, %v3941_v39  ;;  %9576 = vtanh.f32 %v2449_v34  ;;  %v2450_v35 = vadd.f32 %v2425_v45, %v2313_v44  ;;  %9084 = vmatmul.mubr.msk.bf16.gmra.mrb[36].mxu1 %vm1945_vm2, %v2472_v27  ;;  %9216 = vmatmul.mubr.msk.bf16.gmra.mrb[144].mxu0 %vm1945_vm2, %v3621_v46  ;;  %v2488_v27 = vld [vmem:[#allocation3 + $0x108] sm:$0xff] }
 0x251   : > { %4440 = vst.msk [vmem:[#allocation3 + $0x38] sm:$0xff] %vm1945_vm2, %v3950_v36  ;;  %v9567_v33 = vpop.eup %9566  ;;  %9578 = vtanh.f32 %v2452_v42 }
 0x252   : > { %4438 = vst.msk [vmem:[#allocation3 + $0x28] sm:$0xff] %vm1945_vm2, %v3942_v43  ;;  %v9569_v47 = vpop.eup %9568  ;;  %9580 = vtanh.f32 %v2450_v35  ;;  %v2494_v43 = vld [vmem:[#allocation3 + $0x138] sm:$0xff] }
 0x253   : > { %v9571_v48 = vpop.eup %9570  ;;  %v9209_v49 = vpop.f32.mrb[136].mxu0 }
 0x254   : > { %v9573_v50 = vpop.eup %9572  ;;  %v3963_v51 = vadd.f32 %v9209_v49, %v11533_v54  ;;  %v3954_v52 = vpop.f32.mrb[137].mxu0  ;;  %v2474_v53 = vpack.c.bf16 %v9571_v48, %v9567_v33  ;;  %v2492_v33 = vld [vmem:[#allocation3 + $0x128] sm:$0xff] }
 0x255   : > { %v3955_v55 = vadd.f32 %v11533_v54, %v3954_v52  ;;  %v9210_v56 = vpop.f32.mrb[138].mxu0  ;;  %v2473_v57 = vpack.c.bf16 %v9573_v50, %v9569_v47  ;;  %v3623_v62 = vld [vmem:[#allocation2 + $0x58] sm:$0xff] }
 0x256   : > { %4443 = vst.msk [vmem:[#allocation3 + $0x50] sm:$0xff] %vm1945_vm2, %v3963_v51  ;;  %v3966_v58 = vadd.f32 %v9210_v56, %v11533_v54  ;;  %v3957_v59 = vpop.f32.mrb[139].mxu0  ;;  %v3622_v60 = vld [vmem:[#allocation2 + $0x50] sm:$0xff]  ;;  %2483 = vst.msk [vmem:[#allocation2 + $0x68] sm:$0xff] %vm1945_vm2, %v2474_v53  ;;  %v2495_v56 = vld [vmem:[#allocation3 + $0x140] sm:$0xff] }
 0x257   : > { %4441 = vst.msk [vmem:[#allocation3 + $0x40] sm:$0xff] %vm1945_vm2, %v3955_v55  ;;  %v3958_v61 = vadd.f32 %v11533_v54, %v3957_v59  ;;  %2482 = vst.msk [vmem:[#allocation2 + $0x60] sm:$0xff] %vm1945_vm2, %v2473_v57  ;;  %9087 = vmatprep.mubr.msk.bf16.mxu1 %vm1945_vm2, %v2473_v57  ;;  %9219 = vmatprep.mubr.msk.bf16.mxu0 %vm1945_vm2, %v3622_v60 }
 0x258   : > { %4444 = vst.msk [vmem:[#allocation3 + $0x58] sm:$0xff] %vm1945_vm2, %v3966_v58  ;;  %9088 = vmatmul.mubr.msk.bf16.gmra.mrb[40].mxu1 %vm1945_vm2, %v2474_v53  ;;  %9220 = vmatmul.mubr.msk.bf16.gmra.mrb[148].mxu0 %vm1945_vm2, %v3623_v62  ;;  %v2497_v53 = vld [vmem:[#allocation3 + $0x150] sm:$0xff] }
 0x259   : > { %v9575_v63 = vpop.eup %9574  ;;  %4442 = vst.msk [vmem:[#allocation3 + $0x48] sm:$0xff] %vm1945_vm2, %v3958_v61 }
 0x25a   : > { %v9577_v0 = vpop.eup %9576 }
 0x25b   : > { %v9579_v1 = vpop.eup %9578  ;;  %v9213_v2 = vpop.f32.mrb[140].mxu0 }
 0x25c   : > { %v9581_v3 = vpop.eup %9580  ;;  %v3979_v4 = vadd.f32 %v9213_v2, %v11533_v54  ;;  %v3970_v5 = vpop.f32.mrb[141].mxu0  ;;  %v2476_v6 = vpack.c.bf16 %v9579_v1, %v9575_v63 }
 0x25d   : > { %v3971_v7 = vadd.f32 %v11533_v54, %v3970_v5  ;;  %v9214_v8 = vpop.f32.mrb[142].mxu0  ;;  %v2475_v9 = vpack.c.bf16 %v9581_v3, %v9577_v0  ;;  %v3625_v41 = vld [vmem:[#allocation2 + $0x68] sm:$0xff] }
 0x25e   : > { %4447 = vst.msk [vmem:[#allocation3 + $0x70] sm:$0xff] %vm1945_vm2, %v3979_v4  ;;  %v3982_v10 = vadd.f32 %v9214_v8, %v11533_v54  ;;  %v3973_v11 = vpop.f32.mrb[143].mxu0  ;;  %v3624_v12 = vld [vmem:[#allocation2 + $0x60] sm:$0xff]  ;;  %2485 = vst.msk [vmem:[#allocation2 + $0x78] sm:$0xff] %vm1945_vm2, %v2476_v6  ;;  %v2498_v4 = vld [vmem:[#allocation3 + $0x158] sm:$0xff] }
 0x25f   : > { %4445 = vst.msk [vmem:[#allocation3 + $0x60] sm:$0xff] %vm1945_vm2, %v3971_v7  ;;  %v3974_v13 = vadd.f32 %v11533_v54, %v3973_v11  ;;  %2484 = vst.msk [vmem:[#allocation2 + $0x70] sm:$0xff] %vm1945_vm2, %v2475_v9  ;;  %9091 = vmatprep.mubr.msk.bf16.mxu1 %vm1945_vm2, %v2475_v9  ;;  %9223 = vmatprep.mubr.msk.bf16.mxu0 %vm1945_vm2, %v3624_v12  ;;  %v2496_v9 = vld [vmem:[#allocation3 + $0x148] sm:$0xff] }
 0x260   : > { %4448 = vst.msk [vmem:[#allocation3 + $0x78] sm:$0xff] %vm1945_vm2, %v3982_v10  ;;  %9092 = vmatmul.mubr.msk.bf16.gmra.mrb[44].mxu1 %vm1945_vm2, %v2476_v6  ;;  %9224 = vmatmul.mubr.msk.bf16.gmra.mrb[152].mxu0 %vm1945_vm2, %v3625_v41 }
 0x261   : > { %4446 = vst.msk [vmem:[#allocation3 + $0x68] sm:$0xff] %vm1945_vm2, %v3974_v13 }
 0x265   : > { %v3627_v15 = vld [vmem:[#allocation2 + $0x78] sm:$0xff] }
 0x266   : > { %v3626_v14 = vld [vmem:[#allocation2 + $0x70] sm:$0xff] }
 0x267   : > { %9227 = vmatprep.mubr.msk.bf16.mxu0 %vm1945_vm2, %v3626_v14 }
 0x268   : > { %9228 = vmatmul.mubr.msk.bf16.gmra.mrb[156].mxu0 %vm1945_vm2, %v3627_v15  ;;  %v2501_v15 = vld [vmem:[#allocation3 + $0x170] sm:$0xff] }
 0x31b   : > { %v9081_v20 = vpop.f32.mrb[32].mxu1 }
 0x31c   : > { %v2626_v21 = vadd.f32 %v9081_v20, %v2489_v17  ;;  %v2561_v22 = vpop.f32.mrb[33].mxu1 }
 0x31d   : > { %v2624_v23 = vadd.f32 %v2561_v22, %v2487_v18  ;;  %v9082_v25 = vpop.f32.mrb[34].mxu1  ;;  %v2499_v18 = vld [vmem:[#allocation3 + $0x160] sm:$0xff] }
 0x31e   : > { %9582 = vtanh.f32 %v2626_v21  ;;  %v2627_v26 = vadd.f32 %v9082_v25, %v2490_v24  ;;  %v2564_v28 = vpop.f32.mrb[35].mxu1 }
 0x31f   : > { %9584 = vtanh.f32 %v2624_v23  ;;  %v2625_v29 = vadd.f32 %v2564_v28, %v2488_v27 }
 0x320   : > { %9586 = vtanh.f32 %v2627_v26 }
 0x321   : > { %9588 = vtanh.f32 %v2625_v29 }
 0x323   : > { %v9085_v32 = vpop.f32.mrb[36].mxu1  ;;  %v9217_v34 = vpop.f32.mrb[144].mxu0 }
 0x324   : > { %v2630_v36 = vadd.f32 %v9085_v32, %v2493_v30  ;;  %v3995_v37 = vadd.f32 %v9217_v34, %v11533_v54  ;;  %v2577_v38 = vpop.f32.mrb[37].mxu1  ;;  %v3986_v39 = vpop.f32.mrb[145].mxu0 }
 0x325   : > { %v2628_v40 = vadd.f32 %v2577_v38, %v2491_v31  ;;  %v3987_v42 = vadd.f32 %v11533_v54, %v3986_v39  ;;  %v9086_v44 = vpop.f32.mrb[38].mxu1  ;;  %v9218_v45 = vpop.f32.mrb[146].mxu0  ;;  %v2502_v31 = vld [vmem:[#allocation3 + $0x178] sm:$0xff]  ;;  %v2500_v39 = vld [vmem:[#allocation3 + $0x168] sm:$0xff] }
 0x326   : > { %9590 = vtanh.f32 %v2630_v36  ;;  %4451 = vst.msk [vmem:[#allocation3 + $0x90] sm:$0xff] %vm1945_vm2, %v3995_v37  ;;  %v2631_v46 = vadd.f32 %v9086_v44, %v2494_v43  ;;  %v3998_v35 = vadd.f32 %v9218_v45, %v11533_v54  ;;  %v2580_v47 = vpop.f32.mrb[39].mxu1  ;;  %v3989_v48 = vpop.f32.mrb[147].mxu0 }
 0x327   : > { %9592 = vtanh.f32 %v2628_v40  ;;  %4449 = vst.msk [vmem:[#allocation3 + $0x80] sm:$0xff] %vm1945_vm2, %v3987_v42  ;;  %v2629_v49 = vadd.f32 %v2580_v47, %v2492_v33  ;;  %v3990_v50 = vadd.f32 %v11533_v54, %v3989_v48 }
 0x328   : > { %v9583_v51 = vpop.eup %9582  ;;  %9594 = vtanh.f32 %v2631_v46  ;;  %4452 = vst.msk [vmem:[#allocation3 + $0x98] sm:$0xff] %vm1945_vm2, %v3998_v35 }
 0x329   : > { %v9585_v52 = vpop.eup %9584  ;;  %9596 = vtanh.f32 %v2629_v49  ;;  %4450 = vst.msk [vmem:[#allocation3 + $0x88] sm:$0xff] %vm1945_vm2, %v3990_v50 }
 0x32a   : > { %v9587_v55 = vpop.eup %9586 }
 0x32b   : > { %v9589_v57 = vpop.eup %9588  ;;  %v2657_v58 = vpack.c.bf16 %v9587_v55, %v9583_v51  ;;  %v9089_v59 = vpop.f32.mrb[40].mxu1 }
 0x32c   : > { %v9221_v60 = vpop.f32.mrb[148].mxu0  ;;  %v2634_v61 = vadd.f32 %v9089_v59, %v2497_v53  ;;  %v2593_v63 = vpop.f32.mrb[41].mxu1  ;;  %v2656_v1 = vpack.c.bf16 %v9589_v57, %v9585_v52 }
 0x32d   : > { %v4011_v62 = vadd.f32 %v9221_v60, %v11533_v54  ;;  %v4002_v0 = vpop.f32.mrb[149].mxu0  ;;  %2666 = vst.msk [vmem:[#allocation2 + $0x88] sm:$0xff] %vm1945_vm2, %v2657_v58  ;;  %v2632_v2 = vadd.f32 %v2593_v63, %v2495_v56  ;;  %v9090_v5 = vpop.f32.mrb[42].mxu1 }
 0x32e   : > { %v4003_v3 = vadd.f32 %v11533_v54, %v4002_v0  ;;  %v9222_v6 = vpop.f32.mrb[150].mxu0  ;;  %9598 = vtanh.f32 %v2634_v61  ;;  %v2635_v7 = vadd.f32 %v9090_v5, %v2498_v4  ;;  %v2596_v10 = vpop.f32.mrb[43].mxu1  ;;  %2665 = vst.msk [vmem:[#allocation2 + $0x80] sm:$0xff] %vm1945_vm2, %v2656_v1  ;;  %9099 = vmatprep.mubr.msk.bf16.mxu1 %vm1945_vm2, %v2656_v1 }
 0x32f   : > { %4455 = vst.msk [vmem:[#allocation3 + $0xb0] sm:$0xff] %vm1945_vm2, %v4011_v62  ;;  %v4014_v8 = vadd.f32 %v9222_v6, %v11533_v54  ;;  %v4005_v11 = vpop.f32.mrb[151].mxu0  ;;  %9600 = vtanh.f32 %v2632_v2  ;;  %v2633_v12 = vadd.f32 %v2596_v10, %v2496_v9  ;;  %9100 = vmatmul.mubr.msk.bf16.vlgmr.msra.gmra.mrb[48].mxu1 %vm1945_vm2, %v2657_v58 }
 0x330   : > { %4453 = vst.msk [vmem:[#allocation3 + $0xa0] sm:$0xff] %vm1945_vm2, %v4003_v3  ;;  %v4006_v13 = vadd.f32 %v11533_v54, %v4005_v11  ;;  %v9591_v41 = vpop.eup %9590  ;;  %9602 = vtanh.f32 %v2635_v7  ;;  %9116 = vmatpush3.bf16.msra.mxu1 %v11550_v16  ;;  %v2676_v7 = vld [vmem:[#allocation3 + $0x190] sm:$0xff] }
 0x331   : > { %4456 = vst.msk [vmem:[#allocation3 + $0xb8] sm:$0xff] %vm1945_vm2, %v4014_v8  ;;  %v9593_v14 = vpop.eup %9592  ;;  %9604 = vtanh.f32 %v2633_v12  ;;  %9117 = vmatprep.subr.bf16.mxu1 %v11556_v19  ;;  %v2674_v8 = vld [vmem:[#allocation3 + $0x180] sm:$0xff] }
 0x332   : > { %4454 = vst.msk [vmem:[#allocation3 + $0xa8] sm:$0xff] %vm1945_vm2, %v4006_v13  ;;  %v9595_v17 = vpop.eup %9594  ;;  %v2677_v13 = vld [vmem:[#allocation3 + $0x198] sm:$0xff] }
 0x333   : > { %v9597_v20 = vpop.eup %9596  ;;  %v9093_v21 = vpop.f32.mrb[44].mxu1  ;;  %v2659_v23 = vpack.c.bf16 %v9595_v17, %v9591_v41 }
 0x334   : > { %v9225_v22 = vpop.f32.mrb[152].mxu0  ;;  %v2638_v24 = vadd.f32 %v9093_v21, %v2501_v15  ;;  %v2609_v26 = vpop.f32.mrb[45].mxu1  ;;  %v2658_v28 = vpack.c.bf16 %v9597_v20, %v9593_v14  ;;  %9118 = vmatpush3.bf16.msra.mxu1 %v11556_v19  ;;  %v3629_v43 = vld [vmem:[#allocation2 + $0x88] sm:$0xff]  ;;  %v2680_v20 = vld [vmem:[#allocation3 + $0x1b0] sm:$0xff]  ;;  %v2678_v21 = vld [vmem:[#allocation3 + $0x1a0] sm:$0xff] }
 0x335   : > { %v4027_v25 = vadd.f32 %v9225_v22, %v11533_v54  ;;  %v4018_v27 = vpop.f32.mrb[153].mxu0  ;;  %v2636_v29 = vadd.f32 %v2609_v26, %v2499_v18  ;;  %v9094_v32 = vpop.f32.mrb[46].mxu1  ;;  %v3628_v36 = vld [vmem:[#allocation2 + $0x80] sm:$0xff]  ;;  %2668 = vst.msk [vmem:[#allocation2 + $0x98] sm:$0xff] %vm1945_vm2, %v2659_v23  ;;  %9135 = vmatprep.subr.bf16.mxu1 %v11550_v16  ;;  %v2675_v15 = vld [vmem:[#allocation3 + $0x188] sm:$0xff] }
 0x336   : > { %v4019_v30 = vadd.f32 %v11533_v54, %v4018_v27  ;;  %v9226_v34 = vpop.f32.mrb[154].mxu0  ;;  %9606 = vtanh.f32 %v2638_v24  ;;  %v2639_v37 = vadd.f32 %v9094_v32, %v2502_v31  ;;  %v2612_v40 = vpop.f32.mrb[47].mxu1  ;;  %2667 = vst.msk [vmem:[#allocation2 + $0x90] sm:$0xff] %vm1945_vm2, %v2658_v28  ;;  %9103 = vmatprep.mubr.msk.bf16.mxu1 %vm1945_vm2, %v2658_v28  ;;  %9231 = vmatprep.mubr.msk.bf16.mxu0 %vm1945_vm2, %v3628_v36 }
 0x337   : > { %4459 = vst.msk [vmem:[#allocation3 + $0xd0] sm:$0xff] %vm1945_vm2, %v4027_v25  ;;  %v4030_v38 = vadd.f32 %v9226_v34, %v11533_v54  ;;  %v4021_v42 = vpop.f32.mrb[155].mxu0  ;;  %9608 = vtanh.f32 %v2636_v29  ;;  %v2637_v44 = vadd.f32 %v2612_v40, %v2500_v39  ;;  %9104 = vmatmul.mubr.msk.bf16.gmra.mrb[52].mxu1 %vm1945_vm2, %v2659_v23  ;;  %9232 = vmatmul.mubr.msk.bf16.gmra.mrb[160].mxu0 %vm1945_vm2, %v3629_v43 }
 0x338   : > { %4457 = vst.msk [vmem:[#allocation3 + $0xc0] sm:$0xff] %vm1945_vm2, %v4019_v30  ;;  %v4022_v45 = vadd.f32 %v11533_v54, %v4021_v42  ;;  %v9599_v46 = vpop.eup %9598  ;;  %9610 = vtanh.f32 %v2639_v37  ;;  %v2681_v30 = vld [vmem:[#allocation3 + $0x1b8] sm:$0xff]  ;;  %v2679_v37 = vld [vmem:[#allocation3 + $0x1a8] sm:$0xff] }
 0x339   : > { %4460 = vst.msk [vmem:[#allocation3 + $0xd8] sm:$0xff] %vm1945_vm2, %v4030_v38  ;;  %v9601_v35 = vpop.eup %9600  ;;  %9612 = vtanh.f32 %v2637_v44 }
 0x33a   : > { %4458 = vst.msk [vmem:[#allocation3 + $0xc8] sm:$0xff] %vm1945_vm2, %v4022_v45  ;;  %v9603_v33 = vpop.eup %9602  ;;  %v2684_v45 = vld [vmem:[#allocation3 + $0x1d0] sm:$0xff] }
 0x33b   : > { %v9605_v47 = vpop.eup %9604  ;;  %v9229_v48 = vpop.f32.mrb[156].mxu0  ;;  %v2661_v49 = vpack.c.bf16 %v9603_v33, %v9599_v46 }
 0x33c   : > { %v4043_v50 = vadd.f32 %v9229_v48, %v11533_v54  ;;  %v4034_v51 = vpop.f32.mrb[157].mxu0  ;;  %v2660_v52 = vpack.c.bf16 %v9605_v47, %v9601_v35  ;;  %v3631_v59 = vld [vmem:[#allocation2 + $0x98] sm:$0xff]  ;;  %v2682_v35 = vld [vmem:[#allocation3 + $0x1c0] sm:$0xff] }
 0x33d   : > { %v4035_v53 = vadd.f32 %v11533_v54, %v4034_v51  ;;  %v9230_v55 = vpop.f32.mrb[158].mxu0  ;;  %v3630_v56 = vld [vmem:[#allocation2 + $0x90] sm:$0xff]  ;;  %2670 = vst.msk [vmem:[#allocation2 + $0xa8] sm:$0xff] %vm1945_vm2, %v2661_v49 }
 0x33e   : > { %4463 = vst.msk [vmem:[#allocation3 + $0xf0] sm:$0xff] %vm1945_vm2, %v4043_v50  ;;  %v4046_v57 = vadd.f32 %v9230_v55, %v11533_v54  ;;  %2669 = vst.msk [vmem:[#allocation2 + $0xa0] sm:$0xff] %vm1945_vm2, %v2660_v52  ;;  %9107 = vmatprep.mubr.msk.bf16.mxu1 %vm1945_vm2, %v2660_v52  ;;  %v4037_v58 = vpop.f32.mrb[159].mxu0  ;;  %9235 = vmatprep.mubr.msk.bf16.mxu0 %vm1945_vm2, %v3630_v56 }
 0x33f   : > { %4461 = vst.msk [vmem:[#allocation3 + $0xe0] sm:$0xff] %vm1945_vm2, %v4035_v53  ;;  %v4038_v60 = vadd.f32 %v11533_v54, %v4037_v58  ;;  %9108 = vmatmul.mubr.msk.bf16.gmra.mrb[56].mxu1 %vm1945_vm2, %v2661_v49  ;;  %9236 = vmatmul.mubr.msk.bf16.gmra.mrb[164].mxu0 %vm1945_vm2, %v3631_v59  ;;  %v2685_v58 = vld [vmem:[#allocation3 + $0x1d8] sm:$0xff] }
 0x340   : > { %v9607_v61 = vpop.eup %9606  ;;  %4464 = vst.msk [vmem:[#allocation3 + $0xf8] sm:$0xff] %vm1945_vm2, %v4046_v57 }
 0x341   : > { %v9609_v62 = vpop.eup %9608  ;;  %4462 = vst.msk [vmem:[#allocation3 + $0xe8] sm:$0xff] %vm1945_vm2, %v4038_v60 }
 0x342   : > { %v9611_v63 = vpop.eup %9610 }
 0x343   : > { %v9613_v0 = vpop.eup %9612  ;;  %v2663_v1 = vpack.c.bf16 %v9611_v63, %v9607_v61  ;;  %v2683_v63 = vld [vmem:[#allocation3 + $0x1c8] sm:$0xff] }
 0x344   : > { %v2662_v2 = vpack.c.bf16 %v9613_v0, %v9609_v62  ;;  %v3633_v4 = vld [vmem:[#allocation2 + $0xa8] sm:$0xff] }
 0x345   : > { %v3632_v3 = vld [vmem:[#allocation2 + $0xa0] sm:$0xff]  ;;  %2672 = vst.msk [vmem:[#allocation2 + $0xb8] sm:$0xff] %vm1945_vm2, %v2663_v1 }
 0x346   : > { %2671 = vst.msk [vmem:[#allocation2 + $0xb0] sm:$0xff] %vm1945_vm2, %v2662_v2  ;;  %9111 = vmatprep.mubr.msk.bf16.mxu1 %vm1945_vm2, %v2662_v2  ;;  %9239 = vmatprep.mubr.msk.bf16.mxu0 %vm1945_vm2, %v3632_v3 }
 0x347   : > { %9112 = vmatmul.mubr.msk.bf16.gmra.mrb[60].mxu1 %vm1945_vm2, %v2663_v1  ;;  %9240 = vmatmul.mubr.msk.bf16.gmra.mrb[168].mxu0 %vm1945_vm2, %v3633_v4 }
 0x34c   : > { %v3635_v6 = vld [vmem:[#allocation2 + $0xb8] sm:$0xff] }
 0x34d   : > { %v3634_v5 = vld [vmem:[#allocation2 + $0xb0] sm:$0xff] }
 0x34e   : > { %9243 = vmatprep.mubr.msk.bf16.mxu0 %vm1945_vm2, %v3634_v5 }
 0x34f   : > { %9244 = vmatmul.mubr.msk.bf16.gmra.mrb[172].mxu0 %vm1945_vm2, %v3635_v6  ;;  %v2688_v6 = vld [vmem:[#allocation3 + $0x1f0] sm:$0xff] }
 0x402   : > { %v9101_v9 = vpop.f32.mrb[48].mxu1 }
 0x403   : > { %v2813_v10 = vadd.f32 %v9101_v9, %v2676_v7  ;;  %v2748_v11 = vpop.f32.mrb[49].mxu1 }
 0x404   : > { %v2811_v12 = vadd.f32 %v2748_v11, %v2674_v8  ;;  %v9102_v41 = vpop.f32.mrb[50].mxu1  ;;  %v2686_v8 = vld [vmem:[#allocation3 + $0x1e0] sm:$0xff] }
 0x405   : > { %9614 = vtanh.f32 %v2813_v10  ;;  %v2814_v14 = vadd.f32 %v9102_v41, %v2677_v13  ;;  %v2751_v17 = vpop.f32.mrb[51].mxu1 }
 0x406   : > { %9616 = vtanh.f32 %v2811_v12  ;;  %v2812_v18 = vadd.f32 %v2751_v17, %v2675_v15 }
 0x407   : > { %9618 = vtanh.f32 %v2814_v14 }
 0x408   : > { %9620 = vtanh.f32 %v2812_v18 }
 0x40a   : > { %v9105_v22 = vpop.f32.mrb[52].mxu1  ;;  %v9233_v23 = vpop.f32.mrb[160].mxu0 }
 0x40b   : > { %v2817_v24 = vadd.f32 %v9105_v22, %v2680_v20  ;;  %v4059_v25 = vadd.f32 %v9233_v23, %v11533_v54  ;;  %v2764_v26 = vpop.f32.mrb[53].mxu1  ;;  %v4050_v27 = vpop.f32.mrb[161].mxu0 }
 0x40c   : > { %v2815_v28 = vadd.f32 %v2764_v26, %v2678_v21  ;;  %v4051_v29 = vadd.f32 %v11533_v54, %v4050_v27  ;;  %v9106_v31 = vpop.f32.mrb[54].mxu1  ;;  %v9234_v32 = vpop.f32.mrb[162].mxu0  ;;  %v2689_v21 = vld [vmem:[#allocation3 + $0x1f8] sm:$0xff]  ;;  %v2687_v27 = vld [vmem:[#allocation3 + $0x1e8] sm:$0xff] }
 0x40d   : > { %9622 = vtanh.f32 %v2817_v24  ;;  %4467 = vst.msk [vmem:[#allocation3 + $0x110] sm:$0xff] %vm1945_vm2, %v4059_v25  ;;  %v2818_v34 = vadd.f32 %v9106_v31, %v2681_v30  ;;  %v4062_v36 = vadd.f32 %v9234_v32, %v11533_v54  ;;  %v2767_v38 = vpop.f32.mrb[55].mxu1  ;;  %v4053_v39 = vpop.f32.mrb[163].mxu0 }
 0x40e   : > { %9624 = vtanh.f32 %v2815_v28  ;;  %4465 = vst.msk [vmem:[#allocation3 + $0x100] sm:$0xff] %vm1945_vm2, %v4051_v29  ;;  %v2816_v40 = vadd.f32 %v2767_v38, %v2679_v37  ;;  %v4054_v42 = vadd.f32 %v11533_v54, %v4053_v39 }
 0x40f   : > { %v9615_v43 = vpop.eup %9614  ;;  %9626 = vtanh.f32 %v2818_v34  ;;  %4468 = vst.msk [vmem:[#allocation3 + $0x118] sm:$0xff] %vm1945_vm2, %v4062_v36 }
 0x410   : > { %v9617_v44 = vpop.eup %9616  ;;  %9628 = vtanh.f32 %v2816_v40  ;;  %4466 = vst.msk [vmem:[#allocation3 + $0x108] sm:$0xff] %vm1945_vm2, %v4054_v42 }
 0x411   : > { %v9619_v46 = vpop.eup %9618 }
 0x412   : > { %v9621_v33 = vpop.eup %9620  ;;  %v2844_v47 = vpack.c.bf16 %v9619_v46, %v9615_v43  ;;  %v9109_v48 = vpop.f32.mrb[56].mxu1 }
 0x413   : > { %v9237_v49 = vpop.f32.mrb[164].mxu0  ;;  %v2821_v50 = vadd.f32 %v9109_v48, %v2684_v45  ;;  %v2780_v52 = vpop.f32.mrb[57].mxu1  ;;  %v2843_v55 = vpack.c.bf16 %v9621_v33, %v9617_v44 }
 0x414   : > { %v4075_v51 = vadd.f32 %v9237_v49, %v11533_v54  ;;  %v4066_v53 = vpop.f32.mrb[165].mxu0  ;;  %2853 = vst.msk [vmem:[#allocation2 + $0xc8] sm:$0xff] %vm1945_vm2, %v2844_v47  ;;  %v2819_v56 = vadd.f32 %v2780_v52, %v2682_v35  ;;  %v9110_v59 = vpop.f32.mrb[58].mxu1 }
 0x415   : > { %v4067_v57 = vadd.f32 %v11533_v54, %v4066_v53  ;;  %v9238_v60 = vpop.f32.mrb[166].mxu0  ;;  %9630 = vtanh.f32 %v2821_v50  ;;  %v2822_v61 = vadd.f32 %v9110_v59, %v2685_v58  ;;  %v2783_v0 = vpop.f32.mrb[59].mxu1  ;;  %2852 = vst.msk [vmem:[#allocation2 + $0xc0] sm:$0xff] %vm1945_vm2, %v2843_v55  ;;  %9119 = vmatprep.mubr.msk.bf16.mxu1 %vm1945_vm2, %v2843_v55  ;;  %v2863_v59 = vld [vmem:[#allocation3 + $0x210] sm:$0xff] }
 0x416   : > { %4471 = vst.msk [vmem:[#allocation3 + $0x130] sm:$0xff] %vm1945_vm2, %v4075_v51  ;;  %v4078_v62 = vadd.f32 %v9238_v60, %v11533_v54  ;;  %v4069_v1 = vpop.f32.mrb[167].mxu0  ;;  %9632 = vtanh.f32 %v2819_v56  ;;  %v2820_v2 = vadd.f32 %v2783_v0, %v2683_v63  ;;  %9120 = vmatmul.mubr.msk.bf16.vlgmr.msra.gmra.mrb[64].mxu1 %vm1945_vm2, %v2844_v47  ;;  %v2861_v60 = vld [vmem:[#allocation3 + $0x200] sm:$0xff] }
 0x417   : > { %4469 = vst.msk [vmem:[#allocation3 + $0x120] sm:$0xff] %vm1945_vm2, %v4067_v57  ;;  %v4070_v3 = vadd.f32 %v11533_v54, %v4069_v1  ;;  %v9623_v4 = vpop.eup %9622  ;;  %9634 = vtanh.f32 %v2822_v61  ;;  %9136 = vmatpush3.bf16.msra.mxu1 %v11550_v16  ;;  %v2864_v1 = vld [vmem:[#allocation3 + $0x218] sm:$0xff] }
 0x418   : > { %4472 = vst.msk [vmem:[#allocation3 + $0x138] sm:$0xff] %vm1945_vm2, %v4078_v62  ;;  %v9625_v5 = vpop.eup %9624  ;;  %9636 = vtanh.f32 %v2820_v2  ;;  %9137 = vmatprep.subr.bf16.mxu1 %v11556_v19 }
 0x419   : > { %4470 = vst.msk [vmem:[#allocation3 + $0x128] sm:$0xff] %vm1945_vm2, %v4070_v3  ;;  %v9627_v7 = vpop.eup %9626 }
 0x41a   : > { %v9629_v9 = vpop.eup %9628  ;;  %v9113_v10 = vpop.f32.mrb[60].mxu1  ;;  %v2846_v12 = vpack.c.bf16 %v9627_v7, %v9623_v4  ;;  %v2862_v4 = vld [vmem:[#allocation3 + $0x208] sm:$0xff]  ;;  %v2867_v7 = vld [vmem:[#allocation3 + $0x230] sm:$0xff] }
 0x41b   : > { %v9241_v11 = vpop.f32.mrb[168].mxu0  ;;  %v2825_v13 = vadd.f32 %v9113_v10, %v2688_v6  ;;  %v2796_v14 = vpop.f32.mrb[61].mxu1  ;;  %v2845_v17 = vpack.c.bf16 %v9629_v9, %v9625_v5  ;;  %9138 = vmatpush3.bf16.msra.mxu1 %v11556_v19  ;;  %v3637_v29 = vld [vmem:[#allocation2 + $0xc8] sm:$0xff] }
 0x41c   : > { %v4091_v41 = vadd.f32 %v9241_v11, %v11533_v54  ;;  %v4082_v15 = vpop.f32.mrb[169].mxu0  ;;  %v2823_v18 = vadd.f32 %v2796_v14, %v2686_v8  ;;  %v9114_v22 = vpop.f32.mrb[62].mxu1  ;;  %v3636_v24 = vld [vmem:[#allocation2 + $0xc0] sm:$0xff]  ;;  %2855 = vst.msk [vmem:[#allocation2 + $0xd8] sm:$0xff] %vm1945_vm2, %v2846_v12  ;;  %9155 = vmatprep.subr.bf16.mxu1 %v11550_v16 }
 0x41d   : > { %v4083_v20 = vadd.f32 %v11533_v54, %v4082_v15  ;;  %v9242_v23 = vpop.f32.mrb[170].mxu0  ;;  %9638 = vtanh.f32 %v2825_v13  ;;  %v2826_v25 = vadd.f32 %v9114_v22, %v2689_v21  ;;  %v2799_v28 = vpop.f32.mrb[63].mxu1  ;;  %2854 = vst.msk [vmem:[#allocation2 + $0xd0] sm:$0xff] %vm1945_vm2, %v2845_v17  ;;  %9123 = vmatprep.mubr.msk.bf16.mxu1 %vm1945_vm2, %v2845_v17  ;;  %9247 = vmatprep.mubr.msk.bf16.mxu0 %vm1945_vm2, %v3636_v24  ;;  %v2865_v8 = vld [vmem:[#allocation3 + $0x220] sm:$0xff]  ;;  %v2868_v17 = vld [vmem:[#allocation3 + $0x238] sm:$0xff]  ;;  %v2866_v24 = vld [vmem:[#allocation3 + $0x228] sm:$0xff] }
 0x41e   : > { %4475 = vst.msk [vmem:[#allocation3 + $0x150] sm:$0xff] %vm1945_vm2, %v4091_v41  ;;  %v4094_v26 = vadd.f32 %v9242_v23, %v11533_v54  ;;  %v4085_v19 = vpop.f32.mrb[171].mxu0  ;;  %9640 = vtanh.f32 %v2823_v18  ;;  %v2824_v16 = vadd.f32 %v2799_v28, %v2687_v27  ;;  %9124 = vmatmul.mubr.msk.bf16.gmra.mrb[68].mxu1 %vm1945_vm2, %v2846_v12  ;;  %9248 = vmatmul.mubr.msk.bf16.gmra.mrb[176].mxu0 %vm1945_vm2, %v3637_v29  ;;  %v11731_v22 = vld [vmem:[%s12844_s5 + $0x1] ss:$0 sm:$0xff]  ;;  %v2871_v29 = vld [vmem:[#allocation3 + $0x250] sm:$0xff] }
 0x41f   : > { %4473 = vst.msk [vmem:[#allocation3 + $0x140] sm:$0xff] %vm1945_vm2, %v4083_v20  ;;  %v4086_v30 = vadd.f32 %v11533_v54, %v4085_v19  ;;  %v9631_v31 = vpop.eup %9630  ;;  %9642 = vtanh.f32 %v2826_v25 }
 0x420   : > { %4476 = vst.msk [vmem:[#allocation3 + $0x158] sm:$0xff] %vm1945_vm2, %v4094_v26  ;;  %v9633_v32 = vpop.eup %9632  ;;  %9644 = vtanh.f32 %v2824_v16 }
 0x421   : > { %4474 = vst.msk [vmem:[#allocation3 + $0x148] sm:$0xff] %vm1945_vm2, %v4086_v30  ;;  %v9635_v34 = vpop.eup %9634  ;;  %v2869_v30 = vld [vmem:[#allocation3 + $0x240] sm:$0xff] }
 0x422   : > { %v9637_v36 = vpop.eup %9636  ;;  %v9245_v37 = vpop.f32.mrb[172].mxu0  ;;  %v2848_v38 = vpack.c.bf16 %v9635_v34, %v9631_v31 }
 0x423   : > { %v4107_v39 = vadd.f32 %v9245_v37, %v11533_v54  ;;  %v4098_v40 = vpop.f32.mrb[173].mxu0  ;;  %v2847_v42 = vpack.c.bf16 %v9637_v36, %v9633_v32  ;;  %v3639_v33 = vld [vmem:[#allocation2 + $0xd8] sm:$0xff] }
 0x424   : > { %v4099_v43 = vadd.f32 %v11533_v54, %v4098_v40  ;;  %v9246_v44 = vpop.f32.mrb[174].mxu0  ;;  %v3638_v45 = vld [vmem:[#allocation2 + $0xd0] sm:$0xff]  ;;  %2857 = vst.msk [vmem:[#allocation2 + $0xe8] sm:$0xff] %vm1945_vm2, %v2848_v38 }
 0x425   : > { %4479 = vst.msk [vmem:[#allocation3 + $0x170] sm:$0xff] %vm1945_vm2, %v4107_v39  ;;  %v4110_v46 = vadd.f32 %v9246_v44, %v11533_v54  ;;  %2856 = vst.msk [vmem:[#allocation2 + $0xe0] sm:$0xff] %vm1945_vm2, %v2847_v42  ;;  %9127 = vmatprep.mubr.msk.bf16.mxu1 %vm1945_vm2, %v2847_v42  ;;  %v4101_v35 = vpop.f32.mrb[175].mxu0  ;;  %9251 = vmatprep.mubr.msk.bf16.mxu0 %vm1945_vm2, %v3638_v45  ;;  %v2872_v45 = vld [vmem:[#allocation3 + $0x258] sm:$0xff] }
 0x426   : > { %4477 = vst.msk [vmem:[#allocation3 + $0x160] sm:$0xff] %vm1945_vm2, %v4099_v43  ;;  %v4102_v47 = vadd.f32 %v11533_v54, %v4101_v35  ;;  %9128 = vmatmul.mubr.msk.bf16.gmra.mrb[72].mxu1 %vm1945_vm2, %v2848_v38  ;;  %9252 = vmatmul.mubr.msk.bf16.gmra.mrb[180].mxu0 %vm1945_vm2, %v3639_v33 }
 0x427   : > { %v9639_v48 = vpop.eup %9638  ;;  %4480 = vst.msk [vmem:[#allocation3 + $0x178] sm:$0xff] %vm1945_vm2, %v4110_v46 }
 0x428   : > { %v9641_v49 = vpop.eup %9640  ;;  %4478 = vst.msk [vmem:[#allocation3 + $0x168] sm:$0xff] %vm1945_vm2, %v4102_v47 }
 0x429   : > { %v9643_v50 = vpop.eup %9642 }
 0x42a   : > { %v9645_v51 = vpop.eup %9644  ;;  %v2850_v52 = vpack.c.bf16 %v9643_v50, %v9639_v48  ;;  %v2870_v48 = vld [vmem:[#allocation3 + $0x248] sm:$0xff] }
 0x42b   : > { %v2849_v53 = vpack.c.bf16 %v9645_v51, %v9641_v49  ;;  %v3641_v56 = vld [vmem:[#allocation2 + $0xe8] sm:$0xff] }
 0x42c   : > { %v3640_v55 = vld [vmem:[#allocation2 + $0xe0] sm:$0xff]  ;;  %2859 = vst.msk [vmem:[#allocation2 + $0xf8] sm:$0xff] %vm1945_vm2, %v2850_v52 }
 0x42d   : > { %2858 = vst.msk [vmem:[#allocation2 + $0xf0] sm:$0xff] %vm1945_vm2, %v2849_v53  ;;  %9131 = vmatprep.mubr.msk.bf16.mxu1 %vm1945_vm2, %v2849_v53  ;;  %9255 = vmatprep.mubr.msk.bf16.mxu0 %vm1945_vm2, %v3640_v55  ;;  %v11752_v55 = vld [vmem:[%s12843_s4] sm:$0xff]  }
 0x42e   : > { %9132 = vmatmul.mubr.msk.bf16.gmra.mrb[76].mxu1 %vm1945_vm2, %v2850_v52  ;;  %9256 = vmatmul.mubr.msk.bf16.gmra.mrb[184].mxu0 %vm1945_vm2, %v3641_v56 }
 0x433   : > { %v3643_v58 = vld [vmem:[#allocation2 + $0xf8] sm:$0xff] }
 0x434   : > { %v3642_v57 = vld [vmem:[#allocation2 + $0xf0] sm:$0xff] }
 0x435   : > { %9259 = vmatprep.mubr.msk.bf16.mxu0 %vm1945_vm2, %v3642_v57  ;;  %v2875_v57 = vld [vmem:[#allocation3 + $0x270] sm:$0xff] }
 0x436   : > { %9260 = vmatmul.mubr.msk.bf16.gmra.mrb[188].mxu0 %vm1945_vm2, %v3643_v58  ;;  %v11759_v58 = vld [vmem:[%s12843_s4 + $0x8] sm:$0xff]  }
 0x4e9   : > { %v9121_v61 = vpop.f32.mrb[64].mxu1 }
 0x4ea   : > { %v3000_v62 = vadd.f32 %v9121_v61, %v2863_v59  ;;  %v2935_v63 = vpop.f32.mrb[65].mxu1 }
 0x4eb   : > { %v2998_v0 = vadd.f32 %v2935_v63, %v2861_v60  ;;  %v9122_v2 = vpop.f32.mrb[66].mxu1  ;;  %v2873_v60 = vld [vmem:[#allocation3 + $0x260] sm:$0xff] }
 0x4ec   : > { %9646 = vtanh.f32 %v3000_v62  ;;  %v3001_v3 = vadd.f32 %v9122_v2, %v2864_v1  ;;  %v2938_v5 = vpop.f32.mrb[67].mxu1 }
 0x4ed   : > { %9648 = vtanh.f32 %v2998_v0  ;;  %v2999_v6 = vadd.f32 %v2938_v5, %v2862_v4 }
 0x4ee   : > { %9650 = vtanh.f32 %v3001_v3 }
 0x4ef   : > { %9652 = vtanh.f32 %v2999_v6 }
 0x4f1   : > { %v9125_v9 = vpop.f32.mrb[68].mxu1  ;;  %v9249_v10 = vpop.f32.mrb[176].mxu0 }
 0x4f2   : > { %v3004_v11 = vadd.f32 %v9125_v9, %v2867_v7  ;;  %v4123_v12 = vadd.f32 %v9249_v10, %v11533_v54  ;;  %v2951_v13 = vpop.f32.mrb[69].mxu1  ;;  %v4114_v41 = vpop.f32.mrb[177].mxu0 }
 0x4f3   : > { %v3002_v14 = vadd.f32 %v2951_v13, %v2865_v8  ;;  %v4115_v15 = vadd.f32 %v11533_v54, %v4114_v41  ;;  %v9126_v18 = vpop.f32.mrb[70].mxu1  ;;  %v9250_v20 = vpop.f32.mrb[178].mxu0  ;;  %v2876_v8 = vld [vmem:[#allocation3 + $0x278] sm:$0xff]  ;;  %v2874_v41 = vld [vmem:[#allocation3 + $0x268] sm:$0xff] }
 0x4f4   : > { %9654 = vtanh.f32 %v3004_v11  ;;  %4483 = vst.msk [vmem:[#allocation3 + $0x190] sm:$0xff] %vm1945_vm2, %v4123_v12  ;;  %v3005_v21 = vadd.f32 %v9126_v18, %v2868_v17  ;;  %v4126_v23 = vadd.f32 %v11731_v22, %v9250_v20  ;;  %v2954_v25 = vpop.f32.mrb[71].mxu1  ;;  %v4117_v26 = vpop.f32.mrb[179].mxu0 }
 0x4f5   : > { %9656 = vtanh.f32 %v3002_v14  ;;  %4481 = vst.msk [vmem:[#allocation3 + $0x180] sm:$0xff] %vm1945_vm2, %v4115_v15  ;;  %v3003_v54 = vadd.f32 %v2954_v25, %v2866_v24  ;;  %v4118_v27 = vadd.f32 %v11731_v22, %v4117_v26 }
 0x4f6   : > { %v9647_v28 = vpop.eup %9646  ;;  %9658 = vtanh.f32 %v3005_v21  ;;  %4484 = vst.msk [vmem:[#allocation3 + $0x198] sm:$0xff] %vm1945_vm2, %v4126_v23 }
 0x4f7   : > { %v9649_v19 = vpop.eup %9648  ;;  %9660 = vtanh.f32 %v3003_v54  ;;  %4482 = vst.msk [vmem:[#allocation3 + $0x188] sm:$0xff] %vm1945_vm2, %v4118_v27 }
 0x4f8   : > { %v9651_v16 = vpop.eup %9650 }
 0x4f9   : > { %v9653_v31 = vpop.eup %9652  ;;  %v3031_v32 = vpack.c.bf16 %v9651_v16, %v9647_v28  ;;  %v9129_v34 = vpop.f32.mrb[72].mxu1 }
 0x4fa   : > { %v9253_v36 = vpop.f32.mrb[180].mxu0  ;;  %v3008_v37 = vadd.f32 %v9129_v34, %v2871_v29  ;;  %v2967_v39 = vpop.f32.mrb[73].mxu1  ;;  %v3030_v42 = vpack.c.bf16 %v9653_v31, %v9649_v19 }
 0x4fb   : > { %v4139_v38 = vadd.f32 %v11731_v22, %v9253_v36  ;;  %v4130_v40 = vpop.f32.mrb[181].mxu0  ;;  %3040 = vst.msk [vmem:[#allocation2 + $0x108] sm:$0xff] %vm1945_vm2, %v3031_v32  ;;  %v3006_v43 = vadd.f32 %v2967_v39, %v2869_v30  ;;  %v9130_v46 = vpop.f32.mrb[74].mxu1 }
 0x4fc   : > { %v4131_v44 = vadd.f32 %v11731_v22, %v4130_v40  ;;  %v9254_v35 = vpop.f32.mrb[182].mxu0  ;;  %9662 = vtanh.f32 %v3008_v37  ;;  %v3009_v33 = vadd.f32 %v9130_v46, %v2872_v45  ;;  %v2970_v49 = vpop.f32.mrb[75].mxu1  ;;  %3039 = vst.msk [vmem:[#allocation2 + $0x100] sm:$0xff] %vm1945_vm2, %v3030_v42  ;;  %9139 = vmatprep.mubr.msk.bf16.mxu1 %vm1945_vm2, %v3030_v42 }
 0x4fd   : > { %4487 = vst.msk [vmem:[#allocation3 + $0x1b0] sm:$0xff] %vm1945_vm2, %v4139_v38  ;;  %v4142_v47 = vadd.f32 %v11731_v22, %v9254_v35  ;;  %v4133_v50 = vpop.f32.mrb[183].mxu0  ;;  %9664 = vtanh.f32 %v3006_v43  ;;  %v3007_v51 = vadd.f32 %v2970_v49, %v2870_v48  ;;  %9140 = vmatmul.mubr.msk.bf16.vlgmr.msra.gmra.mrb[80].mxu1 %vm1945_vm2, %v3031_v32 }
 0x4fe   : > { %4485 = vst.msk [vmem:[#allocation3 + $0x1a0] sm:$0xff] %vm1945_vm2, %v4131_v44  ;;  %v4134_v52 = vadd.f32 %v11731_v22, %v4133_v50  ;;  %v9655_v53 = vpop.eup %9654  ;;  %9666 = vtanh.f32 %v3009_v33  ;;  %9156 = vmatpush3.bf16.msra.mxu1 %v11752_v55  ;;  %v3050_v33 = vld [vmem:[#allocation3 + $0x290] sm:$0xff] }
 0x4ff   : > { %4488 = vst.msk [vmem:[#allocation3 + $0x1b8] sm:$0xff] %vm1945_vm2, %v4142_v47  ;;  %v9657_v56 = vpop.eup %9656  ;;  %9668 = vtanh.f32 %v3007_v51  ;;  %9157 = vmatprep.subr.bf16.mxu1 %v11759_v58  ;;  %v3048_v47 = vld [vmem:[#allocation3 + $0x280] sm:$0xff] }
 0x500   : > { %4486 = vst.msk [vmem:[#allocation3 + $0x1a8] sm:$0xff] %vm1945_vm2, %v4134_v52  ;;  %v9659_v59 = vpop.eup %9658  ;;  %v3051_v52 = vld [vmem:[#allocation3 + $0x298] sm:$0xff] }
 0x501   : > { %v9661_v61 = vpop.eup %9660  ;;  %v9133_v62 = vpop.f32.mrb[76].mxu1  ;;  %v3033_v0 = vpack.c.bf16 %v9659_v59, %v9655_v53 }
 0x502   : > { %v9257_v63 = vpop.f32.mrb[184].mxu0  ;;  %v3012_v1 = vadd.f32 %v9133_v62, %v2875_v57  ;;  %v2983_v3 = vpop.f32.mrb[77].mxu1  ;;  %v3032_v5 = vpack.c.bf16 %v9661_v61, %v9657_v56  ;;  %9158 = vmatpush3.bf16.msra.mxu1 %v11759_v58  ;;  %v3645_v17 = vld [vmem:[#allocation2 + $0x108] sm:$0xff]  ;;  %v3054_v61 = vld [vmem:[#allocation3 + $0x2b0] sm:$0xff]  ;;  %v3052_v62 = vld [vmem:[#allocation3 + $0x2a0] sm:$0xff] }
 0x503   : > { %v4155_v2 = vadd.f32 %v11731_v22, %v9257_v63  ;;  %v4146_v4 = vpop.f32.mrb[185].mxu0  ;;  %v3010_v6 = vadd.f32 %v2983_v3, %v2873_v60  ;;  %v9134_v9 = vpop.f32.mrb[78].mxu1  ;;  %v3644_v11 = vld [vmem:[#allocation2 + $0x100] sm:$0xff]  ;;  %3042 = vst.msk [vmem:[#allocation2 + $0x118] sm:$0xff] %vm1945_vm2, %v3033_v0  ;;  %9175 = vmatprep.subr.bf16.mxu1 %v11752_v55  ;;  %v3049_v57 = vld [vmem:[#allocation3 + $0x288] sm:$0xff] }
 0x504   : > { %v4147_v7 = vadd.f32 %v11731_v22, %v4146_v4  ;;  %v9258_v10 = vpop.f32.mrb[186].mxu0  ;;  %9670 = vtanh.f32 %v3012_v1  ;;  %v3013_v12 = vadd.f32 %v9134_v9, %v2876_v8  ;;  %v2986_v14 = vpop.f32.mrb[79].mxu1  ;;  %3041 = vst.msk [vmem:[#allocation2 + $0x110] sm:$0xff] %vm1945_vm2, %v3032_v5  ;;  %9143 = vmatprep.mubr.msk.bf16.mxu1 %vm1945_vm2, %v3032_v5  ;;  %9263 = vmatprep.mubr.msk.bf16.mxu0 %vm1945_vm2, %v3644_v11 }
 0x505   : > { %4491 = vst.msk [vmem:[#allocation3 + $0x1d0] sm:$0xff] %vm1945_vm2, %v4155_v2  ;;  %v4158_v13 = vadd.f32 %v11731_v22, %v9258_v10  ;;  %v4149_v15 = vpop.f32.mrb[187].mxu0  ;;  %9672 = vtanh.f32 %v3010_v6  ;;  %v3011_v18 = vadd.f32 %v2986_v14, %v2874_v41  ;;  %9144 = vmatmul.mubr.msk.bf16.gmra.mrb[84].mxu1 %vm1945_vm2, %v3033_v0  ;;  %9264 = vmatmul.mubr.msk.bf16.gmra.mrb[192].mxu0 %vm1945_vm2, %v3645_v17 }
 0x506   : > { %4489 = vst.msk [vmem:[#allocation3 + $0x1c0] sm:$0xff] %vm1945_vm2, %v4147_v7  ;;  %v4150_v20 = vadd.f32 %v11731_v22, %v4149_v15  ;;  %v9663_v21 = vpop.eup %9662  ;;  %9674 = vtanh.f32 %v3013_v12  ;;  %v3055_v7 = vld [vmem:[#allocation3 + $0x2b8] sm:$0xff]  ;;  %v3053_v12 = vld [vmem:[#allocation3 + $0x2a8] sm:$0xff] }
 0x507   : > { %4492 = vst.msk [vmem:[#allocation3 + $0x1d8] sm:$0xff] %vm1945_vm2, %v4158_v13  ;;  %v9665_v23 = vpop.eup %9664  ;;  %9676 = vtanh.f32 %v3011_v18 }
 0x508   : > { %4490 = vst.msk [vmem:[#allocation3 + $0x1c8] sm:$0xff] %vm1945_vm2, %v4150_v20  ;;  %v9667_v24 = vpop.eup %9666  ;;  %v3058_v20 = vld [vmem:[#allocation3 + $0x2d0] sm:$0xff] }
 0x509   : > { %v9669_v25 = vpop.eup %9668  ;;  %v9261_v26 = vpop.f32.mrb[188].mxu0  ;;  %v3035_v54 = vpack.c.bf16 %v9667_v24, %v9663_v21 }
 0x50a   : > { %v4171_v27 = vadd.f32 %v11731_v22, %v9261_v26  ;;  %v4162_v28 = vpop.f32.mrb[189].mxu0  ;;  %v3034_v19 = vpack.c.bf16 %v9669_v25, %v9665_v23  ;;  %v3647_v34 = vld [vmem:[#allocation2 + $0x118] sm:$0xff]  ;;  %v3056_v23 = vld [vmem:[#allocation3 + $0x2c0] sm:$0xff] }
 0x50b   : > { %v4163_v29 = vadd.f32 %v11731_v22, %v4162_v28  ;;  %v9262_v16 = vpop.f32.mrb[190].mxu0  ;;  %v3646_v30 = vld [vmem:[#allocation2 + $0x110] sm:$0xff]  ;;  %3044 = vst.msk [vmem:[#allocation2 + $0x128] sm:$0xff] %vm1945_vm2, %v3035_v54 }
 0x50c   : > { %4495 = vst.msk [vmem:[#allocation3 + $0x1f0] sm:$0xff] %vm1945_vm2, %v4171_v27  ;;  %v4174_v31 = vadd.f32 %v11731_v22, %v9262_v16  ;;  %3043 = vst.msk [vmem:[#allocation2 + $0x120] sm:$0xff] %vm1945_vm2, %v3034_v19  ;;  %9147 = vmatprep.mubr.msk.bf16.mxu1 %vm1945_vm2, %v3034_v19  ;;  %v4165_v32 = vpop.f32.mrb[191].mxu0  ;;  %9267 = vmatprep.mubr.msk.bf16.mxu0 %vm1945_vm2, %v3646_v30 }
 0x50d   : > { %4493 = vst.msk [vmem:[#allocation3 + $0x1e0] sm:$0xff] %vm1945_vm2, %v4163_v29  ;;  %v4166_v36 = vadd.f32 %v11731_v22, %v4165_v32  ;;  %9148 = vmatmul.mubr.msk.bf16.gmra.mrb[88].mxu1 %vm1945_vm2, %v3035_v54  ;;  %9268 = vmatmul.mubr.msk.bf16.gmra.mrb[196].mxu0 %vm1945_vm2, %v3647_v34  ;;  %v3059_v32 = vld [vmem:[#allocation3 + $0x2d8] sm:$0xff] }
 0x50e   : > { %v9671_v37 = vpop.eup %9670  ;;  %4496 = vst.msk [vmem:[#allocation3 + $0x1f8] sm:$0xff] %vm1945_vm2, %v4174_v31 }
 0x50f   : > { %v9673_v38 = vpop.eup %9672  ;;  %4494 = vst.msk [vmem:[#allocation3 + $0x1e8] sm:$0xff] %vm1945_vm2, %v4166_v36 }
 0x510   : > { %v9675_v39 = vpop.eup %9674 }
 0x511   : > { %v9677_v40 = vpop.eup %9676  ;;  %v3037_v42 = vpack.c.bf16 %v9675_v39, %v9671_v37  ;;  %v3057_v39 = vld [vmem:[#allocation3 + $0x2c8] sm:$0xff] }
 0x512   : > { %v3036_v43 = vpack.c.bf16 %v9677_v40, %v9673_v38  ;;  %v3649_v45 = vld [vmem:[#allocation2 + $0x128] sm:$0xff] }
 0x513   : > { %v3648_v44 = vld [vmem:[#allocation2 + $0x120] sm:$0xff]  ;;  %3046 = vst.msk [vmem:[#allocation2 + $0x138] sm:$0xff] %vm1945_vm2, %v3037_v42 }
 0x514   : > { %3045 = vst.msk [vmem:[#allocation2 + $0x130] sm:$0xff] %vm1945_vm2, %v3036_v43  ;;  %9151 = vmatprep.mubr.msk.bf16.mxu1 %vm1945_vm2, %v3036_v43  ;;  %9271 = vmatprep.mubr.msk.bf16.mxu0 %vm1945_vm2, %v3648_v44 }
 0x515   : > { %9152 = vmatmul.mubr.msk.bf16.gmra.mrb[92].mxu1 %vm1945_vm2, %v3037_v42  ;;  %9272 = vmatmul.mubr.msk.bf16.gmra.mrb[200].mxu0 %vm1945_vm2, %v3649_v45 }
 0x51a   : > { %v3651_v35 = vld [vmem:[#allocation2 + $0x138] sm:$0xff] }
 0x51b   : > { %v3650_v46 = vld [vmem:[#allocation2 + $0x130] sm:$0xff] }
 0x51c   : > { %9275 = vmatprep.mubr.msk.bf16.mxu0 %vm1945_vm2, %v3650_v46 }
 0x51d   : > { %9276 = vmatmul.mubr.msk.bf16.gmra.mrb[204].mxu0 %vm1945_vm2, %v3651_v35  ;;  %v3062_v35 = vld [vmem:[#allocation3 + $0x2f0] sm:$0xff] }
 0x5d0   : > { %v9141_v48 = vpop.f32.mrb[80].mxu1 }
 0x5d1   : > { %v3187_v49 = vadd.f32 %v9141_v48, %v3050_v33  ;;  %v3122_v50 = vpop.f32.mrb[81].mxu1 }
 0x5d2   : > { %v3185_v51 = vadd.f32 %v3122_v50, %v3048_v47  ;;  %v9142_v53 = vpop.f32.mrb[82].mxu1  ;;  %v3060_v47 = vld [vmem:[#allocation3 + $0x2e0] sm:$0xff] }
 0x5d3   : > { %9678 = vtanh.f32 %v3187_v49  ;;  %v3188_v56 = vadd.f32 %v9142_v53, %v3051_v52  ;;  %v3125_v59 = vpop.f32.mrb[83].mxu1 }
 0x5d4   : > { %9680 = vtanh.f32 %v3185_v51  ;;  %v3186_v60 = vadd.f32 %v3125_v59, %v3049_v57 }
 0x5d5   : > { %9682 = vtanh.f32 %v3188_v56 }
 0x5d6   : > { %9684 = vtanh.f32 %v3186_v60 }
 0x5d8   : > { %v9145_v63 = vpop.f32.mrb[84].mxu1  ;;  %v9265_v0 = vpop.f32.mrb[192].mxu0 }
 0x5d9   : > { %v3191_v1 = vadd.f32 %v9145_v63, %v3054_v61  ;;  %v4187_v2 = vadd.f32 %v11731_v22, %v9265_v0  ;;  %v3138_v3 = vpop.f32.mrb[85].mxu1  ;;  %v4178_v4 = vpop.f32.mrb[193].mxu0  ;;  %v3063_v61 = vld [vmem:[#allocation3 + $0x2f8] sm:$0xff] }
 0x5da   : > { %v3189_v5 = vadd.f32 %v3138_v3, %v3052_v62  ;;  %v4179_v6 = vadd.f32 %v11731_v22, %v4178_v4  ;;  %v9146_v8 = vpop.f32.mrb[86].mxu1  ;;  %v9266_v9 = vpop.f32.mrb[194].mxu0  ;;  %v3061_v3 = vld [vmem:[#allocation3 + $0x2e8] sm:$0xff] }
 0x5db   : > { %9686 = vtanh.f32 %v3191_v1  ;;  %4499 = vst.msk [vmem:[#allocation3 + $0x210] sm:$0xff] %vm1945_vm2, %v4187_v2  ;;  %v3192_v10 = vadd.f32 %v9146_v8, %v3055_v7  ;;  %v4190_v11 = vadd.f32 %v11731_v22, %v9266_v9  ;;  %v3141_v13 = vpop.f32.mrb[87].mxu1  ;;  %v4181_v41 = vpop.f32.mrb[195].mxu0 }
 0x5dc   : > { %9688 = vtanh.f32 %v3189_v5  ;;  %4497 = vst.msk [vmem:[#allocation3 + $0x200] sm:$0xff] %vm1945_vm2, %v4179_v6  ;;  %v3190_v14 = vadd.f32 %v3141_v13, %v3053_v12  ;;  %v4182_v15 = vadd.f32 %v11731_v22, %v4181_v41 }
 0x5dd   : > { %v9679_v17 = vpop.eup %9678  ;;  %9690 = vtanh.f32 %v3192_v10  ;;  %4500 = vst.msk [vmem:[#allocation3 + $0x218] sm:$0xff] %vm1945_vm2, %v4190_v11 }
 0x5de   : > { %v9681_v18 = vpop.eup %9680  ;;  %9692 = vtanh.f32 %v3190_v14  ;;  %4498 = vst.msk [vmem:[#allocation3 + $0x208] sm:$0xff] %vm1945_vm2, %v4182_v15 }
 0x5df   : > { %v9683_v21 = vpop.eup %9682 }
 0x5e0   : > { %v9685_v24 = vpop.eup %9684  ;;  %v3218_v25 = vpack.c.bf16 %v9683_v21, %v9679_v17  ;;  %v9149_v26 = vpop.f32.mrb[88].mxu1 }
 0x5e1   : > { %v9269_v54 = vpop.f32.mrb[196].mxu0  ;;  %v3195_v27 = vadd.f32 %v9149_v26, %v3058_v20  ;;  %v3154_v19 = vpop.f32.mrb[89].mxu1  ;;  %v3217_v16 = vpack.c.bf16 %v9685_v24, %v9681_v18 }
 0x5e2   : > { %v4203_v28 = vadd.f32 %v11731_v22, %v9269_v54  ;;  %v4194_v29 = vpop.f32.mrb[197].mxu0  ;;  %3227 = vst.msk [vmem:[#allocation2 + $0x148] sm:$0xff] %vm1945_vm2, %v3218_v25  ;;  %v3193_v30 = vadd.f32 %v3154_v19, %v3056_v23  ;;  %v9150_v34 = vpop.f32.mrb[90].mxu1 }
 0x5e3   : > { %v4195_v31 = vadd.f32 %v11731_v22, %v4194_v29  ;;  %v9270_v36 = vpop.f32.mrb[198].mxu0  ;;  %9694 = vtanh.f32 %v3195_v27  ;;  %v3196_v37 = vadd.f32 %v9150_v34, %v3059_v32  ;;  %v3157_v40 = vpop.f32.mrb[91].mxu1  ;;  %3226 = vst.msk [vmem:[#allocation2 + $0x140] sm:$0xff] %vm1945_vm2, %v3217_v16  ;;  %9159 = vmatprep.mubr.msk.bf16.mxu1 %vm1945_vm2, %v3217_v16  ;;  %v11862_v34 = vld [vmem:[%s12843_s4 + $0x10] sm:$0xff]  }
 0x5e4   : > { %4503 = vst.msk [vmem:[#allocation3 + $0x230] sm:$0xff] %vm1945_vm2, %v4203_v28  ;;  %v4206_v38 = vadd.f32 %v11731_v22, %v9270_v36  ;;  %v4197_v42 = vpop.f32.mrb[199].mxu0  ;;  %9696 = vtanh.f32 %v3193_v30  ;;  %v3194_v43 = vadd.f32 %v3157_v40, %v3057_v39  ;;  %9160 = vmatmul.mubr.msk.bf16.vlgmr.msra.gmra.mrb[96].mxu1 %vm1945_vm2, %v3218_v25  ;;  %v3237_v36 = vld [vmem:[#allocation3 + $0x310] sm:$0xff] }
 0x5e5   : > { %4501 = vst.msk [vmem:[#allocation3 + $0x220] sm:$0xff] %vm1945_vm2, %v4195_v31  ;;  %v4198_v44 = vadd.f32 %v11731_v22, %v4197_v42  ;;  %v9687_v45 = vpop.eup %9686  ;;  %9698 = vtanh.f32 %v3196_v37  ;;  %9176 = vmatpush3.bf16.msra.mxu1 %v11752_v55  ;;  %v3235_v37 = vld [vmem:[#allocation3 + $0x300] sm:$0xff] }
 0x5e6   : > { %4504 = vst.msk [vmem:[#allocation3 + $0x238] sm:$0xff] %vm1945_vm2, %v4206_v38  ;;  %v9689_v46 = vpop.eup %9688  ;;  %9700 = vtanh.f32 %v3194_v43  ;;  %9177 = vmatprep.subr.bf16.mxu1 %v11759_v58  ;;  %v3238_v43 = vld [vmem:[#allocation3 + $0x318] sm:$0xff] }
 0x5e7   : > { %4502 = vst.msk [vmem:[#allocation3 + $0x228] sm:$0xff] %vm1945_vm2, %v4198_v44  ;;  %v9691_v33 = vpop.eup %9690 }
 0x5e8   : > { %v9693_v48 = vpop.eup %9692  ;;  %v9153_v49 = vpop.f32.mrb[92].mxu1  ;;  %v3220_v51 = vpack.c.bf16 %v9691_v33, %v9687_v45 }
 0x5e9   : > { %v9273_v50 = vpop.f32.mrb[200].mxu0  ;;  %v3199_v52 = vadd.f32 %v9153_v49, %v3062_v35  ;;  %v3170_v56 = vpop.f32.mrb[93].mxu1  ;;  %v3219_v59 = vpack.c.bf16 %v9693_v48, %v9689_v46  ;;  %9178 = vmatpush3.bf16.msra.mxu1 %v11759_v58  ;;  %v3653_v5 = vld [vmem:[#allocation2 + $0x148] sm:$0xff]  ;;  %v3239_v48 = vld [vmem:[#allocation3 + $0x320] sm:$0xff] }
 0x5ea   : > { %v4219_v53 = vadd.f32 %v11731_v22, %v9273_v50  ;;  %v4210_v57 = vpop.f32.mrb[201].mxu0  ;;  %v3197_v55 = vadd.f32 %v3170_v56, %v3060_v47  ;;  %v9154_v62 = vpop.f32.mrb[94].mxu1  ;;  %v3652_v0 = vld [vmem:[#allocation2 + $0x140] sm:$0xff]  ;;  %3229 = vst.msk [vmem:[#allocation2 + $0x158] sm:$0xff] %vm1945_vm2, %v3220_v51  ;;  %9327 = vmatprep.subr.bf16.mxu1 %v11862_v34  ;;  %v3236_v46 = vld [vmem:[#allocation3 + $0x308] sm:$0xff]  ;;  %v3241_v47 = vld [vmem:[#allocation3 + $0x330] sm:$0xff] }
 0x5eb   : > { %v4211_v60 = vadd.f32 %v11731_v22, %v4210_v57  ;;  %v9274_v63 = vpop.f32.mrb[202].mxu0  ;;  %9702 = vtanh.f32 %v3199_v52  ;;  %v3200_v1 = vadd.f32 %v9154_v62, %v3063_v61  ;;  %v3173_v4 = vpop.f32.mrb[95].mxu1  ;;  %3228 = vst.msk [vmem:[#allocation2 + $0x150] sm:$0xff] %vm1945_vm2, %v3219_v59  ;;  %9163 = vmatprep.mubr.msk.bf16.mxu1 %vm1945_vm2, %v3219_v59  ;;  %9279 = vmatprep.mubr.msk.bf16.mxu0 %vm1945_vm2, %v3652_v0  ;;  %v3240_v0 = vld [vmem:[#allocation3 + $0x328] sm:$0xff] }
 0x5ec   : > { %4507 = vst.msk [vmem:[#allocation3 + $0x250] sm:$0xff] %vm1945_vm2, %v4219_v53  ;;  %v4222_v2 = vadd.f32 %v11731_v22, %v9274_v63  ;;  %v4213_v58 = vpop.f32.mrb[203].mxu0  ;;  %9704 = vtanh.f32 %v3197_v55  ;;  %v3198_v6 = vadd.f32 %v3173_v4, %v3061_v3  ;;  %9164 = vmatmul.mubr.msk.bf16.gmra.mrb[100].mxu1 %vm1945_vm2, %v3220_v51  ;;  %9280 = vmatmul.mubr.msk.bf16.gmra.mrb[208].mxu0 %vm1945_vm2, %v3653_v5  ;;  %v3242_v55 = vld [vmem:[#allocation3 + $0x338] sm:$0xff] }
 0x5ed   : > { %4505 = vst.msk [vmem:[#allocation3 + $0x240] sm:$0xff] %vm1945_vm2, %v4211_v60  ;;  %v4214_v7 = vadd.f32 %v11731_v22, %v4213_v58  ;;  %v9695_v8 = vpop.eup %9694  ;;  %9706 = vtanh.f32 %v3200_v1 }
 0x5ee   : > { %4508 = vst.msk [vmem:[#allocation3 + $0x258] sm:$0xff] %vm1945_vm2, %v4222_v2  ;;  %v9697_v9 = vpop.eup %9696  ;;  %9708 = vtanh.f32 %v3198_v6  ;;  %v3245_v6 = vld [vmem:[#allocation3 + $0x350] sm:$0xff] }
 0x5ef   : > { %4506 = vst.msk [vmem:[#allocation3 + $0x248] sm:$0xff] %vm1945_vm2, %v4214_v7  ;;  %v9699_v10 = vpop.eup %9698 }
 0x5f0   : > { %v9701_v11 = vpop.eup %9700  ;;  %v9277_v12 = vpop.f32.mrb[204].mxu0  ;;  %v3222_v13 = vpack.c.bf16 %v9699_v10, %v9695_v8  ;;  %v3243_v8 = vld [vmem:[#allocation3 + $0x340] sm:$0xff] }
 0x5f1   : > { %v4235_v41 = vadd.f32 %v11731_v22, %v9277_v12  ;;  %v4226_v14 = vpop.f32.mrb[205].mxu0  ;;  %v3221_v15 = vpack.c.bf16 %v9701_v11, %v9697_v9  ;;  %v3655_v24 = vld [vmem:[#allocation2 + $0x158] sm:$0xff] }
 0x5f2   : > { %v4227_v17 = vadd.f32 %v11731_v22, %v4226_v14  ;;  %v9278_v18 = vpop.f32.mrb[206].mxu0  ;;  %v3654_v20 = vld [vmem:[#allocation2 + $0x150] sm:$0xff]  ;;  %3231 = vst.msk [vmem:[#allocation2 + $0x168] sm:$0xff] %vm1945_vm2, %v3222_v13 }
 0x5f3   : > { %4511 = vst.msk [vmem:[#allocation3 + $0x270] sm:$0xff] %vm1945_vm2, %v4235_v41  ;;  %v4238_v21 = vadd.f32 %v11731_v22, %v9278_v18  ;;  %3230 = vst.msk [vmem:[#allocation2 + $0x160] sm:$0xff] %vm1945_vm2, %v3221_v15  ;;  %9167 = vmatprep.mubr.msk.bf16.mxu1 %vm1945_vm2, %v3221_v15  ;;  %v4229_v23 = vpop.f32.mrb[207].mxu0  ;;  %9283 = vmatprep.mubr.msk.bf16.mxu0 %vm1945_vm2, %v3654_v20 }
 0x5f4   : > { %4509 = vst.msk [vmem:[#allocation3 + $0x260] sm:$0xff] %vm1945_vm2, %v4227_v17  ;;  %v4230_v25 = vadd.f32 %v11731_v22, %v4229_v23  ;;  %9168 = vmatmul.mubr.msk.bf16.gmra.mrb[104].mxu1 %vm1945_vm2, %v3222_v13  ;;  %9284 = vmatmul.mubr.msk.bf16.gmra.mrb[212].mxu0 %vm1945_vm2, %v3655_v24 }
 0x5f5   : > { %v9703_v26 = vpop.eup %9702  ;;  %4512 = vst.msk [vmem:[#allocation3 + $0x278] sm:$0xff] %vm1945_vm2, %v4238_v21  ;;  %v3246_v21 = vld [vmem:[#allocation3 + $0x358] sm:$0xff] }
 0x5f6   : > { %v9705_v54 = vpop.eup %9704  ;;  %4510 = vst.msk [vmem:[#allocation3 + $0x268] sm:$0xff] %vm1945_vm2, %v4230_v25  ;;  %v11879_v25 = vld [vmem:[%s12843_s4 + $0x18] sm:$0xff]  }
 0x5f7   : > { %v9707_v27 = vpop.eup %9706 }
 0x5f8   : > { %v9709_v28 = vpop.eup %9708  ;;  %v3224_v19 = vpack.c.bf16 %v9707_v27, %v9703_v26  ;;  %v3244_v27 = vld [vmem:[#allocation3 + $0x348] sm:$0xff] }
 0x5f9   : > { %v3223_v29 = vpack.c.bf16 %v9709_v28, %v9705_v54  ;;  %v3657_v30 = vld [vmem:[#allocation2 + $0x168] sm:$0xff] }
 0x5fa   : > { %v3656_v16 = vld [vmem:[#allocation2 + $0x160] sm:$0xff]  ;;  %3233 = vst.msk [vmem:[#allocation2 + $0x178] sm:$0xff] %vm1945_vm2, %v3224_v19 }
 0x5fb   : > { %3232 = vst.msk [vmem:[#allocation2 + $0x170] sm:$0xff] %vm1945_vm2, %v3223_v29  ;;  %9171 = vmatprep.mubr.msk.bf16.mxu1 %vm1945_vm2, %v3223_v29  ;;  %9287 = vmatprep.mubr.msk.bf16.mxu0 %vm1945_vm2, %v3656_v16 }
 0x5fc   : > { %9172 = vmatmul.mubr.msk.bf16.gmra.mrb[108].mxu1 %vm1945_vm2, %v3224_v19  ;;  %9288 = vmatmul.mubr.msk.bf16.gmra.mrb[216].mxu0 %vm1945_vm2, %v3657_v30 }
 0x601   : > { %v3659_v32 = vld [vmem:[#allocation2 + $0x178] sm:$0xff] }
 0x602   : > { %v3658_v31 = vld [vmem:[#allocation2 + $0x170] sm:$0xff] }
 0x603   : > { %9291 = vmatprep.mubr.msk.bf16.mxu0 %vm1945_vm2, %v3658_v31 }
 0x604   : > { %9292 = vmatmul.mubr.msk.bf16.gmra.mrb[220].mxu0 %vm1945_vm2, %v3659_v32  ;;  %v3249_v32 = vld [vmem:[#allocation3 + $0x370] sm:$0xff] }
 0x6b7   : > { %v9161_v38 = vpop.f32.mrb[96].mxu1 }
 0x6b8   : > { %v3374_v39 = vadd.f32 %v9161_v38, %v3237_v36  ;;  %v3309_v40 = vpop.f32.mrb[97].mxu1 }
 0x6b9   : > { %v3372_v42 = vadd.f32 %v3309_v40, %v3235_v37  ;;  %v9162_v44 = vpop.f32.mrb[98].mxu1  ;;  %v3247_v37 = vld [vmem:[#allocation3 + $0x360] sm:$0xff] }
 0x6ba   : > { %9710 = vtanh.f32 %v3374_v39  ;;  %v3375_v45 = vadd.f32 %v9162_v44, %v3238_v43  ;;  %v3312_v35 = vpop.f32.mrb[99].mxu1 }
 0x6bb   : > { %9712 = vtanh.f32 %v3372_v42  ;;  %v3373_v33 = vadd.f32 %v3312_v35, %v3236_v46 }
 0x6bc   : > { %9714 = vtanh.f32 %v3375_v45 }
 0x6bd   : > { %9716 = vtanh.f32 %v3373_v33 }
 0x6bf   : > { %v9165_v49 = vpop.f32.mrb[100].mxu1  ;;  %v9281_v50 = vpop.f32.mrb[208].mxu0 }
 0x6c0   : > { %v3378_v51 = vadd.f32 %v9165_v49, %v3241_v47  ;;  %v4251_v52 = vadd.f32 %v11731_v22, %v9281_v50  ;;  %v3325_v53 = vpop.f32.mrb[101].mxu1  ;;  %v4242_v56 = vpop.f32.mrb[209].mxu0 }
 0x6c1   : > { %v3376_v57 = vadd.f32 %v3325_v53, %v3239_v48  ;;  %v4243_v59 = vadd.f32 %v11731_v22, %v4242_v56  ;;  %v9166_v60 = vpop.f32.mrb[102].mxu1  ;;  %v9282_v61 = vpop.f32.mrb[210].mxu0  ;;  %v3250_v48 = vld [vmem:[#allocation3 + $0x378] sm:$0xff]  ;;  %v3248_v56 = vld [vmem:[#allocation3 + $0x368] sm:$0xff] }
 0x6c2   : > { %9718 = vtanh.f32 %v3378_v51  ;;  %4515 = vst.msk [vmem:[#allocation3 + $0x290] sm:$0xff] %vm1945_vm2, %v4251_v52  ;;  %v3379_v62 = vadd.f32 %v9166_v60, %v3242_v55  ;;  %v4254_v63 = vadd.f32 %v11731_v22, %v9282_v61  ;;  %v3328_v1 = vpop.f32.mrb[103].mxu1  ;;  %v4245_v2 = vpop.f32.mrb[211].mxu0 }
 0x6c3   : > { %9720 = vtanh.f32 %v3376_v57  ;;  %4513 = vst.msk [vmem:[#allocation3 + $0x280] sm:$0xff] %vm1945_vm2, %v4243_v59  ;;  %v3377_v3 = vadd.f32 %v3328_v1, %v3240_v0  ;;  %v4246_v4 = vadd.f32 %v11731_v22, %v4245_v2 }
 0x6c4   : > { %v9711_v58 = vpop.eup %9710  ;;  %9722 = vtanh.f32 %v3379_v62  ;;  %4516 = vst.msk [vmem:[#allocation3 + $0x298] sm:$0xff] %vm1945_vm2, %v4254_v63 }
 0x6c5   : > { %v9713_v5 = vpop.eup %9712  ;;  %9724 = vtanh.f32 %v3377_v3  ;;  %4514 = vst.msk [vmem:[#allocation3 + $0x288] sm:$0xff] %vm1945_vm2, %v4246_v4 }
 0x6c6   : > { %v9715_v7 = vpop.eup %9714 }
 0x6c7   : > { %v9717_v9 = vpop.eup %9716  ;;  %v3405_v10 = vpack.c.bf16 %v9715_v7, %v9711_v58  ;;  %v9169_v11 = vpop.f32.mrb[104].mxu1 }
 0x6c8   : > { %v9285_v12 = vpop.f32.mrb[212].mxu0  ;;  %v3382_v13 = vadd.f32 %v9169_v11, %v3245_v6  ;;  %v3341_v14 = vpop.f32.mrb[105].mxu1  ;;  %v3404_v17 = vpack.c.bf16 %v9717_v9, %v9713_v5 }
 0x6c9   : > { %v4267_v41 = vadd.f32 %v11731_v22, %v9285_v12  ;;  %v4258_v15 = vpop.f32.mrb[213].mxu0  ;;  %3414 = vst.msk [vmem:[#allocation2 + $0x188] sm:$0xff] %vm1945_vm2, %v3405_v10  ;;  %v3380_v18 = vadd.f32 %v3341_v14, %v3243_v8  ;;  %v9170_v23 = vpop.f32.mrb[106].mxu1  ;;  %v8399_v14 = vld [vmem:[%s11025_s16 + $0x80] sm:$0xff] }
 0x6ca   : > { %v4259_v20 = vadd.f32 %v11731_v22, %v4258_v15  ;;  %v9286_v24 = vpop.f32.mrb[214].mxu0  ;;  %9726 = vtanh.f32 %v3382_v13  ;;  %v3383_v26 = vadd.f32 %v9170_v23, %v3246_v21  ;;  %v3344_v28 = vpop.f32.mrb[107].mxu1  ;;  %3413 = vst.msk [vmem:[#allocation2 + $0x180] sm:$0xff] %vm1945_vm2, %v3404_v17  ;;  %9179 = vmatprep.mubr.msk.bf16.mxu1 %vm1945_vm2, %v3404_v17  ;;  %v8400_v15 = vld [vmem:[%s11025_s16 + $0x88] sm:$0xff] }
 0x6cb   : > { %4519 = vst.msk [vmem:[#allocation3 + $0x2b0] sm:$0xff] %vm1945_vm2, %v4267_v41  ;;  %v4270_v54 = vadd.f32 %v11731_v22, %v9286_v24  ;;  %v4261_v19 = vpop.f32.mrb[215].mxu0  ;;  %9728 = vtanh.f32 %v3380_v18  ;;  %v3381_v29 = vadd.f32 %v3344_v28, %v3244_v27  ;;  %9180 = vmatmul.mubr.msk.bf16.vlgmr.msra.gmra.mrb[112].mxu1 %vm1945_vm2, %v3405_v10  ;;  %v4599_v21 = vpack.c.bf16 %v8400_v15, %v8399_v14  ;;  %v8403_v27 = vld [vmem:[%s11025_s16 + $0xa0] sm:$0xff]  ;;  %v8404_v28 = vld [vmem:[%s11025_s16 + $0xa8] sm:$0xff] }
 0x6cc   : > { %4517 = vst.msk [vmem:[#allocation3 + $0x2a0] sm:$0xff] %vm1945_vm2, %v4259_v20  ;;  %v4262_v16 = vadd.f32 %v11731_v22, %v4261_v19  ;;  %v9719_v30 = vpop.eup %9718  ;;  %9730 = vtanh.f32 %v3383_v26  ;;  %9328 = vmatpush3.bf16.msra.mxu1 %v11862_v34  ;;  %v8401_v26 = vld [vmem:[%s11025_s16 + $0x90] sm:$0xff] }
 0x6cd   : > { %4520 = vst.msk [vmem:[#allocation3 + $0x2b8] sm:$0xff] %vm1945_vm2, %v4270_v54  ;;  %v9721_v31 = vpop.eup %9720  ;;  %9732 = vtanh.f32 %v3381_v29  ;;  %9329 = vmatprep.subr.bf16.mxu1 %v11879_v25  ;;  %v8402_v54 = vld [vmem:[%s11025_s16 + $0x98] sm:$0xff]  ;;  %v4601_v29 = vpack.c.bf16 %v8404_v28, %v8403_v27 }
 0x6ce   : > { %4518 = vst.msk [vmem:[#allocation3 + $0x2a8] sm:$0xff] %vm1945_vm2, %v4262_v16  ;;  %v9723_v36 = vpop.eup %9722  ;;  %v4600_v19 = vpack.c.bf16 %v8402_v54, %v8401_v26 }
 0x6cf   : > { %v9725_v38 = vpop.eup %9724  ;;  %v9173_v39 = vpop.f32.mrb[108].mxu1  ;;  %v3407_v42 = vpack.c.bf16 %v9723_v36, %v9719_v30  ;;  %v8407_v36 = vld [vmem:[%s11025_s16 + $0xc0] sm:$0xff] }
 0x6d0   : > { %v9289_v40 = vpop.f32.mrb[216].mxu0  ;;  %v3386_v43 = vadd.f32 %v9173_v39, %v3249_v32  ;;  %v3357_v45 = vpop.f32.mrb[109].mxu1  ;;  %v3406_v35 = vpack.c.bf16 %v9725_v38, %v9721_v31  ;;  %9330 = vmatpush3.bf16.msra.mxu1 %v11879_v25  ;;  %v3661_v55 = vld [vmem:[#allocation2 + $0x188] sm:$0xff]  ;;  %v8405_v31 = vld [vmem:[%s11025_s16 + $0xb0] sm:$0xff]  ;;  %v8406_v32 = vld [vmem:[%s11025_s16 + $0xb8] sm:$0xff] }
 0x6d1   : > { %v4283_v44 = vadd.f32 %v11731_v22, %v9289_v40  ;;  %v4274_v46 = vpop.f32.mrb[217].mxu0  ;;  %v3384_v33 = vadd.f32 %v3357_v45, %v3247_v37  ;;  %v9174_v49 = vpop.f32.mrb[110].mxu1  ;;  %v3660_v51 = vld [vmem:[#allocation2 + $0x180] sm:$0xff]  ;;  %3416 = vst.msk [vmem:[#allocation2 + $0x198] sm:$0xff] %vm1945_vm2, %v3407_v42  ;;  %9347 = vmatprep.subr.bf16.mxu1 %v11862_v34  ;;  %v8408_v37 = vld [vmem:[%s11025_s16 + $0xc8] sm:$0xff]  ;;  %v4602_v38 = vpack.c.bf16 %v8406_v32, %v8405_v31  ;;  %v8409_v40 = vld [vmem:[%s11025_s16 + $0xd0] sm:$0xff] }
 0x6d2   : > { %v4275_v47 = vadd.f32 %v11731_v22, %v4274_v46  ;;  %v9290_v50 = vpop.f32.mrb[218].mxu0  ;;  %9734 = vtanh.f32 %v3386_v43  ;;  %v3387_v52 = vadd.f32 %v9174_v49, %v3250_v48  ;;  %v3360_v57 = vpop.f32.mrb[111].mxu1  ;;  %3415 = vst.msk [vmem:[#allocation2 + $0x190] sm:$0xff] %vm1945_vm2, %v3406_v35  ;;  %9183 = vmatprep.mubr.msk.bf16.mxu1 %vm1945_vm2, %v3406_v35  ;;  %9295 = vmatprep.mubr.msk.bf16.mxu0 %vm1945_vm2, %v3660_v51  ;;  %v8411_v43 = vld [vmem:[%s11025_s16 + $0xe0] sm:$0xff]  ;;  %v8413_v35 = vld [vmem:[%s11025_s16 + $0xf0] sm:$0xff] }
 0x6d3   : > { %4523 = vst.msk [vmem:[#allocation3 + $0x2d0] sm:$0xff] %vm1945_vm2, %v4283_v44  ;;  %v4286_v53 = vadd.f32 %v11731_v22, %v9290_v50  ;;  %v4277_v59 = vpop.f32.mrb[219].mxu0  ;;  %9736 = vtanh.f32 %v3384_v33  ;;  %v3385_v60 = vadd.f32 %v3360_v57, %v3248_v56  ;;  %9184 = vmatmul.mubr.msk.bf16.gmra.mrb[116].mxu1 %vm1945_vm2, %v3407_v42  ;;  %9296 = vmatmul.mubr.msk.bf16.gmra.mrb[224].mxu0 %vm1945_vm2, %v3661_v55  ;;  %v8410_v42 = vld [vmem:[%s11025_s16 + $0xd8] sm:$0xff]  ;;  %v8412_v44 = vld [vmem:[%s11025_s16 + $0xe8] sm:$0xff]  ;;  %v3424_v48 = vld [vmem:[#allocation3 + $0x390] sm:$0xff] }
 0x6d4   : > { %4521 = vst.msk [vmem:[#allocation3 + $0x2c0] sm:$0xff] %vm1945_vm2, %v4275_v47  ;;  %v4278_v61 = vadd.f32 %v11731_v22, %v4277_v59  ;;  %v9727_v62 = vpop.eup %9726  ;;  %9738 = vtanh.f32 %v3387_v52  ;;  %v4603_v39 = vpack.c.bf16 %v8408_v37, %v8407_v36  ;;  %v4604_v45 = vpack.c.bf16 %v8410_v42, %v8409_v40  ;;  %v8414_v33 = vld [vmem:[%s11025_s16 + $0xf8] sm:$0xff]  ;;  %v3422_v49 = vld [vmem:[#allocation3 + $0x380] sm:$0xff]  ;;  %v3423_v55 = vld [vmem:[#allocation3 + $0x388] sm:$0xff] }
 0x6d5   : > { %4524 = vst.msk [vmem:[#allocation3 + $0x2d8] sm:$0xff] %vm1945_vm2, %v4286_v53  ;;  %v9729_v63 = vpop.eup %9728  ;;  %9740 = vtanh.f32 %v3385_v60  ;;  %v4605_v46 = vpack.c.bf16 %v8412_v44, %v8411_v43  ;;  %v4606_v47 = vpack.c.bf16 %v8414_v33, %v8413_v35  ;;  %v3425_v56 = vld [vmem:[#allocation3 + $0x398] sm:$0xff]  ;;  %v3431_v42 = vld [vmem:[#allocation3 + $0x3c8] sm:$0xff] }
 0x6d6   : > { %4522 = vst.msk [vmem:[#allocation3 + $0x2c8] sm:$0xff] %vm1945_vm2, %v4278_v61  ;;  %v9731_v0 = vpop.eup %9730  ;;  %v3433_v36 = vld [vmem:[#allocation3 + $0x3d8] sm:$0xff] }
 0x6d7   : > { %v9733_v1 = vpop.eup %9732  ;;  %v9293_v2 = vpop.f32.mrb[220].mxu0  ;;  %v3409_v3 = vpack.c.bf16 %v9731_v0, %v9727_v62  ;;  %v3428_v62 = vld [vmem:[#allocation3 + $0x3b0] sm:$0xff] }
 0x6d8   : > { %v4299_v4 = vadd.f32 %v11731_v22, %v9293_v2  ;;  %v4290_v58 = vpop.f32.mrb[221].mxu0  ;;  %v3408_v5 = vpack.c.bf16 %v9733_v1, %v9729_v63  ;;  %v3663_v11 = vld [vmem:[#allocation2 + $0x198] sm:$0xff]  ;;  %v3426_v63 = vld [vmem:[#allocation3 + $0x3a0] sm:$0xff] }
 0x6d9   : > { %v4291_v6 = vadd.f32 %v11731_v22, %v4290_v58  ;;  %v9294_v7 = vpop.f32.mrb[222].mxu0  ;;  %v3662_v8 = vld [vmem:[#allocation2 + $0x190] sm:$0xff]  ;;  %3418 = vst.msk [vmem:[#allocation2 + $0x1a8] sm:$0xff] %vm1945_vm2, %v3409_v3 }
 0x6da   : > { %4527 = vst.msk [vmem:[#allocation3 + $0x2f0] sm:$0xff] %vm1945_vm2, %v4299_v4  ;;  %v4302_v9 = vadd.f32 %v11731_v22, %v9294_v7  ;;  %3417 = vst.msk [vmem:[#allocation2 + $0x1a0] sm:$0xff] %vm1945_vm2, %v3408_v5  ;;  %9187 = vmatprep.mubr.msk.bf16.mxu1 %vm1945_vm2, %v3408_v5  ;;  %v4293_v10 = vpop.f32.mrb[223].mxu0  ;;  %9299 = vmatprep.mubr.msk.bf16.mxu0 %vm1945_vm2, %v3662_v8  ;;  %v3429_v8 = vld [vmem:[#allocation3 + $0x3b8] sm:$0xff] }
 0x6db   : > { %4525 = vst.msk [vmem:[#allocation3 + $0x2e0] sm:$0xff] %vm1945_vm2, %v4291_v6  ;;  %v4294_v12 = vadd.f32 %v11731_v22, %v4293_v10  ;;  %9188 = vmatmul.mubr.msk.bf16.gmra.mrb[120].mxu1 %vm1945_vm2, %v3409_v3  ;;  %9300 = vmatmul.mubr.msk.bf16.gmra.mrb[228].mxu0 %vm1945_vm2, %v3663_v11  ;;  %v11961_v3 = vld [vmem:[%s12844_s5 + $0x1] ss:$0 sm:$0xff] }
 0x6dc   : > { %v9735_v13 = vpop.eup %9734  ;;  %4528 = vst.msk [vmem:[#allocation3 + $0x2f8] sm:$0xff] %vm1945_vm2, %v4302_v9 }
 0x6dd   : > { %v9737_v41 = vpop.eup %9736  ;;  %4526 = vst.msk [vmem:[#allocation3 + $0x2e8] sm:$0xff] %vm1945_vm2, %v4294_v12 }
 0x6de   : > { %v9739_v17 = vpop.eup %9738 }
 0x6df   : > { %v9741_v18 = vpop.eup %9740  ;;  %v3411_v20 = vpack.c.bf16 %v9739_v17, %v9735_v13  ;;  %v3427_v13 = vld [vmem:[#allocation3 + $0x3a8] sm:$0xff] }
 0x6e0   : > { %v3410_v22 = vpack.c.bf16 %v9741_v18, %v9737_v41  ;;  %v3665_v24 = vld [vmem:[#allocation2 + $0x1a8] sm:$0xff] }
 0x6e1   : > { %v3664_v23 = vld [vmem:[#allocation2 + $0x1a0] sm:$0xff]  ;;  %3420 = vst.msk [vmem:[#allocation2 + $0x1b8] sm:$0xff] %vm1945_vm2, %v3411_v20 }
 0x6e2   : > { %3419 = vst.msk [vmem:[#allocation2 + $0x1b0] sm:$0xff] %vm1945_vm2, %v3410_v22  ;;  %9191 = vmatprep.mubr.msk.bf16.mxu1 %vm1945_vm2, %v3410_v22  ;;  %9303 = vmatprep.mubr.msk.bf16.mxu0 %vm1945_vm2, %v3664_v23  ;;  %v3432_v22 = vld [vmem:[#allocation3 + $0x3d0] sm:$0xff]  ;;  %v3430_v23 = vld [vmem:[#allocation3 + $0x3c0] sm:$0xff] }
 0x6e3   : > { %9192 = vmatmul.mubr.msk.bf16.gmra.mrb[124].mxu1 %vm1945_vm2, %v3411_v20  ;;  %9304 = vmatmul.mubr.msk.bf16.gmra.mrb[232].mxu0 %vm1945_vm2, %v3665_v24 }
 0x6e4   : > { %9331 = vmatprep.mubr.msk.bf16.mxu1 %vm1945_vm2, %v4599_v21 }
 0x6e8   : > { %v3667_v30 = vld [vmem:[#allocation2 + $0x1b8] sm:$0xff] }
 0x6e9   : > { %v3666_v16 = vld [vmem:[#allocation2 + $0x1b0] sm:$0xff] }
 0x6ea   : > { %9307 = vmatprep.mubr.msk.bf16.mxu0 %vm1945_vm2, %v3666_v16 }
 0x6eb   : > { %9308 = vmatmul.mubr.msk.bf16.gmra.mrb[236].mxu0 %vm1945_vm2, %v3667_v30  ;;  %9332 = vmatmul.mubr.msk.bf16.vlgmr.msra.gmra.mrb[128].mxu1 %vm1945_vm2, %v4600_v19 }
 0x6ec   : > { %9335 = vmatprep.mubr.msk.bf16.mxu1 %vm1945_vm2, %v4601_v29  ;;  %9348 = vmatpush3.bf16.msra.mxu1 %v11862_v34 }
 0x6ed   : > { %9349 = vmatprep.subr.bf16.mxu1 %v11879_v25 }
 0x6f0   : > { %9350 = vmatpush3.bf16.msra.mxu1 %v11879_v25 }
 0x6f1   : > { %9367 = vmatprep.subr.bf16.mxu1 %v11862_v34 }
 0x6f3   : > { %9336 = vmatmul.mubr.msk.bf16.gmra.mrb[132].mxu1 %vm1945_vm2, %v4602_v38 }
 0x6f4   : > { %9339 = vmatprep.mubr.msk.bf16.mxu1 %vm1945_vm2, %v4603_v39 }
 0x6fb   : > { %9340 = vmatmul.mubr.msk.bf16.gmra.mrb[136].mxu1 %vm1945_vm2, %v4604_v45 }
 0x6fc   : > { %9343 = vmatprep.mubr.msk.bf16.mxu1 %vm1945_vm2, %v4605_v46 }
 0x703   : > { %9344 = vmatmul.mubr.msk.bf16.gmra.mrb[140].mxu1 %vm1945_vm2, %v4606_v47  ;;  %v3436_v47 = vld [vmem:[#allocation3 + $0x3f0] sm:$0xff] }
 0x79e   : > { %v9181_v50 = vpop.f32.mrb[112].mxu1 }
 0x79f   : > { %v3561_v51 = vadd.f32 %v9181_v50, %v3424_v48  ;;  %v3496_v52 = vpop.f32.mrb[113].mxu1 }
 0x7a0   : > { %v3559_v53 = vadd.f32 %v3496_v52, %v3422_v49  ;;  %v9182_v57 = vpop.f32.mrb[114].mxu1  ;;  %v3434_v49 = vld [vmem:[#allocation3 + $0x3e0] sm:$0xff] }
 0x7a1   : > { %9742 = vtanh.f32 %v3561_v51  ;;  %v3562_v59 = vadd.f32 %v9182_v57, %v3425_v56  ;;  %v3499_v60 = vpop.f32.mrb[115].mxu1 }
 0x7a2   : > { %9744 = vtanh.f32 %v3559_v53  ;;  %v3560_v61 = vadd.f32 %v3499_v60, %v3423_v55 }
 0x7a3   : > { %9746 = vtanh.f32 %v3562_v59 }
 0x7a4   : > { %9748 = vtanh.f32 %v3560_v61 }
 0x7a6   : > { %v9185_v0 = vpop.f32.mrb[116].mxu1  ;;  %v9297_v1 = vpop.f32.mrb[224].mxu0 }
 0x7a7   : > { %v3565_v2 = vadd.f32 %v9185_v0, %v3428_v62  ;;  %v4315_v4 = vadd.f32 %v11961_v3, %v9297_v1  ;;  %v3512_v58 = vpop.f32.mrb[117].mxu1  ;;  %v4306_v5 = vpop.f32.mrb[225].mxu0 }
 0x7a8   : > { %v3563_v6 = vadd.f32 %v3512_v58, %v3426_v63  ;;  %v4307_v7 = vadd.f32 %v11961_v3, %v4306_v5  ;;  %v9186_v9 = vpop.f32.mrb[118].mxu1  ;;  %v9298_v10 = vpop.f32.mrb[226].mxu0  ;;  %v3437_v63 = vld [vmem:[#allocation3 + $0x3f8] sm:$0xff]  ;;  %v3435_v5 = vld [vmem:[#allocation3 + $0x3e8] sm:$0xff] }
 0x7a9   : > { %9750 = vtanh.f32 %v3565_v2  ;;  %4531 = vst.msk [vmem:[#allocation3 + $0x310] sm:$0xff] %vm1945_vm2, %v4315_v4  ;;  %v3566_v11 = vadd.f32 %v9186_v9, %v3429_v8  ;;  %v4318_v12 = vadd.f32 %v11961_v3, %v9298_v10  ;;  %v3515_v41 = vpop.f32.mrb[119].mxu1  ;;  %v4309_v14 = vpop.f32.mrb[227].mxu0 }
 0x7aa   : > { %9752 = vtanh.f32 %v3563_v6  ;;  %4529 = vst.msk [vmem:[#allocation3 + $0x300] sm:$0xff] %vm1945_vm2, %v4307_v7  ;;  %v3564_v15 = vadd.f32 %v3515_v41, %v3427_v13  ;;  %v4310_v17 = vadd.f32 %v11961_v3, %v4309_v14 }
 0x7ab   : > { %v9743_v18 = vpop.eup %9742  ;;  %9754 = vtanh.f32 %v3566_v11  ;;  %4532 = vst.msk [vmem:[#allocation3 + $0x318] sm:$0xff] %vm1945_vm2, %v4318_v12 }
 0x7ac   : > { %v9745_v20 = vpop.eup %9744  ;;  %9756 = vtanh.f32 %v3564_v15  ;;  %4530 = vst.msk [vmem:[#allocation3 + $0x308] sm:$0xff] %vm1945_vm2, %v4310_v17  ;;  %v4585_v17 = vld [vmem:[#allocation3 + $0x10] sm:$0xff] }
 0x7ad   : > { %v9747_v21 = vpop.eup %9746 }
 0x7ae   : > { %v9749_v24 = vpop.eup %9748  ;;  %v3592_v26 = vpack.c.bf16 %v9747_v21, %v9743_v18  ;;  %v9189_v54 = vpop.f32.mrb[120].mxu1 }
 0x7af   : > { %v9301_v27 = vpop.f32.mrb[228].mxu0  ;;  %v3591_v28 = vpack.c.bf16 %v9749_v24, %v9745_v20  ;;  %v3569_v19 = vadd.f32 %v9189_v54, %v3432_v22  ;;  %v3528_v16 = vpop.f32.mrb[121].mxu1  ;;  %v4583_v24 = vld [vmem:[#allocation3] sm:$0xff] }
 0x7b0   : > { %v4331_v29 = vadd.f32 %v11961_v3, %v9301_v27  ;;  %v4322_v30 = vpop.f32.mrb[229].mxu0  ;;  %3601 = vst.msk [vmem:[#allocation2 + $0x1c8] sm:$0xff] %vm1945_vm2, %v3592_v26  ;;  %v3567_v31 = vadd.f32 %v3528_v16, %v3430_v23  ;;  %v9190_v37 = vpop.f32.mrb[122].mxu1 }
 0x7b1   : > { %v4323_v32 = vadd.f32 %v11961_v3, %v4322_v30  ;;  %v9302_v38 = vpop.f32.mrb[230].mxu0  ;;  %3600 = vst.msk [vmem:[#allocation2 + $0x1c0] sm:$0xff] %vm1945_vm2, %v3591_v28  ;;  %9758 = vtanh.f32 %v3569_v19  ;;  %v3570_v39 = vadd.f32 %v9190_v37, %v3433_v36  ;;  %v3531_v43 = vpop.f32.mrb[123].mxu1  ;;  %v4586_v19 = vld [vmem:[#allocation3 + $0x18] sm:$0xff]  ;;  %v4584_v36 = vld [vmem:[#allocation3 + $0x8] sm:$0xff] }
 0x7b2   : > { %4535 = vst.msk [vmem:[#allocation3 + $0x330] sm:$0xff] %vm1945_vm2, %v4331_v29  ;;  %v4334_v40 = vadd.f32 %v11961_v3, %v9302_v38  ;;  %v4325_v44 = vpop.f32.mrb[231].mxu0  ;;  %9760 = vtanh.f32 %v3567_v31  ;;  %v3568_v45 = vadd.f32 %v3531_v43, %v3431_v42 }
 0x7b3   : > { %4533 = vst.msk [vmem:[#allocation3 + $0x320] sm:$0xff] %vm1945_vm2, %v4323_v32  ;;  %v4326_v46 = vadd.f32 %v11961_v3, %v4325_v44  ;;  %v9751_v35 = vpop.eup %9750  ;;  %9762 = vtanh.f32 %v3570_v39 }
 0x7b4   : > { %4536 = vst.msk [vmem:[#allocation3 + $0x338] sm:$0xff] %vm1945_vm2, %v4334_v40  ;;  %v9753_v33 = vpop.eup %9752  ;;  %9764 = vtanh.f32 %v3568_v45 }
 0x7b5   : > { %4534 = vst.msk [vmem:[#allocation3 + $0x328] sm:$0xff] %vm1945_vm2, %v4326_v46  ;;  %v9755_v48 = vpop.eup %9754 }
 0x7b6   : > { %v9757_v50 = vpop.eup %9756  ;;  %v3594_v51 = vpack.c.bf16 %v9755_v48, %v9751_v35  ;;  %v9193_v52 = vpop.f32.mrb[124].mxu1  ;;  %v4589_v35 = vld [vmem:[#allocation3 + $0x30] sm:$0xff] }
 0x7b7   : > { %v9305_v53 = vpop.f32.mrb[232].mxu0  ;;  %v3593_v56 = vpack.c.bf16 %v9757_v50, %v9753_v33  ;;  %v3573_v57 = vadd.f32 %v9193_v52, %v3436_v47  ;;  %v3544_v55 = vpop.f32.mrb[125].mxu1  ;;  %v3669_v8 = vld [vmem:[#allocation2 + $0x1c8] sm:$0xff]  ;;  %v4590_v52 = vld [vmem:[#allocation3 + $0x38] sm:$0xff] }
 0x7b8   : > { %v4347_v59 = vadd.f32 %v11961_v3, %v9305_v53  ;;  %v4338_v60 = vpop.f32.mrb[233].mxu0  ;;  %3603 = vst.msk [vmem:[#allocation2 + $0x1d8] sm:$0xff] %vm1945_vm2, %v3594_v51  ;;  %v3571_v61 = vadd.f32 %v3544_v55, %v3434_v49  ;;  %v9194_v0 = vpop.f32.mrb[126].mxu1  ;;  %v3668_v2 = vld [vmem:[#allocation2 + $0x1c0] sm:$0xff] }
 0x7b9   : > { %v4339_v62 = vadd.f32 %v11961_v3, %v4338_v60  ;;  %v9306_v1 = vpop.f32.mrb[234].mxu0  ;;  %3602 = vst.msk [vmem:[#allocation2 + $0x1d0] sm:$0xff] %vm1945_vm2, %v3593_v56  ;;  %9766 = vtanh.f32 %v3573_v57  ;;  %v3574_v4 = vadd.f32 %v9194_v0, %v3437_v63  ;;  %v3547_v6 = vpop.f32.mrb[127].mxu1  ;;  %9311 = vmatprep.mubr.msk.bf16.mxu0 %vm1945_vm2, %v3668_v2  ;;  %v4587_v49 = vld [vmem:[#allocation3 + $0x20] sm:$0xff] }
 0x7ba   : > { %4539 = vst.msk [vmem:[#allocation3 + $0x350] sm:$0xff] %vm1945_vm2, %v4347_v59  ;;  %v4350_v58 = vadd.f32 %v11961_v3, %v9306_v1  ;;  %v4341_v7 = vpop.f32.mrb[235].mxu0  ;;  %9768 = vtanh.f32 %v3571_v61  ;;  %v3572_v9 = vadd.f32 %v3547_v6, %v3435_v5  ;;  %9312 = vmatmul.mubr.msk.bf16.gmra.mrb[240].mxu0 %vm1945_vm2, %v3669_v8  ;;  %v4588_v59 = vld [vmem:[#allocation3 + $0x28] sm:$0xff]  ;;  %v12011_v61 = vld [vmem:[%s12845_s6] ss:$0 sm:$0xff]  ;;  %v4593_v6 = vld [vmem:[#allocation3 + $0x50] sm:$0xff] }
 0x7bb   : > { %4537 = vst.msk [vmem:[#allocation3 + $0x340] sm:$0xff] %vm1945_vm2, %v4339_v62  ;;  %v4342_v10 = vadd.f32 %v11961_v3, %v4341_v7  ;;  %v9759_v11 = vpop.eup %9758  ;;  %9770 = vtanh.f32 %v3574_v4 }
 0x7bc   : > { %4540 = vst.msk [vmem:[#allocation3 + $0x358] sm:$0xff] %vm1945_vm2, %v4350_v58  ;;  %v9761_v12 = vpop.eup %9760  ;;  %9772 = vtanh.f32 %v3572_v9 }
 0x7bd   : > { %4538 = vst.msk [vmem:[#allocation3 + $0x348] sm:$0xff] %vm1945_vm2, %v4342_v10  ;;  %v9763_v13 = vpop.eup %9762 }
 0x7be   : > { %v9765_v41 = vpop.eup %9764  ;;  %v3596_v14 = vpack.c.bf16 %v9763_v13, %v9759_v11  ;;  %v9309_v15 = vpop.f32.mrb[236].mxu0  ;;  %v4591_v11 = vld [vmem:[#allocation3 + $0x40] sm:$0xff] }
 0x7bf   : > { %v9333_v18 = vpop.f32.mrb[128].mxu1  ;;  %v3595_v20 = vpack.c.bf16 %v9765_v41, %v9761_v12  ;;  %v4363_v22 = vadd.f32 %v11961_v3, %v9309_v15  ;;  %v4354_v23 = vpop.f32.mrb[237].mxu0  ;;  %v3671_v38 = vld [vmem:[#allocation2 + $0x1d8] sm:$0xff] }
 0x7c0   : > { %v4742_v21 = vadd.f32 %v9333_v18, %v4585_v17  ;;  %v4677_v26 = vpop.f32.mrb[129].mxu1  ;;  %3605 = vst.msk [vmem:[#allocation2 + $0x1e8] sm:$0xff] %vm1945_vm2, %v3596_v14  ;;  %v4355_v54 = vadd.f32 %v11961_v3, %v4354_v23  ;;  %v9310_v28 = vpop.f32.mrb[238].mxu0  ;;  %v3670_v16 = vld [vmem:[#allocation2 + $0x1d0] sm:$0xff]  ;;  %v4594_v17 = vld [vmem:[#allocation3 + $0x58] sm:$0xff] }
 0x7c1   : > { %v4740_v27 = vadd.f32 %v4677_v26, %v4583_v24  ;;  %v9334_v29 = vpop.f32.mrb[130].mxu1  ;;  %3604 = vst.msk [vmem:[#allocation2 + $0x1e0] sm:$0xff] %vm1945_vm2, %v3595_v20  ;;  %4543 = vst.msk [vmem:[#allocation3 + $0x370] sm:$0xff] %vm1945_vm2, %v4363_v22  ;;  %v4366_v30 = vadd.f32 %v11961_v3, %v9310_v28  ;;  %v4357_v32 = vpop.f32.mrb[239].mxu0  ;;  %9315 = vmatprep.mubr.msk.bf16.mxu0 %vm1945_vm2, %v3670_v16 }
 0x7c2   : > { %9774 = vtanh.f32 %v4742_v21  ;;  %v4743_v31 = vadd.f32 %v9334_v29, %v4586_v19  ;;  %v4680_v37 = vpop.f32.mrb[131].mxu1  ;;  %4541 = vst.msk [vmem:[#allocation3 + $0x360] sm:$0xff] %vm1945_vm2, %v4355_v54  ;;  %v4358_v39 = vadd.f32 %v11961_v3, %v4357_v32  ;;  %9316 = vmatmul.mubr.msk.bf16.gmra.mrb[244].mxu0 %vm1945_vm2, %v3671_v38  ;;  %v4592_v21 = vld [vmem:[#allocation3 + $0x48] sm:$0xff] }
 0x7c3   : > { %9776 = vtanh.f32 %v4740_v27  ;;  %v4741_v40 = vadd.f32 %v4680_v37, %v4584_v36  ;;  %v9767_v42 = vpop.eup %9766  ;;  %4544 = vst.msk [vmem:[#allocation3 + $0x378] sm:$0xff] %vm1945_vm2, %v4366_v30 }
 0x7c4   : > { %9778 = vtanh.f32 %v4743_v31  ;;  %v9769_v43 = vpop.eup %9768  ;;  %4542 = vst.msk [vmem:[#allocation3 + $0x368] sm:$0xff] %vm1945_vm2, %v4358_v39  ;;  %v4597_v31 = vld [vmem:[#allocation3 + $0x70] sm:$0xff] }
 0x7c5   : > { %9780 = vtanh.f32 %v4741_v40  ;;  %v9771_v44 = vpop.eup %9770  ;;  %v4595_v40 = vld [vmem:[#allocation3 + $0x60] sm:$0xff] }
 0x7c6   : > { %v9773_v45 = vpop.eup %9772  ;;  %v3598_v46 = vpack.c.bf16 %v9771_v44, %v9767_v42  ;;  %v9337_v33 = vpop.f32.mrb[132].mxu1 }
 0x7c7   : > { %v3597_v47 = vpack.c.bf16 %v9773_v45, %v9769_v43  ;;  %v4746_v48 = vadd.f32 %v9337_v33, %v4589_v35  ;;  %v4693_v50 = vpop.f32.mrb[133].mxu1  ;;  %v3673_v60 = vld [vmem:[#allocation2 + $0x1e8] sm:$0xff] }
 0x7c8   : > { %3607 = vst.msk [vmem:[#allocation2 + $0x1f8] sm:$0xff] %vm1945_vm2, %v3598_v46  ;;  %v4744_v51 = vadd.f32 %v4693_v50, %v4587_v49  ;;  %v9338_v53 = vpop.f32.mrb[134].mxu1  ;;  %v3672_v56 = vld [vmem:[#allocation2 + $0x1e0] sm:$0xff]  ;;  %v4598_v46 = vld [vmem:[#allocation3 + $0x78] sm:$0xff]  ;;  %v4596_v49 = vld [vmem:[#allocation3 + $0x68] sm:$0xff] }
 0x7c9   : > { %3606 = vst.msk [vmem:[#allocation2 + $0x1f0] sm:$0xff] %vm1945_vm2, %v3597_v47  ;;  %9782 = vtanh.f32 %v4746_v48  ;;  %v4747_v57 = vadd.f32 %v9338_v53, %v4590_v52  ;;  %9319 = vmatprep.mubr.msk.bf16.mxu0 %vm1945_vm2, %v3672_v56  ;;  %v4696_v55 = vpop.f32.mrb[135].mxu1 }
 0x7ca   : > { %9784 = vtanh.f32 %v4744_v51  ;;  %v4745_v62 = vadd.f32 %v4696_v55, %v4588_v59  ;;  %9320 = vmatmul.mubr.msk.bf16.gmra.mrb[248].mxu0 %vm1945_vm2, %v3673_v60 }
 0x7cb   : > { %9786 = vtanh.f32 %v4747_v57 }
 0x7cc   : > { %v9775_v63 = vpop.eup %9774  ;;  %9788 = vtanh.f32 %v4745_v62 }
 0x7cd   : > { %v9777_v0 = vpop.eup %9776  ;;  %v4780_v1 = vmul.f32 %v9775_v63, %v12011_v61 }
 0x7ce   : > { %v9779_v2 = vpop.eup %9778  ;;  %v4778_v4 = vmul.f32 %v9777_v0, %v12011_v61  ;;  %v9341_v7 = vpop.f32.mrb[136].mxu1 }
 0x7cf   : > { %v9781_v58 = vpop.eup %9780  ;;  %v5084_v5 = vpack.c.bf16 %v9779_v2, %v9775_v63  ;;  %v4800_v8 = vsel %vm1945_vm2, %v4780_v1, 0.0  ;;  %v4781_v9 = vmul.f32 %v9779_v2, %v12011_v61  ;;  %v4750_v10 = vadd.f32 %v9341_v7, %v4593_v6  ;;  %v4709_v12 = vpop.f32.mrb[137].mxu1  ;;  %v3675_v24 = vld [vmem:[#allocation2 + $0x1f8] sm:$0xff] }
 0x7d0   : > { %4801 = vadd.xlane.f32.xlu1 %v4800_v8  ;;  %v4794_v13 = vsel %vm1945_vm2, %v4778_v4, 0.0  ;;  %v5083_v41 = vpack.c.bf16 %v9781_v58, %v9777_v0  ;;  %v4779_v14 = vmul.f32 %v9781_v58, %v12011_v61  ;;  %v4748_v15 = vadd.f32 %v4709_v12, %v4591_v11  ;;  %v9342_v18 = vpop.f32.mrb[138].mxu1  ;;  %v3674_v20 = vld [vmem:[#allocation2 + $0x1f0] sm:$0xff] }
 0x7d1   : > { %4795 = vadd.xlane.f32.xlu0 %v4794_v13  ;;  %9790 = vtanh.f32 %v4750_v10  ;;  %v4751_v22 = vadd.f32 %v9342_v18, %v4594_v17  ;;  %9323 = vmatprep.mubr.msk.bf16.mxu0 %vm1945_vm2, %v3674_v20  ;;  %v4712_v23 = vpop.f32.mrb[139].mxu1  ;;  %v4803_v54 = vsel %vm1945_vm2, %v4781_v9, 0.0 }
 0x7d2   : > { %9351 = vmatprep.mubr.msk.bf16.mxu1 %vm1945_vm2, %v5083_v41  ;;  %9792 = vtanh.f32 %v4748_v15  ;;  %v4749_v26 = vadd.f32 %v4712_v23, %v4592_v21  ;;  %9324 = vmatmul.mubr.msk.bf16.gmra.mrb[252].mxu0 %vm1945_vm2, %v3675_v24  ;;  %v4797_v28 = vsel %vm1945_vm2, %v4779_v14, 0.0 }
 0x7d3   : > { %9352 = vmatmul.mubr.msk.bf16.vlgmr.msra.gmra.mrb[144].mxu1 %vm1945_vm2, %v5084_v5  ;;  %v9783_v27 = vpop.eup %9782  ;;  %9794 = vtanh.f32 %v4751_v22 }
 0x7d4   : > { %4804 = vadd.xlane.f32.xlu1 %v4803_v54  ;;  %9368 = vmatpush3.bf16.msra.mxu1 %v11862_v34  ;;  %v9785_v19 = vpop.eup %9784  ;;  %9796 = vtanh.f32 %v4749_v26  ;;  %v4784_v29 = vmul.f32 %v9783_v27, %v12011_v61 }
 0x7d5   : > { %4798 = vadd.xlane.f32.xlu0 %v4797_v28  ;;  %9369 = vmatprep.subr.bf16.mxu1 %v11879_v25  ;;  %v9787_v16 = vpop.eup %9786  ;;  %v4782_v44 = vmul.f32 %v9785_v19, %v12011_v61 }
 0x7d6   : > { %v9789_v30 = vpop.eup %9788  ;;  %v9345_v32 = vpop.f32.mrb[140].mxu1  ;;  %v4812_v36 = vsel %vm1945_vm2, %v4784_v29, 0.0  ;;  %v4785_v37 = vmul.f32 %v9787_v16, %v12011_v61  ;;  %v5086_v38 = vpack.c.bf16 %v9787_v16, %v9783_v27 }
 0x7d7   : > { %v4754_v39 = vadd.f32 %v9345_v32, %v4597_v31  ;;  %v4725_v42 = vpop.f32.mrb[141].mxu1  ;;  %v5085_v43 = vpack.c.bf16 %v9789_v30, %v9785_v19  ;;  %v4783_v47 = vmul.f32 %v9789_v30, %v12011_v61  ;;  %v4806_v52 = vsel %vm1945_vm2, %v4782_v44, 0.0 }
 0x7d8   : > { %9370 = vmatpush3.bf16.msra.mxu1 %v11879_v25  ;;  %v4752_v45 = vadd.f32 %v4725_v42, %v4595_v40  ;;  %v9346_v35 = vpop.f32.mrb[142].mxu1  ;;  %v4815_v33 = vsel %vm1945_vm2, %v4785_v37, 0.0 }
 0x7d9   : > { %4813 = vadd.xlane.f32.xlu0 %v4812_v36  ;;  %9387 = vmatprep.subr.bf16.mxu1 %v11862_v34  ;;  %9798 = vtanh.f32 %v4754_v39  ;;  %v4755_v48 = vadd.f32 %v9346_v35, %v4598_v46  ;;  %v4728_v50 = vpop.f32.mrb[143].mxu1  ;;  %v4809_v34 = vsel %vm1945_vm2, %v4783_v47, 0.0  ;;  %v4954_v35 = vlaneseq }
 0x7da   : > { %4816 = vadd.xlane.f32.xlu1 %v4815_v33  ;;  %9355 = vmatprep.mubr.msk.bf16.mxu1 %vm1945_vm2, %v5085_v43  ;;  %9800 = vtanh.f32 %v4752_v45  ;;  %v4753_v51 = vadd.f32 %v4728_v50, %v4596_v49 }
 0x7db   : > { %9356 = vmatmul.mubr.msk.bf16.gmra.mrb[148].mxu1 %vm1945_vm2, %v5086_v38  ;;  %v9791_v25 = vpop.eup %9790  ;;  %9802 = vtanh.f32 %v4755_v48 }
 0x7dc   : > { %v9793_v53 = vpop.eup %9792  ;;  %9804 = vtanh.f32 %v4753_v51  ;;  %v4788_v56 = vmul.f32 %v9791_v25, %v12011_v61 }
 0x7dd   : > { %4807 = vadd.xlane.f32.xlu0 %v4806_v52  ;;  %v9795_v57 = vpop.eup %9794  ;;  %v4786_v0 = vmul.f32 %v9793_v53, %v12011_v61 }
 0x7de   : > { %4810 = vadd.xlane.f32.xlu1 %v4809_v34  ;;  %v9797_v59 = vpop.eup %9796  ;;  %v4824_v55 = vsel %vm1945_vm2, %v4788_v56, 0.0  ;;  %v4789_v60 = vmul.f32 %v9795_v57, %v12011_v61  ;;  %v5088_v62 = vpack.c.bf16 %v9795_v57, %v9791_v25 }
 0x7df   : > { %v5087_v63 = vpack.c.bf16 %v9797_v59, %v9793_v53  ;;  %v4787_v2 = vmul.f32 %v9797_v59, %v12011_v61  ;;  %v4818_v58 = vsel %vm1945_vm2, %v4786_v0, 0.0  ;;  %v12060_v53 = vand.u32 127, %v4954_v35 }
 0x7e0   : > { %v4827_v1 = vsel %vm1945_vm2, %v4789_v60, 0.0  ;;  %v12063_v0 = vshrl.u32 %v4954_v35, 7 }
 0x7e1   : > { %4825 = vadd.xlane.f32.xlu0 %v4824_v55  ;;  %9359 = vmatprep.mubr.msk.bf16.mxu1 %vm1945_vm2, %v5087_v63  ;;  %v4821_v6 = vsel %vm1945_vm2, %v4787_v2, 0.0  ;;  %v4960_v57 = vadd.s32 4294967288, %v12060_v53 }
 0x7e2   : > { %4828 = vadd.xlane.f32.xlu1 %v4827_v1 }
 0x7e3   : > { %9360 = vmatmul.mubr.msk.bf16.gmra.mrb[152].mxu1 %vm1945_vm2, %v5088_v62  ;;  %v9799_v4 = vpop.eup %9798 }
 0x7e4   : > { %v9801_v5 = vpop.eup %9800  ;;  %v4792_v7 = vmul.f32 %v9799_v4, %v12011_v61 }
 0x7e5   : > { %4819 = vadd.xlane.f32.xlu0 %v4818_v58  ;;  %v9803_v8 = vpop.eup %9802  ;;  %v4790_v41 = vmul.f32 %v9801_v5, %v12011_v61  ;;  %v4967_v58 = vadd.s32 4294967280, %v12060_v53 }
 0x7e6   : > { %4822 = vadd.xlane.f32.xlu1 %v4821_v6  ;;  %v9805_v9 = vpop.eup %9804  ;;  %v4836_v10 = vsel %vm1945_vm2, %v4792_v7, 0.0  ;;  %v4793_v11 = vmul.f32 %v9803_v8, %v12011_v61  ;;  %v5090_v12 = vpack.c.bf16 %v9803_v8, %v9799_v4 }
 0x7e7   : > { %v5089_v13 = vpack.c.bf16 %v9805_v9, %v9801_v5  ;;  %v4791_v15 = vmul.f32 %v9805_v9, %v12011_v61  ;;  %v4830_v17 = vsel %vm1945_vm2, %v4790_v41, 0.0  ;;  %v12067_v5 = vsub.s32 %v4960_v57, %v12063_v0 }
 0x7e8   : > { %v4839_v14 = vsel %vm1945_vm2, %v4793_v11, 0.0 }
 0x7e9   : > { %4837 = vadd.xlane.f32.xlu0 %v4836_v10  ;;  %9363 = vmatprep.mubr.msk.bf16.mxu1 %vm1945_vm2, %v5089_v13  ;;  %v4833_v18 = vsel %vm1945_vm2, %v4791_v15, 0.0  ;;  %v12071_v13 = vsub.s32 %v12060_v53, %v12063_v0  ;;  %v4974_v15 = vadd.s32 4294967272, %v12060_v53 }
 0x7ea   : > { %4840 = vadd.xlane.f32.xlu1 %v4839_v14 }
 0x7eb   : > { %9364 = vmatmul.mubr.msk.bf16.gmra.mrb[156].mxu1 %vm1945_vm2, %v5090_v12 }
 0x7ed   : > { %4831 = vadd.xlane.f32.xlu0 %v4830_v17 }
 0x7ee   : > { %4834 = vadd.xlane.f32.xlu1 %v4833_v18  ;;  %v12075_v18 = vsub.s32 %v4967_v58, %v12063_v0 }
 0x85d   : > { %v4802_v20 = vpop.xlane.xlu1 %4801 }
 0x85e   : > { %v8428_v22 = vmul.f32 -1.442695, %v4802_v20  ;;  %v4796_v21 = vpop.xlane.xlu0 %4795 }
 0x85f   : > { %v8426_v23 = vmul.f32 -1.442695, %v4796_v21  ;;  %v4995_v21 = vadd.s32 4294967248, %v12060_v53 }
 0x860   : > { %9806 = vpow2.f32 %v8428_v22 }
 0x861   : > { %9808 = vpow2.f32 %v8426_v23  ;;  %v4805_v24 = vpop.xlane.xlu1 %4804  ;;  %v4981_v23 = vadd.s32 4294967264, %v12060_v53 }
 0x862   : > { %v8429_v26 = vmul.f32 -1.442695, %v4805_v24  ;;  %v4799_v54 = vpop.xlane.xlu0 %4798 }
 0x863   : > { %v8427_v27 = vmul.f32 -1.442695, %v4799_v54  ;;  %v4988_v54 = vadd.s32 4294967256, %v12060_v53 }
 0x864   : > { %9810 = vpow2.f32 %v8429_v26 }
 0x865   : > { %9812 = vpow2.f32 %v8427_v27 }
 0x866   : > { %v4814_v28 = vpop.xlane.xlu0 %4813 }
 0x867   : > { %v8432_v19 = vmul.f32 -1.442695, %v4814_v28  ;;  %v4817_v29 = vpop.xlane.xlu1 %4816 }
 0x868   : > { %v8433_v16 = vmul.f32 -1.442695, %v4817_v29  ;;  %v12083_v29 = vsub.s32 %v4974_v15, %v12063_v0 }
 0x869   : > { %9814 = vpow2.f32 %v8432_v19 }
 0x86a   : > { %v9807_v30 = vpop.eup %9806  ;;  %9816 = vpow2.f32 %v8433_v16  ;;  %v4808_v31 = vpop.xlane.xlu0 %4807 }
 0x86b   : > { %v9809_v32 = vpop.eup %9808  ;;  %v4892_v36 = vadd.f32 1.0, %v9807_v30  ;;  %v8430_v37 = vmul.f32 -1.442695, %v4808_v31  ;;  %v4811_v38 = vpop.xlane.xlu1 %4810  ;;  %v5002_v31 = vadd.s32 4294967240, %v12060_v53 }
 0x86c   : > { %v8431_v39 = vmul.f32 -1.442695, %v4811_v38  ;;  %v4890_v40 = vadd.f32 1.0, %v9809_v32  ;;  %v12092_v38 = vsub.s32 %v4981_v23, %v12063_v0 }
 0x86d   : > { %9818 = vrcp.f32 %v4892_v36 }
 0x86e   : > { %v9811_v42 = vpop.eup %9810  ;;  %v4826_v43 = vpop.xlane.xlu0 %4825  ;;  %9820 = vpow2.f32 %v8430_v37  ;;  %v12089_v37 = vsub.s32 %v4995_v21, %v12063_v0 }
 0x86f   : > { %v9813_v44 = vpop.eup %9812  ;;  %v8436_v45 = vmul.f32 -1.442695, %v4826_v43  ;;  %v4829_v46 = vpop.xlane.xlu1 %4828  ;;  %v4893_v33 = vadd.f32 1.0, %v9811_v42  ;;  %9822 = vpow2.f32 %v8431_v39  ;;  %v12095_v42 = vsub.s32 %v4988_v54, %v12063_v0 }
 0x870   : > { %v4891_v47 = vadd.f32 1.0, %v9813_v44  ;;  %9824 = vrcp.f32 %v4890_v40  ;;  %v8437_v48 = vmul.f32 -1.442695, %v4829_v46  ;;  %v5009_v44 = vadd.s32 4294967232, %v12060_v53 }
 0x872   : > { %9826 = vrcp.f32 %v4891_v47  ;;  %v4820_v49 = vpop.xlane.xlu0 %4819  ;;  %v12108_v57 = vsub.s32 %v5009_v44, %v12063_v0 }
 0x873   : > { %v9815_v50 = vpop.eup %9814  ;;  %9828 = vpow2.f32 %v8436_v45  ;;  %v8434_v51 = vmul.f32 -1.442695, %v4820_v49  ;;  %v4823_v25 = vpop.xlane.xlu1 %4822 }
 0x874   : > { %v9817_v52 = vpop.eup %9816  ;;  %9830 = vrcp.f32 %v4893_v33  ;;  %v4896_v34 = vadd.f32 1.0, %v9815_v50  ;;  %v8435_v56 = vmul.f32 -1.442695, %v4823_v25  ;;  %v5016_v25 = vadd.s32 4294967224, %v12060_v53 }
 0x875   : > { %9832 = vpow2.f32 %v8434_v51  ;;  %v4897_v55 = vadd.f32 1.0, %v9817_v52 }
 0x876   : > { %9834 = vpow2.f32 %v8437_v48  ;;  %v4838_v59 = vpop.xlane.xlu0 %4837  ;;  %v12101_v48 = vsub.s32 %v5002_v31, %v12063_v0 }
 0x877   : > { %9836 = vrcp.f32 %v4896_v34  ;;  %v8440_v60 = vmul.f32 -1.442695, %v4838_v59  ;;  %v4841_v62 = vpop.xlane.xlu1 %4840  ;;  %v9819_v63 = vpop.eup %9818 }
 0x878   : > { %9838 = vpow2.f32 %v8435_v56  ;;  %v8441_v1 = vmul.f32 -1.442695, %v4841_v62  ;;  %v9821_v2 = vpop.eup %9820  ;;  %v4971_v36 = vrot.slane %v9819_v63, %v12075_v18 }
 0x879   : > { %9840 = vpow2.f32 %v8440_v60  ;;  %v9823_v4 = vpop.eup %9822  ;;  %v4894_v6 = vadd.f32 1.0, %v9821_v2 }
 0x87a   : > { %9842 = vpow2.f32 %v8441_v1  ;;  %v4832_v7 = vpop.xlane.xlu0 %4831  ;;  %v9825_v8 = vpop.eup %9824  ;;  %v4895_v9 = vadd.f32 1.0, %v9823_v4  ;;  %v5023_v1 = vadd.s32 4294967216, %v12060_v53 }
 0x87b   : > { %9844 = vrcp.f32 %v4897_v55  ;;  %v8438_v10 = vmul.f32 -1.442695, %v4832_v7  ;;  %v4835_v11 = vpop.xlane.xlu1 %4834  ;;  %v4959_v26 = vrot.slane %v9825_v8, %v12071_v13  ;;  %v12117_v7 = vsub.s32 %v5016_v25, %v12063_v0 }
 0x87c   : > { %v9827_v12 = vpop.eup %9826  ;;  %9846 = vrcp.f32 %v4894_v6  ;;  %v8439_v41 = vmul.f32 -1.442695, %v4835_v11  ;;  %v5030_v8 = vadd.s32 4294967208, %v12060_v53  ;;  %v12122_v11 = vsub.s32 %v5023_v1, %v12063_v0 }
 0x87d   : > { %v9829_v14 = vpop.eup %9828  ;;  %9848 = vrcp.f32 %v4895_v9  ;;  %v4964_v20 = vrot.slane %v9827_v12, %v12067_v5 }
 0x87e   : > { %v9831_v17 = vpop.eup %9830  ;;  %9850 = vpow2.f32 %v8438_v10  ;;  %v4900_v27 = vadd.f32 1.0, %v9829_v14 }
 0x87f   : > { %v9833_v22 = vpop.eup %9832  ;;  %9852 = vpow2.f32 %v8439_v41  ;;  %v4966_v30 = vsel %vm4965_vm3, %v4964_v20, %v4959_v26  ;;  %v4978_v47 = vrot.slane %v9831_v17, %v12083_v29  ;;  %v5037_v41 = vadd.s32 4294967200, %v12060_v53 }
 0x880   : > { %v9835_v24 = vpop.eup %9834  ;;  %v4898_v28 = vadd.f32 1.0, %v9833_v22  ;;  %v4973_v46 = vsel %vm4972_vm4, %v4971_v36, %v4966_v30  ;;  %v5044_v20 = vadd.s32 4294967192, %v12060_v53 }
 0x881   : > { %v9837_v19 = vpop.eup %9836  ;;  %v4901_v43 = vadd.f32 1.0, %v9835_v24  ;;  %v4980_v34 = vsel %vm4979_vm5, %v4978_v47, %v4973_v46  ;;  %v5051_v24 = vadd.s32 4294967184, %v12060_v53  ;;  %v12147_v36 = vsub.s32 %v5037_v41, %v12063_v0 }
 0x882   : > { %v9839_v16 = vpop.eup %9838  ;;  %9854 = vrcp.f32 %v4898_v28  ;;  %v4999_v55 = vrot.slane %v9837_v19, %v12089_v37  ;;  %v5058_v28 = vadd.s32 4294967176, %v12060_v53 }
 0x883   : > { %v9841_v32 = vpop.eup %9840  ;;  %v4899_v39 = vadd.f32 1.0, %v9839_v16  ;;  %9856 = vrcp.f32 %v4900_v27  ;;  %v12139_v27 = vsub.s32 %v5030_v8, %v12063_v0 }
 0x884   : > { %v9843_v40 = vpop.eup %9842  ;;  %v4904_v35 = vadd.f32 1.0, %v9841_v32 }
 0x885   : > { %v9845_v45 = vpop.eup %9844  ;;  %9858 = vrcp.f32 %v4899_v39  ;;  %v4905_v49 = vadd.f32 1.0, %v9843_v40  ;;  %v12158_v40 = vsub.s32 %v5044_v20, %v12063_v0 }
 0x886   : > { %v9847_v33 = vpop.eup %9846  ;;  %9860 = vrcp.f32 %v4901_v43  ;;  %v5006_v6 = vrot.slane %v9845_v45, %v12101_v48  ;;  %v12163_v45 = vsub.s32 %v5051_v24, %v12063_v0 }
 0x887   : > { %v9849_v50 = vpop.eup %9848  ;;  %v4985_v51 = vrot.slane %v9847_v33, %v12092_v38  ;;  %9862 = vrcp.f32 %v4904_v35  ;;  %v12168_v33 = vsub.s32 %v5058_v28, %v12063_v0 }
 0x888   : > { %v9851_v52 = vpop.eup %9850  ;;  %v4992_v56 = vrot.slane %v9849_v50, %v12095_v42  ;;  %9864 = vrcp.f32 %v4905_v49 }
 0x889   : > { %v9853_v59 = vpop.eup %9852  ;;  %v4987_v60 = vsel %vm4986_vm6, %v4985_v51, %v4980_v34  ;;  %v4902_v62 = vadd.f32 1.0, %v9851_v52 }
 0x88a   : > { %v4994_v63 = vsel %vm4993_vm7, %v4992_v56, %v4987_v60  ;;  %v4903_v2 = vadd.f32 1.0, %v9853_v59 }
 0x88b   : > { %v5001_v4 = vsel %vm5000_vm8, %v4999_v55, %v4994_v63  ;;  %9866 = vrcp.f32 %v4902_v62 }
 0x88c   : > { %v9855_v58 = vpop.eup %9854  ;;  %9868 = vrcp.f32 %v4903_v2  ;;  %v5008_v12 = vsel %vm5007_vm9, %v5006_v6, %v5001_v4 }
 0x88d   : > { %v5013_v9 = vrot.slane %v9855_v58, %v12108_v57  ;;  %v9857_v10 = vpop.eup %9856  ;;  %v9313_v14 = vpop.f32.mrb[240].mxu0 }
 0x88e   : > { %v4379_v22 = vadd.f32 %v11961_v3, %v9313_v14  ;;  %v4370_v21 = vpop.f32.mrb[241].mxu0  ;;  %v5027_v31 = vrot.slane %v9857_v10, %v12122_v11  ;;  %v10549_v10 = vld [vmem:[%s12844_s5 + $0x1] ss:$0 sm:$0xff] }
 0x88f   : > { %v9859_v15 = vpop.eup %9858  ;;  %v5015_v17 = vsel %vm5014_vm10, %v5013_v9, %v5008_v12  ;;  %v4371_v26 = vadd.f32 %v11961_v3, %v4370_v21  ;;  %v9314_v54 = vpop.f32.mrb[242].mxu0 }
 0x890   : > { %v5020_v23 = vrot.slane %v9859_v15, %v12117_v7  ;;  %4547 = vst.msk [vmem:[#allocation3 + $0x390] sm:$0xff] %vm1945_vm2, %v4379_v22  ;;  %v4382_v19 = vadd.f32 %v11961_v3, %v9314_v54  ;;  %v4373_v16 = vpop.f32.mrb[243].mxu0  ;;  %v9861_v30 = vpop.eup %9860 }
 0x891   : > { %4545 = vst.msk [vmem:[#allocation3 + $0x380] sm:$0xff] %vm1945_vm2, %v4371_v26  ;;  %v4374_v53 = vadd.f32 %v11961_v3, %v4373_v16  ;;  %v9863_v39 = vpop.eup %9862  ;;  %v5034_v35 = vrot.slane %v9861_v30, %v12139_v27  ;;  %v5067_v26 = vld [vmem:[#allocation3 + $0x80] sm:$0xff]  ;;  %v5070_v30 = vld [vmem:[#allocation3 + $0x98] sm:$0xff] }
 0x892   : > { %v5022_v32 = vsel %vm5021_vm11, %v5020_v23, %v5015_v17  ;;  %4548 = vst.msk [vmem:[#allocation3 + $0x398] sm:$0xff] %vm1945_vm2, %v4382_v19  ;;  %v9865_v43 = vpop.eup %9864  ;;  %v5055_v56 = vrot.slane %v9863_v39, %v12163_v45 }
 0x893   : > { %v5029_v44 = vsel %vm5028_vm12, %v5027_v31, %v5022_v32  ;;  %4546 = vst.msk [vmem:[#allocation3 + $0x388] sm:$0xff] %vm1945_vm2, %v4374_v53  ;;  %v5062_v60 = vrot.slane %v9865_v43, %v12168_v33  ;;  %v5068_v43 = vld [vmem:[#allocation3 + $0x88] sm:$0xff] }
 0x894   : > { %v5036_v51 = vsel %vm5035_vm13, %v5034_v35, %v5029_v44 }
 0x895   : > { %v9867_v46 = vpop.eup %9866  ;;  %v9317_v50 = vpop.f32.mrb[244].mxu0 }
 0x896   : > { %v9869_v47 = vpop.eup %9868  ;;  %v5041_v49 = vrot.slane %v9867_v46, %v12147_v36  ;;  %v4395_v52 = vadd.f32 %v11961_v3, %v9317_v50  ;;  %v4386_v34 = vpop.f32.mrb[245].mxu0 }
 0x897   : > { %v5048_v25 = vrot.slane %v9869_v47, %v12158_v40  ;;  %v4387_v59 = vadd.f32 %v11961_v3, %v4386_v34  ;;  %v9318_v55 = vpop.f32.mrb[246].mxu0  ;;  %v5073_v47 = vld [vmem:[#allocation3 + $0xb0] sm:$0xff]  ;;  %v5074_v34 = vld [vmem:[#allocation3 + $0xb8] sm:$0xff] }
 0x898   : > { %v5043_v0 = vsel %vm5042_vm14, %v5041_v49, %v5036_v51  ;;  %4551 = vst.msk [vmem:[#allocation3 + $0x3b0] sm:$0xff] %vm1945_vm2, %v4395_v52  ;;  %v4398_v63 = vadd.f32 %v11961_v3, %v9318_v55  ;;  %v4389_v1 = vpop.f32.mrb[247].mxu0  ;;  %v5071_v51 = vld [vmem:[#allocation3 + $0xa0] sm:$0xff] }
 0x899   : > { %v5050_v62 = vsel %vm5049_vm15, %v5048_v25, %v5043_v0  ;;  %4549 = vst.msk [vmem:[#allocation3 + $0x3a0] sm:$0xff] %vm1945_vm2, %v4387_v59  ;;  %v4390_v4 = vadd.f32 %v11961_v3, %v4389_v1  ;;  %v5072_v59 = vld [vmem:[#allocation3 + $0xa8] sm:$0xff] }
 0x89a   : > { %v5057_v2 = vsel %vm5056_vm0, %v5055_v56, %v5050_v62  ;;  %4552 = vst.msk [vmem:[#allocation3 + $0x3b8] sm:$0xff] %vm1945_vm2, %v4398_v63 }
 0x89b   : > { %v5064_v58 = vsel %vm5063_vm1, %v5062_v60, %v5057_v2  ;;  %4550 = vst.msk [vmem:[#allocation3 + $0x3a8] sm:$0xff] %vm1945_vm2, %v4390_v4 }
 0x89c   : > { %5066 = vst [vmem:[%s12182_s12] sm:$0x1] %v5064_v58 }
 0x89d   : > { %v9321_v6 = vpop.f32.mrb[248].mxu0 }
 0x89e   : > { %v4411_v8 = vadd.f32 %v11961_v3, %v9321_v6  ;;  %v4402_v9 = vpop.f32.mrb[249].mxu0  ;;  %v5069_v3 = vld [vmem:[#allocation3 + $0x90] sm:$0xff] }
 0x89f   : > { %v4403_v12 = vadd.f32 %v10549_v10, %v4402_v9  ;;  %v9322_v41 = vpop.f32.mrb[250].mxu0  ;;  %v5077_v6 = vld [vmem:[#allocation3 + $0xd0] sm:$0xff] }
 0x8a0   : > { %4555 = vst.msk [vmem:[#allocation3 + $0x3d0] sm:$0xff] %vm1945_vm2, %v4411_v8  ;;  %v4414_v14 = vadd.f32 %v10549_v10, %v9322_v41  ;;  %v4405_v15 = vpop.f32.mrb[251].mxu0 }
 0x8a1   : > { %4553 = vst.msk [vmem:[#allocation3 + $0x3c0] sm:$0xff] %vm1945_vm2, %v4403_v12  ;;  %v4406_v17 = vadd.f32 %v10549_v10, %v4405_v15 }
 0x8a2   : > { %4556 = vst.msk [vmem:[#allocation3 + $0x3d8] sm:$0xff] %vm1945_vm2, %v4414_v14  ;;  %v5075_v14 = vld [vmem:[#allocation3 + $0xc0] sm:$0xff] }
 0x8a3   : > { %4554 = vst.msk [vmem:[#allocation3 + $0x3c8] sm:$0xff] %vm1945_vm2, %v4406_v17 }
 0x8a5   : > { %v9325_v20 = vpop.f32.mrb[252].mxu0 }
 0x8a6   : > { %v9353_v22 = vpop.f32.mrb[144].mxu1  ;;  %v4427_v21 = vadd.f32 %v10549_v10, %v9325_v20  ;;  %v4418_v24 = vpop.f32.mrb[253].mxu0 }
 0x8a7   : > { %v5214_v23 = vadd.f32 %v9353_v22, %v5069_v3  ;;  %v5149_v54 = vpop.f32.mrb[145].mxu1  ;;  %v4419_v28 = vadd.f32 %v10549_v10, %v4418_v24  ;;  %v9326_v16 = vpop.f32.mrb[254].mxu0  ;;  %v5078_v3 = vld [vmem:[#allocation3 + $0xd8] sm:$0xff] }
 0x8a8   : > { %v5212_v19 = vadd.f32 %v5149_v54, %v5067_v26  ;;  %v9354_v31 = vpop.f32.mrb[146].mxu1  ;;  %4559 = vst.msk [vmem:[#allocation3 + $0x3f0] sm:$0xff] %vm1945_vm2, %v4427_v21  ;;  %v4430_v32 = vadd.f32 %v10549_v10, %v9326_v16  ;;  %v4421_v39 = vpop.f32.mrb[255].mxu0  ;;  %v5076_v26 = vld [vmem:[#allocation3 + $0xc8] sm:$0xff] }
 0x8a9   : > { %9870 = vtanh.f32 %v5214_v23  ;;  %v5215_v53 = vadd.f32 %v9354_v31, %v5070_v30  ;;  %v5152_v44 = vpop.f32.mrb[147].mxu1  ;;  %4557 = vst.msk [vmem:[#allocation3 + $0x3e0] sm:$0xff] %vm1945_vm2, %v4419_v28  ;;  %v4422_v46 = vadd.f32 %v10549_v10, %v4421_v39  ;;  %v12218_v30 = vld [vmem:[%s12843_s4 + $0x10] sm:$0xff]   ;;  %v12226_v39 = vld [vmem:[%s12843_s4 + $0x18] sm:$0xff]  }
 0x8aa   : > { %9872 = vtanh.f32 %v5212_v19  ;;  %v5213_v35 = vadd.f32 %v5152_v44, %v5068_v43  ;;  %4560 = vst.msk [vmem:[#allocation3 + $0x3f8] sm:$0xff] %vm1945_vm2, %v4430_v32 }
 0x8ab   : > { %9874 = vtanh.f32 %v5215_v53  ;;  %4558 = vst.msk [vmem:[#allocation3 + $0x3e8] sm:$0xff] %vm1945_vm2, %v4422_v46  ;;  %v5081_v46 = vld [vmem:[#allocation3 + $0xf0] sm:$0xff] }
 0x8ac   : > { %9876 = vtanh.f32 %v5213_v35 }
 0x8ae   : > { %v9357_v49 = vpop.f32.mrb[148].mxu1 }
 0x8af   : > { %v5218_v50 = vadd.f32 %v9357_v49, %v5073_v47  ;;  %v5165_v25 = vpop.f32.mrb[149].mxu1 }
 0x8b0   : > { %v5216_v52 = vadd.f32 %v5165_v25, %v5071_v51  ;;  %v9358_v56 = vpop.f32.mrb[150].mxu1 }
 0x8b1   : > { %9878 = vtanh.f32 %v5218_v50  ;;  %v5219_v0 = vadd.f32 %v9358_v56, %v5074_v34  ;;  %v5168_v55 = vpop.f32.mrb[151].mxu1 }
 0x8b2   : > { %9880 = vtanh.f32 %v5216_v52  ;;  %v5217_v60 = vadd.f32 %v5168_v55, %v5072_v59  ;;  %v5079_v52 = vld [vmem:[#allocation3 + $0xe0] sm:$0xff]  ;;  %v5082_v59 = vld [vmem:[#allocation3 + $0xf8] sm:$0xff] }
 0x8b3   : > { %v9871_v62 = vpop.eup %9870  ;;  %9882 = vtanh.f32 %v5219_v0 }
 0x8b4   : > { %v9873_v63 = vpop.eup %9872  ;;  %9884 = vtanh.f32 %v5217_v60  ;;  %v5246_v1 = vmul.f32 %v9871_v62, %v12011_v61 }
 0x8b5   : > { %v9875_v2 = vpop.eup %9874  ;;  %v5244_v12 = vmul.f32 %v9873_v63, %v12011_v61 }
 0x8b6   : > { %v9877_v4 = vpop.eup %9876  ;;  %v5518_v58 = vpack.c.bf16 %v9875_v2, %v9871_v62  ;;  %v9361_v8 = vpop.f32.mrb[152].mxu1  ;;  %v5266_v9 = vsel %vm1945_vm2, %v5246_v1, 0.0  ;;  %v5247_v10 = vmul.f32 %v9875_v2, %v12011_v61  ;;  %v5080_v1 = vld [vmem:[#allocation3 + $0xe8] sm:$0xff] }
 0x8b7   : > { %v5222_v41 = vadd.f32 %v9361_v8, %v5077_v6  ;;  %v5181_v15 = vpop.f32.mrb[153].mxu1  ;;  %5267 = vadd.xlane.f32.xlu0 %v5266_v9  ;;  %v5517_v17 = vpack.c.bf16 %v9877_v4, %v9873_v63  ;;  %v5245_v23 = vmul.f32 %v9877_v4, %v12011_v61  ;;  %v5260_v19 = vsel %vm1945_vm2, %v5244_v12, 0.0 }
 0x8b8   : > { %v5220_v20 = vadd.f32 %v5181_v15, %v5075_v14  ;;  %v9362_v22 = vpop.f32.mrb[154].mxu1  ;;  %v5269_v21 = vsel %vm1945_vm2, %v5247_v10, 0.0 }
 0x8b9   : > { %9886 = vtanh.f32 %v5222_v41  ;;  %v5223_v24 = vadd.f32 %v9362_v22, %v5078_v3  ;;  %5270 = vadd.xlane.f32.xlu1 %v5269_v21  ;;  %v5184_v54 = vpop.f32.mrb[155].mxu1  ;;  %9371 = vmatprep.mubr.msk.bf16.mxu1 %vm1945_vm2, %v5517_v17  ;;  %v5263_v32 = vsel %vm1945_vm2, %v5245_v23, 0.0 }
 0x8ba   : > { %9888 = vtanh.f32 %v5220_v20  ;;  %v5221_v28 = vadd.f32 %v5184_v54, %v5076_v26  ;;  %9372 = vmatmul.mubr.msk.bf16.vlgmr.msra.gmra.mrb[160].mxu1 %vm1945_vm2, %v5518_v58 }
 0x8bb   : > { %v9879_v16 = vpop.eup %9878  ;;  %9890 = vtanh.f32 %v5223_v24  ;;  %5261 = vadd.xlane.f32.xlu0 %v5260_v19  ;;  %9388 = vmatpush3.bf16.msra.mxu1 %v12218_v30 }
 0x8bc   : > { %v9881_v31 = vpop.eup %9880  ;;  %9892 = vtanh.f32 %v5221_v28  ;;  %v5250_v53 = vmul.f32 %v9879_v16, %v12011_v61  ;;  %9389 = vmatprep.subr.bf16.mxu1 %v12226_v39 }
 0x8bd   : > { %v9883_v43 = vpop.eup %9882  ;;  %5264 = vadd.xlane.f32.xlu1 %v5263_v32  ;;  %v5248_v51 = vmul.f32 %v9881_v31, %v12011_v61 }
 0x8be   : > { %v9885_v44 = vpop.eup %9884  ;;  %v9365_v35 = vpop.f32.mrb[156].mxu1  ;;  %v5278_v47 = vsel %vm1945_vm2, %v5250_v53, 0.0  ;;  %v5251_v49 = vmul.f32 %v9883_v43, %v12011_v61  ;;  %v5520_v50 = vpack.c.bf16 %v9883_v43, %v9879_v16 }
 0x8bf   : > { %v5226_v25 = vadd.f32 %v9365_v35, %v5081_v46  ;;  %v5197_v34 = vpop.f32.mrb[157].mxu1  ;;  %5279 = vadd.xlane.f32.xlu0 %v5278_v47  ;;  %v5519_v56 = vpack.c.bf16 %v9885_v44, %v9881_v31  ;;  %9390 = vmatpush3.bf16.msra.mxu1 %v12226_v39  ;;  %v5249_v62 = vmul.f32 %v9885_v44, %v12011_v61  ;;  %v5272_v58 = vsel %vm1945_vm2, %v5248_v51, 0.0 }
 0x8c0   : > { %v5224_v0 = vadd.f32 %v5197_v34, %v5079_v52  ;;  %v9366_v55 = vpop.f32.mrb[158].mxu1  ;;  %v5281_v60 = vsel %vm1945_vm2, %v5251_v49, 0.0  ;;  %9407 = vmatprep.subr.bf16.mxu1 %v12218_v30 }
 0x8c1   : > { %9894 = vtanh.f32 %v5226_v25  ;;  %v5227_v63 = vadd.f32 %v9366_v55, %v5082_v59  ;;  %5282 = vadd.xlane.f32.xlu1 %v5281_v60  ;;  %v5200_v2 = vpop.f32.mrb[159].mxu1  ;;  %9375 = vmatprep.mubr.msk.bf16.mxu1 %vm1945_vm2, %v5519_v56  ;;  %v5275_v9 = vsel %vm1945_vm2, %v5249_v62, 0.0 }
 0x8c2   : > { %9896 = vtanh.f32 %v5224_v0  ;;  %v5225_v4 = vadd.f32 %v5200_v2, %v5080_v1  ;;  %9376 = vmatmul.mubr.msk.bf16.gmra.mrb[164].mxu1 %vm1945_vm2, %v5520_v50 }
 0x8c3   : > { %v9887_v6 = vpop.eup %9886  ;;  %9898 = vtanh.f32 %v5227_v63  ;;  %5273 = vadd.xlane.f32.xlu0 %v5272_v58 }
 0x8c4   : > { %v9889_v8 = vpop.eup %9888  ;;  %9900 = vtanh.f32 %v5225_v4  ;;  %v5254_v10 = vmul.f32 %v9887_v6, %v12011_v61 }
 0x8c5   : > { %v9891_v12 = vpop.eup %9890  ;;  %5276 = vadd.xlane.f32.xlu1 %v5275_v9  ;;  %v5252_v20 = vmul.f32 %v9889_v8, %v12011_v61 }
 0x8c6   : > { %v9893_v41 = vpop.eup %9892  ;;  %v5290_v14 = vsel %vm1945_vm2, %v5254_v10, 0.0  ;;  %v5255_v15 = vmul.f32 %v9891_v12, %v12011_v61  ;;  %v5522_v17 = vpack.c.bf16 %v9891_v12, %v9887_v6 }
 0x8c7   : > { %5291 = vadd.xlane.f32.xlu0 %v5290_v14  ;;  %v5521_v3 = vpack.c.bf16 %v9893_v41, %v9889_v8  ;;  %v5253_v21 = vmul.f32 %v9893_v41, %v12011_v61  ;;  %v5284_v23 = vsel %vm1945_vm2, %v5252_v20, 0.0 }
 0x8c8   : > { %v5293_v22 = vsel %vm1945_vm2, %v5255_v15, 0.0 }
 0x8c9   : > { %5294 = vadd.xlane.f32.xlu1 %v5293_v22  ;;  %9379 = vmatprep.mubr.msk.bf16.mxu1 %vm1945_vm2, %v5521_v3  ;;  %v5287_v54 = vsel %vm1945_vm2, %v5253_v21, 0.0 }
 0x8ca   : > { %9380 = vmatmul.mubr.msk.bf16.gmra.mrb[168].mxu1 %vm1945_vm2, %v5522_v17 }
 0x8cb   : > { %v9895_v24 = vpop.eup %9894  ;;  %5285 = vadd.xlane.f32.xlu0 %v5284_v23 }
 0x8cc   : > { %v9897_v26 = vpop.eup %9896  ;;  %v5258_v28 = vmul.f32 %v9895_v24, %v12011_v61 }
 0x8cd   : > { %v9899_v19 = vpop.eup %9898  ;;  %5288 = vadd.xlane.f32.xlu1 %v5287_v54  ;;  %v5256_v43 = vmul.f32 %v9897_v26, %v12011_v61 }
 0x8ce   : > { %v9901_v16 = vpop.eup %9900  ;;  %v5302_v31 = vsel %vm1945_vm2, %v5258_v28, 0.0  ;;  %v5259_v32 = vmul.f32 %v9899_v19, %v12011_v61  ;;  %v5524_v53 = vpack.c.bf16 %v9899_v19, %v9895_v24 }
 0x8cf   : > { %5303 = vadd.xlane.f32.xlu0 %v5302_v31  ;;  %v5523_v44 = vpack.c.bf16 %v9901_v16, %v9897_v26  ;;  %v5257_v35 = vmul.f32 %v9901_v16, %v12011_v61  ;;  %v5296_v47 = vsel %vm1945_vm2, %v5256_v43, 0.0 }
 0x8d0   : > { %v5305_v46 = vsel %vm1945_vm2, %v5259_v32, 0.0 }
 0x8d1   : > { %5306 = vadd.xlane.f32.xlu1 %v5305_v46  ;;  %9383 = vmatprep.mubr.msk.bf16.mxu1 %vm1945_vm2, %v5523_v44  ;;  %v5299_v49 = vsel %vm1945_vm2, %v5257_v35, 0.0 }
 0x8d2   : > { %9384 = vmatmul.mubr.msk.bf16.gmra.mrb[172].mxu1 %vm1945_vm2, %v5524_v53 }
 0x8d3   : > { %5297 = vadd.xlane.f32.xlu0 %v5296_v47 }
 0x8d5   : > { %5300 = vadd.xlane.f32.xlu1 %v5299_v49 }
 0x944   : > { %v5268_v50 = vpop.xlane.xlu0 %5267 }
 0x945   : > { %v8452_v51 = vmul.f32 -1.442695, %v5268_v50 }
 0x946   : > { %v5271_v25 = vpop.xlane.xlu1 %5270 }
 0x947   : > { %9902 = vpow2.f32 %v8452_v51  ;;  %v8453_v52 = vmul.f32 -1.442695, %v5271_v25 }
 0x948   : > { %v5262_v34 = vpop.xlane.xlu0 %5261 }
 0x949   : > { %9904 = vpow2.f32 %v8453_v52  ;;  %v8450_v56 = vmul.f32 -1.442695, %v5262_v34 }
 0x94a   : > { %v5265_v61 = vpop.xlane.xlu1 %5264 }
 0x94b   : > { %9906 = vpow2.f32 %v8450_v56  ;;  %v8451_v0 = vmul.f32 -1.442695, %v5265_v61 }
 0x94c   : > { %v5280_v59 = vpop.xlane.xlu0 %5279 }
 0x94d   : > { %9908 = vpow2.f32 %v8451_v0  ;;  %v8456_v55 = vmul.f32 -1.442695, %v5280_v59 }
 0x94e   : > { %v5283_v60 = vpop.xlane.xlu1 %5282 }
 0x94f   : > { %9910 = vpow2.f32 %v8456_v55  ;;  %v8457_v62 = vmul.f32 -1.442695, %v5283_v60 }
 0x950   : > { %v5274_v63 = vpop.xlane.xlu0 %5273 }
 0x951   : > { %v9903_v1 = vpop.eup %9902  ;;  %v8454_v2 = vmul.f32 -1.442695, %v5274_v63  ;;  %9912 = vpow2.f32 %v8457_v62 }
 0x952   : > { %v5358_v4 = vadd.f32 1.0, %v9903_v1  ;;  %v5277_v58 = vpop.xlane.xlu1 %5276 }
 0x953   : > { %v9905_v6 = vpop.eup %9904  ;;  %9914 = vpow2.f32 %v8454_v2  ;;  %v8455_v8 = vmul.f32 -1.442695, %v5277_v58 }
 0x954   : > { %v5292_v9 = vpop.xlane.xlu0 %5291  ;;  %v5359_v12 = vadd.f32 1.0, %v9905_v6 }
 0x955   : > { %v9907_v10 = vpop.eup %9906  ;;  %9916 = vpow2.f32 %v8455_v8  ;;  %v8460_v41 = vmul.f32 -1.442695, %v5292_v9 }
 0x956   : > { %9918 = vrcp.f32 %v5358_v4  ;;  %v5356_v14 = vadd.f32 1.0, %v9907_v10  ;;  %v5295_v15 = vpop.xlane.xlu1 %5294 }
 0x957   : > { %v9909_v17 = vpop.eup %9908  ;;  %9920 = vpow2.f32 %v8460_v41  ;;  %v8461_v3 = vmul.f32 -1.442695, %v5295_v15 }
 0x958   : > { %9922 = vrcp.f32 %v5356_v14  ;;  %v5357_v20 = vadd.f32 1.0, %v9909_v17  ;;  %v5286_v22 = vpop.xlane.xlu0 %5285 }
 0x959   : > { %v9911_v21 = vpop.eup %9910  ;;  %9924 = vrcp.f32 %v5359_v12  ;;  %v8458_v23 = vmul.f32 -1.442695, %v5286_v22 }
 0x95a   : > { %9926 = vrcp.f32 %v5357_v20  ;;  %v5362_v24 = vadd.f32 1.0, %v9911_v21  ;;  %v5289_v26 = vpop.xlane.xlu1 %5288 }
 0x95b   : > { %9928 = vpow2.f32 %v8458_v23  ;;  %v8459_v54 = vmul.f32 -1.442695, %v5289_v26  ;;  %v9913_v28 = vpop.eup %9912 }
 0x95c   : > { %9930 = vpow2.f32 %v8461_v3  ;;  %v5304_v19 = vpop.xlane.xlu0 %5303  ;;  %v5363_v35 = vadd.f32 1.0, %v9913_v28 }
 0x95d   : > { %v9915_v16 = vpop.eup %9914  ;;  %9932 = vpow2.f32 %v8459_v54  ;;  %v8464_v31 = vmul.f32 -1.442695, %v5304_v19 }
 0x95e   : > { %9934 = vrcp.f32 %v5362_v24  ;;  %v5360_v32 = vadd.f32 1.0, %v9915_v16  ;;  %v5307_v53 = vpop.xlane.xlu1 %5306 }
 0x95f   : > { %v9917_v43 = vpop.eup %9916  ;;  %9936 = vpow2.f32 %v8464_v31  ;;  %v8465_v44 = vmul.f32 -1.442695, %v5307_v53 }
 0x960   : > { %v9919_v46 = vpop.eup %9918  ;;  %9938 = vrcp.f32 %v5360_v32  ;;  %v5361_v47 = vadd.f32 1.0, %v9917_v43  ;;  %v5298_v49 = vpop.xlane.xlu0 %5297 }
 0x961   : > { %v9921_v50 = vpop.eup %9920  ;;  %9940 = vpow2.f32 %v8465_v44  ;;  %v8462_v51 = vmul.f32 -1.442695, %v5298_v49  ;;  %v5432_v2 = vrot.slane %v9919_v46, %v12075_v18 }
 0x962   : > { %v9923_v25 = vpop.eup %9922  ;;  %9942 = vrcp.f32 %v5361_v47  ;;  %v5301_v52 = vpop.xlane.xlu1 %5300  ;;  %v5366_v60 = vadd.f32 1.0, %v9921_v50 }
 0x963   : > { %v9925_v34 = vpop.eup %9924  ;;  %9944 = vpow2.f32 %v8462_v51  ;;  %v8463_v56 = vmul.f32 -1.442695, %v5301_v52  ;;  %v5423_v59 = vrot.slane %v9923_v25, %v12071_v13 }
 0x964   : > { %v9927_v61 = vpop.eup %9926  ;;  %9946 = vrcp.f32 %v5363_v35  ;;  %v5437_v41 = vrot.slane %v9925_v34, %v12083_v29 }
 0x965   : > { %v9929_v0 = vpop.eup %9928  ;;  %v5427_v55 = vrot.slane %v9927_v61, %v12067_v5  ;;  %9948 = vpow2.f32 %v8463_v56 }
 0x966   : > { %v9931_v62 = vpop.eup %9930  ;;  %v5364_v63 = vadd.f32 1.0, %v9929_v0 }
 0x967   : > { %v9933_v1 = vpop.eup %9932  ;;  %v5428_v4 = vsel %vm4965_vm3, %v5427_v55, %v5423_v59  ;;  %v5367_v10 = vadd.f32 1.0, %v9931_v62 }
 0x968   : > { %v9935_v58 = vpop.eup %9934  ;;  %9950 = vrcp.f32 %v5364_v63  ;;  %v5365_v6 = vadd.f32 1.0, %v9933_v1  ;;  %v5433_v9 = vsel %vm4972_vm4, %v5432_v2, %v5428_v4 }
 0x969   : > { %v9937_v8 = vpop.eup %9936  ;;  %9952 = vrcp.f32 %v5366_v60  ;;  %v5438_v3 = vsel %vm4979_vm5, %v5437_v41, %v5433_v9  ;;  %v5452_v19 = vrot.slane %v9935_v58, %v12089_v37  ;;  %v5503_v9 = vld [vmem:[#allocation3 + $0x110] sm:$0xff]  ;;  %v5501_v41 = vld [vmem:[#allocation3 + $0x100] sm:$0xff] }
 0x96a   : > { %v9939_v12 = vpop.eup %9938  ;;  %9954 = vrcp.f32 %v5365_v6  ;;  %v5370_v17 = vadd.f32 1.0, %v9937_v8 }
 0x96b   : > { %v9941_v14 = vpop.eup %9940  ;;  %v5442_v15 = vrot.slane %v9939_v12, %v12092_v38  ;;  %9956 = vrcp.f32 %v5367_v10 }
 0x96c   : > { %v9943_v20 = vpop.eup %9942  ;;  %v5371_v24 = vadd.f32 1.0, %v9941_v14  ;;  %9958 = vrcp.f32 %v5370_v17  ;;  %v5504_v17 = vld [vmem:[#allocation3 + $0x118] sm:$0xff] }
 0x96d   : > { %v9945_v22 = vpop.eup %9944  ;;  %v5443_v21 = vsel %vm4986_vm6, %v5442_v15, %v5438_v3  ;;  %v5447_v23 = vrot.slane %v9943_v20, %v12095_v42 }
 0x96e   : > { %v9947_v26 = vpop.eup %9946  ;;  %v5368_v54 = vadd.f32 1.0, %v9945_v22  ;;  %v5502_v22 = vld [vmem:[#allocation3 + $0x108] sm:$0xff] }
 0x96f   : > { %v9949_v28 = vpop.eup %9948  ;;  %v5448_v16 = vsel %vm4993_vm7, %v5447_v23, %v5443_v21  ;;  %v5457_v43 = vrot.slane %v9947_v26, %v12101_v48 }
 0x970   : > { %9960 = vrcp.f32 %v5368_v54  ;;  %v5369_v31 = vadd.f32 1.0, %v9949_v28  ;;  %v5453_v32 = vsel %vm5000_vm8, %v5452_v19, %v5448_v16  ;;  %v5505_v28 = vld [vmem:[#allocation3 + $0x120] sm:$0xff] }
 0x971   : > { %9962 = vrcp.f32 %v5371_v24  ;;  %v5458_v47 = vsel %vm5007_vm9, %v5457_v43, %v5453_v32  ;;  %v5507_v24 = vld [vmem:[#allocation3 + $0x130] sm:$0xff]  ;;  %v5506_v43 = vld [vmem:[#allocation3 + $0x128] sm:$0xff] }
 0x972   : > { %v9951_v53 = vpop.eup %9950  ;;  %9964 = vrcp.f32 %v5369_v31  ;;  %v5508_v31 = vld [vmem:[#allocation3 + $0x138] sm:$0xff] }
 0x973   : > { %v9953_v44 = vpop.eup %9952  ;;  %v5462_v46 = vrot.slane %v9951_v53, %v12108_v57 }
 0x974   : > { %v9955_v35 = vpop.eup %9954  ;;  %v5472_v25 = vrot.slane %v9953_v44, %v12122_v11 }
 0x975   : > { %v5463_v49 = vsel %vm5014_vm10, %v5462_v46, %v5458_v47  ;;  %v5467_v50 = vrot.slane %v9955_v35, %v12117_v7  ;;  %v9957_v51 = vpop.eup %9956 }
 0x976   : > { %v9959_v34 = vpop.eup %9958  ;;  %v5477_v0 = vrot.slane %v9957_v51, %v12139_v27 }
 0x977   : > { %v5468_v52 = vsel %vm5021_vm11, %v5467_v50, %v5463_v49  ;;  %v5492_v2 = vrot.slane %v9959_v34, %v12163_v45  ;;  %v12295_v49 = vld [vmem:[%s12845_s6] ss:$0 sm:$0xff]  ;;  %v5511_v34 = vld [vmem:[#allocation3 + $0x150] sm:$0xff] }
 0x978   : > { %v5473_v56 = vsel %vm5028_vm12, %v5472_v25, %v5468_v52 }
 0x979   : > { %v5478_v62 = vsel %vm5035_vm13, %v5477_v0, %v5473_v56 }
 0x97a   : > { %v9961_v61 = vpop.eup %9960 }
 0x97b   : > { %v9963_v59 = vpop.eup %9962  ;;  %v5482_v55 = vrot.slane %v9961_v61, %v12147_v36 }
 0x97c   : > { %v9965_v60 = vpop.eup %9964  ;;  %v5497_v4 = vrot.slane %v9963_v59, %v12168_v33 }
 0x97d   : > { %v5483_v63 = vsel %vm5042_vm14, %v5482_v55, %v5478_v62  ;;  %v5487_v1 = vrot.slane %v9965_v60, %v12158_v40  ;;  %v5509_v60 = vld [vmem:[#allocation3 + $0x140] sm:$0xff] }
 0x97f   : > { %v5488_v58 = vsel %vm5049_vm15, %v5487_v1, %v5483_v63 }
 0x980   : > { %v5493_v6 = vsel %vm5056_vm0, %v5492_v2, %v5488_v58  ;;  %v5512_v2 = vld [vmem:[#allocation3 + $0x158] sm:$0xff] }
 0x981   : > { %v5498_v8 = vsel %vm5063_vm1, %v5497_v4, %v5493_v6 }
 0x982   : > { %5500 = vst [vmem:[%s12182_s12 + $0x1] sm:$0x1] %v5498_v8 }
 0x98d   : > { %v9373_v10 = vpop.f32.mrb[160].mxu1 }
 0x98e   : > { %v5648_v12 = vadd.f32 %v9373_v10, %v5503_v9  ;;  %v5583_v14 = vpop.f32.mrb[161].mxu1  ;;  %v5510_v9 = vld [vmem:[#allocation3 + $0x148] sm:$0xff] }
 0x98f   : > { %v5646_v15 = vadd.f32 %v5583_v14, %v5501_v41  ;;  %v9374_v20 = vpop.f32.mrb[162].mxu1 }
 0x990   : > { %9966 = vtanh.f32 %v5648_v12  ;;  %v5649_v3 = vadd.f32 %v9374_v20, %v5504_v17  ;;  %v5586_v21 = vpop.f32.mrb[163].mxu1 }
 0x991   : > { %9968 = vtanh.f32 %v5646_v15  ;;  %v5647_v23 = vadd.f32 %v5586_v21, %v5502_v22  ;;  %v5515_v21 = vld [vmem:[#allocation3 + $0x170] sm:$0xff] }
 0x992   : > { %9970 = vtanh.f32 %v5649_v3 }
 0x993   : > { %9972 = vtanh.f32 %v5647_v23 }
 0x995   : > { %v9377_v26 = vpop.f32.mrb[164].mxu1 }
 0x996   : > { %v5652_v54 = vadd.f32 %v9377_v26, %v5507_v24  ;;  %v5599_v19 = vpop.f32.mrb[165].mxu1 }
 0x997   : > { %v5650_v16 = vadd.f32 %v5599_v19, %v5505_v28  ;;  %v9378_v32 = vpop.f32.mrb[166].mxu1 }
 0x998   : > { %9974 = vtanh.f32 %v5652_v54  ;;  %v5653_v53 = vadd.f32 %v9378_v32, %v5508_v31  ;;  %v5602_v44 = vpop.f32.mrb[167].mxu1 }
 0x999   : > { %9976 = vtanh.f32 %v5650_v16  ;;  %v5651_v46 = vadd.f32 %v5602_v44, %v5506_v43  ;;  %v5513_v16 = vld [vmem:[#allocation3 + $0x160] sm:$0xff]  ;;  %v5516_v43 = vld [vmem:[#allocation3 + $0x178] sm:$0xff] }
 0x99a   : > { %v9967_v35 = vpop.eup %9966  ;;  %9978 = vtanh.f32 %v5653_v53 }
 0x99b   : > { %v9969_v47 = vpop.eup %9968  ;;  %9980 = vtanh.f32 %v5651_v46  ;;  %v5680_v50 = vmul.f32 %v12295_v49, %v9967_v35 }
 0x99c   : > { %v9971_v51 = vpop.eup %9970  ;;  %v5678_v59 = vmul.f32 %v12295_v49, %v9969_v47 }
 0x99d   : > { %v9973_v25 = vpop.eup %9972  ;;  %v5952_v52 = vpack.c.bf16 %v9971_v51, %v9967_v35  ;;  %v9381_v56 = vpop.f32.mrb[168].mxu1  ;;  %v5700_v61 = vsel %vm1945_vm2, %v5680_v50, 0.0  ;;  %v5681_v0 = vmul.f32 %v12295_v49, %v9971_v51  ;;  %v5514_v50 = vld [vmem:[#allocation3 + $0x168] sm:$0xff] }
 0x99e   : > { %v5656_v55 = vadd.f32 %v9381_v56, %v5511_v34  ;;  %v5615_v62 = vpop.f32.mrb[169].mxu1  ;;  %5701 = vadd.xlane.f32.xlu0 %v5700_v61  ;;  %v5951_v63 = vpack.c.bf16 %v9973_v25, %v9969_v47  ;;  %v5679_v6 = vmul.f32 %v12295_v49, %v9973_v25  ;;  %v5694_v41 = vsel %vm1945_vm2, %v5678_v59, 0.0 }
 0x99f   : > { %v5654_v1 = vadd.f32 %v5615_v62, %v5509_v60  ;;  %v9382_v4 = vpop.f32.mrb[170].mxu1  ;;  %v5703_v58 = vsel %vm1945_vm2, %v5681_v0, 0.0 }
 0x9a0   : > { %9982 = vtanh.f32 %v5656_v55  ;;  %v5657_v8 = vadd.f32 %v9382_v4, %v5512_v2  ;;  %v5618_v10 = vpop.f32.mrb[171].mxu1  ;;  %9391 = vmatprep.mubr.msk.bf16.mxu1 %vm1945_vm2, %v5951_v63  ;;  %5704 = vadd.xlane.f32.xlu1 %v5703_v58  ;;  %v5697_v17 = vsel %vm1945_vm2, %v5679_v6, 0.0 }
 0x9a1   : > { %9984 = vtanh.f32 %v5654_v1  ;;  %v5655_v12 = vadd.f32 %v5618_v10, %v5510_v9  ;;  %9392 = vmatmul.mubr.msk.bf16.vlgmr.msra.gmra.mrb[176].mxu1 %vm1945_vm2, %v5952_v52 }
 0x9a2   : > { %v9975_v14 = vpop.eup %9974  ;;  %9986 = vtanh.f32 %v5657_v8  ;;  %5695 = vadd.xlane.f32.xlu0 %v5694_v41  ;;  %9408 = vmatpush3.bf16.msra.mxu1 %v12218_v30 }
 0x9a3   : > { %v9977_v15 = vpop.eup %9976  ;;  %9988 = vtanh.f32 %v5655_v12  ;;  %v5684_v20 = vmul.f32 %v12295_v49, %v9975_v14  ;;  %9409 = vmatprep.subr.bf16.mxu1 %v12226_v39 }
 0x9a4   : > { %v9979_v3 = vpop.eup %9978  ;;  %5698 = vadd.xlane.f32.xlu1 %v5697_v17  ;;  %v5682_v28 = vmul.f32 %v12295_v49, %v9977_v15 }
 0x9a5   : > { %v9981_v22 = vpop.eup %9980  ;;  %v9385_v23 = vpop.f32.mrb[172].mxu1  ;;  %v5712_v24 = vsel %vm1945_vm2, %v5684_v20, 0.0  ;;  %v5685_v26 = vmul.f32 %v12295_v49, %v9979_v3  ;;  %v5954_v54 = vpack.c.bf16 %v9979_v3, %v9975_v14 }
 0x9a6   : > { %v5660_v19 = vadd.f32 %v9385_v23, %v5515_v21  ;;  %v5631_v31 = vpop.f32.mrb[173].mxu1  ;;  %5713 = vadd.xlane.f32.xlu0 %v5712_v24  ;;  %v5953_v32 = vpack.c.bf16 %v9981_v22, %v9977_v15  ;;  %9410 = vmatpush3.bf16.msra.mxu1 %v12226_v39  ;;  %v5683_v35 = vmul.f32 %v12295_v49, %v9981_v22  ;;  %v5706_v39 = vsel %vm1945_vm2, %v5682_v28, 0.0 }
 0x9a7   : > { %v5658_v53 = vadd.f32 %v5631_v31, %v5513_v16  ;;  %v9386_v44 = vpop.f32.mrb[174].mxu1  ;;  %v5715_v46 = vsel %vm1945_vm2, %v5685_v26, 0.0  ;;  %9427 = vmatprep.subr.bf16.mxu1 %v12218_v30 }
 0x9a8   : > { %9990 = vtanh.f32 %v5660_v19  ;;  %v5661_v47 = vadd.f32 %v9386_v44, %v5516_v43  ;;  %v5634_v51 = vpop.f32.mrb[175].mxu1  ;;  %9395 = vmatprep.mubr.msk.bf16.mxu1 %vm1945_vm2, %v5953_v32  ;;  %5716 = vadd.xlane.f32.xlu1 %v5715_v46  ;;  %v5709_v30 = vsel %vm1945_vm2, %v5683_v35, 0.0 }
 0x9a9   : > { %9992 = vtanh.f32 %v5658_v53  ;;  %v5659_v25 = vadd.f32 %v5634_v51, %v5514_v50  ;;  %9396 = vmatmul.mubr.msk.bf16.gmra.mrb[180].mxu1 %vm1945_vm2, %v5954_v54 }
 0x9aa   : > { %v9983_v52 = vpop.eup %9982  ;;  %9994 = vtanh.f32 %v5661_v47  ;;  %5707 = vadd.xlane.f32.xlu0 %v5706_v39 }
 0x9ab   : > { %v9985_v34 = vpop.eup %9984  ;;  %9996 = vtanh.f32 %v5659_v25  ;;  %v5688_v56 = vmul.f32 %v12295_v49, %v9983_v52 }
 0x9ac   : > { %v9987_v61 = vpop.eup %9986  ;;  %5710 = vadd.xlane.f32.xlu1 %v5709_v30  ;;  %v5686_v62 = vmul.f32 %v12295_v49, %v9985_v34 }
 0x9ad   : > { %v9989_v0 = vpop.eup %9988  ;;  %v5724_v59 = vsel %vm1945_vm2, %v5688_v56, 0.0  ;;  %v5689_v55 = vmul.f32 %v12295_v49, %v9987_v61  ;;  %v5956_v60 = vpack.c.bf16 %v9987_v61, %v9983_v52 }
 0x9ae   : > { %5725 = vadd.xlane.f32.xlu0 %v5724_v59  ;;  %v5955_v63 = vpack.c.bf16 %v9989_v0, %v9985_v34  ;;  %v5687_v2 = vmul.f32 %v12295_v49, %v9989_v0  ;;  %v5718_v4 = vsel %vm1945_vm2, %v5686_v62, 0.0 }
 0x9af   : > { %v5727_v1 = vsel %vm1945_vm2, %v5689_v55, 0.0 }
 0x9b0   : > { %9399 = vmatprep.mubr.msk.bf16.mxu1 %vm1945_vm2, %v5955_v63  ;;  %5728 = vadd.xlane.f32.xlu1 %v5727_v1  ;;  %v5721_v8 = vsel %vm1945_vm2, %v5687_v2, 0.0 }
 0x9b1   : > { %9400 = vmatmul.mubr.msk.bf16.gmra.mrb[184].mxu1 %vm1945_vm2, %v5956_v60 }
 0x9b2   : > { %v9991_v58 = vpop.eup %9990  ;;  %5719 = vadd.xlane.f32.xlu0 %v5718_v4 }
 0x9b3   : > { %v9993_v6 = vpop.eup %9992  ;;  %v5692_v9 = vmul.f32 %v12295_v49, %v9991_v58 }
 0x9b4   : > { %v9995_v10 = vpop.eup %9994  ;;  %5722 = vadd.xlane.f32.xlu1 %v5721_v8  ;;  %v5690_v17 = vmul.f32 %v12295_v49, %v9993_v6 }
 0x9b5   : > { %v9997_v12 = vpop.eup %9996  ;;  %v5736_v41 = vsel %vm1945_vm2, %v5692_v9, 0.0  ;;  %v5693_v14 = vmul.f32 %v12295_v49, %v9995_v10  ;;  %v5958_v15 = vpack.c.bf16 %v9995_v10, %v9991_v58 }
 0x9b6   : > { %5737 = vadd.xlane.f32.xlu0 %v5736_v41  ;;  %v5957_v20 = vpack.c.bf16 %v9997_v12, %v9993_v6  ;;  %v5691_v22 = vmul.f32 %v12295_v49, %v9997_v12  ;;  %v5730_v21 = vsel %vm1945_vm2, %v5690_v17, 0.0 }
 0x9b7   : > { %v5739_v3 = vsel %vm1945_vm2, %v5693_v14, 0.0 }
 0x9b8   : > { %9403 = vmatprep.mubr.msk.bf16.mxu1 %vm1945_vm2, %v5957_v20  ;;  %5740 = vadd.xlane.f32.xlu1 %v5739_v3  ;;  %v5733_v23 = vsel %vm1945_vm2, %v5691_v22, 0.0 }
 0x9b9   : > { %9404 = vmatmul.mubr.msk.bf16.gmra.mrb[188].mxu1 %vm1945_vm2, %v5958_v15 }
 0x9ba   : > { %5731 = vadd.xlane.f32.xlu0 %v5730_v21 }
 0x9bc   : > { %5734 = vadd.xlane.f32.xlu1 %v5733_v23 }
 0xa2b   : > { %v5702_v24 = vpop.xlane.xlu0 %5701 }
 0xa2c   : > { %v8476_v26 = vmul.f32 -1.442695, %v5702_v24 }
 0xa2d   : > { %v5705_v54 = vpop.xlane.xlu1 %5704 }
 0xa2e   : > { %9998 = vpow2.f32 %v8476_v26  ;;  %v8477_v28 = vmul.f32 -1.442695, %v5705_v54 }
 0xa2f   : > { %v5696_v19 = vpop.xlane.xlu0 %5695 }
 0xa30   : > { %10000 = vpow2.f32 %v8477_v28  ;;  %v8474_v16 = vmul.f32 -1.442695, %v5696_v19 }
 0xa31   : > { %v5699_v31 = vpop.xlane.xlu1 %5698 }
 0xa32   : > { %10002 = vpow2.f32 %v8474_v16  ;;  %v8475_v32 = vmul.f32 -1.442695, %v5699_v31 }
 0xa33   : > { %v5714_v53 = vpop.xlane.xlu0 %5713 }
 0xa34   : > { %10004 = vpow2.f32 %v8475_v32  ;;  %v8480_v43 = vmul.f32 -1.442695, %v5714_v53 }
 0xa35   : > { %v5717_v44 = vpop.xlane.xlu1 %5716 }
 0xa36   : > { %10006 = vpow2.f32 %v8480_v43  ;;  %v8481_v46 = vmul.f32 -1.442695, %v5717_v44 }
 0xa37   : > { %v5708_v35 = vpop.xlane.xlu0 %5707 }
 0xa38   : > { %v9999_v47 = vpop.eup %9998  ;;  %v8478_v50 = vmul.f32 -1.442695, %v5708_v35  ;;  %10008 = vpow2.f32 %v8481_v46 }
 0xa39   : > { %v5792_v51 = vadd.f32 1.0, %v9999_v47  ;;  %v5711_v25 = vpop.xlane.xlu1 %5710 }
 0xa3a   : > { %v10001_v39 = vpop.eup %10000  ;;  %10010 = vpow2.f32 %v8478_v50  ;;  %v8479_v52 = vmul.f32 -1.442695, %v5711_v25 }
 0xa3b   : > { %v5726_v34 = vpop.xlane.xlu0 %5725  ;;  %v5793_v56 = vadd.f32 1.0, %v10001_v39 }
 0xa3c   : > { %v10003_v30 = vpop.eup %10002  ;;  %10012 = vpow2.f32 %v8479_v52  ;;  %v8484_v61 = vmul.f32 -1.442695, %v5726_v34 }
 0xa3d   : > { %10014 = vrcp.f32 %v5792_v51  ;;  %v5790_v0 = vadd.f32 1.0, %v10003_v30  ;;  %v5729_v59 = vpop.xlane.xlu1 %5728 }
 0xa3e   : > { %v10005_v55 = vpop.eup %10004  ;;  %10016 = vpow2.f32 %v8484_v61  ;;  %v8485_v62 = vmul.f32 -1.442695, %v5729_v59 }
 0xa3f   : > { %10018 = vrcp.f32 %v5790_v0  ;;  %v5791_v60 = vadd.f32 1.0, %v10005_v55  ;;  %v5720_v63 = vpop.xlane.xlu0 %5719 }
 0xa40   : > { %v10007_v1 = vpop.eup %10006  ;;  %10020 = vrcp.f32 %v5793_v56  ;;  %v8482_v2 = vmul.f32 -1.442695, %v5720_v63 }
 0xa41   : > { %10022 = vrcp.f32 %v5791_v60  ;;  %v5796_v4 = vadd.f32 1.0, %v10007_v1  ;;  %v5723_v58 = vpop.xlane.xlu1 %5722 }
 0xa42   : > { %10024 = vpow2.f32 %v8482_v2  ;;  %v8483_v6 = vmul.f32 -1.442695, %v5723_v58  ;;  %v10009_v8 = vpop.eup %10008 }
 0xa43   : > { %10026 = vpow2.f32 %v8485_v62  ;;  %v5738_v9 = vpop.xlane.xlu0 %5737  ;;  %v5797_v3 = vadd.f32 1.0, %v10009_v8 }
 0xa44   : > { %v10011_v10 = vpop.eup %10010  ;;  %10028 = vpow2.f32 %v8483_v6  ;;  %v8488_v12 = vmul.f32 -1.442695, %v5738_v9 }
 0xa45   : > { %10030 = vrcp.f32 %v5796_v4  ;;  %v5794_v41 = vadd.f32 1.0, %v10011_v10  ;;  %v5741_v14 = vpop.xlane.xlu1 %5740 }
 0xa46   : > { %v10013_v15 = vpop.eup %10012  ;;  %10032 = vpow2.f32 %v8488_v12  ;;  %v8489_v17 = vmul.f32 -1.442695, %v5741_v14 }
 0xa47   : > { %v10015_v20 = vpop.eup %10014  ;;  %10034 = vrcp.f32 %v5794_v41  ;;  %v5795_v22 = vadd.f32 1.0, %v10013_v15  ;;  %v5732_v21 = vpop.xlane.xlu0 %5731 }
 0xa48   : > { %v10017_v23 = vpop.eup %10016  ;;  %10036 = vpow2.f32 %v8489_v17  ;;  %v8486_v24 = vmul.f32 -1.442695, %v5732_v21  ;;  %v5866_v47 = vrot.slane %v10015_v20, %v12075_v18 }
 0xa49   : > { %v10019_v26 = vpop.eup %10018  ;;  %10038 = vrcp.f32 %v5795_v22  ;;  %v5735_v54 = vpop.xlane.xlu1 %5734  ;;  %v5800_v43 = vadd.f32 1.0, %v10017_v23 }
 0xa4a   : > { %v10021_v28 = vpop.eup %10020  ;;  %10040 = vpow2.f32 %v8486_v24  ;;  %v8487_v19 = vmul.f32 -1.442695, %v5735_v54  ;;  %v5857_v32 = vrot.slane %v10019_v26, %v12071_v13 }
 0xa4b   : > { %v10023_v16 = vpop.eup %10022  ;;  %10042 = vrcp.f32 %v5797_v3  ;;  %v5871_v56 = vrot.slane %v10021_v28, %v12083_v29 }
 0xa4c   : > { %v10025_v31 = vpop.eup %10024  ;;  %v5861_v53 = vrot.slane %v10023_v16, %v12067_v5  ;;  %10044 = vpow2.f32 %v8487_v19 }
 0xa4d   : > { %v10027_v44 = vpop.eup %10026  ;;  %v5798_v46 = vadd.f32 1.0, %v10025_v31 }
 0xa4e   : > { %v10029_v35 = vpop.eup %10028  ;;  %v5862_v50 = vsel %vm4965_vm3, %v5861_v53, %v5857_v32  ;;  %v5801_v34 = vadd.f32 1.0, %v10027_v44 }
 0xa4f   : > { %v10031_v51 = vpop.eup %10030  ;;  %10046 = vrcp.f32 %v5798_v46  ;;  %v5799_v25 = vadd.f32 1.0, %v10029_v35  ;;  %v5867_v52 = vsel %vm4972_vm4, %v5866_v47, %v5862_v50 }
 0xa50   : > { %v10033_v39 = vpop.eup %10032  ;;  %10048 = vrcp.f32 %v5800_v43  ;;  %v5872_v60 = vsel %vm4979_vm5, %v5871_v56, %v5867_v52  ;;  %v5886_v8 = vrot.slane %v10031_v51, %v12089_v37 }
 0xa51   : > { %v10035_v30 = vpop.eup %10034  ;;  %10050 = vrcp.f32 %v5799_v25  ;;  %v5804_v59 = vadd.f32 1.0, %v10033_v39  ;;  %v5937_v39 = vld [vmem:[#allocation3 + $0x190] sm:$0xff] }
 0xa52   : > { %v10037_v61 = vpop.eup %10036  ;;  %v5876_v0 = vrot.slane %v10035_v30, %v12092_v38  ;;  %10052 = vrcp.f32 %v5801_v34  ;;  %v5935_v30 = vld [vmem:[#allocation3 + $0x180] sm:$0xff] }
 0xa53   : > { %v10039_v55 = vpop.eup %10038  ;;  %v5805_v2 = vadd.f32 1.0, %v10037_v61  ;;  %10054 = vrcp.f32 %v5804_v59 }
 0xa54   : > { %v10041_v62 = vpop.eup %10040  ;;  %v5877_v63 = vsel %vm4986_vm6, %v5876_v0, %v5872_v60  ;;  %v5881_v1 = vrot.slane %v10039_v55, %v12095_v42  ;;  %v5938_v0 = vld [vmem:[#allocation3 + $0x198] sm:$0xff]  ;;  %v5936_v60 = vld [vmem:[#allocation3 + $0x188] sm:$0xff] }
 0xa55   : > { %v10043_v4 = vpop.eup %10042  ;;  %v5802_v58 = vadd.f32 1.0, %v10041_v62 }
 0xa56   : > { %v10045_v6 = vpop.eup %10044  ;;  %v5882_v9 = vsel %vm4993_vm7, %v5881_v1, %v5877_v63  ;;  %v5891_v14 = vrot.slane %v10043_v4, %v12101_v48  ;;  %v5941_v1 = vld [vmem:[#allocation3 + $0x1b0] sm:$0xff] }
 0xa57   : > { %10056 = vrcp.f32 %v5802_v58  ;;  %v5803_v10 = vadd.f32 1.0, %v10045_v6  ;;  %v5887_v12 = vsel %vm5000_vm8, %v5886_v8, %v5882_v9  ;;  %v5939_v58 = vld [vmem:[#allocation3 + $0x1a0] sm:$0xff]  ;;  %v5942_v9 = vld [vmem:[#allocation3 + $0x1b8] sm:$0xff] }
 0xa58   : > { %10058 = vrcp.f32 %v5805_v2  ;;  %v5892_v3 = vsel %vm5007_vm9, %v5891_v14, %v5887_v12 }
 0xa59   : > { %v10047_v41 = vpop.eup %10046  ;;  %10060 = vrcp.f32 %v5803_v10 }
 0xa5a   : > { %v10049_v15 = vpop.eup %10048  ;;  %v5896_v17 = vrot.slane %v10047_v41, %v12108_v57  ;;  %v5940_v41 = vld [vmem:[#allocation3 + $0x1a8] sm:$0xff] }
 0xa5b   : > { %v10051_v20 = vpop.eup %10050  ;;  %v5906_v24 = vrot.slane %v10049_v15, %v12122_v11 }
 0xa5c   : > { %v5897_v22 = vsel %vm5014_vm10, %v5896_v17, %v5892_v3  ;;  %v5901_v21 = vrot.slane %v10051_v20, %v12117_v7  ;;  %v10053_v23 = vpop.eup %10052 }
 0xa5d   : > { %v10055_v54 = vpop.eup %10054  ;;  %v5911_v16 = vrot.slane %v10053_v23, %v12139_v27 }
 0xa5e   : > { %v5902_v26 = vsel %vm5021_vm11, %v5901_v21, %v5897_v22  ;;  %v5926_v35 = vrot.slane %v10055_v54, %v12163_v45 }
 0xa5f   : > { %v5907_v28 = vsel %vm5028_vm12, %v5906_v24, %v5902_v26  ;;  %v5945_v24 = vld [vmem:[#allocation3 + $0x1d0] sm:$0xff] }
 0xa60   : > { %v5912_v43 = vsel %vm5035_vm13, %v5911_v16, %v5907_v28 }
 0xa61   : > { %v10057_v19 = vpop.eup %10056 }
 0xa62   : > { %v10059_v31 = vpop.eup %10058  ;;  %v5916_v32 = vrot.slane %v10057_v19, %v12147_v36 }
 0xa63   : > { %v10061_v53 = vpop.eup %10060  ;;  %v5931_v47 = vrot.slane %v10059_v31, %v12168_v33  ;;  %v5943_v31 = vld [vmem:[#allocation3 + $0x1c0] sm:$0xff] }
 0xa64   : > { %v5917_v44 = vsel %vm5042_vm14, %v5916_v32, %v5912_v43  ;;  %v5921_v46 = vrot.slane %v10061_v53, %v12158_v40 }
 0xa66   : > { %v5922_v50 = vsel %vm5049_vm15, %v5921_v46, %v5917_v44  ;;  %v5946_v44 = vld [vmem:[#allocation3 + $0x1d8] sm:$0xff] }
 0xa67   : > { %v5927_v51 = vsel %vm5056_vm0, %v5926_v35, %v5922_v50 }
 0xa68   : > { %v5932_v25 = vsel %vm5063_vm1, %v5931_v47, %v5927_v51  ;;  %v5944_v51 = vld [vmem:[#allocation3 + $0x1c8] sm:$0xff] }
 0xa69   : > { %5934 = vst [vmem:[%s12182_s12 + $0x2] sm:$0x1] %v5932_v25 }
 0xa74   : > { %v9393_v52 = vpop.f32.mrb[176].mxu1 }
 0xa75   : > { %v6082_v34 = vadd.f32 %v9393_v52, %v5937_v39  ;;  %v6017_v56 = vpop.f32.mrb[177].mxu1 }
 0xa76   : > { %v6080_v61 = vadd.f32 %v6017_v56, %v5935_v30  ;;  %v9394_v59 = vpop.f32.mrb[178].mxu1  ;;  %v12385_v30 = vld [vmem:[%s12843_s4 + $0x10] sm:$0xff]  }
 0xa77   : > { %10062 = vtanh.f32 %v6082_v34  ;;  %v6083_v55 = vadd.f32 %v9394_v59, %v5938_v0  ;;  %v6020_v62 = vpop.f32.mrb[179].mxu1  ;;  %v12393_v59 = vld [vmem:[%s12843_s4 + $0x18] sm:$0xff]  }
 0xa78   : > { %10064 = vtanh.f32 %v6080_v61  ;;  %v6081_v63 = vadd.f32 %v6020_v62, %v5936_v60  ;;  %v5949_v62 = vld [vmem:[#allocation3 + $0x1f0] sm:$0xff] }
 0xa79   : > { %10066 = vtanh.f32 %v6083_v55 }
 0xa7a   : > { %10068 = vtanh.f32 %v6081_v63 }
 0xa7c   : > { %v9397_v2 = vpop.f32.mrb[180].mxu1 }
 0xa7d   : > { %v6086_v4 = vadd.f32 %v9397_v2, %v5941_v1  ;;  %v6033_v6 = vpop.f32.mrb[181].mxu1 }
 0xa7e   : > { %v6084_v8 = vadd.f32 %v6033_v6, %v5939_v58  ;;  %v9398_v10 = vpop.f32.mrb[182].mxu1 }
 0xa7f   : > { %10070 = vtanh.f32 %v6086_v4  ;;  %v6087_v12 = vadd.f32 %v9398_v10, %v5942_v9  ;;  %v6036_v14 = vpop.f32.mrb[183].mxu1 }
 0xa80   : > { %10072 = vtanh.f32 %v6084_v8  ;;  %v6085_v15 = vadd.f32 %v6036_v14, %v5940_v41  ;;  %v5947_v8 = vld [vmem:[#allocation3 + $0x1e0] sm:$0xff]  ;;  %v5950_v41 = vld [vmem:[#allocation3 + $0x1f8] sm:$0xff] }
 0xa81   : > { %v10063_v17 = vpop.eup %10062  ;;  %10074 = vtanh.f32 %v6087_v12 }
 0xa82   : > { %v10065_v20 = vpop.eup %10064  ;;  %10076 = vtanh.f32 %v6085_v15  ;;  %v6114_v3 = vmul.f32 %v12295_v49, %v10063_v17 }
 0xa83   : > { %v10067_v22 = vpop.eup %10066  ;;  %v6112_v19 = vmul.f32 %v12295_v49, %v10065_v20 }
 0xa84   : > { %v10069_v21 = vpop.eup %10068  ;;  %v6386_v23 = vpack.c.bf16 %v10067_v22, %v10063_v17  ;;  %v9401_v26 = vpop.f32.mrb[184].mxu1  ;;  %v6134_v54 = vsel %vm1945_vm2, %v6114_v3, 0.0  ;;  %v6115_v28 = vmul.f32 %v12295_v49, %v10067_v22  ;;  %v5948_v3 = vld [vmem:[#allocation3 + $0x1e8] sm:$0xff] }
 0xa85   : > { %v6090_v16 = vadd.f32 %v9401_v26, %v5945_v24  ;;  %v6049_v32 = vpop.f32.mrb[185].mxu1  ;;  %6135 = vadd.xlane.f32.xlu0 %v6134_v54  ;;  %v6385_v53 = vpack.c.bf16 %v10069_v21, %v10065_v20  ;;  %v6113_v47 = vmul.f32 %v12295_v49, %v10069_v21  ;;  %v6128_v52 = vsel %vm1945_vm2, %v6112_v19, 0.0 }
 0xa86   : > { %v6088_v43 = vadd.f32 %v6049_v32, %v5943_v31  ;;  %v9402_v46 = vpop.f32.mrb[186].mxu1  ;;  %v6137_v35 = vsel %vm1945_vm2, %v6115_v28, 0.0 }
 0xa87   : > { %10078 = vtanh.f32 %v6090_v16  ;;  %v6091_v50 = vadd.f32 %v9402_v46, %v5946_v44  ;;  %v6052_v25 = vpop.f32.mrb[187].mxu1  ;;  %9411 = vmatprep.mubr.msk.bf16.mxu1 %vm1945_vm2, %v6385_v53  ;;  %6138 = vadd.xlane.f32.xlu1 %v6137_v35  ;;  %v6131_v61 = vsel %vm1945_vm2, %v6113_v47, 0.0 }
 0xa88   : > { %10080 = vtanh.f32 %v6088_v43  ;;  %v6089_v39 = vadd.f32 %v6052_v25, %v5944_v51  ;;  %9412 = vmatmul.mubr.msk.bf16.vlgmr.msra.gmra.mrb[192].mxu1 %vm1945_vm2, %v6386_v23 }
 0xa89   : > { %v10071_v34 = vpop.eup %10070  ;;  %10082 = vtanh.f32 %v6091_v50  ;;  %6129 = vadd.xlane.f32.xlu0 %v6128_v52  ;;  %9428 = vmatpush3.bf16.msra.mxu1 %v12385_v30 }
 0xa8a   : > { %v10073_v56 = vpop.eup %10072  ;;  %10084 = vtanh.f32 %v6089_v39  ;;  %v6118_v0 = vmul.f32 %v12295_v49, %v10071_v34  ;;  %9429 = vmatprep.subr.bf16.mxu1 %v12393_v59 }
 0xa8b   : > { %v10075_v55 = vpop.eup %10074  ;;  %6132 = vadd.xlane.f32.xlu1 %v6131_v61  ;;  %v6116_v58 = vmul.f32 %v12295_v49, %v10073_v56 }
 0xa8c   : > { %v10077_v60 = vpop.eup %10076  ;;  %v9405_v63 = vpop.f32.mrb[188].mxu1  ;;  %v6146_v1 = vsel %vm1945_vm2, %v6118_v0, 0.0  ;;  %v6119_v2 = vmul.f32 %v12295_v49, %v10075_v55  ;;  %v6388_v4 = vpack.c.bf16 %v10075_v55, %v10071_v34 }
 0xa8d   : > { %v6094_v6 = vadd.f32 %v9405_v63, %v5949_v62  ;;  %v6065_v9 = vpop.f32.mrb[189].mxu1  ;;  %6147 = vadd.xlane.f32.xlu0 %v6146_v1  ;;  %v6387_v10 = vpack.c.bf16 %v10077_v60, %v10073_v56  ;;  %9430 = vmatpush3.bf16.msra.mxu1 %v12393_v59  ;;  %v6117_v17 = vmul.f32 %v12295_v49, %v10077_v60  ;;  %v6140_v23 = vsel %vm1945_vm2, %v6116_v58, 0.0 }
 0xa8e   : > { %v6092_v12 = vadd.f32 %v6065_v9, %v5947_v8  ;;  %v9406_v14 = vpop.f32.mrb[190].mxu1  ;;  %v6149_v15 = vsel %vm1945_vm2, %v6119_v2, 0.0  ;;  %9447 = vmatprep.subr.bf16.mxu1 %v12385_v30 }
 0xa8f   : > { %10086 = vtanh.f32 %v6094_v6  ;;  %v6095_v20 = vadd.f32 %v9406_v14, %v5950_v41  ;;  %v6068_v22 = vpop.f32.mrb[191].mxu1  ;;  %9415 = vmatprep.mubr.msk.bf16.mxu1 %vm1945_vm2, %v6387_v10  ;;  %6150 = vadd.xlane.f32.xlu1 %v6149_v15  ;;  %v6143_v54 = vsel %vm1945_vm2, %v6117_v17, 0.0 }
 0xa90   : > { %10088 = vtanh.f32 %v6092_v12  ;;  %v6093_v21 = vadd.f32 %v6068_v22, %v5948_v3  ;;  %9416 = vmatmul.mubr.msk.bf16.gmra.mrb[196].mxu1 %vm1945_vm2, %v6388_v4 }
 0xa91   : > { %v10079_v24 = vpop.eup %10078  ;;  %10090 = vtanh.f32 %v6095_v20  ;;  %6141 = vadd.xlane.f32.xlu0 %v6140_v23 }
 0xa92   : > { %v10081_v26 = vpop.eup %10080  ;;  %10092 = vtanh.f32 %v6093_v21  ;;  %v6122_v28 = vmul.f32 %v12295_v49, %v10079_v24 }
 0xa93   : > { %v10083_v19 = vpop.eup %10082  ;;  %6144 = vadd.xlane.f32.xlu1 %v6143_v54  ;;  %v6120_v43 = vmul.f32 %v12295_v49, %v10081_v26 }
 0xa94   : > { %v10085_v16 = vpop.eup %10084  ;;  %v6158_v31 = vsel %vm1945_vm2, %v6122_v28, 0.0  ;;  %v6123_v32 = vmul.f32 %v12295_v49, %v10083_v19  ;;  %v6390_v53 = vpack.c.bf16 %v10083_v19, %v10079_v24 }
 0xa95   : > { %6159 = vadd.xlane.f32.xlu0 %v6158_v31  ;;  %v6389_v44 = vpack.c.bf16 %v10085_v16, %v10081_v26  ;;  %v6121_v35 = vmul.f32 %v12295_v49, %v10085_v16  ;;  %v6152_v47 = vsel %vm1945_vm2, %v6120_v43, 0.0 }
 0xa96   : > { %v6161_v46 = vsel %vm1945_vm2, %v6123_v32, 0.0 }
 0xa97   : > { %9419 = vmatprep.mubr.msk.bf16.mxu1 %vm1945_vm2, %v6389_v44  ;;  %6162 = vadd.xlane.f32.xlu1 %v6161_v46  ;;  %v6155_v25 = vsel %vm1945_vm2, %v6121_v35, 0.0 }
 0xa98   : > { %9420 = vmatmul.mubr.msk.bf16.gmra.mrb[200].mxu1 %vm1945_vm2, %v6390_v53 }
 0xa99   : > { %v10087_v50 = vpop.eup %10086  ;;  %6153 = vadd.xlane.f32.xlu0 %v6152_v47 }
 0xa9a   : > { %v10089_v51 = vpop.eup %10088  ;;  %v6126_v39 = vmul.f32 %v12295_v49, %v10087_v50 }
 0xa9b   : > { %v10091_v52 = vpop.eup %10090  ;;  %6156 = vadd.xlane.f32.xlu1 %v6155_v25  ;;  %v6124_v55 = vmul.f32 %v12295_v49, %v10089_v51 }
 0xa9c   : > { %v10093_v34 = vpop.eup %10092  ;;  %v6170_v56 = vsel %vm1945_vm2, %v6126_v39, 0.0  ;;  %v6127_v61 = vmul.f32 %v12295_v49, %v10091_v52  ;;  %v6392_v0 = vpack.c.bf16 %v10091_v52, %v10087_v50 }
 0xa9d   : > { %6171 = vadd.xlane.f32.xlu0 %v6170_v56  ;;  %v6391_v60 = vpack.c.bf16 %v10093_v34, %v10089_v51  ;;  %v6125_v63 = vmul.f32 %v12295_v49, %v10093_v34  ;;  %v6164_v1 = vsel %vm1945_vm2, %v6124_v55, 0.0 }
 0xa9e   : > { %v6173_v62 = vsel %vm1945_vm2, %v6127_v61, 0.0 }
 0xa9f   : > { %9423 = vmatprep.mubr.msk.bf16.mxu1 %vm1945_vm2, %v6391_v60  ;;  %6174 = vadd.xlane.f32.xlu1 %v6173_v62  ;;  %v6167_v2 = vsel %vm1945_vm2, %v6125_v63, 0.0 }
 0xaa0   : > { %9424 = vmatmul.mubr.msk.bf16.gmra.mrb[204].mxu1 %vm1945_vm2, %v6392_v0 }
 0xaa1   : > { %6165 = vadd.xlane.f32.xlu0 %v6164_v1 }
 0xaa3   : > { %6168 = vadd.xlane.f32.xlu1 %v6167_v2 }
 0xb12   : > { %v6136_v4 = vpop.xlane.xlu0 %6135 }
 0xb13   : > { %v8500_v58 = vmul.f32 -1.442695, %v6136_v4 }
 0xb14   : > { %v6139_v6 = vpop.xlane.xlu1 %6138 }
 0xb15   : > { %10094 = vpow2.f32 %v8500_v58  ;;  %v8501_v8 = vmul.f32 -1.442695, %v6139_v6 }
 0xb16   : > { %v6130_v9 = vpop.xlane.xlu0 %6129 }
 0xb17   : > { %10096 = vpow2.f32 %v8501_v8  ;;  %v8498_v10 = vmul.f32 -1.442695, %v6130_v9 }
 0xb18   : > { %v6133_v49 = vpop.xlane.xlu1 %6132 }
 0xb19   : > { %10098 = vpow2.f32 %v8498_v10  ;;  %v8499_v12 = vmul.f32 -1.442695, %v6133_v49 }
 0xb1a   : > { %v6148_v41 = vpop.xlane.xlu0 %6147 }
 0xb1b   : > { %10100 = vpow2.f32 %v8499_v12  ;;  %v8504_v14 = vmul.f32 -1.442695, %v6148_v41 }
 0xb1c   : > { %v6151_v15 = vpop.xlane.xlu1 %6150 }
 0xb1d   : > { %10102 = vpow2.f32 %v8504_v14  ;;  %v8505_v17 = vmul.f32 -1.442695, %v6151_v15 }
 0xb1e   : > { %v6142_v20 = vpop.xlane.xlu0 %6141 }
 0xb1f   : > { %v10095_v3 = vpop.eup %10094  ;;  %v8502_v22 = vmul.f32 -1.442695, %v6142_v20  ;;  %10104 = vpow2.f32 %v8505_v17 }
 0xb20   : > { %v6226_v21 = vadd.f32 1.0, %v10095_v3  ;;  %v6145_v23 = vpop.xlane.xlu1 %6144 }
 0xb21   : > { %v10097_v24 = vpop.eup %10096  ;;  %10106 = vpow2.f32 %v8502_v22  ;;  %v8503_v26 = vmul.f32 -1.442695, %v6145_v23 }
 0xb22   : > { %v6160_v54 = vpop.xlane.xlu0 %6159  ;;  %v6227_v19 = vadd.f32 1.0, %v10097_v24 }
 0xb23   : > { %v10099_v28 = vpop.eup %10098  ;;  %10108 = vpow2.f32 %v8503_v26  ;;  %v8508_v16 = vmul.f32 -1.442695, %v6160_v54 }
 0xb24   : > { %10110 = vrcp.f32 %v6226_v21  ;;  %v6224_v31 = vadd.f32 1.0, %v10099_v28  ;;  %v6163_v32 = vpop.xlane.xlu1 %6162 }
 0xb25   : > { %v10101_v53 = vpop.eup %10100  ;;  %10112 = vpow2.f32 %v8508_v16  ;;  %v8509_v44 = vmul.f32 -1.442695, %v6163_v32 }
 0xb26   : > { %10114 = vrcp.f32 %v6224_v31  ;;  %v6225_v43 = vadd.f32 1.0, %v10101_v53  ;;  %v6154_v46 = vpop.xlane.xlu0 %6153 }
 0xb27   : > { %v10103_v35 = vpop.eup %10102  ;;  %10116 = vrcp.f32 %v6227_v19  ;;  %v8506_v47 = vmul.f32 -1.442695, %v6154_v46 }
 0xb28   : > { %10118 = vrcp.f32 %v6225_v43  ;;  %v6230_v50 = vadd.f32 1.0, %v10103_v35  ;;  %v6157_v51 = vpop.xlane.xlu1 %6156 }
 0xb29   : > { %10120 = vpow2.f32 %v8506_v47  ;;  %v8507_v25 = vmul.f32 -1.442695, %v6157_v51  ;;  %v10105_v39 = vpop.eup %10104 }
 0xb2a   : > { %10122 = vpow2.f32 %v8509_v44  ;;  %v6172_v52 = vpop.xlane.xlu0 %6171  ;;  %v6231_v63 = vadd.f32 1.0, %v10105_v39 }
 0xb2b   : > { %v10107_v34 = vpop.eup %10106  ;;  %10124 = vpow2.f32 %v8507_v25  ;;  %v8512_v56 = vmul.f32 -1.442695, %v6172_v52 }
 0xb2c   : > { %10126 = vrcp.f32 %v6230_v50  ;;  %v6228_v61 = vadd.f32 1.0, %v10107_v34  ;;  %v6175_v0 = vpop.xlane.xlu1 %6174 }
 0xb2d   : > { %v10109_v55 = vpop.eup %10108  ;;  %10128 = vpow2.f32 %v8512_v56  ;;  %v8513_v60 = vmul.f32 -1.442695, %v6175_v0 }
 0xb2e   : > { %v10111_v62 = vpop.eup %10110  ;;  %10130 = vrcp.f32 %v6228_v61  ;;  %v6229_v1 = vadd.f32 1.0, %v10109_v55  ;;  %v6166_v2 = vpop.xlane.xlu0 %6165 }
 0xb2f   : > { %v10113_v4 = vpop.eup %10112  ;;  %10132 = vpow2.f32 %v8513_v60  ;;  %v8510_v58 = vmul.f32 -1.442695, %v6166_v2  ;;  %v6300_v22 = vrot.slane %v10111_v62, %v12075_v18 }
 0xb30   : > { %v10115_v6 = vpop.eup %10114  ;;  %10134 = vrcp.f32 %v6229_v1  ;;  %v6169_v8 = vpop.xlane.xlu1 %6168  ;;  %v6234_v15 = vadd.f32 1.0, %v10113_v4 }
 0xb31   : > { %v10117_v9 = vpop.eup %10116  ;;  %10136 = vpow2.f32 %v8510_v58  ;;  %v8511_v10 = vmul.f32 -1.442695, %v6169_v8  ;;  %v6291_v41 = vrot.slane %v10115_v6, %v12071_v13 }
 0xb32   : > { %v10119_v49 = vpop.eup %10118  ;;  %10138 = vrcp.f32 %v6231_v63  ;;  %v6305_v16 = vrot.slane %v10117_v9, %v12083_v29 }
 0xb33   : > { %v10121_v12 = vpop.eup %10120  ;;  %v6295_v14 = vrot.slane %v10119_v49, %v12067_v5  ;;  %10140 = vpow2.f32 %v8511_v10 }
 0xb34   : > { %v10123_v17 = vpop.eup %10122  ;;  %v6232_v20 = vadd.f32 1.0, %v10121_v12 }
 0xb35   : > { %v10125_v3 = vpop.eup %10124  ;;  %v6296_v21 = vsel %vm4965_vm3, %v6295_v14, %v6291_v41  ;;  %v6235_v28 = vadd.f32 1.0, %v10123_v17 }
 0xb36   : > { %v10127_v23 = vpop.eup %10126  ;;  %10142 = vrcp.f32 %v6232_v20  ;;  %v6233_v24 = vadd.f32 1.0, %v10125_v3  ;;  %v6301_v54 = vsel %vm4972_vm4, %v6300_v22, %v6296_v21 }
 0xb37   : > { %v10129_v26 = vpop.eup %10128  ;;  %10144 = vrcp.f32 %v6234_v15  ;;  %v6306_v44 = vsel %vm4979_vm5, %v6305_v16, %v6301_v54  ;;  %v6320_v52 = vrot.slane %v10127_v23, %v12089_v37  ;;  %v6371_v54 = vld [vmem:[#allocation3 + $0x210] sm:$0xff]  ;;  %v6369_v16 = vld [vmem:[#allocation3 + $0x200] sm:$0xff] }
 0xb38   : > { %v10131_v19 = vpop.eup %10130  ;;  %10146 = vrcp.f32 %v6233_v24  ;;  %v6238_v53 = vadd.f32 1.0, %v10129_v26 }
 0xb39   : > { %v10133_v31 = vpop.eup %10132  ;;  %v6310_v32 = vrot.slane %v10131_v19, %v12092_v38  ;;  %10148 = vrcp.f32 %v6235_v28 }
 0xb3a   : > { %v10135_v43 = vpop.eup %10134  ;;  %v6239_v50 = vadd.f32 1.0, %v10133_v31  ;;  %10150 = vrcp.f32 %v6238_v53  ;;  %v6372_v53 = vld [vmem:[#allocation3 + $0x218] sm:$0xff] }
 0xb3b   : > { %v10137_v46 = vpop.eup %10136  ;;  %v6311_v35 = vsel %vm4986_vm6, %v6310_v32, %v6306_v44  ;;  %v6315_v47 = vrot.slane %v10135_v43, %v12095_v42 }
 0xb3c   : > { %v10139_v51 = vpop.eup %10138  ;;  %v6236_v25 = vadd.f32 1.0, %v10137_v46  ;;  %v6370_v46 = vld [vmem:[#allocation3 + $0x208] sm:$0xff] }
 0xb3d   : > { %v10141_v39 = vpop.eup %10140  ;;  %v6316_v34 = vsel %vm4993_vm7, %v6315_v47, %v6311_v35  ;;  %v6325_v55 = vrot.slane %v10139_v51, %v12101_v48 }
 0xb3e   : > { %10152 = vrcp.f32 %v6236_v25  ;;  %v6237_v56 = vadd.f32 1.0, %v10141_v39  ;;  %v6321_v61 = vsel %vm5000_vm8, %v6320_v52, %v6316_v34  ;;  %v6373_v39 = vld [vmem:[#allocation3 + $0x220] sm:$0xff] }
 0xb3f   : > { %10154 = vrcp.f32 %v6239_v50  ;;  %v6326_v1 = vsel %vm5007_vm9, %v6325_v55, %v6321_v61  ;;  %v6375_v50 = vld [vmem:[#allocation3 + $0x230] sm:$0xff]  ;;  %v6374_v55 = vld [vmem:[#allocation3 + $0x228] sm:$0xff] }
 0xb40   : > { %v10143_v0 = vpop.eup %10142  ;;  %10156 = vrcp.f32 %v6237_v56  ;;  %v6376_v56 = vld [vmem:[#allocation3 + $0x238] sm:$0xff] }
 0xb41   : > { %v10145_v60 = vpop.eup %10144  ;;  %v6330_v62 = vrot.slane %v10143_v0, %v12108_v57 }
 0xb42   : > { %v10147_v63 = vpop.eup %10146  ;;  %v6340_v6 = vrot.slane %v10145_v60, %v12122_v11 }
 0xb43   : > { %v6331_v2 = vsel %vm5014_vm10, %v6330_v62, %v6326_v1  ;;  %v6335_v4 = vrot.slane %v10147_v63, %v12117_v7  ;;  %v10149_v58 = vpop.eup %10148 }
 0xb44   : > { %v10151_v9 = vpop.eup %10150  ;;  %v6345_v12 = vrot.slane %v10149_v58, %v12139_v27 }
 0xb45   : > { %v6336_v8 = vsel %vm5021_vm11, %v6335_v4, %v6331_v2  ;;  %v6360_v22 = vrot.slane %v10151_v9, %v12163_v45  ;;  %v12462_v2 = vld [vmem:[%s12845_s6] ss:$0 sm:$0xff]  ;;  %v6379_v9 = vld [vmem:[#allocation3 + $0x250] sm:$0xff] }
 0xb46   : > { %v6341_v10 = vsel %vm5028_vm12, %v6340_v6, %v6336_v8 }
 0xb47   : > { %v6346_v17 = vsel %vm5035_vm13, %v6345_v12, %v6341_v10 }
 0xb48   : > { %v10153_v49 = vpop.eup %10152 }
 0xb49   : > { %v10155_v41 = vpop.eup %10154  ;;  %v6350_v14 = vrot.slane %v10153_v49, %v12147_v36 }
 0xb4a   : > { %v10157_v15 = vpop.eup %10156  ;;  %v6365_v21 = vrot.slane %v10155_v41, %v12168_v33 }
 0xb4b   : > { %v6351_v20 = vsel %vm5042_vm14, %v6350_v14, %v6346_v17  ;;  %v6355_v3 = vrot.slane %v10157_v15, %v12158_v40  ;;  %v6377_v15 = vld [vmem:[#allocation3 + $0x240] sm:$0xff] }
 0xb4d   : > { %v6356_v23 = vsel %vm5049_vm15, %v6355_v3, %v6351_v20 }
 0xb4e   : > { %v6361_v24 = vsel %vm5056_vm0, %v6360_v22, %v6356_v23  ;;  %v6380_v22 = vld [vmem:[#allocation3 + $0x258] sm:$0xff] }
 0xb4f   : > { %v6366_v26 = vsel %vm5063_vm1, %v6365_v21, %v6361_v24 }
 0xb50   : > { %6368 = vst [vmem:[%s12182_s12 + $0x3] sm:$0x1] %v6366_v26 }
 0xb5b   : > { %v9413_v28 = vpop.f32.mrb[192].mxu1 }
 0xb5c   : > { %v6516_v19 = vadd.f32 %v9413_v28, %v6371_v54  ;;  %v6451_v31 = vpop.f32.mrb[193].mxu1  ;;  %v6378_v54 = vld [vmem:[#allocation3 + $0x248] sm:$0xff] }
 0xb5d   : > { %v6514_v32 = vadd.f32 %v6451_v31, %v6369_v16  ;;  %v9414_v43 = vpop.f32.mrb[194].mxu1 }
 0xb5e   : > { %10158 = vtanh.f32 %v6516_v19  ;;  %v6517_v44 = vadd.f32 %v9414_v43, %v6372_v53  ;;  %v6454_v35 = vpop.f32.mrb[195].mxu1 }
 0xb5f   : > { %10160 = vtanh.f32 %v6514_v32  ;;  %v6515_v47 = vadd.f32 %v6454_v35, %v6370_v46  ;;  %v6383_v35 = vld [vmem:[#allocation3 + $0x270] sm:$0xff] }
 0xb60   : > { %10162 = vtanh.f32 %v6517_v44 }
 0xb61   : > { %10164 = vtanh.f32 %v6515_v47 }
 0xb63   : > { %v9417_v51 = vpop.f32.mrb[196].mxu1 }
 0xb64   : > { %v6520_v25 = vadd.f32 %v9417_v51, %v6375_v50  ;;  %v6467_v52 = vpop.f32.mrb[197].mxu1 }
 0xb65   : > { %v6518_v34 = vadd.f32 %v6467_v52, %v6373_v39  ;;  %v9418_v61 = vpop.f32.mrb[198].mxu1  ;;  %v6381_v52 = vld [vmem:[#allocation3 + $0x260] sm:$0xff] }
 0xb66   : > { %10166 = vtanh.f32 %v6520_v25  ;;  %v6521_v0 = vadd.f32 %v9418_v61, %v6376_v56  ;;  %v6470_v60 = vpop.f32.mrb[199].mxu1 }
 0xb67   : > { %10168 = vtanh.f32 %v6518_v34  ;;  %v6519_v62 = vadd.f32 %v6470_v60, %v6374_v55  ;;  %v6384_v55 = vld [vmem:[#allocation3 + $0x278] sm:$0xff] }
 0xb68   : > { %v10159_v63 = vpop.eup %10158  ;;  %10170 = vtanh.f32 %v6521_v0 }
 0xb69   : > { %v10161_v1 = vpop.eup %10160  ;;  %10172 = vtanh.f32 %v6519_v62  ;;  %v6548_v4 = vmul.f32 %v12462_v2, %v10159_v63 }
 0xb6a   : > { %v10163_v58 = vpop.eup %10162  ;;  %v6546_v41 = vmul.f32 %v12462_v2, %v10161_v1 }
 0xb6b   : > { %v10165_v6 = vpop.eup %10164  ;;  %v6820_v8 = vpack.c.bf16 %v10163_v58, %v10159_v63  ;;  %v9421_v10 = vpop.f32.mrb[200].mxu1  ;;  %v6568_v49 = vsel %vm1945_vm2, %v6548_v4, 0.0  ;;  %v6549_v12 = vmul.f32 %v12462_v2, %v10163_v58  ;;  %v6382_v63 = vld [vmem:[#allocation3 + $0x268] sm:$0xff] }
 0xb6c   : > { %v6524_v14 = vadd.f32 %v9421_v10, %v6379_v9  ;;  %v6483_v17 = vpop.f32.mrb[201].mxu1  ;;  %6569 = vadd.xlane.f32.xlu0 %v6568_v49  ;;  %v6819_v20 = vpack.c.bf16 %v10165_v6, %v10161_v1  ;;  %v6547_v24 = vmul.f32 %v12462_v2, %v10165_v6  ;;  %v6562_v16 = vsel %vm1945_vm2, %v6546_v41, 0.0 }
 0xb6d   : > { %v6522_v3 = vadd.f32 %v6483_v17, %v6377_v15  ;;  %v9422_v21 = vpop.f32.mrb[202].mxu1  ;;  %v6571_v23 = vsel %vm1945_vm2, %v6549_v12, 0.0 }
 0xb6e   : > { %10174 = vtanh.f32 %v6524_v14  ;;  %v6525_v26 = vadd.f32 %v9422_v21, %v6380_v22  ;;  %v6486_v28 = vpop.f32.mrb[203].mxu1  ;;  %9431 = vmatprep.mubr.msk.bf16.mxu1 %vm1945_vm2, %v6819_v20  ;;  %6572 = vadd.xlane.f32.xlu1 %v6571_v23  ;;  %v6565_v53 = vsel %vm1945_vm2, %v6547_v24, 0.0 }
 0xb6f   : > { %10176 = vtanh.f32 %v6522_v3  ;;  %v6523_v19 = vadd.f32 %v6486_v28, %v6378_v54  ;;  %9432 = vmatmul.mubr.msk.bf16.vlgmr.msra.gmra.mrb[208].mxu1 %vm1945_vm2, %v6820_v8 }
 0xb70   : > { %v10167_v31 = vpop.eup %10166  ;;  %10178 = vtanh.f32 %v6525_v26  ;;  %6563 = vadd.xlane.f32.xlu0 %v6562_v16  ;;  %9448 = vmatpush3.bf16.msra.mxu1 %v12385_v30 }
 0xb71   : > { %v10169_v32 = vpop.eup %10168  ;;  %10180 = vtanh.f32 %v6523_v19  ;;  %v6552_v43 = vmul.f32 %v12462_v2, %v10167_v31  ;;  %9449 = vmatprep.subr.bf16.mxu1 %v12393_v59 }
 0xb72   : > { %v10171_v44 = vpop.eup %10170  ;;  %6566 = vadd.xlane.f32.xlu1 %v6565_v53  ;;  %v6550_v25 = vmul.f32 %v12462_v2, %v10169_v32 }
 0xb73   : > { %v10173_v46 = vpop.eup %10172  ;;  %v9425_v47 = vpop.f32.mrb[204].mxu1  ;;  %v6580_v50 = vsel %vm1945_vm2, %v6552_v43, 0.0  ;;  %v6822_v51 = vpack.c.bf16 %v10171_v44, %v10167_v31  ;;  %v6553_v6 = vmul.f32 %v12462_v2, %v10171_v44 }
 0xb74   : > { %v6528_v39 = vadd.f32 %v9425_v47, %v6383_v35  ;;  %v6499_v34 = vpop.f32.mrb[205].mxu1  ;;  %6581 = vadd.xlane.f32.xlu0 %v6580_v50  ;;  %v6821_v56 = vpack.c.bf16 %v10173_v46, %v10169_v32  ;;  %v6551_v61 = vmul.f32 %v12462_v2, %v10173_v46  ;;  %9450 = vmatpush3.bf16.msra.mxu1 %v12393_v59  ;;  %v6574_v59 = vsel %vm1945_vm2, %v6550_v25, 0.0 }
 0xb75   : > { %v6526_v0 = vadd.f32 %v6499_v34, %v6381_v52  ;;  %v9426_v60 = vpop.f32.mrb[206].mxu1  ;;  %9467 = vmatprep.subr.bf16.mxu1 %v12385_v30  ;;  %v6583_v49 = vsel %vm1945_vm2, %v6553_v6, 0.0 }
 0xb76   : > { %10182 = vtanh.f32 %v6528_v39  ;;  %v6529_v62 = vadd.f32 %v9426_v60, %v6384_v55  ;;  %v6502_v1 = vpop.f32.mrb[207].mxu1  ;;  %9435 = vmatprep.mubr.msk.bf16.mxu1 %vm1945_vm2, %v6821_v56  ;;  %v6577_v4 = vsel %vm1945_vm2, %v6551_v61, 0.0 }
 0xb77   : > { %10184 = vtanh.f32 %v6526_v0  ;;  %v6527_v58 = vadd.f32 %v6502_v1, %v6382_v63  ;;  %9436 = vmatmul.mubr.msk.bf16.gmra.mrb[212].mxu1 %vm1945_vm2, %v6822_v51  ;;  %6578 = vadd.xlane.f32.xlu1 %v6577_v4 }
 0xb78   : > { %v10175_v8 = vpop.eup %10174  ;;  %10186 = vtanh.f32 %v6529_v62  ;;  %6575 = vadd.xlane.f32.xlu0 %v6574_v59 }
 0xb79   : > { %v10177_v30 = vpop.eup %10176  ;;  %10188 = vtanh.f32 %v6527_v58  ;;  %v6556_v41 = vmul.f32 %v12462_v2, %v10175_v8 }
 0xb7a   : > { %v10179_v9 = vpop.eup %10178  ;;  %v6554_v17 = vmul.f32 %v12462_v2, %v10177_v30 }
 0xb7b   : > { %v10181_v10 = vpop.eup %10180  ;;  %v6824_v12 = vpack.c.bf16 %v10179_v9, %v10175_v8  ;;  %v6592_v15 = vsel %vm1945_vm2, %v6556_v41, 0.0  ;;  %v6557_v26 = vmul.f32 %v12462_v2, %v10179_v9 }
 0xb7c   : > { %6584 = vadd.xlane.f32.xlu0 %v6583_v49  ;;  %v6823_v14 = vpack.c.bf16 %v10181_v10, %v10177_v30  ;;  %v6586_v23 = vsel %vm1945_vm2, %v6554_v17, 0.0  ;;  %v6555_v19 = vmul.f32 %v12462_v2, %v10181_v10 }
 0xb7d   : > { %v6595_v28 = vsel %vm1945_vm2, %v6557_v26, 0.0 }
 0xb7e   : > { %9439 = vmatprep.mubr.msk.bf16.mxu1 %vm1945_vm2, %v6823_v14  ;;  %v6589_v16 = vsel %vm1945_vm2, %v6555_v19, 0.0 }
 0xb7f   : > { %9440 = vmatmul.mubr.msk.bf16.gmra.mrb[216].mxu1 %vm1945_vm2, %v6824_v12 }
 0xb80   : > { %v10183_v20 = vpop.eup %10182  ;;  %6593 = vadd.xlane.f32.xlu0 %v6592_v15 }
 0xb81   : > { %v10185_v3 = vpop.eup %10184  ;;  %v6560_v31 = vmul.f32 %v12462_v2, %v10183_v20 }
 0xb82   : > { %v12493_v22 = vpop.eup %10186  ;;  %v6558_v53 = vmul.f32 %v12462_v2, %v10185_v3 }
 0xb83   : > { %v10189_v21 = vpop.eup %10188  ;;  %v6826_v24 = vpack.c.bf16 %v12493_v22, %v10183_v20  ;;  %v6604_v32 = vsel %vm1945_vm2, %v6560_v31, 0.0 }
 0xb84   : > { %6587 = vadd.xlane.f32.xlu0 %v6586_v23  ;;  %v6825_v54 = vpack.c.bf16 %v10189_v21, %v10185_v3  ;;  %v6598_v43 = vsel %vm1945_vm2, %v6558_v53, 0.0  ;;  %v6559_v44 = vmul.f32 %v12462_v2, %v10189_v21 }
 0xb86   : > { %9443 = vmatprep.mubr.msk.bf16.mxu1 %vm1945_vm2, %v6825_v54  ;;  %v6601_v46 = vsel %vm1945_vm2, %v6559_v44, 0.0 }
 0xb87   : > { %9444 = vmatmul.mubr.msk.bf16.gmra.mrb[220].mxu1 %vm1945_vm2, %v6826_v24 }
 0xb88   : > { %6596 = vadd.xlane.f32.xlu0 %v6595_v28 }
 0xb8c   : > { %6590 = vadd.xlane.f32.xlu0 %v6589_v16 }
 0xb90   : > { %6605 = vadd.xlane.f32.xlu0 %v6604_v32 }
 0xb94   : > { %6599 = vadd.xlane.f32.xlu0 %v6598_v43 }
 0xb98   : > { %6602 = vadd.xlane.f32.xlu0 %v6601_v46 }
 0xbf9   : > { %v6570_v35 = vpop.xlane.xlu0 %6569 }
 0xbfa   : > { %v8524_v47 = vmul.f32 -1.442695, %v6570_v35 }
 0xbfb   : > { %v6573_v50 = vpop.xlane.xlu1 %6572 }
 0xbfc   : > { %10190 = vpow2.f32 %v8524_v47  ;;  %v8525_v51 = vmul.f32 -1.442695, %v6573_v50 }
 0xbfd   : > { %v6564_v25 = vpop.xlane.xlu0 %6563 }
 0xbfe   : > { %10192 = vpow2.f32 %v8525_v51  ;;  %v8522_v39 = vmul.f32 -1.442695, %v6564_v25 }
 0xbff   : > { %v6567_v52 = vpop.xlane.xlu1 %6566 }
 0xc00   : > { %10194 = vpow2.f32 %v8522_v39  ;;  %v8523_v34 = vmul.f32 -1.442695, %v6567_v52 }
 0xc01   : > { %v6582_v56 = vpop.xlane.xlu0 %6581 }
 0xc02   : > { %10196 = vpow2.f32 %v8523_v34  ;;  %v8528_v61 = vmul.f32 -1.442695, %v6582_v56 }
 0xc04   : > { %10198 = vpow2.f32 %v8528_v61  ;;  %v6579_v0 = vpop.xlane.xlu1 %6578 }
 0xc05   : > { %v8527_v55 = vmul.f32 -1.442695, %v6579_v0  ;;  %v6576_v60 = vpop.xlane.xlu0 %6575 }
 0xc06   : > { %v10191_v62 = vpop.eup %10190  ;;  %v8526_v63 = vmul.f32 -1.442695, %v6576_v60 }
 0xc07   : > { %v6660_v1 = vadd.f32 1.0, %v10191_v62  ;;  %10200 = vpow2.f32 %v8527_v55 }
 0xc08   : > { %v10193_v4 = vpop.eup %10192  ;;  %10202 = vpow2.f32 %v8526_v63 }
 0xc09   : > { %v6585_v58 = vpop.xlane.xlu0 %6584  ;;  %v6661_v6 = vadd.f32 1.0, %v10193_v4  ;;  %10204 = vrcp.f32 %v6660_v1 }
 0xc0a   : > { %v10195_v59 = vpop.eup %10194  ;;  %v8529_v8 = vmul.f32 -1.442695, %v6585_v58 }
 0xc0b   : > { %v6658_v30 = vadd.f32 1.0, %v10195_v59 }
 0xc0c   : > { %v10197_v9 = vpop.eup %10196  ;;  %10206 = vpow2.f32 %v8529_v8 }
 0xc0d   : > { %10208 = vrcp.f32 %v6658_v30  ;;  %v6659_v10 = vadd.f32 1.0, %v10197_v9  ;;  %v6594_v49 = vpop.xlane.xlu0 %6593 }
 0xc0e   : > { %v10199_v12 = vpop.eup %10198  ;;  %10210 = vrcp.f32 %v6661_v6  ;;  %v8532_v41 = vmul.f32 -1.442695, %v6594_v49 }
 0xc0f   : > { %10212 = vrcp.f32 %v6659_v10  ;;  %v6664_v14 = vadd.f32 1.0, %v10199_v12 }
 0xc10   : > { %10214 = vpow2.f32 %v8532_v41 }
 0xc11   : > { %v10201_v15 = vpop.eup %10200  ;;  %v6588_v17 = vpop.xlane.xlu0 %6587  ;;  %10216 = vrcp.f32 %v6664_v14 }
 0xc12   : > { %v10203_v20 = vpop.eup %10202  ;;  %v6663_v3 = vadd.f32 1.0, %v10201_v15  ;;  %v8530_v21 = vmul.f32 -1.442695, %v6588_v17 }
 0xc13   : > { %v6662_v23 = vadd.f32 1.0, %v10203_v20  ;;  %v10205_v24 = vpop.eup %10204 }
 0xc14   : > { %10218 = vrcp.f32 %v6663_v3  ;;  %v6734_v35 = vrot.slane %v10205_v24, %v12075_v18 }
 0xc15   : > { %10220 = vrcp.f32 %v6662_v23  ;;  %v6597_v26 = vpop.xlane.xlu0 %6596 }
 0xc16   : > { %v10207_v54 = vpop.eup %10206  ;;  %10222 = vpow2.f32 %v8530_v21  ;;  %v8533_v28 = vmul.f32 -1.442695, %v6597_v26 }
 0xc17   : > { %v10209_v19 = vpop.eup %10208  ;;  %v6665_v16 = vadd.f32 1.0, %v10207_v54 }
 0xc18   : > { %v10211_v31 = vpop.eup %10210  ;;  %10224 = vpow2.f32 %v8533_v28  ;;  %v6725_v43 = vrot.slane %v10209_v19, %v12071_v13 }
 0xc19   : > { %v10213_v32 = vpop.eup %10212  ;;  %10226 = vrcp.f32 %v6665_v16  ;;  %v6591_v53 = vpop.xlane.xlu0 %6590  ;;  %v6739_v50 = vrot.slane %v10211_v31, %v12083_v29 }
 0xc1a   : > { %v6729_v44 = vrot.slane %v10213_v32, %v12067_v5  ;;  %v8531_v46 = vmul.f32 -1.442695, %v6591_v53  ;;  %v10215_v47 = vpop.eup %10214 }
 0xc1b   : > { %v10217_v25 = vpop.eup %10216  ;;  %v6668_v63 = vadd.f32 1.0, %v10215_v47 }
 0xc1c   : > { %v6730_v51 = vsel %vm4965_vm3, %v6729_v44, %v6725_v43  ;;  %10228 = vpow2.f32 %v8531_v46  ;;  %v6754_v59 = vrot.slane %v10217_v25, %v12089_v37 }
 0xc1d   : > { %v6735_v39 = vsel %vm4972_vm4, %v6734_v35, %v6730_v51  ;;  %v6606_v52 = vpop.xlane.xlu0 %6605 }
 0xc1e   : > { %v10219_v34 = vpop.eup %10218  ;;  %v6740_v56 = vsel %vm4979_vm5, %v6739_v50, %v6735_v39  ;;  %v8536_v61 = vmul.f32 -1.442695, %v6606_v52 }
 0xc1f   : > { %v10221_v0 = vpop.eup %10220  ;;  %v6749_v62 = vrot.slane %v10219_v34, %v12095_v42 }
 0xc20   : > { %v10223_v55 = vpop.eup %10222  ;;  %v6744_v60 = vrot.slane %v10221_v0, %v12092_v38  ;;  %10230 = vpow2.f32 %v8536_v61 }
 0xc21   : > { %v6666_v1 = vadd.f32 1.0, %v10223_v55  ;;  %v6600_v4 = vpop.xlane.xlu0 %6599  ;;  %v6805_v55 = vld [vmem:[#allocation3 + $0x290] sm:$0xff] }
 0xc22   : > { %v10225_v58 = vpop.eup %10224  ;;  %v6745_v6 = vsel %vm4986_vm6, %v6744_v60, %v6740_v56  ;;  %v8534_v8 = vmul.f32 -1.442695, %v6600_v4 }
 0xc23   : > { %v10227_v30 = vpop.eup %10226  ;;  %v6750_v9 = vsel %vm4993_vm7, %v6749_v62, %v6745_v6  ;;  %10232 = vrcp.f32 %v6666_v1  ;;  %v6669_v10 = vadd.f32 1.0, %v10225_v58 }
 0xc24   : > { %v6755_v49 = vsel %vm5000_vm8, %v6754_v59, %v6750_v9  ;;  %v6759_v12 = vrot.slane %v10227_v30, %v12101_v48  ;;  %10234 = vpow2.f32 %v8534_v8  ;;  %v6806_v59 = vld [vmem:[#allocation3 + $0x298] sm:$0xff]  ;;  %v6804_v30 = vld [vmem:[#allocation3 + $0x288] sm:$0xff] }
 0xc25   : > { %v6603_v41 = vpop.xlane.xlu0 %6602  ;;  %10236 = vrcp.f32 %v6668_v63  ;;  %v6803_v63 = vld [vmem:[#allocation3 + $0x280] sm:$0xff] }
 0xc26   : > { %v10229_v14 = vpop.eup %10228  ;;  %v6760_v15 = vsel %vm5007_vm9, %v6759_v12, %v6755_v49  ;;  %v8535_v17 = vmul.f32 -1.442695, %v6603_v41  ;;  %10238 = vrcp.f32 %v6669_v10  ;;  %v6809_v49 = vld [vmem:[#allocation3 + $0x2b0] sm:$0xff] }
 0xc27   : > { %v6667_v20 = vadd.f32 1.0, %v10229_v14  ;;  %v6807_v14 = vld [vmem:[#allocation3 + $0x2a0] sm:$0xff] }
 0xc28   : > { %10240 = vpow2.f32 %v8535_v17 }
 0xc29   : > { %10242 = vrcp.f32 %v6667_v20  ;;  %v6810_v20 = vld [vmem:[#allocation3 + $0x2b8] sm:$0xff] }
 0xc2a   : > { %v10231_v3 = vpop.eup %10230 }
 0xc2b   : > { %v6672_v19 = vadd.f32 1.0, %v10231_v3 }
 0xc2d   : > { %v10233_v21 = vpop.eup %10232 }
 0xc2e   : > { %v10235_v23 = vpop.eup %10234  ;;  %v6764_v24 = vrot.slane %v10233_v21, %v12108_v57 }
 0xc2f   : > { %v6670_v26 = vadd.f32 1.0, %v10235_v23  ;;  %v10237_v54 = vpop.eup %10236  ;;  %v6808_v23 = vld [vmem:[#allocation3 + $0x2a8] sm:$0xff] }
 0xc30   : > { %v6765_v28 = vsel %vm5014_vm10, %v6764_v24, %v6760_v15  ;;  %v10239_v16 = vpop.eup %10238  ;;  %v6774_v44 = vrot.slane %v10237_v54, %v12122_v11 }
 0xc31   : > { %10244 = vrcp.f32 %v6670_v26  ;;  %v6779_v46 = vrot.slane %v10239_v16, %v12139_v27 }
 0xc32   : > { %v10241_v31 = vpop.eup %10240  ;;  %10246 = vrcp.f32 %v6672_v19 }
 0xc33   : > { %v10243_v32 = vpop.eup %10242  ;;  %v6671_v53 = vadd.f32 1.0, %v10241_v31 }
 0xc34   : > { %v6769_v43 = vrot.slane %v10243_v32, %v12117_v7 }
 0xc35   : > { %10248 = vrcp.f32 %v6671_v53  ;;  %v6813_v53 = vld [vmem:[#allocation3 + $0x2d0] sm:$0xff] }
 0xc36   : > { %v6770_v35 = vsel %vm5021_vm11, %v6769_v43, %v6765_v28 }
 0xc37   : > { %v6775_v47 = vsel %vm5028_vm12, %v6774_v44, %v6770_v35 }
 0xc38   : > { %v6780_v50 = vsel %vm5035_vm13, %v6779_v46, %v6775_v47 }
 0xc3b   : > { %v10245_v51 = vpop.eup %10244 }
 0xc3c   : > { %v6784_v25 = vrot.slane %v10245_v51, %v12147_v36  ;;  %v10247_v39 = vpop.eup %10246 }
 0xc3d   : > { %v6794_v61 = vrot.slane %v10247_v39, %v12163_v45 }
 0xc3e   : > { %v6785_v52 = vsel %vm5042_vm14, %v6784_v25, %v6780_v50  ;;  %v6811_v50 = vld [vmem:[#allocation3 + $0x2c0] sm:$0xff] }
 0xc3f   : > { %v10249_v34 = vpop.eup %10248 }
 0xc40   : > { %v6789_v56 = vrot.slane %v10249_v34, %v12158_v40 }
 0xc42   : > { %v6790_v0 = vsel %vm5049_vm15, %v6789_v56, %v6785_v52  ;;  %v9433_v60 = vpop.f32.mrb[208].mxu1  ;;  %v6814_v52 = vld [vmem:[#allocation3 + $0x2d8] sm:$0xff] }
 0xc43   : > { %v6950_v62 = vadd.f32 %v9433_v60, %v6805_v55  ;;  %v6885_v1 = vpop.f32.mrb[209].mxu1  ;;  %v12538_v4 = vsel %vm5056_vm0, %v6794_v61, %v6790_v0  ;;  %v6812_v55 = vld [vmem:[#allocation3 + $0x2c8] sm:$0xff] }
 0xc44   : > { %v6948_v58 = vadd.f32 %v6885_v1, %v6803_v63  ;;  %v9434_v6 = vpop.f32.mrb[210].mxu1 }
 0xc45   : > { %10250 = vtanh.f32 %v6950_v62  ;;  %v6951_v8 = vadd.f32 %v9434_v6, %v6806_v59  ;;  %v6888_v9 = vpop.f32.mrb[211].mxu1 }
 0xc46   : > { %10252 = vtanh.f32 %v6948_v58  ;;  %v6949_v10 = vadd.f32 %v6888_v9, %v6804_v30  ;;  %v10556_v58 = vld [vmem:[%s12843_s4 + $0x10] sm:$0xff]   ;;  %v10557_v30 = vld [vmem:[%s12843_s4 + $0x18] sm:$0xff]  }
 0xc47   : > { %10254 = vtanh.f32 %v6951_v8 }
 0xc48   : > { %10256 = vtanh.f32 %v6949_v10 }
 0xc4a   : > { %v9437_v12 = vpop.f32.mrb[212].mxu1 }
 0xc4b   : > { %v6954_v41 = vadd.f32 %v9437_v12, %v6809_v49  ;;  %v6901_v15 = vpop.f32.mrb[213].mxu1  ;;  %v6817_v49 = vld [vmem:[#allocation3 + $0x2f0] sm:$0xff] }
 0xc4c   : > { %v6952_v17 = vadd.f32 %v6901_v15, %v6807_v14  ;;  %v9438_v3 = vpop.f32.mrb[214].mxu1 }
 0xc4d   : > { %10258 = vtanh.f32 %v6954_v41  ;;  %v6955_v21 = vadd.f32 %v9438_v3, %v6810_v20  ;;  %v6904_v24 = vpop.f32.mrb[215].mxu1  ;;  %v6815_v20 = vld [vmem:[#allocation3 + $0x2e0] sm:$0xff] }
 0xc4e   : > { %10260 = vtanh.f32 %v6952_v17  ;;  %v6953_v26 = vadd.f32 %v6904_v24, %v6808_v23 }
 0xc4f   : > { %v10251_v54 = vpop.eup %10250  ;;  %10262 = vtanh.f32 %v6955_v21 }
 0xc50   : > { %v10253_v28 = vpop.eup %10252  ;;  %10264 = vtanh.f32 %v6953_v26  ;;  %v6982_v19 = vmul.f32 %v12462_v2, %v10251_v54  ;;  %v6818_v26 = vld [vmem:[#allocation3 + $0x2f8] sm:$0xff] }
 0xc51   : > { %v10255_v16 = vpop.eup %10254  ;;  %v6980_v35 = vmul.f32 %v12462_v2, %v10253_v28 }
 0xc52   : > { %v10257_v31 = vpop.eup %10256  ;;  %v7254_v32 = vpack.c.bf16 %v10255_v16, %v10251_v54  ;;  %v9441_v43 = vpop.f32.mrb[216].mxu1  ;;  %v7002_v44 = vsel %vm1945_vm2, %v6982_v19, 0.0  ;;  %v6983_v46 = vmul.f32 %v12462_v2, %v10255_v16  ;;  %v6816_v19 = vld [vmem:[#allocation3 + $0x2e8] sm:$0xff] }
 0xc53   : > { %v6958_v47 = vadd.f32 %v9441_v43, %v6813_v53  ;;  %v6917_v51 = vpop.f32.mrb[217].mxu1  ;;  %7003 = vadd.xlane.f32.xlu1 %v7002_v44  ;;  %v7253_v25 = vpack.c.bf16 %v10257_v31, %v10253_v28  ;;  %v6981_v61 = vmul.f32 %v12462_v2, %v10257_v31  ;;  %v6996_v63 = vsel %vm1945_vm2, %v6980_v35, 0.0 }
 0xc54   : > { %v6956_v39 = vadd.f32 %v6917_v51, %v6811_v50  ;;  %v9442_v34 = vpop.f32.mrb[218].mxu1  ;;  %v7005_v56 = vsel %vm1945_vm2, %v6983_v46, 0.0 }
 0xc55   : > { %10266 = vtanh.f32 %v6958_v47  ;;  %v6959_v0 = vadd.f32 %v9442_v34, %v6814_v52  ;;  %v6920_v60 = vpop.f32.mrb[219].mxu1  ;;  %9451 = vmatprep.mubr.msk.bf16.mxu1 %vm1945_vm2, %v7253_v25  ;;  %7006 = vadd.xlane.f32.xlu0 %v7005_v56  ;;  %v6999_v6 = vsel %vm1945_vm2, %v6981_v61, 0.0 }
 0xc56   : > { %10268 = vtanh.f32 %v6956_v39  ;;  %v6957_v62 = vadd.f32 %v6920_v60, %v6812_v55  ;;  %9452 = vmatmul.mubr.msk.bf16.vlgmr.msra.gmra.mrb[224].mxu1 %vm1945_vm2, %v7254_v32 }
 0xc57   : > { %v10259_v1 = vpop.eup %10258  ;;  %10270 = vtanh.f32 %v6959_v0  ;;  %6997 = vadd.xlane.f32.xlu1 %v6996_v63  ;;  %9468 = vmatpush3.bf16.msra.mxu1 %v10556_v58 }
 0xc58   : > { %v10261_v59 = vpop.eup %10260  ;;  %10272 = vtanh.f32 %v6957_v62  ;;  %v6986_v8 = vmul.f32 %v12462_v2, %v10259_v1  ;;  %9469 = vmatprep.subr.bf16.mxu1 %v10557_v30 }
 0xc59   : > { %v10263_v9 = vpop.eup %10262  ;;  %7000 = vadd.xlane.f32.xlu0 %v6999_v6  ;;  %v6984_v15 = vmul.f32 %v12462_v2, %v10261_v59 }
 0xc5a   : > { %v10265_v10 = vpop.eup %10264  ;;  %v9445_v12 = vpop.f32.mrb[220].mxu1  ;;  %v7014_v41 = vsel %vm1945_vm2, %v6986_v8, 0.0  ;;  %v7256_v14 = vpack.c.bf16 %v10263_v9, %v10259_v1  ;;  %v6987_v43 = vmul.f32 %v12462_v2, %v10263_v9 }
 0xc5b   : > { %v6962_v17 = vadd.f32 %v9445_v12, %v6817_v49  ;;  %v6933_v3 = vpop.f32.mrb[221].mxu1  ;;  %7015 = vadd.xlane.f32.xlu1 %v7014_v41  ;;  %v7255_v21 = vpack.c.bf16 %v10265_v10, %v10261_v59  ;;  %v6985_v23 = vmul.f32 %v12462_v2, %v10265_v10  ;;  %9470 = vmatpush3.bf16.msra.mxu1 %v10557_v30  ;;  %v7008_v53 = vsel %vm1945_vm2, %v6984_v15, 0.0 }
 0xc5c   : > { %v6960_v24 = vadd.f32 %v6933_v3, %v6815_v20  ;;  %v9446_v54 = vpop.f32.mrb[222].mxu1  ;;  %v7017_v50 = vsel %vm1945_vm2, %v6987_v43, 0.0 }
 0xc5d   : > { %10274 = vtanh.f32 %v6962_v17  ;;  %v6963_v28 = vadd.f32 %v9446_v54, %v6818_v26  ;;  %v6936_v16 = vpop.f32.mrb[223].mxu1  ;;  %9455 = vmatprep.mubr.msk.bf16.mxu1 %vm1945_vm2, %v7255_v21  ;;  %v7011_v31 = vsel %vm1945_vm2, %v6985_v23, 0.0 }
 0xc5e   : > { %10276 = vtanh.f32 %v6960_v24  ;;  %v6961_v32 = vadd.f32 %v6936_v16, %v6816_v19  ;;  %9456 = vmatmul.mubr.msk.bf16.gmra.mrb[228].mxu1 %vm1945_vm2, %v7256_v14  ;;  %7012 = vadd.xlane.f32.xlu0 %v7011_v31 }
 0xc5f   : > { %v10267_v44 = vpop.eup %10266  ;;  %10278 = vtanh.f32 %v6963_v28  ;;  %7009 = vadd.xlane.f32.xlu1 %v7008_v53 }
 0xc60   : > { %v10269_v46 = vpop.eup %10268  ;;  %10280 = vtanh.f32 %v6961_v32  ;;  %v6990_v25 = vmul.f32 %v12462_v2, %v10267_v44 }
 0xc61   : > { %v10271_v35 = vpop.eup %10270  ;;  %v6988_v34 = vmul.f32 %v12462_v2, %v10269_v46 }
 0xc62   : > { %v10273_v47 = vpop.eup %10272  ;;  %v7258_v51 = vpack.c.bf16 %v10271_v35, %v10267_v44  ;;  %v7026_v52 = vsel %vm1945_vm2, %v6990_v25, 0.0  ;;  %v6991_v63 = vmul.f32 %v12462_v2, %v10271_v35 }
 0xc63   : > { %7018 = vadd.xlane.f32.xlu1 %v7017_v50  ;;  %v7257_v39 = vpack.c.bf16 %v10273_v47, %v10269_v46  ;;  %v7020_v60 = vsel %vm1945_vm2, %v6988_v34, 0.0  ;;  %v6989_v59 = vmul.f32 %v12462_v2, %v10273_v47 }
 0xc64   : > { %v7029_v58 = vsel %vm1945_vm2, %v6991_v63, 0.0 }
 0xc65   : > { %9459 = vmatprep.mubr.msk.bf16.mxu1 %vm1945_vm2, %v7257_v39  ;;  %v7023_v6 = vsel %vm1945_vm2, %v6989_v59, 0.0 }
 0xc66   : > { %9460 = vmatmul.mubr.msk.bf16.gmra.mrb[232].mxu1 %vm1945_vm2, %v7258_v51 }
 0xc67   : > { %v10275_v56 = vpop.eup %10274  ;;  %7027 = vadd.xlane.f32.xlu1 %v7026_v52 }
 0xc68   : > { %v10277_v61 = vpop.eup %10276  ;;  %v6994_v8 = vmul.f32 %v12462_v2, %v10275_v56 }
 0xc69   : > { %v12571_v0 = vpop.eup %10278  ;;  %v6992_v9 = vmul.f32 %v12462_v2, %v10277_v61 }
 0xc6a   : > { %v10281_v55 = vpop.eup %10280  ;;  %v7260_v62 = vpack.c.bf16 %v12571_v0, %v10275_v56  ;;  %v7038_v30 = vsel %vm1945_vm2, %v6994_v8, 0.0 }
 0xc6b   : > { %7021 = vadd.xlane.f32.xlu1 %v7020_v60  ;;  %v7259_v1 = vpack.c.bf16 %v10281_v55, %v10277_v61  ;;  %v7032_v10 = vsel %vm1945_vm2, %v6992_v9, 0.0  ;;  %v6993_v49 = vmul.f32 %v12462_v2, %v10281_v55 }
 0xc6d   : > { %9463 = vmatprep.mubr.msk.bf16.mxu1 %vm1945_vm2, %v7259_v1  ;;  %v7035_v12 = vsel %vm1945_vm2, %v6993_v49, 0.0 }
 0xc6e   : > { %9464 = vmatmul.mubr.msk.bf16.gmra.mrb[236].mxu1 %vm1945_vm2, %v7260_v62 }
 0xc6f   : > { %7030 = vadd.xlane.f32.xlu1 %v7029_v58 }
 0xc73   : > { %7024 = vadd.xlane.f32.xlu1 %v7023_v6 }
 0xc77   : > { %7039 = vadd.xlane.f32.xlu1 %v7038_v30 }
 0xc7b   : > { %7033 = vadd.xlane.f32.xlu1 %v7032_v10 }
 0xc7f   : > { %7036 = vadd.xlane.f32.xlu1 %v7035_v12 }
 0xce0   : > { %v7004_v41 = vpop.xlane.xlu1 %7003 }
 0xce1   : > { %v8548_v14 = vmul.f32 -1.442695, %v7004_v41 }
 0xce2   : > { %v7007_v15 = vpop.xlane.xlu0 %7006 }
 0xce3   : > { %10282 = vpow2.f32 %v8548_v14  ;;  %v8549_v17 = vmul.f32 -1.442695, %v7007_v15 }
 0xce4   : > { %v6998_v20 = vpop.xlane.xlu1 %6997 }
 0xce5   : > { %v8546_v3 = vmul.f32 -1.442695, %v6998_v20  ;;  %v7239_v20 = vld [vmem:[#allocation3 + $0x310] sm:$0xff] }
 0xce6   : > { %v7001_v21 = vpop.xlane.xlu0 %7000 }
 0xce7   : > { %10284 = vpow2.f32 %v8546_v3  ;;  %v8547_v23 = vmul.f32 -1.442695, %v7001_v21 }
 0xce8   : > { %10286 = vpow2.f32 %v8549_v17  ;;  %v7016_v24 = vpop.xlane.xlu1 %7015 }
 0xce9   : > { %10288 = vpow2.f32 %v8547_v23  ;;  %v8552_v26 = vmul.f32 -1.442695, %v7016_v24  ;;  %v7237_v23 = vld [vmem:[#allocation3 + $0x300] sm:$0xff] }
 0xceb   : > { %10290 = vpow2.f32 %v8552_v26  ;;  %v7013_v54 = vpop.xlane.xlu0 %7012 }
 0xcec   : > { %v8551_v28 = vmul.f32 -1.442695, %v7013_v54  ;;  %v7010_v19 = vpop.xlane.xlu1 %7009  ;;  %v7240_v54 = vld [vmem:[#allocation3 + $0x318] sm:$0xff] }
 0xced   : > { %v8550_v16 = vmul.f32 -1.442695, %v7010_v19  ;;  %v10283_v31 = vpop.eup %10282 }
 0xcee   : > { %10292 = vpow2.f32 %v8551_v28  ;;  %v7094_v53 = vadd.f32 1.0, %v10283_v31 }
 0xcef   : > { %10294 = vpow2.f32 %v8550_v16  ;;  %v7238_v16 = vld [vmem:[#allocation3 + $0x308] sm:$0xff] }
 0xcf1   : > { %v10285_v32 = vpop.eup %10284 }
 0xcf2   : > { %v10287_v43 = vpop.eup %10286  ;;  %v7092_v44 = vadd.f32 1.0, %v10285_v32 }
 0xcf3   : > { %v10289_v46 = vpop.eup %10288  ;;  %v7095_v50 = vadd.f32 1.0, %v10287_v43 }
 0xcf4   : > { %10296 = vrcp.f32 %v7092_v44  ;;  %v7093_v35 = vadd.f32 1.0, %v10289_v46  ;;  %v7241_v46 = vld [vmem:[#allocation3 + $0x320] sm:$0xff] }
 0xcf5   : > { %v10291_v47 = vpop.eup %10290  ;;  %10298 = vrcp.f32 %v7094_v53  ;;  %v7243_v53 = vld [vmem:[#allocation3 + $0x330] sm:$0xff] }
 0xcf6   : > { %10300 = vrcp.f32 %v7093_v35  ;;  %v7098_v51 = vadd.f32 1.0, %v10291_v47 }
 0xcf7   : > { %10302 = vrcp.f32 %v7095_v50  ;;  %v7244_v50 = vld [vmem:[#allocation3 + $0x338] sm:$0xff] }
 0xcf8   : > { %v10293_v25 = vpop.eup %10292  ;;  %10304 = vrcp.f32 %v7098_v51 }
 0xcf9   : > { %v10295_v39 = vpop.eup %10294  ;;  %v7097_v52 = vadd.f32 1.0, %v10293_v25 }
 0xcfa   : > { %v7096_v34 = vadd.f32 1.0, %v10295_v39  ;;  %v7242_v39 = vld [vmem:[#allocation3 + $0x328] sm:$0xff] }
 0xcfb   : > { %10306 = vrcp.f32 %v7097_v52 }
 0xcfc   : > { %10308 = vrcp.f32 %v7096_v34 }
 0xcfe   : > { %v10297_v56 = vpop.eup %10296 }
 0xcff   : > { %v10299_v61 = vpop.eup %10298  ;;  %v7159_v60 = vrot.slane %v10297_v56, %v12071_v13 }
 0xd00   : > { %v10301_v55 = vpop.eup %10300  ;;  %v7168_v63 = vrot.slane %v10299_v61, %v12075_v18 }
 0xd01   : > { %v7163_v62 = vrot.slane %v10301_v55, %v12067_v5  ;;  %v10303_v1 = vpop.eup %10302 }
 0xd02   : > { %v10305_v59 = vpop.eup %10304  ;;  %v7173_v9 = vrot.slane %v10303_v1, %v12083_v29 }
 0xd03   : > { %v7164_v58 = vsel %vm4965_vm3, %v7163_v62, %v7159_v60  ;;  %v7188_v41 = vrot.slane %v10305_v59, %v12089_v37 }
 0xd04   : > { %v7169_v6 = vsel %vm4972_vm4, %v7168_v63, %v7164_v58  ;;  %v7247_v58 = vld [vmem:[#allocation3 + $0x350] sm:$0xff] }
 0xd05   : > { %v10307_v8 = vpop.eup %10306  ;;  %v7174_v12 = vsel %vm4979_vm5, %v7173_v9, %v7169_v6  ;;  %v7245_v9 = vld [vmem:[#allocation3 + $0x340] sm:$0xff] }
 0xd06   : > { %v10309_v30 = vpop.eup %10308  ;;  %v7183_v49 = vrot.slane %v10307_v8, %v12095_v42 }
 0xd07   : > { %v7178_v10 = vrot.slane %v10309_v30, %v12092_v38 }
 0xd09   : > { %v7179_v14 = vsel %vm4986_vm6, %v7178_v10, %v7174_v12 }
 0xd0a   : > { %v7184_v15 = vsel %vm4993_vm7, %v7183_v49, %v7179_v14 }
 0xd0b   : > { %v12600_v17 = vsel %vm5000_vm8, %v7188_v41, %v7184_v15  ;;  %v7248_v15 = vld [vmem:[#allocation3 + $0x358] sm:$0xff] }
 0xd29   : > { %v9453_v3 = vpop.f32.mrb[224].mxu1 }
 0xd2a   : > { %v7384_v21 = vadd.f32 %v9453_v3, %v7239_v20  ;;  %v7319_v24 = vpop.f32.mrb[225].mxu1 }
 0xd2b   : > { %v7382_v26 = vadd.f32 %v7319_v24, %v7237_v23  ;;  %v9454_v28 = vpop.f32.mrb[226].mxu1 }
 0xd2c   : > { %10310 = vtanh.f32 %v7384_v21  ;;  %v7385_v19 = vadd.f32 %v9454_v28, %v7240_v54  ;;  %v7322_v31 = vpop.f32.mrb[227].mxu1  ;;  %v7246_v21 = vld [vmem:[#allocation3 + $0x348] sm:$0xff] }
 0xd2d   : > { %10312 = vtanh.f32 %v7382_v26  ;;  %v7383_v32 = vadd.f32 %v7322_v31, %v7238_v16 }
 0xd2e   : > { %10314 = vtanh.f32 %v7385_v19  ;;  %v12615_v19 = vld [vmem:[%s12845_s6] ss:$0 sm:$0xff] }
 0xd2f   : > { %10316 = vtanh.f32 %v7383_v32 }
 0xd31   : > { %v9457_v43 = vpop.f32.mrb[228].mxu1 }
 0xd32   : > { %v7388_v44 = vadd.f32 %v9457_v43, %v7243_v53  ;;  %v7335_v35 = vpop.f32.mrb[229].mxu1  ;;  %v7251_v53 = vld [vmem:[#allocation3 + $0x370] sm:$0xff] }
 0xd33   : > { %v7386_v47 = vadd.f32 %v7335_v35, %v7241_v46  ;;  %v9458_v51 = vpop.f32.mrb[230].mxu1 }
 0xd34   : > { %10318 = vtanh.f32 %v7388_v44  ;;  %v7389_v25 = vadd.f32 %v9458_v51, %v7244_v50  ;;  %v7338_v52 = vpop.f32.mrb[231].mxu1  ;;  %v7249_v50 = vld [vmem:[#allocation3 + $0x360] sm:$0xff] }
 0xd35   : > { %10320 = vtanh.f32 %v7386_v47  ;;  %v7387_v34 = vadd.f32 %v7338_v52, %v7242_v39 }
 0xd36   : > { %v10311_v56 = vpop.eup %10310  ;;  %10322 = vtanh.f32 %v7389_v25 }
 0xd37   : > { %v10313_v61 = vpop.eup %10312  ;;  %10324 = vtanh.f32 %v7387_v34  ;;  %v7416_v55 = vmul.f32 %v12462_v2, %v10311_v56  ;;  %v7252_v34 = vld [vmem:[#allocation3 + $0x378] sm:$0xff] }
 0xd38   : > { %v10315_v60 = vpop.eup %10314  ;;  %v7414_v62 = vmul.f32 %v12462_v2, %v10313_v61 }
 0xd39   : > { %v10317_v63 = vpop.eup %10316  ;;  %v7688_v1 = vpack.c.bf16 %v10315_v60, %v10311_v56  ;;  %v9461_v59 = vpop.f32.mrb[232].mxu1  ;;  %v7436_v6 = vsel %vm1945_vm2, %v7416_v55, 0.0  ;;  %v7417_v8 = vmul.f32 %v12462_v2, %v10315_v60  ;;  %v7250_v55 = vld [vmem:[#allocation3 + $0x368] sm:$0xff] }
 0xd3a   : > { %v7392_v30 = vadd.f32 %v9461_v59, %v7247_v58  ;;  %v7351_v10 = vpop.f32.mrb[233].mxu1  ;;  %7437 = vadd.xlane.f32.xlu0 %v7436_v6  ;;  %v7430_v49 = vsel %vm1945_vm2, %v7414_v62, 0.0  ;;  %v7687_v12 = vpack.c.bf16 %v10317_v63, %v10313_v61  ;;  %v7415_v41 = vmul.f32 %v12462_v2, %v10317_v63 }
 0xd3b   : > { %v7390_v14 = vadd.f32 %v7351_v10, %v7245_v9  ;;  %v9462_v20 = vpop.f32.mrb[234].mxu1  ;;  %7431 = vadd.xlane.f32.xlu1 %v7430_v49  ;;  %v7439_v2 = vsel %vm1945_vm2, %v7417_v8, 0.0 }
 0xd3c   : > { %10326 = vtanh.f32 %v7392_v30  ;;  %v7393_v3 = vadd.f32 %v9462_v20, %v7248_v15  ;;  %v7354_v23 = vpop.f32.mrb[235].mxu1  ;;  %9471 = vmatprep.mubr.msk.bf16.mxu1 %vm1945_vm2, %v7687_v12  ;;  %v7433_v24 = vsel %vm1945_vm2, %v7415_v41, 0.0 }
 0xd3d   : > { %10328 = vtanh.f32 %v7390_v14  ;;  %v7391_v26 = vadd.f32 %v7354_v23, %v7246_v21  ;;  %9472 = vmatmul.mubr.msk.bf16.vlgmr.msra.gmra.mrb[240].mxu1 %vm1945_vm2, %v7688_v1 }
 0xd3e   : > { %v10319_v54 = vpop.eup %10318  ;;  %10330 = vtanh.f32 %v7393_v3  ;;  %7434 = vadd.xlane.f32.xlu0 %v7433_v24 }
 0xd3f   : > { %v10321_v28 = vpop.eup %10320  ;;  %10332 = vtanh.f32 %v7391_v26  ;;  %7440 = vadd.xlane.f32.xlu1 %v7439_v2  ;;  %v7420_v16 = vmul.f32 %v12615_v19, %v10319_v54 }
 0xd40   : > { %v10323_v31 = vpop.eup %10322  ;;  %v7418_v35 = vmul.f32 %v12615_v19, %v10321_v28 }
 0xd41   : > { %v10325_v32 = vpop.eup %10324  ;;  %v9465_v43 = vpop.f32.mrb[236].mxu1  ;;  %v7448_v44 = vsel %vm1945_vm2, %v7420_v16, 0.0  ;;  %v7690_v46 = vpack.c.bf16 %v10323_v31, %v10319_v54  ;;  %v7421_v58 = vmul.f32 %v12615_v19, %v10323_v31 }
 0xd42   : > { %v7396_v47 = vadd.f32 %v9465_v43, %v7251_v53  ;;  %v7367_v51 = vpop.f32.mrb[237].mxu1  ;;  %7449 = vadd.xlane.f32.xlu0 %v7448_v44  ;;  %v7689_v25 = vpack.c.bf16 %v10325_v32, %v10321_v28  ;;  %v7419_v39 = vmul.f32 %v12615_v19, %v10325_v32  ;;  %v7442_v1 = vsel %vm1945_vm2, %v7418_v35, 0.0  ;;  %v7673_v44 = vld [vmem:[#allocation3 + $0x390] sm:$0xff] }
 0xd43   : > { %v7394_v52 = vadd.f32 %v7367_v51, %v7249_v50  ;;  %v9466_v56 = vpop.f32.mrb[238].mxu1  ;;  %v7451_v9 = vsel %vm1945_vm2, %v7421_v58, 0.0 }
 0xd44   : > { %10334 = vtanh.f32 %v7396_v47  ;;  %v7397_v61 = vadd.f32 %v9466_v56, %v7252_v34  ;;  %v7370_v60 = vpop.f32.mrb[239].mxu1  ;;  %9475 = vmatprep.mubr.msk.bf16.mxu1 %vm1945_vm2, %v7689_v25  ;;  %v7445_v62 = vsel %vm1945_vm2, %v7419_v39, 0.0  ;;  %v7671_v47 = vld [vmem:[#allocation3 + $0x380] sm:$0xff]  ;;  %v7674_v25 = vld [vmem:[#allocation3 + $0x398] sm:$0xff]  ;;  %v7672_v34 = vld [vmem:[#allocation3 + $0x388] sm:$0xff] }
 0xd45   : > { %10336 = vtanh.f32 %v7394_v52  ;;  %v7395_v63 = vadd.f32 %v7370_v60, %v7250_v55  ;;  %9476 = vmatmul.mubr.msk.bf16.gmra.mrb[244].mxu1 %vm1945_vm2, %v7690_v46  ;;  %7446 = vadd.xlane.f32.xlu1 %v7445_v62  ;;  %v7677_v55 = vld [vmem:[#allocation3 + $0x3b0] sm:$0xff] }
 0xd46   : > { %v10327_v59 = vpop.eup %10326  ;;  %10338 = vtanh.f32 %v7397_v61  ;;  %7443 = vadd.xlane.f32.xlu0 %v7442_v1 }
 0xd47   : > { %v10329_v6 = vpop.eup %10328  ;;  %10340 = vtanh.f32 %v7395_v63  ;;  %v7424_v49 = vmul.f32 %v12615_v19, %v10327_v59  ;;  %v7675_v63 = vld [vmem:[#allocation3 + $0x3a0] sm:$0xff] }
 0xd48   : > { %v10331_v8 = vpop.eup %10330  ;;  %v7422_v14 = vmul.f32 %v12615_v19, %v10329_v6 }
 0xd49   : > { %v10333_v30 = vpop.eup %10332  ;;  %v7692_v10 = vpack.c.bf16 %v10331_v8, %v10327_v59  ;;  %v7460_v41 = vsel %vm1945_vm2, %v7424_v49, 0.0  ;;  %v7425_v26 = vmul.f32 %v12615_v19, %v10331_v8  ;;  %v7678_v59 = vld [vmem:[#allocation3 + $0x3b8] sm:$0xff] }
 0xd4a   : > { %7452 = vadd.xlane.f32.xlu0 %v7451_v9  ;;  %v7691_v12 = vpack.c.bf16 %v10333_v30, %v10329_v6  ;;  %v7454_v23 = vsel %vm1945_vm2, %v7422_v14, 0.0  ;;  %v7423_v28 = vmul.f32 %v12615_v19, %v10333_v30  ;;  %v7676_v30 = vld [vmem:[#allocation3 + $0x3a8] sm:$0xff] }
 0xd4b   : > { %v7463_v2 = vsel %vm1945_vm2, %v7425_v26, 0.0 }
 0xd4c   : > { %9479 = vmatprep.mubr.msk.bf16.mxu1 %vm1945_vm2, %v7691_v12  ;;  %v7457_v16 = vsel %vm1945_vm2, %v7423_v28, 0.0 }
 0xd4d   : > { %9480 = vmatmul.mubr.msk.bf16.gmra.mrb[248].mxu1 %vm1945_vm2, %v7692_v10 }
 0xd4e   : > { %v12632_v15 = vpop.eup %10334  ;;  %7461 = vadd.xlane.f32.xlu0 %v7460_v41 }
 0xd4f   : > { %v10337_v20 = vpop.eup %10336 }
 0xd50   : > { %v12634_v3 = vpop.eup %10338  ;;  %v7426_v31 = vmul.f32 %v12615_v19, %v10337_v20 }
 0xd51   : > { %v10341_v21 = vpop.eup %10340  ;;  %v7694_v24 = vpack.c.bf16 %v12634_v3, %v12632_v15 }
 0xd52   : > { %7455 = vadd.xlane.f32.xlu0 %v7454_v23  ;;  %v7693_v54 = vpack.c.bf16 %v10341_v21, %v10337_v20  ;;  %v7466_v32 = vsel %vm1945_vm2, %v7426_v31, 0.0  ;;  %v7427_v53 = vmul.f32 %v12615_v19, %v10341_v21 }
 0xd54   : > { %9483 = vmatprep.mubr.msk.bf16.mxu1 %vm1945_vm2, %v7693_v54  ;;  %v7469_v43 = vsel %vm1945_vm2, %v7427_v53, 0.0 }
 0xd55   : > { %9484 = vmatmul.mubr.msk.bf16.gmra.mrb[252].mxu1 %vm1945_vm2, %v7694_v24 }
 0xd56   : > { %7464 = vadd.xlane.f32.xlu0 %v7463_v2  ;;  %v7681_v2 = vld [vmem:[#allocation3 + $0x3d0] sm:$0xff] }
 0xd5a   : > { %7458 = vadd.xlane.f32.xlu0 %v7457_v16 }
 0xd5e   : > { %7467 = vadd.xlane.f32.xlu0 %v7466_v32 }
 0xd62   : > { %7470 = vadd.xlane.f32.xlu0 %v7469_v43 }
 0xe10   : > { %v9473_v46 = vpop.f32.mrb[240].mxu1 }
 0xe11   : > { %v7818_v35 = vadd.f32 %v9473_v46, %v7673_v44  ;;  %v7753_v50 = vpop.f32.mrb[241].mxu1 }
 0xe12   : > { %v7816_v51 = vadd.f32 %v7753_v50, %v7671_v47  ;;  %v9474_v39 = vpop.f32.mrb[242].mxu1 }
 0xe13   : > { %10342 = vtanh.f32 %v7818_v35  ;;  %v7819_v52 = vadd.f32 %v9474_v39, %v7674_v25  ;;  %v7756_v56 = vpop.f32.mrb[243].mxu1  ;;  %v7679_v35 = vld [vmem:[#allocation3 + $0x3c0] sm:$0xff] }
 0xe14   : > { %10344 = vtanh.f32 %v7816_v51  ;;  %v7817_v61 = vadd.f32 %v7756_v56, %v7672_v34 }
 0xe15   : > { %10346 = vtanh.f32 %v7819_v52 }
 0xe16   : > { %10348 = vtanh.f32 %v7817_v61 }
 0xe18   : > { %v9477_v60 = vpop.f32.mrb[244].mxu1 }
 0xe19   : > { %v7822_v62 = vadd.f32 %v9477_v60, %v7677_v55  ;;  %v7769_v1 = vpop.f32.mrb[245].mxu1  ;;  %v7682_v60 = vld [vmem:[#allocation3 + $0x3d8] sm:$0xff] }
 0xe1a   : > { %v7820_v58 = vadd.f32 %v7769_v1, %v7675_v63  ;;  %v9478_v6 = vpop.f32.mrb[246].mxu1 }
 0xe1b   : > { %10350 = vtanh.f32 %v7822_v62  ;;  %v7823_v8 = vadd.f32 %v9478_v6, %v7678_v59  ;;  %v7772_v9 = vpop.f32.mrb[247].mxu1  ;;  %v7428_v59 = vmul.f32 %v12615_v19, %v12632_v15  ;;  %v6995_v15 = vmul.f32 %v12615_v19, %v12571_v0 }
 0xe1c   : > { %10352 = vtanh.f32 %v7820_v58  ;;  %v7821_v10 = vadd.f32 %v7772_v9, %v7676_v30  ;;  %v7680_v30 = vld [vmem:[#allocation3 + $0x3c8] sm:$0xff] }
 0xe1d   : > { %v10343_v49 = vpop.eup %10342 }
 0xe1e   : > { %v10345_v12 = vpop.eup %10344  ;;  %10354 = vtanh.f32 %v7821_v10  ;;  %v7850_v41 = vmul.f32 %v12615_v19, %v10343_v49  ;;  %v7472_v10 = vsel %vm1945_vm2, %v7428_v59, 0.0  ;;  %v6561_v49 = vmul.f32 %v12615_v19, %v12493_v22  ;;  %v7019_v59 = vpop.xlane.xlu1 %7018 }
 0xe1f   : > { %v10347_v14 = vpop.eup %10346  ;;  %10356 = vtanh.f32 %v7823_v8  ;;  %v7848_v26 = vmul.f32 %v12615_v19, %v10345_v12 }
 0xe20   : > { %v10349_v20 = vpop.eup %10348  ;;  %v9481_v21 = vpop.f32.mrb[248].mxu1  ;;  %v7870_v23 = vsel %vm1945_vm2, %v7850_v41, 0.0  ;;  %v7851_v24 = vmul.f32 %v12615_v19, %v10347_v14  ;;  %v7685_v14 = vld [vmem:[#allocation3 + $0x3f0] sm:$0xff] }
 0xe21   : > { %v7785_v54 = vpop.f32.mrb[249].mxu1  ;;  %7871 = vadd.xlane.f32.xlu1 %v7870_v23  ;;  %v7849_v31 = vmul.f32 %v12615_v19, %v10349_v20  ;;  %v7826_v32 = vadd.f32 %v9481_v21, %v7681_v2  ;;  %v7864_v43 = vsel %vm1945_vm2, %v7848_v26, 0.0  ;;  %v6607_v21 = vsel %vm1945_vm2, %v6561_v49, 0.0 }
 0xe22   : > { %v9482_v28 = vpop.f32.mrb[250].mxu1  ;;  %v7873_v16 = vsel %vm1945_vm2, %v7851_v24, 0.0  ;;  %v7824_v51 = vadd.f32 %v7785_v54, %v7679_v35  ;;  %v7429_v23 = vmul.f32 %v12615_v19, %v12634_v3  ;;  %v7041_v24 = vsel %vm1945_vm2, %v6995_v15, 0.0  ;;  %v7683_v54 = vld [vmem:[#allocation3 + $0x3e0] sm:$0xff]  ;;  %v7684_v3 = vld [vmem:[#allocation3 + $0x3e8] sm:$0xff] }
 0xe23   : > { %v7788_v53 = vpop.f32.mrb[251].mxu1  ;;  %7874 = vadd.xlane.f32.xlu0 %v7873_v16  ;;  %v7867_v47 = vsel %vm1945_vm2, %v7849_v31, 0.0  ;;  %10358 = vtanh.f32 %v7826_v32  ;;  %v7827_v63 = vadd.f32 %v9482_v28, %v7682_v60 }
 0xe24   : > { %10360 = vtanh.f32 %v7824_v51  ;;  %v7825_v9 = vadd.f32 %v7788_v53, %v7680_v30  ;;  %v7475_v2 = vsel %vm1945_vm2, %v7429_v23, 0.0 }
 0xe25   : > { %v10351_v44 = vpop.eup %10350  ;;  %7865 = vadd.xlane.f32.xlu1 %v7864_v43  ;;  %10362 = vtanh.f32 %v7827_v63 }
 0xe26   : > { %v10353_v46 = vpop.eup %10352  ;;  %v7854_v50 = vmul.f32 %v12615_v19, %v10351_v44  ;;  %10364 = vtanh.f32 %v7825_v9 }
 0xe27   : > { %7868 = vadd.xlane.f32.xlu0 %v7867_v47  ;;  %v7852_v34 = vmul.f32 %v12615_v19, %v10353_v46  ;;  %v7686_v46 = vld [vmem:[#allocation3 + $0x3f8] sm:$0xff] }
 0xe28   : > { %v10355_v25 = vpop.eup %10354  ;;  %v9485_v39 = vpop.f32.mrb[252].mxu1  ;;  %v7882_v52 = vsel %vm1945_vm2, %v7854_v50, 0.0 }
 0xe29   : > { %v10357_v56 = vpop.eup %10356  ;;  %v7801_v61 = vpop.f32.mrb[253].mxu1  ;;  %7883 = vadd.xlane.f32.xlu1 %v7882_v52  ;;  %v7853_v55 = vmul.f32 %v12615_v19, %v10355_v25  ;;  %v7876_v6 = vsel %vm1945_vm2, %v7852_v34, 0.0  ;;  %v7830_v20 = vadd.f32 %v9485_v39, %v7685_v14  ;;  %v8553_v14 = vmul.f32 -1.442695, %v7019_v59 }
 0xe2a   : > { %v9486_v62 = vpop.f32.mrb[254].mxu1  ;;  %v7855_v8 = vmul.f32 %v12615_v19, %v10357_v56  ;;  %v7828_v0 = vadd.f32 %v7801_v61, %v7683_v54 }
 0xe2b   : > { %v7804_v1 = vpop.f32.mrb[255].mxu1  ;;  %v7879_v58 = vsel %vm1945_vm2, %v7853_v55, 0.0  ;;  %10366 = vtanh.f32 %v7830_v20  ;;  %v7831_v35 = vadd.f32 %v9486_v62, %v7686_v46 }
 0xe2c   : > { %7880 = vadd.xlane.f32.xlu0 %v7879_v58  ;;  %v7885_v12 = vsel %vm1945_vm2, %v7855_v8, 0.0  ;;  %10368 = vtanh.f32 %v7828_v0  ;;  %v7829_v32 = vadd.f32 %v7804_v1, %v7684_v3  ;;  %v7438_v8 = vpop.xlane.xlu0 %7437 }
 0xe2d   : > { %7877 = vadd.xlane.f32.xlu1 %v7876_v6  ;;  %v10359_v41 = vpop.eup %10358  ;;  %v7028_v6 = vpop.xlane.xlu1 %7027 }
 0xe2e   : > { %v7858_v22 = vmul.f32 %v12615_v19, %v10359_v41  ;;  %v10361_v26 = vpop.eup %10360  ;;  %10370 = vtanh.f32 %v7829_v32  ;;  %v8556_v20 = vmul.f32 -1.442695, %v7028_v6 }
 0xe2f   : > { %v7856_v16 = vmul.f32 %v12615_v19, %v10361_v26  ;;  %v10363_v31 = vpop.eup %10362  ;;  %10372 = vtanh.f32 %v7831_v35 }
 0xe30   : > { %7473 = vadd.xlane.f32.xlu0 %v7472_v10  ;;  %v7894_v28 = vsel %vm1945_vm2, %v7858_v22, 0.0  ;;  %v7859_v43 = vmul.f32 %v12615_v19, %v10363_v31  ;;  %v10365_v44 = vpop.eup %10364  ;;  %v7435_v9 = vpop.xlane.xlu0 %7434  ;;  %10374 = vpow2.f32 %v8553_v14 }
 0xe31   : > { %7886 = vadd.xlane.f32.xlu1 %v7885_v12  ;;  %v7888_v53 = vsel %vm1945_vm2, %v7856_v16, 0.0  ;;  %v7857_v50 = vmul.f32 %v12615_v19, %v10365_v44  ;;  %v7022_v30 = vpop.xlane.xlu1 %7021  ;;  %10376 = vpow2.f32 %v8556_v20 }
 0xe32   : > { %v7897_v47 = vsel %vm1945_vm2, %v7859_v43, 0.0  ;;  %v8554_v23 = vmul.f32 -1.442695, %v7022_v30 }
 0xe33   : > { %v7891_v25 = vsel %vm1945_vm2, %v7857_v50, 0.0 }
 0xe34   : > { %6608 = vadd.xlane.f32.xlu0 %v6607_v21  ;;  %v7450_v49 = vpop.xlane.xlu0 %7449  ;;  %10378 = vpow2.f32 %v8554_v23 }
 0xe35   : > { %7042 = vadd.xlane.f32.xlu1 %v7041_v24  ;;  %v10367_v51 = vpop.eup %10366  ;;  %v7031_v10 = vpop.xlane.xlu1 %7030 }
 0xe36   : > { %v7862_v39 = vmul.f32 %v12615_v19, %v10367_v51  ;;  %v10369_v52 = vpop.eup %10368  ;;  %v8557_v24 = vmul.f32 -1.442695, %v7031_v10  ;;  %v8571_v51 = vmul.f32 -1.442695, %v7435_v9 }
 0xe37   : > { %v7860_v56 = vmul.f32 %v12615_v19, %v10369_v52 }
 0xe38   : > { %7476 = vadd.xlane.f32.xlu0 %v7475_v2  ;;  %v7906_v34 = vsel %vm1945_vm2, %v7862_v39, 0.0  ;;  %v10371_v61 = vpop.eup %10370  ;;  %v7444_v15 = vpop.xlane.xlu0 %7443  ;;  %10380 = vpow2.f32 %v8557_v24 }
 0xe39   : > { %7895 = vadd.xlane.f32.xlu1 %v7894_v28  ;;  %v7900_v55 = vsel %vm1945_vm2, %v7860_v56, 0.0  ;;  %v7861_v60 = vmul.f32 %v12615_v19, %v10371_v61  ;;  %v10373_v62 = vpop.eup %10372  ;;  %v7025_v12 = vpop.xlane.xlu1 %7024  ;;  %v8572_v56 = vmul.f32 -1.442695, %v7438_v8  ;;  %v8574_v59 = vmul.f32 -1.442695, %v7444_v15 }
 0xe3a   : > { %v7863_v1 = vmul.f32 %v12615_v19, %v10373_v62  ;;  %v8555_v22 = vmul.f32 -1.442695, %v7025_v12  ;;  %v10375_v28 = vpop.eup %10374  ;;  %v8576_v62 = vmul.f32 -1.442695, %v7450_v49 }
 0xe3b   : > { %v7903_v63 = vsel %vm1945_vm2, %v7861_v60, 0.0  ;;  %v10377_v3 = vpop.eup %10376 }
 0xe3c   : > { %v7909_v58 = vsel %vm1945_vm2, %v7863_v1, 0.0  ;;  %v7453_v21 = vpop.xlane.xlu0 %7452  ;;  %10382 = vpow2.f32 %v8555_v22  ;;  %v7102_v44 = vadd.f32 1.0, %v10377_v3 }
 0xe3d   : > { %7889 = vadd.xlane.f32.xlu1 %v7888_v53  ;;  %v7040_v41 = vpop.xlane.xlu1 %7039  ;;  %v7099_v53 = vadd.f32 1.0, %v10375_v28  ;;  %v8577_v6 = vmul.f32 -1.442695, %v7453_v21 }
 0xe3e   : > { %v8560_v0 = vmul.f32 -1.442695, %v7040_v41  ;;  %v10379_v43 = vpop.eup %10378 }
 0xe3f   : > { %v7100_v39 = vadd.f32 1.0, %v10379_v43 }
 0xe40   : > { %v7462_v26 = vpop.xlane.xlu0 %7461  ;;  %10384 = vpow2.f32 %v8560_v0 }
 0xe41   : > { %7898 = vadd.xlane.f32.xlu1 %v7897_v47  ;;  %v7034_v19 = vpop.xlane.xlu1 %7033  ;;  %v8580_v49 = vmul.f32 -1.442695, %v7462_v26 }
 0xe42   : > { %v8558_v16 = vmul.f32 -1.442695, %v7034_v19  ;;  %v10381_v46 = vpop.eup %10380 }
 0xe43   : > { %v7103_v52 = vadd.f32 1.0, %v10381_v46 }
 0xe44   : > { %v7456_v2 = vpop.xlane.xlu0 %7455  ;;  %10386 = vpow2.f32 %v8558_v16 }
 0xe45   : > { %7892 = vadd.xlane.f32.xlu1 %v7891_v25  ;;  %v7037_v54 = vpop.xlane.xlu1 %7036  ;;  %v8578_v15 = vmul.f32 -1.442695, %v7456_v2 }
 0xe46   : > { %v8559_v32 = vmul.f32 -1.442695, %v7037_v54  ;;  %v10383_v50 = vpop.eup %10382 }
 0xe48   : > { %v7465_v47 = vpop.xlane.xlu0 %7464  ;;  %10388 = vpow2.f32 %v8559_v32 }
 0xe49   : > { %7907 = vadd.xlane.f32.xlu1 %v7906_v34  ;;  %v7432_v31 = vpop.xlane.xlu1 %7431  ;;  %10390 = vrcp.f32 %v7099_v53  ;;  %v7101_v34 = vadd.f32 1.0, %v10383_v50  ;;  %v8581_v21 = vmul.f32 -1.442695, %v7465_v47 }
 0xe4a   : > { %v8570_v35 = vmul.f32 -1.442695, %v7432_v31  ;;  %10392 = vrcp.f32 %v7102_v44 }
 0xe4c   : > { %10394 = vpow2.f32 %v8570_v35  ;;  %v7459_v60 = vpop.xlane.xlu0 %7458 }
 0xe4d   : > { %7901 = vadd.xlane.f32.xlu1 %v7900_v55  ;;  %v7441_v25 = vpop.xlane.xlu1 %7440  ;;  %10396 = vpow2.f32 %v8571_v51  ;;  %v8579_v16 = vmul.f32 -1.442695, %v7459_v60 }
 0xe4e   : > { %10398 = vrcp.f32 %v7100_v39  ;;  %v8573_v55 = vmul.f32 -1.442695, %v7441_v25 }
 0xe4f   : > { %10400 = vrcp.f32 %v7103_v52 }
 0xe50   : > { %10402 = vrcp.f32 %v7101_v34  ;;  %v7468_v12 = vpop.xlane.xlu0 %7467 }
 0xe51   : > { %7904 = vadd.xlane.f32.xlu1 %v7903_v63  ;;  %v7447_v61 = vpop.xlane.xlu1 %7446  ;;  %v10385_v63 = vpop.eup %10384  ;;  %10404 = vpow2.f32 %v8572_v56  ;;  %v8582_v3 = vmul.f32 -1.442695, %v7468_v12 }
 0xe52   : > { %v8575_v1 = vmul.f32 -1.442695, %v7447_v61  ;;  %10406 = vpow2.f32 %v8573_v55  ;;  %v7106_v9 = vadd.f32 1.0, %v10385_v63 }
 0xe53   : > { %10408 = vpow2.f32 %v8576_v62 }
 0xe54   : > { %10410 = vpow2.f32 %v8575_v1  ;;  %v7471_v28 = vpop.xlane.xlu0 %7470 }
 0xe55   : > { %7910 = vadd.xlane.f32.xlu1 %v7909_v58  ;;  %v10387_v58 = vpop.eup %10386  ;;  %10412 = vpow2.f32 %v8574_v59  ;;  %v8583_v53 = vmul.f32 -1.442695, %v7471_v28 }
 0xe56   : > { %v10389_v30 = vpop.eup %10388  ;;  %v7104_v8 = vadd.f32 1.0, %v10387_v58  ;;  %10414 = vpow2.f32 %v8577_v6 }
 0xe57   : > { %v12693_v10 = vpop.eup %10390  ;;  %v7105_v20 = vadd.f32 1.0, %v10389_v30  ;;  %10416 = vrcp.f32 %v7106_v9 }
 0xe58   : > { %v12695_v41 = vpop.eup %10392  ;;  %10418 = vrcp.f32 %v7104_v8 }
 0xe59   : > { %v10395_v14 = vpop.eup %10394  ;;  %10420 = vpow2.f32 %v8580_v49 }
 0xe5a   : > { %v10397_v23 = vpop.eup %10396  ;;  %v7526_v22 = vadd.f32 1.0, %v10395_v14  ;;  %10422 = vrcp.f32 %v7105_v20 }
 0xe5b   : > { %v12697_v19 = vpop.eup %10398  ;;  %v7527_v0 = vadd.f32 1.0, %v10397_v23  ;;  %10424 = vpow2.f32 %v8578_v15 }
 0xe5c   : > { %v12699_v24 = vpop.eup %10400  ;;  %10426 = vpow2.f32 %v8581_v21 }
 0xe5d   : > { %v12701_v54 = vpop.eup %10402  ;;  %10428 = vrcp.f32 %v7526_v22 }
 0xe5e   : > { %v10405_v26 = vpop.eup %10404  ;;  %10430 = vrcp.f32 %v7527_v0 }
 0xe5f   : > { %v10407_v31 = vpop.eup %10406  ;;  %v7528_v44 = vadd.f32 1.0, %v10405_v26  ;;  %10432 = vpow2.f32 %v8579_v16 }
 0xe60   : > { %v10409_v32 = vpop.eup %10408  ;;  %v7529_v47 = vadd.f32 1.0, %v10407_v31  ;;  %10434 = vpow2.f32 %v8582_v3 }
 0xe61   : > { %v10411_v43 = vpop.eup %10410  ;;  %v7532_v51 = vadd.f32 1.0, %v10409_v32  ;;  %10436 = vpow2.f32 %v8583_v53 }
 0xe62   : > { %v10413_v35 = vpop.eup %10412  ;;  %v7531_v52 = vadd.f32 1.0, %v10411_v43  ;;  %10438 = vrcp.f32 %v7528_v44 }
 0xe63   : > { %v10415_v50 = vpop.eup %10414  ;;  %v7530_v56 = vadd.f32 1.0, %v10413_v35  ;;  %10440 = vrcp.f32 %v7529_v47 }
 0xe64   : > { %v12703_v39 = vpop.eup %10416  ;;  %v7533_v60 = vadd.f32 1.0, %v10415_v50  ;;  %10442 = vrcp.f32 %v7532_v51 }
 0xe65   : > { %v12705_v34 = vpop.eup %10418  ;;  %10444 = vrcp.f32 %v7531_v52 }
 0xe66   : > { %v10421_v55 = vpop.eup %10420  ;;  %10446 = vrcp.f32 %v7530_v56 }
 0xe67   : > { %v12707_v62 = vpop.eup %10422  ;;  %v7536_v30 = vadd.f32 1.0, %v10421_v55  ;;  %10448 = vrcp.f32 %v7533_v60 }
 0xe68   : > { %v10425_v58 = vpop.eup %10424 }
 0xe69   : > { %v10427_v6 = vpop.eup %10426  ;;  %v7534_v14 = vadd.f32 1.0, %v10425_v58 }
 0xe6a   : > { %v10429_v9 = vpop.eup %10428  ;;  %v7537_v15 = vadd.f32 1.0, %v10427_v6 }
 0xe6b   : > { %v10431_v49 = vpop.eup %10430  ;;  %v7593_v44 = vrot.slane %v10429_v9, %v12071_v13 }
 0xe6c   : > { %v10433_v23 = vpop.eup %10432  ;;  %v7597_v16 = vrot.slane %v10431_v49, %v12067_v5 }
 0xe6d   : > { %v10435_v21 = vpop.eup %10434  ;;  %v7535_v31 = vadd.f32 1.0, %v10433_v23 }
 0xe6e   : > { %v10437_v0 = vpop.eup %10436  ;;  %v7538_v53 = vadd.f32 1.0, %v10435_v21  ;;  %v7598_v51 = vsel %vm4965_vm3, %v7597_v16, %v7593_v44 }
 0xe6f   : > { %v10439_v26 = vpop.eup %10438 }
 0xe70   : > { %v10441_v32 = vpop.eup %10440  ;;  %v7602_v55 = vrot.slane %v10439_v26, %v12075_v18 }
 0xe71   : > { %v12710_v43 = vpop.eup %10442  ;;  %v7607_v58 = vrot.slane %v10441_v32, %v12083_v29 }
 0xe72   : > { %v10445_v35 = vpop.eup %10444  ;;  %v7603_v6 = vsel %vm4972_vm4, %v7602_v55, %v7598_v51  ;;  %v7203_v55 = vrot.slane %v12701_v54, %v12117_v7  ;;  %v7208_v54 = vrot.slane %v12695_v41, %v12122_v11 }
 0xe73   : > { %v10447_v50 = vpop.eup %10446 }
 0xeae   : > { %v7872_v2 = vpop.xlane.xlu1 %7871 }
 0xeaf   : > { %v8596_v63 = vmul.f32 -1.442695, %v7872_v2 }
 0xeb0   : > { %v7875_v46 = vpop.xlane.xlu0 %7874 }
 0xeb1   : > { %v8597_v59 = vmul.f32 -1.442695, %v7875_v46  ;;  %10450 = vpow2.f32 %v8596_v63  ;;  %v7539_v46 = vadd.f32 1.0, %v10437_v0  ;;  %v7608_v0 = vsel %vm4979_vm5, %v7607_v58, %v7603_v6 }
 0xeb2   : > { %v7866_v25 = vpop.xlane.xlu1 %7865 }
 0xeb3   : > { %10452 = vpow2.f32 %v8597_v59  ;;  %v8594_v22 = vmul.f32 -1.442695, %v7866_v25 }
 0xeb4   : > { %v7869_v61 = vpop.xlane.xlu0 %7868  ;;  %10454 = vrcp.f32 %v7536_v30  ;;  %v7612_v30 = vrot.slane %v10447_v50, %v12092_v38 }
 0xeb5   : > { %v8595_v8 = vmul.f32 -1.442695, %v7869_v61  ;;  %v12714_v61 = vpop.eup %10448 }
 0xeb6   : > { %v7884_v1 = vpop.xlane.xlu1 %7883 }
 0xeb7   : > { %10456 = vpow2.f32 %v8595_v8  ;;  %v8600_v9 = vmul.f32 -1.442695, %v7884_v1  ;;  %v7613_v1 = vsel %vm4986_vm6, %v7612_v30, %v7608_v0 }
 0xeb8   : > { %10458 = vrcp.f32 %v7534_v14 }
 0xeb9   : > { %v7881_v12 = vpop.xlane.xlu0 %7880  ;;  %10460 = vrcp.f32 %v7537_v15 }
 0xeba   : > { %v7878_v20 = vpop.xlane.xlu1 %7877  ;;  %10462 = vpow2.f32 %v8594_v22  ;;  %v8599_v14 = vmul.f32 -1.442695, %v7881_v12  ;;  %v7617_v12 = vrot.slane %v10445_v35, %v12095_v42  ;;  %v7622_v35 = vrot.slane %v12710_v43, %v12089_v37 }
 0xebb   : > { %v8598_v25 = vmul.f32 -1.442695, %v7878_v20  ;;  %v10451_v63 = vpop.eup %10450 }
 0xebc   : > { %v7962_v21 = vadd.f32 1.0, %v10451_v63  ;;  %v7618_v50 = vsel %vm4993_vm7, %v7617_v12, %v7613_v1 }
 0xebd   : > { %v7474_v28 = vpop.xlane.xlu0 %7473  ;;  %v10453_v59 = vpop.eup %10452  ;;  %v7623_v58 = vsel %vm5000_vm8, %v7622_v35, %v7618_v50 }
 0xebe   : > { %v8584_v3 = vmul.f32 -1.442695, %v7474_v28  ;;  %v7887_v2 = vpop.xlane.xlu1 %7886  ;;  %v12720_v49 = vpop.eup %10454  ;;  %v7963_v28 = vadd.f32 1.0, %v10453_v59 }
 0xebf   : > { %v8601_v16 = vmul.f32 -1.442695, %v7887_v2  ;;  %v7198_v2 = vrot.slane %v12697_v19, %v12108_v57 }
 0xec0   : > { %10464 = vpow2.f32 %v8584_v3 }
 0xec1   : > { %v6609_v47 = vpop.xlane.xlu0 %6608  ;;  %10466 = vrcp.f32 %v7535_v31  ;;  %v10457_v15 = vpop.eup %10456 }
 0xec2   : > { %v8537_v52 = vmul.f32 -1.442695, %v6609_v47  ;;  %v7043_v56 = vpop.xlane.xlu1 %7042  ;;  %10468 = vrcp.f32 %v7538_v53  ;;  %v10459_v22 = vpop.eup %10458  ;;  %v7961_v3 = vadd.f32 1.0, %v10457_v15  ;;  %v7193_v47 = vrot.slane %v12693_v10, %v12101_v48 }
 0xec3   : > { %v8561_v60 = vmul.f32 -1.442695, %v7043_v56  ;;  %10470 = vrcp.f32 %v7539_v46  ;;  %v12723_v26 = vpop.eup %10460  ;;  %v7627_v10 = vrot.slane %v12714_v61, %v12101_v48  ;;  %v7632_v6 = vrot.slane %v10459_v22, %v12108_v57 }
 0xec4   : > { %10472 = vpow2.f32 %v8537_v52  ;;  %v10463_v31 = vpop.eup %10462  ;;  %v7194_v43 = vsel %vm5007_vm9, %v7193_v47, %v12600_v17  ;;  %v7642_v47 = vrot.slane %v12720_v49, %v12122_v11  ;;  %v7228_v49 = vrot.slane %v12703_v39, %v12163_v45 }
 0xec5   : > { %v7477_v8 = vpop.xlane.xlu0 %7476  ;;  %10474 = vpow2.f32 %v8598_v25  ;;  %v7960_v52 = vadd.f32 1.0, %v10463_v31  ;;  %v7199_v61 = vsel %vm5014_vm10, %v7198_v2, %v7194_v43 }
 0xec6   : > { %v8585_v20 = vmul.f32 -1.442695, %v7477_v8  ;;  %v7896_v23 = vpop.xlane.xlu1 %7895  ;;  %10476 = vpow2.f32 %v8561_v60 }
 0xec7   : > { %v8604_v59 = vmul.f32 -1.442695, %v7896_v23  ;;  %v7628_v23 = vsel %vm5007_vm9, %v7627_v10, %v7623_v58 }
 0xec8   : > { %10478 = vpow2.f32 %v8585_v20  ;;  %v7204_v20 = vsel %vm5021_vm11, %v7203_v55, %v7199_v61  ;;  %v7633_v41 = vsel %vm5014_vm10, %v7632_v6, %v7628_v23 }
 0xec9   : > { %10480 = vpow2.f32 %v8600_v9  ;;  %v7209_v12 = vsel %vm5028_vm12, %v7208_v54, %v7204_v20 }
 0xeca   : > { %10482 = vpow2.f32 %v8599_v14  ;;  %v7890_v32 = vpop.xlane.xlu1 %7889  ;;  %v10465_v53 = vpop.eup %10464 }
 0xecb   : > { %10484 = vrcp.f32 %v7962_v21  ;;  %v8602_v44 = vmul.f32 -1.442695, %v7890_v32  ;;  %v10467_v46 = vpop.eup %10466  ;;  %v7540_v51 = vadd.f32 1.0, %v10465_v53 }
 0xecc   : > { %10486 = vrcp.f32 %v7963_v28  ;;  %v12730_v25 = vpop.eup %10468  ;;  %v7637_v8 = vrot.slane %v10467_v46, %v12117_v7  ;;  %v7223_v46 = vrot.slane %v12707_v62, %v12158_v40  ;;  %v7647_v62 = vrot.slane %v12723_v26, %v12139_v27 }
 0xecd   : > { %10488 = vpow2.f32 %v8601_v16  ;;  %v12736_v56 = vpop.eup %10470  ;;  %v7652_v58 = vrot.slane %v12730_v25, %v12147_v36 }
 0xece   : > { %10490 = vrcp.f32 %v7961_v3  ;;  %v7899_v60 = vpop.xlane.xlu1 %7898  ;;  %v10473_v63 = vpop.eup %10472  ;;  %v7218_v3 = vrot.slane %v12705_v34, %v12147_v36  ;;  %v7638_v32 = vsel %vm5021_vm11, %v7637_v8, %v7633_v41  ;;  %v7657_v26 = vrot.slane %v12736_v56, %v12158_v40 }
 0xecf   : > { %10492 = vpow2.f32 %v8602_v44  ;;  %v10475_v19 = vpop.eup %10474  ;;  %v6673_v30 = vadd.f32 1.0, %v10473_v63  ;;  %v8605_v16 = vmul.f32 -1.442695, %v7899_v60  ;;  %v7213_v44 = vrot.slane %v12699_v24, %v12139_v27 }
 0xed0   : > { %10494 = vrcp.f32 %v7540_v51  ;;  %v10477_v9 = vpop.eup %10476  ;;  %v7964_v22 = vadd.f32 1.0, %v10475_v19 }
 0xed1   : > { %10496 = vrcp.f32 %v7960_v52  ;;  %v7107_v17 = vadd.f32 1.0, %v10477_v9  ;;  %v7214_v35 = vsel %vm5035_vm13, %v7213_v44, %v7209_v12  ;;  %v7643_v52 = vsel %vm5028_vm12, %v7642_v47, %v7638_v32 }
 0xed2   : > { %v10479_v14 = vpop.eup %10478  ;;  %10498 = vrcp.f32 %v6673_v30  ;;  %v7893_v15 = vpop.xlane.xlu1 %7892  ;;  %v7219_v24 = vsel %vm5042_vm14, %v7218_v3, %v7214_v35  ;;  %v7648_v6 = vsel %vm5035_vm13, %v7647_v62, %v7643_v52 }
 0xed3   : > { %v10481_v21 = vpop.eup %10480  ;;  %v7541_v0 = vadd.f32 1.0, %v10479_v14  ;;  %10500 = vpow2.f32 %v8604_v59  ;;  %v8603_v28 = vmul.f32 -1.442695, %v7893_v15  ;;  %v7224_v63 = vsel %vm5049_vm15, %v7223_v46, %v7219_v24 }
 0xed4   : > { %v10483_v1 = vpop.eup %10482  ;;  %10502 = vrcp.f32 %v7107_v17  ;;  %v7966_v2 = vadd.f32 1.0, %v10481_v21  ;;  %v7653_v23 = vsel %vm5042_vm14, %v7652_v58, %v7648_v6  ;;  %v7229_v15 = vsel %vm5056_vm0, %v7228_v49, %v7224_v63 }
 0xed5   : > { %v12753_v31 = vpop.eup %10484  ;;  %10504 = vrcp.f32 %v7541_v0  ;;  %v7965_v55 = vadd.f32 1.0, %v10483_v1  ;;  %v7658_v1 = vsel %vm5049_vm15, %v7657_v26, %v7653_v23 }
 0xed6   : > { %v12759_v53 = vpop.eup %10486  ;;  %10506 = vpow2.f32 %v8603_v28  ;;  %v7908_v50 = vpop.xlane.xlu1 %7907  ;;  %v8036_v44 = vrot.slane %v12753_v31, %v12075_v18 }
 0xed7   : > { %v10489_v51 = vpop.eup %10488  ;;  %10508 = vrcp.f32 %v7964_v22  ;;  %v8608_v59 = vmul.f32 -1.442695, %v7908_v50  ;;  %v8041_v52 = vrot.slane %v12759_v53, %v12083_v29 }
 0xed8   : > { %v10491_v34 = vpop.eup %10490  ;;  %10510 = vpow2.f32 %v8605_v16  ;;  %v7967_v30 = vadd.f32 1.0, %v10489_v51 }
 0xed9   : > { %v10493_v10 = vpop.eup %10492  ;;  %10512 = vrcp.f32 %v7966_v2  ;;  %v8031_v61 = vrot.slane %v10491_v34, %v12067_v5 }
 0xeda   : > { %v10495_v60 = vpop.eup %10494  ;;  %v7902_v19 = vpop.xlane.xlu1 %7901  ;;  %10514 = vrcp.f32 %v7965_v55  ;;  %v7968_v39 = vadd.f32 1.0, %v10493_v10 }
 0xedb   : > { %v10497_v43 = vpop.eup %10496  ;;  %v8606_v9 = vmul.f32 -1.442695, %v7902_v19  ;;  %v7662_v14 = vrot.slane %v10495_v60, %v12163_v45 }
 0xedc   : > { %v10499_v54 = vpop.eup %10498  ;;  %v8027_v17 = vrot.slane %v10497_v43, %v12071_v13 }
 0xedd   : > { %v10501_v8 = vpop.eup %10500  ;;  %v6799_v25 = vrot.slane %v10499_v54, %v12168_v33  ;;  %10516 = vpow2.f32 %v8606_v9  ;;  %v7663_v12 = vsel %vm5056_vm0, %v7662_v14, %v7658_v1 }
 0xede   : > { %v10503_v20 = vpop.eup %10502  ;;  %10518 = vpow2.f32 %v8608_v59  ;;  %v7905_v56 = vpop.xlane.xlu1 %7904  ;;  %v8032_v41 = vsel %vm4965_vm3, %v8031_v61, %v8027_v17  ;;  %v7970_v50 = vadd.f32 1.0, %v10501_v8 }
 0xedf   : > { %v10505_v21 = vpop.eup %10504  ;;  %10520 = vrcp.f32 %v7967_v30  ;;  %v6800_v5 = vsel %vm5063_vm1, %v6799_v25, %v12538_v4  ;;  %v7233_v22 = vrot.slane %v10503_v20, %v12168_v33  ;;  %v8607_v0 = vmul.f32 -1.442695, %v7905_v56 }
 0xee0   : > { %v10507_v28 = vpop.eup %10506  ;;  %6802 = vst [vmem:[%s12182_s12 + $0x4] sm:$0x1] %v6800_v5  ;;  %v7667_v13 = vrot.slane %v10505_v21, %v12168_v33  ;;  %10522 = vrcp.f32 %v7968_v39  ;;  %v8037_v2 = vsel %vm4972_vm4, %v8036_v44, %v8032_v41 }
 0xee1   : > { %v10509_v16 = vpop.eup %10508  ;;  %v7234_v3 = vsel %vm5063_vm1, %v7233_v22, %v7229_v15  ;;  %v7969_v4 = vadd.f32 1.0, %v10507_v28  ;;  %10524 = vpow2.f32 %v8607_v0  ;;  %v8042_v31 = vsel %vm4979_vm5, %v8041_v52, %v8037_v2 }
 0xee2   : > { %v10511_v32 = vpop.eup %10510  ;;  %7236 = vst [vmem:[%s12182_s12 + $0x5] sm:$0x1] %v7234_v3  ;;  %v7668_v46 = vsel %vm5063_vm1, %v7667_v13, %v7663_v12  ;;  %v7911_v47 = vpop.xlane.xlu1 %7910  ;;  %v8046_v34 = vrot.slane %v10509_v16, %v12092_v38 }
 0xee3   : > { %7670 = vst [vmem:[%s12182_s12 + $0x6] sm:$0x1] %v7668_v46  ;;  %10526 = vrcp.f32 %v7969_v4  ;;  %v8609_v51 = vmul.f32 -1.442695, %v7911_v47  ;;  %v10513_v35 = vpop.eup %10512  ;;  %v7971_v55 = vadd.f32 1.0, %v10511_v32 }
 0xee4   : > { %v10515_v10 = vpop.eup %10514  ;;  %v8047_v62 = vsel %vm4986_vm6, %v8046_v34, %v8042_v31  ;;  %v8056_v59 = vrot.slane %v10513_v35, %v12089_v37 }
 0xee5   : > { %10528 = vpow2.f32 %v8609_v51  ;;  %v8051_v63 = vrot.slane %v10515_v10, %v12095_v42 }
 0xee6   : > { %10530 = vrcp.f32 %v7970_v50 }
 0xee7   : > { %v10517_v18 = vpop.eup %10516  ;;  %10532 = vrcp.f32 %v7971_v55  ;;  %v8052_v29 = vsel %vm4993_vm7, %v8051_v63, %v8047_v62 }
 0xee8   : > { %v10519_v24 = vpop.eup %10518  ;;  %v7972_v60 = vadd.f32 1.0, %v10517_v18  ;;  %v8057_v30 = vsel %vm5000_vm8, %v8056_v59, %v8052_v29 }
 0xee9   : > { %v10521_v49 = vpop.eup %10520  ;;  %v7974_v53 = vadd.f32 1.0, %v10519_v24 }
 0xeea   : > { %v10523_v38 = vpop.eup %10522  ;;  %10534 = vrcp.f32 %v7972_v60  ;;  %v8061_v6 = vrot.slane %v10521_v49, %v12101_v48 }
 0xeeb   : > { %v10525_v58 = vpop.eup %10524  ;;  %v8066_v9 = vrot.slane %v10523_v38, %v12108_v57 }
 0xeec   : > { %v7973_v19 = vadd.f32 1.0, %v10525_v58  ;;  %v8062_v39 = vsel %vm5007_vm9, %v8061_v6, %v8057_v30 }
 0xeed   : > { %v10527_v43 = vpop.eup %10526  ;;  %v8067_v8 = vsel %vm5014_vm10, %v8066_v9, %v8062_v39 }
 0xeee   : > { %10536 = vrcp.f32 %v7973_v19  ;;  %v8071_v42 = vrot.slane %v10527_v43, %v12117_v7 }
 0xeef   : > { %v10529_v54 = vpop.eup %10528  ;;  %10538 = vrcp.f32 %v7974_v53 }
 0xef0   : > { %v7975_v26 = vadd.f32 1.0, %v10529_v54  ;;  %v10531_v61 = vpop.eup %10530  ;;  %v8072_v14 = vsel %vm5021_vm11, %v8071_v42, %v8067_v8 }
 0xef1   : > { %v10533_v37 = vpop.eup %10532  ;;  %v8076_v25 = vrot.slane %v10531_v61, %v12122_v11 }
 0xef2   : > { %10540 = vrcp.f32 %v7975_v26  ;;  %v8081_v7 = vrot.slane %v10533_v37, %v12139_v27 }
 0xef3   : > { %v8077_v57 = vsel %vm5028_vm12, %v8076_v25, %v8072_v14 }
 0xef4   : > { %v10535_v48 = vpop.eup %10534  ;;  %v8082_v15 = vsel %vm5035_vm13, %v8081_v7, %v8077_v57 }
 0xef5   : > { %v8086_v20 = vrot.slane %v10535_v48, %v12147_v36 }
 0xef7   : > { %v8087_v21 = vsel %vm5042_vm14, %v8086_v20, %v8082_v15 }
 0xef8   : > { %v10537_v23 = vpop.eup %10536 }
 0xef9   : > { %v10539_v17 = vpop.eup %10538  ;;  %v8091_v56 = vrot.slane %v10537_v23, %v12158_v40 }
 0xefa   : > { %v8096_v0 = vrot.slane %v10539_v17, %v12163_v45 }
 0xefb   : > { %v8092_v5 = vsel %vm5049_vm15, %v8091_v56, %v8087_v21 }
 0xefc   : > { %v10541_v22 = vpop.eup %10540  ;;  %v8097_v28 = vsel %vm5056_vm0, %v8096_v0, %v8092_v5 }
 0xefd   : > { %v8101_v11 = vrot.slane %v10541_v22, %v12168_v33 }
 0xeff   : > { %v8102_v36 = vsel %vm5063_vm1, %v8101_v11, %v8097_v28 }
 0xf00   : > { %8104 = vst [vmem:[%s12182_s12 + $0x7] sm:$0x1] %v8102_v36 }
 0xf01 PF: > { %p14_p9 = scmp.ge.s32.totalorder %s10640_s28, 4   ;;  %s12849_s24 = smov %s10577_s25 }
 0xf02   : > { %s12850_s25 = smov %s10649_s8  ;;  %s12851_s26 = smov %s10640_s28 }
 0xf03   :  { %16 = sbr.rel (!%p14_p9) target bundleno = 2 (0x2), region = 184 }

</bundles_post_ra>
